<compile_context>
chip_gen: v7x
topology: tpu7x:2x2x1
jax: 0.10.0
libtpu: 0.0.40
codegen_flags: <defaults>
</compile_context>

<pallas_src>
import jax
import jax.numpy as jnp
from jax.experimental import pallas as pl
from jax.experimental.pallas import tpu as pltpu


def _round_up(n: int, m: int) -> int:
    return ((n + m - 1) // m) * m


def _make_siren_kernel(n_layers: int, d_in: int, d_out: int, d_pad_out):
    """refs = (x, w0, b_stack, w1, ..., w_{n_layers-1}, out).

    d_pad_out[i] = lane-padded width of layer i's output (i = 0 .. n_layers-1).
    omega is already folded into the non-final weights/biases.
    """
    d_pad_out = tuple(int(d) for d in d_pad_out)

    def kernel(*refs):
        x_ref = refs[0]
        w0_ref = refs[1]
        b_ref = refs[2]
        w_refs = refs[3:3 + (n_layers - 1)]
        o_ref = refs[3 + (n_layers - 1)]

        x = x_ref[...]                                    # (TILE_N, d_in) f32

        # ---- layer 0 on the VPU, in f32 (K = d_in is tiny) ------------------
        z = b_ref[0:1, :d_pad_out[0]]                     # (1, d1_pad) f32
        for k in range(d_in):                             # unrolled, d_in small
            z = z + x[:, k:k + 1] * w0_ref[k:k + 1, :]    # (TILE_N, d1_pad)
        h = jnp.sin(z) if n_layers > 1 else z

        # ---- hidden + final layers on the MXU (bf16 x bf16 -> f32) ----------
        for i in range(1, n_layers):
            z = jnp.dot(h.astype(jnp.bfloat16), w_refs[i - 1][...],
                        preferred_element_type=jnp.float32)
            z = z + b_ref[i:i + 1, :d_pad_out[i]]
            h = jnp.sin(z) if i < n_layers - 1 else z     # omega pre-folded

        o_ref[...] = h[:, :d_out].astype(o_ref.dtype)     # narrow (TILE_N, d_out)

    return kernel


def _probe_buffered_support() -> bool:
    """Check whether pl.BlockSpec(..., pipeline_mode=pl.Buffered(1)) works here."""
    try:
        x = jnp.zeros((8, 128), jnp.float32)

        def k(a_ref, b_ref, o_ref):
            o_ref[...] = a_ref[...] + b_ref[...]

        out = pl.pallas_call(
            k,
            out_shape=jax.ShapeDtypeStruct((8, 128), jnp.float32),
            grid=(1,),
            in_specs=[pl.BlockSpec((8, 128), lambda i: (0, 0),
                                   pipeline_mode=pl.Buffered(1)),
                      pl.BlockSpec((8, 128), lambda i: (0, 0))],
            out_specs=pl.BlockSpec((8, 128), lambda i: (0, 0)),
        )(x, x)
        jax.block_until_ready(out)
        return True
    except Exception:
        return False


class SirenPallas:
    """Pallas-TPU Siren: x -> sin(omega * L_0(x)) -> ... -> L_{last}(.)"""

    TILE_N = 1024       # sweep 512-2048; halved below until the grid has >= 2 steps
    MIN_TILE_N = 256
    LANE = 128

    def __init__(self, layers, weight_init=True, omega=30.0, act_fun=None, key=None):
        # TODO(synk): custom `act_fun` is not supported; only the default sin.
        assert act_fun is None, "only the default sin activation is supported"
        assert len(layers) >= 2
        self.layers = [int(d) for d in layers]
        self.n_layers = len(self.layers) - 1
        self.omega = float(omega)
        if key is None:
            key = jax.random.PRNGKey(0)

        # ---- parameters (PyTorch nn.Linear semantics, Siren init) -----------
        # Built directly as (in, out) == W^T so the forward never transposes.
        ws, bs = [], []
        for i in range(self.n_layers):
            fan_in, fan_out = self.layers[i], self.layers[i + 1]
            key, kw, kb = jax.random.split(key, 3)
            if weight_init:
                w_bound = (1.0 / fan_in) if i == 0 else (6.0 / fan_in) ** 0.5 / self.omega
            else:
                w_bound = 1.0 / (fan_in ** 0.5)          # torch kaiming-uniform bound
            b_bound = 1.0 / (fan_in ** 0.5)              # torch default bias init
            ws.append(jax.random.uniform(kw, (fan_in, fan_out), jnp.float32,
                                         -w_bound, w_bound))
            bs.append(jax.random.uniform(kb, (fan_out,), jnp.float32,
                                         -b_bound, b_bound))
        self._w_f32, self._b_f32 = ws, bs                # unpadded, for reference_f32()

        # ---- fold omega, pad to lane multiples, pre-cast to bf16 ------------
        d_in, lane = self.layers[0], self.LANE
        self._d_pad_out = [_round_up(self.layers[i + 1], lane)
                           for i in range(self.n_layers)]
        d_max = max(self._d_pad_out)

        def scale(i):
            return self.omega if i < self.n_layers - 1 else 1.0

        # layer 0: f32 weights for the VPU path, rows padded to a sublane multiple.
        w0 = jnp.zeros((_round_up(d_in, 8), self._d_pad_out[0]), jnp.float32)
        self._w0_pad = w0.at[:d_in, :self.layers[1]].set(scale(0) * ws[0])

        # biases of all layers stacked into a single resident operand.
        b_stack = jnp.zeros((self.n_layers, d_max), jnp.float32)
        for i in range(self.n_layers):
            b_stack = b_stack.at[i, :self.layers[i + 1]].set(scale(i) * bs[i])
        self._b_stack = b_stack

        # hidden / final weights: (in_pad, out_pad) bf16 MXU operands.
        self._w_hidden = []
        for i in range(1, self.n_layers):
            wp = jnp.zeros((self._d_pad_out[i - 1], self._d_pad_out[i]), jnp.float32)
            wp = wp.at[:self.layers[i], :self.layers[i + 1]].set(scale(i) * ws[i])
            self._w_hidden.append(wp.astype(jnp.bfloat16))

        # TODO(synk): block-diagonal lane packing of narrow (32/64-wide) hidden
        # layers (4x/2x MXU+VPU utilization) and a weight-streaming path for
        # very wide networks whose resident weights would not fit in VMEM.

        self._use_buffered = None       # lazily probed pl.Buffered(1) support
        self._fwd_cache = {}            # n -> jitted forward

    # ------------------------------------------------------------------ specs
    def _weight_spec(self, shape):
        idx = lambda i: (0, 0)
        if self._use_buffered:
            # Resident weights never change block index: one buffer is enough
            # (avoids doubling their footprint under v7x's 64 MiB VMEM).
            return pl.BlockSpec(shape, idx, pipeline_mode=pl.Buffered(1))
        return pl.BlockSpec(shape, idx)

    def _choose_tile(self, n):
        tile = self.TILE_N
        # Keep >= 2 grid steps when possible so v7x's two TensorCores both work.
        while tile > self.MIN_TILE_N and _round_up(n, tile) // tile < 2:
            tile //= 2
        n_pad = _round_up(max(n, 8), tile)
        return tile, n_pad

    # ---------------------------------------------------------------- builder
    def _build_forward(self, n):
        tile_n, n_pad = self._choose_tile(n)
        d_in, d_out = self.layers[0], self.layers[-1]
        d_max = max(self._d_pad_out)
        lane = self.LANE

        kernel = _make_siren_kernel(self.n_layers, d_in, d_out, self._d_pad_out)

        in_specs = [pl.BlockSpec((tile_n, d_in), lambda i: (i, 0))]
        in_specs.append(self._weight_spec(self._w0_pad.shape))
        in_specs.append(self._weight_spec(self._b_stack.shape))
        for w in self._w_hidden:
            in_specs.append(self._weight_spec(w.shape))
        out_specs = pl.BlockSpec((tile_n, d_out), lambda i: (i, 0))

        # ---- VMEM budget (resident weights + IO buffers + f32 activations) --
        w_factor = 1 if self._use_buffered else 2        # default pipelining double-buffers
        w_bytes = (int(self._w0_pad.size) * 4 + int(self._b_stack.size) * 4
                   + sum(int(w.size) * 2 for w in self._w_hidden))
        io_bytes = 2 * tile_n * (_round_up(d_in, lane) + _round_up(d_out, lane)) * 4
        act_bytes = 3 * tile_n * d_max * 4
        need = w_factor * w_bytes + io_bytes + act_bytes
        try:
            cap = int(pltpu.get_tpu_info().vmem_capacity_bytes)
        except Exception:
            cap = 64 * 1024 * 1024
        if cap <= 32 * 1024 * 1024:
            cap = 64 * 1024 * 1024
        vmem_limit = int(min(cap - 8 * 1024 * 1024,
                             max(32 * 1024 * 1024, 2 * need)))

        flops = 2 * n_pad * d_in * self._d_pad_out[0]
        flops += sum(2 * n_pad * self._d_pad_out[i - 1] * self._d_pad_out[i]
                     for i in range(1, self.n_layers))
        transcendentals = n_pad * sum(self._d_pad_out[:self.n_layers - 1])
        bytes_accessed = n_pad * d_in * 4 + n_pad * d_out * 4 + w_bytes
        cost = pl.CostEstimate(flops=int(flops),
                               transcendentals=int(transcendentals),
                               bytes_accessed=int(bytes_accessed))

        call = pl.pallas_call(
            kernel,
            out_shape=jax.ShapeDtypeStruct((n_pad, d_out), jnp.float32),
            grid=(n_pad // tile_n,),
            in_specs=in_specs,
            out_specs=out_specs,
            compiler_params=pltpu.CompilerParams(
                dimension_semantics=("parallel",),
                vmem_limit_bytes=vmem_limit),
            cost_estimate=cost,
        )

        def fwd(x, w0, b_stack, *w_hidden):
            x32 = x.astype(jnp.float32)
            if n_pad != n:
                x32 = jnp.pad(x32, ((0, n_pad - n), (0, 0)))
            out = call(x32, w0, b_stack, *w_hidden)
            return out[:n] if n_pad != n else out

        return jax.jit(fwd)

    # ---------------------------------------------------------------- forward
    def __call__(self, x):
        n = int(x.shape[0])
        assert x.shape[1] == self.layers[0]
        if self._use_buffered is None:
            self._use_buffered = _probe_buffered_support()
        fwd = self._fwd_cache.get(n)
        if fwd is None:
            fwd = self._build_forward(n)
            self._fwd_cache[n] = fwd
        try:
            return fwd(x, self._w0_pad, self._b_stack, *self._w_hidden)
        except Exception:
            if not self._use_buffered:
                raise
            # Fall back to default double-buffered weight specs.
            self._use_buffered = False
            self._fwd_cache.clear()
            fwd = self._build_forward(n)
            self._fwd_cache[n] = fwd
            return fwd(x, self._w0_pad, self._b_stack, *self._w_hidden)

    # ------------------------------------------------------------- references
    def reference(self, x):
        """Pure-JAX forward on the same folded/padded params (matches kernel math)."""
        x32 = jnp.asarray(x, jnp.float32)
        z = self._b_stack[0:1, :self._d_pad_out[0]]
        for k in range(self.layers[0]):
            z = z + x32[:, k:k + 1] * self._w0_pad[k:k + 1, :]
        h = jnp.sin(z) if self.n_layers > 1 else z
        for i in range(1, self.n_layers):
            z = jnp.dot(h.astype(jnp.bfloat16), self._w_hidden[i - 1],
                        preferred_element_type=jnp.float32)
            z = z + self._b_stack[i:i + 1, :self._d_pad_out[i]]
            h = jnp.sin(z) if i < self.n_layers - 1 else z
        return h[:, :self.layers[-1]]

    def reference_f32(self, x):
        """Exact torch-semantics forward in f32 (unfolded, unpadded weights)."""
        h = jnp.asarray(x, jnp.float32)
        for i in range(self.n_layers):
            z = jnp.dot(h, self._w_f32[i]) + self._b_f32[i]
            h = jnp.sin(self.omega * z) if i < self.n_layers - 1 else z
        return h


if __name__ == "__main__":
    key = jax.random.PRNGKey(0)
    k_param, k_x = jax.random.split(key)

    layers = [2, 32, 32, 1]            # small Siren: 2-D coords -> 1 channel
    model = SirenPallas(layers, weight_init=True, omega=30.0, key=k_param)

    n = 300
    x = jax.random.uniform(k_x, (n, layers[0]), jnp.float32, -1.0, 1.0)

    out = jax.block_until_ready(model(x))

    assert out.shape == (n, layers[-1]), out.shape
    assert bool(jnp.all(jnp.isfinite(out))), "non-finite output"

    ref = model.reference(x)            # same f32-layer0 / bf16-MXU path as kernel
    err = float(jnp.max(jnp.abs(out - ref)))
    assert err < 5e-2, f"max abs error vs matched reference: {err}"

    ref32 = model.reference_f32(x)      # exact f32 torch-semantics forward
    err32 = float(jnp.max(jnp.abs(out - ref32)))
    assert err32 < 5e-2, f"max abs error vs f32 reference: {err32}"

    print("KERNEL_OK")
</pallas_src>

<mosaic_0001>
module attributes {stable_mosaic.version = 11 : i64} {
  func.func @k(%arg0: i32, %arg1: memref<8x128xf32, #tpu.memory_space<vmem>>, %arg2: memref<8x128xf32, #tpu.memory_space<vmem>>, %arg3: memref<8x128xf32, #tpu.memory_space<vmem>>) attributes {dimension_semantics = [#tpu.dimension_semantics<arbitrary>], iteration_bounds = array<i64: 1>, scalar_prefetch = 0 : i64, scratch_operands = 0 : i64, tpu.core_type = #tpu.core_type<tc>, window_params = [{pipeline_mode = #tpu.pipeline_mode<synchronous>, transform_indices = @transform_0, window_bounds = array<i64: 8, 128>}, {pipeline_mode = #tpu.pipeline_mode<synchronous>, transform_indices = @transform_1, window_bounds = array<i64: 8, 128>}, {pipeline_mode = #tpu.pipeline_mode<synchronous>, transform_indices = @transform_2, window_bounds = array<i64: 8, 128>}]} {
    %c0 = arith.constant 0 : index
    %c0_0 = arith.constant 0 : index
    %0 = vector.load %arg1[%c0, %c0_0] : memref<8x128xf32, #tpu.memory_space<vmem>>, vector<8x128xf32>
    %c0_1 = arith.constant 0 : index
    %c0_2 = arith.constant 0 : index
    %1 = vector.load %arg2[%c0_1, %c0_2] : memref<8x128xf32, #tpu.memory_space<vmem>>, vector<8x128xf32>
    %2 = arith.addf %0, %1 : vector<8x128xf32>
    %c0_3 = arith.constant 0 : index
    %c0_4 = arith.constant 0 : index
    %3 = vector.load %arg3[%c0_3, %c0_4] : memref<8x128xf32, #tpu.memory_space<vmem>>, vector<8x128xf32>
    tpu.vector_store %arg3[%c0_3, %c0_4], %2 {strides = array<i32>} : memref<8x128xf32, #tpu.memory_space<vmem>>, vector<8x128xf32>,
    return
  }
  func.func @transform_0(%arg0: i32) -> (i32, i32) {
    %c0_i32 = arith.constant 0 : i32
    %c0_i32_0 = arith.constant 0 : i32
    %c0_i32_1 = arith.constant 0 : i32
    return %c0_i32, %c0_i32_0 : i32, i32
  }
  func.func @transform_1(%arg0: i32) -> (i32, i32) {
    %c0_i32 = arith.constant 0 : i32
    %c0_i32_0 = arith.constant 0 : i32
    %c0_i32_1 = arith.constant 0 : i32
    return %c0_i32, %c0_i32_0 : i32, i32
  }
  func.func @transform_2(%arg0: i32) -> (i32, i32) {
    %c0_i32 = arith.constant 0 : i32
    %c0_i32_0 = arith.constant 0 : i32
    %c0_i32_1 = arith.constant 0 : i32
    return %c0_i32, %c0_i32_0 : i32, i32
  }
}

module attributes {stable_mosaic.version = 11 : i64} {
  func.func @kernel(%arg0: i32, %arg1: memref<256x2xf32, #tpu.memory_space<vmem>>, %arg2: memref<8x128xf32, #tpu.memory_space<vmem>>, %arg3: memref<3x128xf32, #tpu.memory_space<vmem>>, %arg4: memref<128x128xbf16, #tpu.memory_space<vmem>>, %arg5: memref<128x128xbf16, #tpu.memory_space<vmem>>, %arg6: memref<256x1xf32, #tpu.memory_space<vmem>>) attributes {dimension_semantics = [#tpu.dimension_semantics<parallel>], iteration_bounds = array<i64: 2>, scalar_prefetch = 0 : i64, scratch_operands = 0 : i64, tpu.core_type = #tpu.core_type<tc>, window_params = [{transform_indices = @transform_0, window_bounds = array<i64: 256, 2>}, {pipeline_mode = #tpu.pipeline_mode<synchronous>, transform_indices = @transform_1, window_bounds = array<i64: 8, 128>}, {pipeline_mode = #tpu.pipeline_mode<synchronous>, transform_indices = @transform_2, window_bounds = array<i64: 3, 128>}, {pipeline_mode = #tpu.pipeline_mode<synchronous>, transform_indices = @transform_3, window_bounds = array<i64: 128, 128>}, {pipeline_mode = #tpu.pipeline_mode<synchronous>, transform_indices = @transform_4, window_bounds = array<i64: 128, 128>}, {transform_indices = @transform_5, window_bounds = array<i64: 256, 1>}]} {
    %c0 = arith.constant 0 : index
    %c0_0 = arith.constant 0 : index
    %0 = vector.load %arg1[%c0, %c0_0] : memref<256x2xf32, #tpu.memory_space<vmem>>, vector<256x2xf32>
    %c0_1 = arith.constant 0 : index
    %c0_2 = arith.constant 0 : index
    %1 = vector.load %arg3[%c0_1, %c0_2] : memref<3x128xf32, #tpu.memory_space<vmem>>, vector<1x128xf32>
    %2 = vector.extract_strided_slice %0 {offsets = [0, 0], sizes = [256, 1], strides = [1, 1]} : vector<256x2xf32> to vector<256x1xf32>
    %c0_3 = arith.constant 0 : index
    %c0_4 = arith.constant 0 : index
    %3 = vector.load %arg2[%c0_3, %c0_4] : memref<8x128xf32, #tpu.memory_space<vmem>>, vector<1x128xf32>
    %4 = vector.broadcast %2 : vector<256x1xf32> to vector<256x128xf32>
    %5 = vector.broadcast %3 : vector<1x128xf32> to vector<256x128xf32>
    %6 = arith.mulf %4, %5 : vector<256x128xf32>
    %7 = vector.broadcast %1 : vector<1x128xf32> to vector<256x128xf32>
    %8 = arith.addf %7, %6 : vector<256x128xf32>
    %9 = vector.extract_strided_slice %0 {offsets = [0, 1], sizes = [256, 1], strides = [1, 1]} : vector<256x2xf32> to vector<256x1xf32>
    %c1 = arith.constant 1 : index
    %c0_5 = arith.constant 0 : index
    %10 = vector.load %arg2[%c1, %c0_5] : memref<8x128xf32, #tpu.memory_space<vmem>>, vector<1x128xf32>
    %11 = vector.broadcast %9 : vector<256x1xf32> to vector<256x128xf32>
    %12 = vector.broadcast %10 : vector<1x128xf32> to vector<256x128xf32>
    %13 = arith.mulf %11, %12 : vector<256x128xf32>
    %14 = arith.addf %8, %13 : vector<256x128xf32>
    %15 = math.sin %14 : vector<256x128xf32>
    %16 = arith.truncf %15 : vector<256x128xf32> to vector<256x128xbf16>
    %c0_6 = arith.constant 0 : index
    %c0_7 = arith.constant 0 : index
    %17 = vector.load %arg4[%c0_6, %c0_7] : memref<128x128xbf16, #tpu.memory_space<vmem>>, vector<128x128xbf16>
    %cst = arith.constant dense<0.000000e+00> : vector<256x128xf32>
    %18 = tpu.matmul %16, %17, %cst {dimension_numbers = #tpu.dot_dimension_numbers<[1], [0], [0], [1], [0, 0, 1, 1], [], []>} : vector<256x128xbf16>, vector<128x128xbf16>, vector<256x128xf32> -> vector<256x128xf32>
    %c1_8 = arith.constant 1 : index
    %c0_9 = arith.constant 0 : index
    %19 = vector.load %arg3[%c1_8, %c0_9] : memref<3x128xf32, #tpu.memory_space<vmem>>, vector<1x128xf32>
    %20 = vector.broadcast %19 : vector<1x128xf32> to vector<256x128xf32>
    %21 = arith.addf %18, %20 : vector<256x128xf32>
    %22 = math.sin %21 : vector<256x128xf32>
    %23 = arith.truncf %22 : vector<256x128xf32> to vector<256x128xbf16>
    %c0_10 = arith.constant 0 : index
    %c0_11 = arith.constant 0 : index
    %24 = vector.load %arg5[%c0_10, %c0_11] : memref<128x128xbf16, #tpu.memory_space<vmem>>, vector<128x128xbf16>
    %cst_12 = arith.constant dense<0.000000e+00> : vector<256x128xf32>
    %25 = tpu.matmul %23, %24, %cst_12 {dimension_numbers = #tpu.dot_dimension_numbers<[1], [0], [0], [1], [0, 0, 1, 1], [], []>} : vector<256x128xbf16>, vector<128x128xbf16>, vector<256x128xf32> -> vector<256x128xf32>
    %c2 = arith.constant 2 : index
    %c0_13 = arith.constant 0 : index
    %26 = vector.load %arg3[%c2, %c0_13] : memref<3x128xf32, #tpu.memory_space<vmem>>, vector<1x128xf32>
    %27 = vector.broadcast %26 : vector<1x128xf32> to vector<256x128xf32>
    %28 = arith.addf %25, %27 : vector<256x128xf32>
    %29 = vector.extract_strided_slice %28 {offsets = [0, 0], sizes = [256, 1], strides = [1, 1]} : vector<256x128xf32> to vector<256x1xf32>
    %c0_14 = arith.constant 0 : index
    %c0_15 = arith.constant 0 : index
    %30 = vector.load %arg6[%c0_14, %c0_15] : memref<256x1xf32, #tpu.memory_space<vmem>>, vector<256x1xf32>
    tpu.vector_store %arg6[%c0_14, %c0_15], %29 {strides = array<i32>} : memref<256x1xf32, #tpu.memory_space<vmem>>, vector<256x1xf32>,
    return
  }
  func.func @transform_0(%arg0: i32) -> (i32, i32) {
    %c0_i32 = arith.constant 0 : i32
    %c0_i32_0 = arith.constant 0 : i32
    return %arg0, %c0_i32 : i32, i32
  }
  func.func @transform_1(%arg0: i32) -> (i32, i32) {
    %c0_i32 = arith.constant 0 : i32
    %c0_i32_0 = arith.constant 0 : i32
    %c0_i32_1 = arith.constant 0 : i32
    return %c0_i32, %c0_i32_0 : i32, i32
  }
  func.func @transform_2(%arg0: i32) -> (i32, i32) {
    %c0_i32 = arith.constant 0 : i32
    %c0_i32_0 = arith.constant 0 : i32
    %c0_i32_1 = arith.constant 0 : i32
    return %c0_i32, %c0_i32_0 : i32, i32
  }
  func.func @transform_3(%arg0: i32) -> (i32, i32) {
    %c0_i32 = arith.constant 0 : i32
    %c0_i32_0 = arith.constant 0 : i32
    %c0_i32_1 = arith.constant 0 : i32
    return %c0_i32, %c0_i32_0 : i32, i32
  }
  func.func @transform_4(%arg0: i32) -> (i32, i32) {
    %c0_i32 = arith.constant 0 : i32
    %c0_i32_0 = arith.constant 0 : i32
    %c0_i32_1 = arith.constant 0 : i32
    return %c0_i32, %c0_i32_0 : i32, i32
  }
  func.func @transform_5(%arg0: i32) -> (i32, i32) {
    %c0_i32 = arith.constant 0 : i32
    %c0_i32_0 = arith.constant 0 : i32
    return %arg0, %c0_i32 : i32, i32
  }
}

</mosaic_0001>

<bundles_post_ra>
// kernel: tpu_custom_call.1
= control target key start
LH: loop header
LB: loop body
LE: loop exit
PB: predicated region body
PF: predicated region fallthrough
CT: control target
= control target key end

     0   :  { %7 = vsyncpa [#allocation3], 0  ;;  %s185_s0 = inlined_call_operand.hbm [shape: f32[8,128], index: 0, kind: input, shape index: {}]   ;;  %s186_s1 = inlined_call_operand.hbm [shape: f32[8,128], index: 1, kind: input, shape index: {}]   ;;  %s187_s2 = inlined_call_operand.hbm [shape: f32[8,128], index: 2, kind: output, shape index: {}]  }
   0x1   :  { %8 = vsyncpa [#allocation6], 0 }
   0x2   :  { %9 = vsyncpa [#allocation4], 0  ;;  %s131_s9 = smov [#allocation2]   ;;  %s132_s11 = smov [#allocation5]  }
   0x3   :  { %s16_s10 = sshll.u32 %s131_s9, 4  ;;  %s26_s12 = sshll.u32 %s132_s11, 4  ;;  %s17_s10 = int_to_ptr.vmem [resolvable:$true] %s16_s10  ;;  %s27_s12 = int_to_ptr.vmem [resolvable:$true] %s26_s12 }
   0x4   :  { %s59_s15 = scalar_lea.hbm %s185_s0, 128 }
   0x5   :  { %p60_p0 = scmp.ne.s32.totalorder %s185_s0, %s59_s15  ;;  %p63_p1 = scmp.lt.u32.totalorder %s59_s15, %s185_s0 }
   0x7   :  { %p65_p2 = pnand %p63_p1, %p60_p0 }
   0x9   :  { %68 = shalt.err (!%p65_p2)
}
   0xa   :  { %s69_s20 = scalar_lea.vmem %s17_s10, 128  ;;  %p74_p4 = scmp.lt.s32.totalorder %s17_s10, %s17_s10 }
   0xb   :  { %p70_p3 = scmp.ne.s32.totalorder %s17_s10, %s69_s20  ;;  %p75_p5 = scmp.lt.s32.totalorder %s69_s20, %s69_s20 }
   0xd   :  { %p76_p6 = por %p75_p5, %p74_p4 }
   0xf   :  { %p77_p7 = pnand %p76_p6, %p70_p3 }
  0x11   :  { %80 = shalt.err (!%p77_p7)
}
  0x12   :  { %19 = dma.hbm_to_vmem [thread:$0]  %s185_s0, 128, %s17_s10, [#allocation3]  }
  0x13   :  { %s81_s25 = scalar_lea.hbm %s186_s1, 128 }
  0x14   :  { %p82_p8 = scmp.ne.s32.totalorder %s186_s1, %s81_s25  ;;  %p85_p9 = scmp.lt.u32.totalorder %s81_s25, %s186_s1 }
  0x16   :  { %p87_p10 = pnand %p85_p9, %p82_p8 }
  0x18   :  { %90 = shalt.err (!%p87_p10)
}
  0x19   :  { %s91_s30 = scalar_lea.vmem %s27_s12, 128  ;;  %p96_p12 = scmp.lt.s32.totalorder %s27_s12, %s27_s12 }
  0x1a   :  { %p92_p11 = scmp.ne.s32.totalorder %s27_s12, %s91_s30  ;;  %p97_p13 = scmp.lt.s32.totalorder %s91_s30, %s91_s30 }
  0x1c   :  { %p98_p0 = por %p97_p13, %p96_p12 }
  0x1e   :  { %p99_p1 = pnand %p98_p0, %p92_p11 }
  0x20   :  { %102 = shalt.err (!%p99_p1)
}
  0x21   :  { %29 = dma.hbm_to_vmem [thread:$0]  %s186_s1, 128, %s27_s12, [#allocation6]  }
  0x22   :  { %125 = dma.done.wait [#allocation3], 128  }
  0x23   :  { %126 = vsyncadd [#allocation3], 4294967168 }
  0x24   :  { %127 = dma.done.wait [#allocation6], 128  }
  0x25   :  { %128 = vsyncadd [#allocation6], 4294967168  ;;  %s133_s4 = smov [#allocation7]   ;;  %v36_v0 = vld [vmem:[#allocation2] sm:$0xff]  ;;  %v37_v1 = vld [vmem:[#allocation5] sm:$0xff] }
  0x26   :  { %s46_s5 = sshll.u32 %s133_s4, 4  ;;  %v38_v2 = vadd.f32 %v37_v1, %v36_v0  ;;  %s47_s5 = int_to_ptr.vmem [resolvable:$true] %s46_s5 }
  0x27   :  { %s103_s6 = scalar_lea.vmem %s47_s5, 128  ;;  %p108_p3 = scmp.lt.s32.totalorder %s47_s5, %s47_s5 }
  0x28   :  { %39 = vst [vmem:[#allocation7] sm:$0xff] %v38_v2  ;;  %p104_p2 = scmp.ne.s32.totalorder %s47_s5, %s103_s6  ;;  %p109_p4 = scmp.lt.s32.totalorder %s103_s6, %s103_s6 }
  0x2a   :  { %p110_p5 = por %p109_p4, %p108_p3 }
  0x2c   :  { %p111_p6 = pnand %p110_p5, %p104_p2 }
  0x2e   :  { %114 = shalt.err (!%p111_p6)
}
  0x2f   :  { %s115_s8 = scalar_lea.hbm %s187_s2, 128 }
  0x30   :  { %p116_p7 = scmp.ne.s32.totalorder %s187_s2, %s115_s8  ;;  %p119_p8 = scmp.lt.u32.totalorder %s115_s8, %s187_s2 }
  0x32   :  { %p121_p9 = pnand %p119_p8, %p116_p7 }
  0x34   :  { %124 = shalt.err (!%p121_p9)
}
  0x35   :  { %49 = dma.vmem_to_hbm [thread:$0]  %s47_s5, 128, %s187_s2, [#allocation4]  }
  0x36   :  { %129 = dma.done.wait [#allocation4], 128  }
  0x37   :  { %130 = vsyncadd [#allocation4], 4294967168 }
  0x38   :  { %53 = vsyncpa [#allocation3], 1 }
  0x39   :  { %54 = vsyncpa [#allocation6], 1 }
  0x3a   :  { %55 = vsyncpa [#allocation4], 1 }

// kernel: fwd.1
= control target key start
LH: loop header
LB: loop body
LE: loop exit
PB: predicated region body
PF: predicated region fallthrough
CT: control target
= control target key end

     0   :  { %s8985_s18 = smov 0   ;;  %s16917_s0 = inlined_call_operand.vmem [shape: f32[512,2], index: 0, kind: input, shape index: {}]   ;;  %s16918_s1 = inlined_call_operand.vmem [shape: f32[8,128], index: 1, kind: input, shape index: {}]   ;;  %s16919_s2 = inlined_call_operand.vmem [shape: f32[3,128], index: 2, kind: input, shape index: {}]   ;;  %s16920_s3 = inlined_call_operand.vmem [shape: bf16[128,128], index: 3, kind: input, shape index: {}]   ;;  %s16921_s4 = inlined_call_operand.vmem [shape: bf16[128,128], index: 4, kind: input, shape index: {}]   ;;  %s16922_s5 = inlined_call_operand.vmem [shape: f32[512,1], index: 5, kind: output, shape index: {}]  }
   0x1 LB: > { %s7929_s19 = sadd.s32 4294967295, %s8945_s18   ;;  %p7933_p0 = scmp.ge.s32.totalorder %s8945_s18, 1  ;;  %s8945_s18 = sphi %s8985_s18, %s15_s18  }
   0x2   : > { %p188_p1 = scmp.lt.s32.totalorder %s8945_s18, 3 }
   0x4   : > { %p189_p2 = pnand %p7933_p0, %p188_p1 }
   0x6   : > { %192 = sbr.rel (%p189_p2) target bundleno = 2057 (0x809), region = 40 }
   0xd   : > { %s7934_s20 = sshll.u32 %s7929_s19, 5  ;;  %v8947_v0 = vmov 0   ;;  %v8948_v6 = vmov 1   ;;  %v9070_v36 = vld [vmem:[%s16918_s1] ss:$0 sm:$0xff] }
   0xe   : > { %8634 = vset.pattern.permute.xlu1 %v8947_v0  ;;  %8633 = vset.pattern.permute.xlu0 %v8947_v0  ;;  %p217_p3 = scmp.lt.s32.totalorder %s7934_s20, 63  ;;  %v9080_v40 = vld [vmem:[%s16919_s2] ss:$0 sm:$0xff]  ;;  %v9085_v41 = vld [vmem:[%s16918_s1 + $0x1] ss:$0 sm:$0xff] }
  0x10   : > { %s18210_s20 = smov (!%p217_p3, %s7934_s20), 63 }
  0x11   : > { %s7935_s21 = sshll.u32 %s18210_s20, 3 }
  0x12   : > { %s9003_s24 = scalar_lea.vmem %s16917_s0, %s7935_s21  ;;  %s16792_s10 = scalar_lea.vmem %s16922_s5, %s7935_s21 }
  0x13   : > { %v231_v1 = vld [vmem:[%s9003_s24 + $0x10] sm:$0xff]  ;;  %v229_v2 = vld [vmem:[%s9003_s24] sm:$0xff]  ;;  %v232_v3 = vld [vmem:[%s9003_s24 + $0x18] sm:$0xff] }
  0x14   : > { %275 = vperm.xlu1 %8634, %v231_v1   ;;  %265 = vperm.xlu0 %8633, %v229_v2   ;;  %v230_v4 = vld [vmem:[%s9003_s24 + $0x8] sm:$0xff]  ;;  %v233_v9 = vld [vmem:[%s9003_s24 + $0x20] sm:$0xff]  ;;  %v235_v11 = vld [vmem:[%s9003_s24 + $0x30] sm:$0xff] }
  0x15   : > { %v234_v5 = vld [vmem:[%s9003_s24 + $0x28] sm:$0xff]  ;;  %v236_v13 = vld [vmem:[%s9003_s24 + $0x38] sm:$0xff]  ;;  %v237_v16 = vld [vmem:[%s9003_s24 + $0x40] sm:$0xff] }
  0x16   : > { %v238_v7 = vld [vmem:[%s9003_s24 + $0x48] sm:$0xff]  ;;  %v239_v17 = vld [vmem:[%s9003_s24 + $0x50] sm:$0xff]  ;;  %v240_v18 = vld [vmem:[%s9003_s24 + $0x58] sm:$0xff] }
  0x17   : > { %v242_v8 = vld [vmem:[%s9003_s24 + $0x68] sm:$0xff]  ;;  %v241_v19 = vld [vmem:[%s9003_s24 + $0x60] sm:$0xff]  ;;  %v243_v20 = vld [vmem:[%s9003_s24 + $0x70] sm:$0xff] }
  0x18   : > { %280 = vperm.xlu1 %8634, %v232_v3   ;;  %270 = vperm.xlu0 %8633, %v230_v4   ;;  %v9016_v10 = vld [vmem:[%s9003_s24 + $0x88] sm:$0xff]  ;;  %v244_v21 = vld [vmem:[%s9003_s24 + $0x78] sm:$0xff]  ;;  %v245_v22 = vld [vmem:[%s9003_s24 + $0x80] sm:$0xff] }
  0x19   : > { %v9021_v12 = vld [vmem:[%s9003_s24 + $0xa8] sm:$0xff]  ;;  %v248_v23 = vld [vmem:[%s9003_s24 + $0x98] sm:$0xff]  ;;  %v249_v24 = vld [vmem:[%s9003_s24 + $0xa0] sm:$0xff] }
  0x1a   : > { %v9026_v14 = vld [vmem:[%s9003_s24 + $0xc8] sm:$0xff]  ;;  %v252_v25 = vld [vmem:[%s9003_s24 + $0xb8] sm:$0xff]  ;;  %v253_v26 = vld [vmem:[%s9003_s24 + $0xc0] sm:$0xff] }
  0x1b   : > { %v9030_v15 = vld [vmem:[%s9003_s24 + $0xe8] sm:$0xff]  ;;  %v247_v27 = vld [vmem:[%s9003_s24 + $0x90] sm:$0xff]  ;;  %v256_v28 = vld [vmem:[%s9003_s24 + $0xd8] sm:$0xff] }
  0x1c   : > { %8635 = vset.pattern.permute.xlu1 %v8948_v6  ;;  %290 = vperm.xlu0 %8633, %v234_v5   ;;  %v257_v29 = vld [vmem:[%s9003_s24 + $0xe0] sm:$0xff]  ;;  %v260_v30 = vld [vmem:[%s9003_s24 + $0xf8] sm:$0xff]  ;;  %v251_v31 = vld [vmem:[%s9003_s24 + $0xb0] sm:$0xff] }
  0x1d   : > { %501 = vperm.xlu1 %8635, %v230_v4   ;;  %v255_v34 = vld [vmem:[%s9003_s24 + $0xd0] sm:$0xff] }
  0x1e   : > { %v259_v54 = vld [vmem:[%s9003_s24 + $0xf0] sm:$0xff] }
  0x20   : > { %310 = vperm.xlu0 %8633, %v238_v7  }
  0x21   : > { %505 = vperm.xlu1 %8635, %v231_v1  }
  0x24   : > { %330 = vperm.xlu0 %8633, %v242_v8  }
  0x25   : > { %8636 = vset.pattern.permute.xlu1 %v8947_v0 }
  0x26   : > { %285 = vperm.xlu1 %8636, %v233_v9  }
  0x28   : > { %350 = vperm.xlu0 %8633, %v9016_v10  }
  0x2a   : > { %295 = vperm.xlu1 %8636, %v235_v11  }
  0x2c   : > { %370 = vperm.xlu0 %8633, %v9021_v12  }
  0x2e   : > { %300 = vperm.xlu1 %8636, %v236_v13  }
  0x30   : > { %390 = vperm.xlu0 %8633, %v9026_v14  }
  0x32   : > { %8637 = vset.pattern.permute.xlu1 %v8948_v6 }
  0x33   : > { %517 = vperm.xlu1 %8637, %v234_v5  }
  0x34   : > { %410 = vperm.xlu0 %8633, %v9030_v15  }
  0x37   : > { %521 = vperm.xlu1 %8637, %v235_v11  }
  0x38   : > { %8649 = vset.pattern.permute.xlu0 %v8948_v6 }
  0x39   : > { %497 = vperm.xlu0 %8649, %v229_v2  }
  0x3b   : > { %8638 = vset.pattern.permute.xlu1 %v8947_v0 }
  0x3c   : > { %305 = vperm.xlu1 %8638, %v237_v16  }
  0x3d   : > { %509 = vperm.xlu0 %8649, %v232_v3   ;;  %v16944_v3 = vmov 920167782  }
  0x40   : > { %315 = vperm.xlu1 %8638, %v239_v17  }
  0x41   : > { %513 = vperm.xlu0 %8649, %v233_v9   ;;  %v16927_v9 = vmov 1326507024  }
  0x44   : > { %320 = vperm.xlu1 %8638, %v240_v18  }
  0x45   : > { %525 = vperm.xlu0 %8649, %v236_v13  }
  0x48   : > { %8639 = vset.pattern.permute.xlu1 %v8948_v6 }
  0x49   : > { %533 = vperm.xlu1 %8639, %v238_v7   ;;  %529 = vperm.xlu0 %8649, %v237_v16  }
  0x4d   : > { %537 = vperm.xlu1 %8639, %v239_v17   ;;  %541 = vperm.xlu0 %8649, %v240_v18   ;;  %v16935_v17 = vmov 2131351028  }
  0x51   : > { %8640 = vset.pattern.permute.xlu1 %v8947_v0  ;;  %545 = vperm.xlu0 %8649, %v241_v19  }
  0x52   : > { %325 = vperm.xlu1 %8640, %v241_v19  }
  0x55   : > { %557 = vperm.xlu0 %8649, %v244_v21  }
  0x56   : > { %335 = vperm.xlu1 %8640, %v243_v20  }
  0x59   : > { %561 = vperm.xlu0 %8649, %v245_v22  }
  0x5a   : > { %340 = vperm.xlu1 %8640, %v244_v21  }
  0x5d   : > { %573 = vperm.xlu0 %8649, %v248_v23  }
  0x5e   : > { %8641 = vset.pattern.permute.xlu1 %v8948_v6 }
  0x5f   : > { %549 = vperm.xlu1 %8641, %v242_v8  }
  0x61   : > { %577 = vperm.xlu0 %8649, %v249_v24  }
  0x63   : > { %553 = vperm.xlu1 %8641, %v243_v20  }
  0x65   : > { %589 = vperm.xlu0 %8649, %v252_v25  }
  0x67   : > { %8642 = vset.pattern.permute.xlu1 %v8947_v0 }
  0x68   : > { %345 = vperm.xlu1 %8642, %v245_v22   ;;  %v16929_v22 = vmov 683565275  }
  0x69   : > { %593 = vperm.xlu0 %8649, %v253_v26  }
  0x6c   : > { %355 = vperm.xlu1 %8642, %v247_v27  }
  0x6d   : > { %605 = vperm.xlu0 %8649, %v256_v28  }
  0x70   : > { %360 = vperm.xlu1 %8642, %v248_v23  }
  0x71   : > { %609 = vperm.xlu0 %8649, %v257_v29  }
  0x74   : > { %8643 = vset.pattern.permute.xlu1 %v8948_v6 }
  0x75   : > { %565 = vperm.xlu1 %8643, %v9016_v10   ;;  %621 = vperm.xlu0 %8649, %v260_v30  }
  0x79   : > { %569 = vperm.xlu1 %8643, %v247_v27  }
  0x7d   : > { %8644 = vset.pattern.permute.xlu1 %v8947_v0 }
  0x7e   : > { %365 = vperm.xlu1 %8644, %v249_v24  }
  0x82   : > { %375 = vperm.xlu1 %8644, %v251_v31  }
  0x86   : > { %380 = vperm.xlu1 %8644, %v252_v25  }
  0x8a   : > { %8645 = vset.pattern.permute.xlu1 %v8948_v6 }
  0x8b   : > { %581 = vperm.xlu1 %8645, %v9021_v12   ;;  %v16931_v12 = vmov 2475754826  }
  0x8f   : > { %585 = vperm.xlu1 %8645, %v251_v31  }
  0x93   : > { %v276_v32 = vpop.permute.xlu1 %275  ;;  %8646 = vset.pattern.permute.xlu1 %v8947_v0  ;;  %v9062_v33 = vpop.permute.xlu0 %265 }
  0x94   : > { %385 = vperm.xlu1 %8646, %v253_v26   ;;  %v429_v39 = vmul.f32 %v9070_v36, %v276_v32 }
  0x96   : > { %v465_v43 = vadd.f32 %v9080_v40, %v429_v39 }
  0x97   : > { %v9065_v35 = vpop.permute.xlu1 %280  ;;  %v9072_v37 = vpop.permute.xlu0 %270 }
  0x98   : > { %395 = vperm.xlu1 %8646, %v255_v34  }
  0x9b   : > { %v291_v44 = vpop.permute.xlu0 %290 }
  0x9c   : > { %400 = vperm.xlu1 %8646, %v256_v28   ;;  %v9074_v38 = vpop.permute.xlu1 %501  ;;  %v432_v58 = vmul.f32 %v9070_v36, %v291_v44 }
  0x9e   : > { %v468_v62 = vadd.f32 %v9080_v40, %v432_v58 }
  0x9f   : > { %v9096_v50 = vpop.permute.xlu0 %310 }
  0xa0   : > { %8647 = vset.pattern.permute.xlu1 %v8948_v6  ;;  %v506_v42 = vpop.permute.xlu1 %505 }
  0xa1   : > { %v630_v45 = vmul.f32 %v9085_v41, %v506_v42  ;;  %597 = vperm.xlu1 %8647, %v9026_v14   ;;  %v16940_v14 = vmov 2102212464  }
  0xa3   : > { %v9091_v46 = vadd.f32 %v630_v45, %v465_v43  ;;  %v9100_v55 = vpop.permute.xlu0 %330  ;;  %v428_v43 = vmul.f32 %v9070_v36, %v9072_v37 }
  0xa5   : > { %17371 = vst [vmem:[#allocation2_spill] sm:$0xff] %v9091_v46  ;;  %v903_v47 = vand.u32 2139095040, %v9091_v46  ;;  %601 = vperm.xlu1 %8647, %v255_v34   ;;  %v9094_v48 = vpop.permute.xlu1 %285  ;;  %v16926_v8 = vand.u32 2147483647, %v9091_v46 }
  0xa7   : > { %v904_v49 = vshrl.u32 %v903_v47, 23  ;;  %v9105_v60 = vpop.permute.xlu0 %350 }
  0xa9   : > { %v7949_v51 = vadd.s32 4294967169, %v904_v49  ;;  %8648 = vset.pattern.permute.xlu1 %v8947_v0  ;;  %v296_v52 = vpop.permute.xlu1 %295 }
  0xaa   : > { %405 = vperm.xlu1 %8648, %v257_v29   ;;  %v433_v0 = vmul.f32 %v9070_v36, %v296_v52 }
  0xab   : > { %v910_v53 = vadd.s32 1, %v7949_v51  ;;  %v9118_v5 = vpop.permute.xlu0 %370 }
  0xac   : > { %v469_v11 = vadd.f32 %v9080_v40, %v433_v0 }
  0xad   : > { %vm911_vm0 = vcmp.gt.s32.totalorder %v910_v53, 0  ;;  %v9102_v56 = vpop.permute.xlu1 %300 }
  0xae   : > { %v912_v57 = vsel %vm911_vm0, %v910_v53, 0  ;;  %415 = vperm.xlu1 %8648, %v259_v54   ;;  %v464_v53 = vadd.f32 %v9080_v40, %v428_v43 }
  0xaf   : > { %v914_v59 = vand.u32 31, %v912_v57  ;;  %v9144_v31 = vpop.permute.xlu0 %390 }
  0xb1   : > { %v9108_v63 = vsub.s32 32, %v914_v59  ;;  %v929_v16 = vshll.u32 %v16944_v3, %v914_v59  ;;  %v917_v23 = vshll.u32 %v16929_v22, %v914_v59  ;;  %v920_v24 = vshll.u32 %v16931_v12, %v914_v59 }
  0xb2   : > { %420 = vperm.xlu1 %8648, %v260_v30   ;;  %v518_v61 = vpop.permute.xlu1 %517  ;;  %v923_v26 = vshll.u32 %v16935_v17, %v914_v59  ;;  %v907_v30 = vand.u32 8388607, %v16926_v8  ;;  %v448_v8 = vmul.f32 %v9070_v36, %v9118_v5 }
  0xb3   : > { %v633_v1 = vmul.f32 %v9085_v41, %v518_v61  ;;  %v927_v4 = vshrl.u32 %v16944_v3, %v9108_v63  ;;  %v930_v10 = vshrl.u32 %v16927_v9, %v9108_v63  ;;  %v918_v13 = vshrl.u32 %v16931_v12, %v9108_v63 }
  0xb4   : > { %v921_v18 = vshrl.u32 %v16935_v17, %v9108_v63  ;;  %v924_v19 = vshrl.u32 %v16940_v14, %v9108_v63  ;;  %v908_v51 = vor.u32 8388608, %v907_v30 }
  0xb5   : > { %v9114_v2 = vadd.f32 %v633_v1, %v468_v62  ;;  %v931_v27 = vor.u32 %v930_v10, %v929_v16  ;;  %v919_v32 = vor.u32 %v918_v13, %v917_v23  ;;  %v916_v23 = vshrl.u32 %v16929_v22, %v9108_v63 }
  0xb6   : > { %8650 = vset.pattern.permute.xlu1 %v8948_v6  ;;  %v522_v7 = vpop.permute.xlu1 %521  ;;  %v9124_v6 = vshrl.u32 %v912_v57, 5  ;;  %v922_v34 = vor.u32 %v921_v18, %v920_v24  ;;  %v925_v39 = vor.u32 %v924_v19, %v923_v26 }
  0xb7   : > { %613 = vperm.xlu1 %8650, %v9030_v15   ;;  %17372 = vst [vmem:[#allocation3_spill] sm:$0xff] %v9114_v2  ;;  %v926_v15 = vshll.u32 %v16940_v14, %v914_v59  ;;  %v1215_v20 = vand.u32 2139095040, %v9114_v2  ;;  %v634_v21 = vmul.f32 %v9085_v41, %v522_v7  ;;  %v9166_v59 = vpop.permute.xlu0 %410  ;;  %v16924_v43 = vand.u32 2147483647, %v9114_v2 }
  0xb8   : > { %vm935_vm1 = vcmp.lt.s32.totalorder %v9124_v6, 4  ;;  %vm932_vm2 = vcmp.lt.s32.totalorder %v9124_v6, 1  ;;  %vm934_vm3 = vcmp.lt.s32.totalorder %v9124_v6, 3  ;;  %vm933_vm5 = vcmp.lt.s32.totalorder %v9124_v6, 2 }
  0xb9   : > { %v928_v25 = vor.u32 %v927_v4, %v926_v15  ;;  %v1216_v28 = vshrl.u32 %v1215_v20, 23  ;;  %v9139_v29 = vadd.f32 %v634_v21, %v469_v11  ;;  %v945_v45 = vsel %vm935_vm1, %v931_v27, 1326507024 }
  0xba   : > { %v940_v52 = vsel %vm932_vm2, %v919_v32, %v922_v34  ;;  %v944_v57 = vsel %vm932_vm2, %v922_v34, %v925_v39  ;;  %v948_v4 = vshll.u32 %v908_v51, 8  ;;  %v937_v19 = vsel %vm935_vm1, %v925_v39, 2102212464 }
  0xbb   : > { %617 = vperm.xlu1 %8650, %v259_v54   ;;  %17373 = vst [vmem:[#allocation4_spill] sm:$0xff] %v9139_v29  ;;  %v7961_v42 = vadd.s32 4294967169, %v1216_v28  ;;  %v941_v44 = vsel %vm935_vm1, %v928_v25, 920167782  ;;  %v1319_v49 = vand.u32 2139095040, %v9139_v29  ;;  %v629_v54 = vmul.f32 %v9085_v41, %v9074_v38  ;;  %v9182_v18 = vpop.permute.xlu0 %497 }
  0xbc   : > { %v942_v37 = vsel %vm934_vm3, %v925_v39, %v941_v44  ;;  %v946_v58 = vsel %vm934_vm3, %v928_v25, %v945_v45  ;;  %v430_v20 = vmul.f32 %v9070_v36, %v9065_v35  ;;  %v936_v26 = vsel %vm932_vm2, %v916_v23, %v919_v32 }
  0xbd   : > { %v1222_v47 = vadd.s32 1, %v7961_v42  ;;  %v1320_v62 = vshrl.u32 %v1319_v49, 23  ;;  %v943_v0 = vsel %vm933_vm5, %v940_v52, %v942_v37  ;;  %v947_v1 = vsel %vm933_vm5, %v944_v57, %v946_v58 }
  0xbe   : > { %v9173_v38 = vadd.f32 %v629_v54, %v464_v53  ;;  %v9175_v10 = vmul.u32.u64.low %v948_v4, %v943_v0  ;;  %v9176_v11 = vmul.u32.u64.high %v948_v4, %v943_v0, %v9175_v10  ;;  %v938_v27 = vsel %vm934_vm3, %v922_v34, %v937_v19 }
  0xbf   : > { %vm1223_vm4 = vcmp.gt.s32.totalorder %v1222_v47, 0  ;;  %v7965_v13 = vadd.s32 4294967169, %v1320_v62  ;;  %v9179_v15 = vmul.u32.u64.low %v948_v4, %v947_v1  ;;  %v9180_v16 = vmul.u32.u64.high %v948_v4, %v947_v1, %v9179_v15  ;;  %v510_v39 = vpop.permute.xlu0 %509 }
  0xc0   : > { %v1224_v61 = vsel %vm1223_vm4, %v1222_v47, 0  ;;  %17374 = vst [vmem:[#allocation5_spill] sm:$0xff] %v9173_v38  ;;  %v799_v21 = vand.u32 2139095040, %v9173_v38  ;;  %v466_v28 = vadd.f32 %v9080_v40, %v430_v20  ;;  %v939_v42 = vsel %vm933_vm5, %v936_v26, %v938_v27 }
  0xc1   : > { %v1226_v7 = vand.u32 31, %v1224_v61  ;;  %v1326_v25 = vadd.s32 1, %v7965_v13  ;;  %v958_v63 = vadd.s32 1, %v9176_v11  ;;  %vm957_vm7 = vc.u32 %v9180_v16, %v9175_v10 }
  0xc2   : > { %v800_v30 = vshrl.u32 %v799_v21, 23  ;;  %v9211_v45 = vshrl.u32 %v1224_v61, 5  ;;  %v631_v49 = vmul.f32 %v9085_v41, %v510_v39  ;;  %v955_v62 = vmul.u32 %v948_v4, %v939_v42 }
  0xc3   : > { %v9191_v24 = vsub.s32 32, %v1226_v7  ;;  %vm1327_vm6 = vcmp.gt.s32.totalorder %v1326_v25, 0  ;;  %v1238_v34 = vshll.u32 %v16940_v14, %v1226_v7  ;;  %v1229_v51 = vshll.u32 %v16929_v22, %v1226_v7 }
  0xc4   : > { %v1241_v37 = vshll.u32 %v16944_v3, %v1226_v7  ;;  %v1328_v53 = vsel %vm1327_vm6, %v1326_v25, 0  ;;  %v7945_v54 = vadd.s32 4294967169, %v800_v30  ;;  %v959_v57 = vsel %vm957_vm7, %v958_v63, %v9176_v11 }
  0xc5   : > { %v1239_v35 = vshrl.u32 %v16944_v3, %v9191_v24  ;;  %v1230_v32 = vshrl.u32 %v16931_v12, %v9191_v24  ;;  %v1242_v44 = vshrl.u32 %v16927_v9, %v9191_v24  ;;  %v1233_v6 = vshrl.u32 %v16935_v17, %v9191_v24 }
  0xc6   : > { %v1236_v47 = vshrl.u32 %v16940_v14, %v9191_v24  ;;  %v1232_v58 = vshll.u32 %v16931_v12, %v1226_v7  ;;  %v1235_v61 = vshll.u32 %v16935_v17, %v1226_v7  ;;  %v1219_v0 = vand.u32 8388607, %v16924_v43 }
  0xc7   : > { %v1240_v52 = vor.u32 %v1239_v35, %v1238_v34  ;;  %v9225_v1 = vor.u32 %v1230_v32, %v1229_v51  ;;  %v1243_v13 = vor.u32 %v1242_v44, %v1241_v37  ;;  %vm1247_vm8 = vcmp.lt.s32.totalorder %v9211_v45, 4 }
  0xc8   : > { %v9227_v15 = vor.u32 %v1233_v6, %v1232_v58  ;;  %v1237_v19 = vor.u32 %v1236_v47, %v1235_v61  ;;  %v1330_v20 = vand.u32 31, %v1328_v53  ;;  %v9230_v21 = vadd.s32 %v959_v57, %v955_v62 }
  0xc9   : > { %v1253_v11 = vsel %vm1247_vm8, %v1240_v52, 920167782  ;;  %v9234_v23 = vadd.f32 %v631_v49, %v466_v28  ;;  %v427_v4 = vmul.f32 %v9070_v36, %v9062_v33  ;;  %v806_v7 = vadd.s32 1, %v7945_v54 }
  0xca   : > { %v436_v25 = vmul.f32 %v9070_v36, %v9096_v50  ;;  %v431_v26 = vmul.f32 %v9070_v36, %v9094_v48  ;;  %v1220_v27 = vor.u32 8388608, %v1219_v0  ;;  %vm1244_vm9 = vcmp.lt.s32.totalorder %v9211_v45, 1 }
  0xcb   : > { %17375 = vst [vmem:[#allocation6_spill] sm:$0xff] %v9234_v23  ;;  %vm1246_vm10 = vcmp.lt.s32.totalorder %v9211_v45, 3  ;;  %v1257_v30 = vsel %vm1247_vm8, %v1243_v13, 1326507024  ;;  %v1252_v33 = vsel %vm1244_vm9, %v9225_v1, %v9227_v15  ;;  %v16923_v50 = vand.u32 2147483647, %v9139_v29 }
  0xcc   : > { %v1254_v28 = vsel %vm1246_vm10, %v1237_v19, %v1253_v11  ;;  %v9253_v35 = vsub.s32 32, %v1330_v20  ;;  %v961_v48 = vadd.s32 536870912, %v9230_v21  ;;  %v1007_v39 = vand.u32 2139095040, %v9234_v23 }
  0xcd   : > { %v9258_v42 = vadd.f32 %v9080_v40, %v427_v4  ;;  %vm1245_vm11 = vcmp.lt.s32.totalorder %v9211_v45, 2  ;;  %v1256_v63 = vsel %vm1244_vm9, %v9227_v15, %v1237_v19  ;;  %v1258_v32 = vsel %vm1246_vm10, %v1240_v52, %v1257_v30 }
  0xce   : > { %v9267_v34 = vadd.f32 %v9080_v40, %v436_v25  ;;  %v440_v44 = vmul.f32 %v9070_v36, %v9100_v55  ;;  %v467_v6 = vadd.f32 %v9080_v40, %v431_v26  ;;  %v1255_v47 = vsel %vm1245_vm11, %v1252_v33, %v1254_v28 }
  0xcf   : > { %vm807_vm12 = vcmp.gt.s32.totalorder %v806_v7, 0  ;;  %v9274_v49 = vshll.u32 %v1220_v27, 8  ;;  %v9278_v51 = vand.u32 8388607, %v16923_v50  ;;  %v1343_v52 = vshrl.u32 %v16944_v3, %v9253_v35 }
  0xd0   : > { %v9282_v37 = vshrl.u32 %v961_v48, 30  ;;  %v1259_v55 = vsel %vm1245_vm11, %v1256_v63, %v1258_v32  ;;  %v1346_v54 = vshrl.u32 %v16927_v9, %v9253_v35  ;;  %v1008_v57 = vshrl.u32 %v1007_v39, 23  ;;  %v514_v63 = vpop.permute.xlu0 %513 }
  0xd1   : > { %v9289_v58 = vmul.u32.u64.low %v9274_v49, %v1255_v47  ;;  %v9290_v61 = vmul.u32.u64.high %v9274_v49, %v1255_v47, %v9289_v58  ;;  %v1334_v62 = vshrl.u32 %v16931_v12, %v9253_v35  ;;  %v1342_v0 = vshll.u32 %v16940_v14, %v1330_v20 }
  0xd2   : > { %17376 = vst [vmem:[#allocation7_spill] sm:$0xff] %v9282_v37  ;;  %v9296_v13 = vshrl.u32 %v1328_v53, 5  ;;  %v1337_v11 = vshrl.u32 %v16935_v17, %v9253_v35  ;;  %v1340_v4 = vshrl.u32 %v16940_v14, %v9253_v35  ;;  %v1345_v25 = vshll.u32 %v16944_v3, %v1330_v20 }
  0xd3   : > { %v9304_v26 = vmul.u32.u64.low %v9274_v49, %v1259_v55  ;;  %v9305_v27 = vmul.u32.u64.high %v9274_v49, %v1259_v55, %v9304_v26  ;;  %v1333_v30 = vshll.u32 %v16929_v22, %v1330_v20  ;;  %v1344_v33 = vor.u32 %v1343_v52, %v1342_v0 }
  0xd4   : > { %v1336_v28 = vshll.u32 %v16931_v12, %v1330_v20  ;;  %v1339_v53 = vshll.u32 %v16935_v17, %v1330_v20  ;;  %v1347_v48 = vor.u32 %v1346_v54, %v1345_v25  ;;  %v7953_v39 = vadd.s32 4294967169, %v1008_v57 }
  0xd5   : > { %v444_v32 = vmul.f32 %v9070_v36, %v9105_v60  ;;  %v1228_v47 = vshrl.u32 %v16929_v22, %v9191_v24  ;;  %v1249_v55 = vsel %vm1247_vm8, %v1237_v19, 2102212464  ;;  %v9316_v26 = vor.u32 %v1334_v62, %v1333_v30 }
  0xd6   : > { %v9318_v50 = vor.u32 %v1337_v11, %v1336_v28  ;;  %v1341_v52 = vor.u32 %v1340_v4, %v1339_v53  ;;  %vm1351_vm13 = vcmp.lt.s32.totalorder %v9296_v13, 4  ;;  %v1014_v20 = vadd.s32 1, %v7953_v39 }
  0xd7   : > { %v808_v54 = vsel %vm807_vm12, %v806_v7, 0  ;;  %v963_v57 = vshll.u32 %v9282_v37, 30  ;;  %v1357_v60 = vsel %vm1351_vm13, %v1344_v33, 920167782  ;;  %v632_v24 = vmul.f32 %v9085_v41, %v514_v63 }
  0xd8   : > { %v1248_v19 = vsel %vm1244_vm9, %v1228_v47, %v9225_v1  ;;  %v1324_v62 = vor.u32 8388608, %v9278_v51  ;;  %v1361_v0 = vsel %vm1351_vm13, %v1347_v48, 1326507024  ;;  %vm1015_vm14 = vcmp.gt.s32.totalorder %v1014_v20, 0 }
  0xd9   : > { %v1250_v7 = vsel %vm1246_vm10, %v9227_v15, %v1249_v55  ;;  %vm1348_vm15 = vcmp.lt.s32.totalorder %v9296_v13, 1  ;;  %vm1350_vm0 = vcmp.lt.s32.totalorder %v9296_v13, 3  ;;  %v1016_v11 = vsel %vm1015_vm14, %v1014_v20, 0 }
  0xda   : > { %v1270_v4 = vadd.s32 1, %v9290_v61  ;;  %v1356_v1 = vsel %vm1348_vm15, %v9316_v26, %v9318_v50  ;;  %v1358_v51 = vsel %vm1350_vm0, %v1341_v52, %v1357_v60  ;;  %v1018_v25 = vand.u32 31, %v1016_v11 }
  0xdb   : > { %v9345_v30 = vsub.s32 %v9230_v21, %v963_v57  ;;  %vm1269_vm1 = vc.u32 %v9305_v27, %v9289_v58  ;;  %v1360_v15 = vsel %vm1348_vm15, %v9318_v50, %v1341_v52  ;;  %v1362_v28 = vsel %vm1350_vm0, %v1344_v33, %v1361_v0 }
  0xdc   : > { %v1251_v53 = vsel %vm1245_vm11, %v1248_v19, %v1250_v7  ;;  %vm1349_vm2 = vcmp.lt.s32.totalorder %v9296_v13, 2  ;;  %v9357_v48 = vsub.s32 32, %v1018_v25  ;;  %v9359_v39 = vadd.f32 %v632_v24, %v467_v6 }
  0xdd   : > { %v9362_v21 = vadd.f32 %v9080_v40, %v440_v44  ;;  %v9365_v63 = vadd.f32 %v9080_v40, %v444_v32  ;;  %v1359_v47 = vsel %vm1349_vm2, %v1356_v1, %v1358_v51  ;;  %v16925_v33 = vand.u32 2147483647, %v9234_v23 }
  0xde   : > { %17377 = vst [vmem:[#allocation8_spill] sm:$0xff] %v9359_v39  ;;  %v9370_v55 = vshrl.u32 %v808_v54, 5  ;;  %v1271_v45 = vsel %vm1269_vm1, %v1270_v4, %v9290_v61  ;;  %v1363_v20 = vsel %vm1349_vm2, %v1360_v15, %v1362_v28  ;;  %v9375_v6 = vshll.u32 %v1324_v62, 8 }
  0xdf   : > { %17378 = vst [vmem:[#allocation9_spill] sm:$0xff] %v9362_v21  ;;  %17379 = vst [vmem:[#allocation10_spill] sm:$0xff] %v9365_v63  ;;  %v9377_v57 = vand.u32 31, %v808_v54  ;;  %v966_v44 = vsub.s32 0, %v9345_v30  ;;  %v434_v32 = vmul.f32 %v9070_v36, %v9102_v56  ;;  %v1267_v60 = vmul.u32 %v9274_v49, %v1251_v53 }
  0xe0   : > { %17380 = vst [vmem:[#allocation11_spill] sm:$0xff] %v9370_v55  ;;  %v9384_v24 = vmul.u32.u64.low %v9375_v6, %v1359_v47  ;;  %v9385_v19 = vmul.u32.u64.high %v9375_v6, %v1359_v47, %v9384_v24  ;;  %v1031_v61 = vshrl.u32 %v16944_v3, %v9357_v48  ;;  %v1111_v62 = vand.u32 2139095040, %v9359_v39 }
  0xe1   : > { %17381 = vst [vmem:[#allocation12_spill] sm:$0xff] %v9377_v57  ;;  %v9391_v0 = vadd.s32 %v1271_v45, %v1267_v60  ;;  %v9394_v54 = vmul.u32.u64.low %v9375_v6, %v1363_v20  ;;  %v9395_v7 = vmul.u32.u64.high %v9375_v6, %v1363_v20, %v9394_v54  ;;  %v1011_v56 = vand.u32 8388607, %v16925_v33 }
  0xe2   : > { %v1353_v49 = vsel %vm1351_vm13, %v1341_v52, 2102212464  ;;  %v9401_v4 = vshrl.u32 %v1016_v11, 5  ;;  %v1030_v1 = vshll.u32 %v16940_v14, %v1018_v25  ;;  %v1034_v51 = vshrl.u32 %v16927_v9, %v9357_v48 }
  0xe3   : > { %v1022_v15 = vshrl.u32 %v16931_v12, %v9357_v48  ;;  %v1025_v28 = vshrl.u32 %v16935_v17, %v9357_v48  ;;  %v1028_v53 = vshrl.u32 %v16940_v14, %v9357_v48  ;;  %v1033_v47 = vshll.u32 %v16944_v3, %v1018_v25 }
  0xe4   : > { %v7950_v52 = vmin.u32 %v966_v44, %v9345_v30  ;;  %v1332_v11 = vshrl.u32 %v16929_v22, %v9253_v35  ;;  %v1032_v45 = vor.u32 %v1031_v61, %v1030_v1  ;;  %v1112_v20 = vshrl.u32 %v1111_v62, 23  ;;  %v9428_v61 = vpop.permute.xlu1 %305 }
  0xe5   : > { %v1021_v60 = vshll.u32 %v16929_v22, %v1018_v25  ;;  %v1024_v54 = vshll.u32 %v16931_v12, %v1018_v25  ;;  %v1027_v43 = vshll.u32 %v16935_v17, %v1018_v25  ;;  %v1035_v33 = vor.u32 %v1034_v51, %v1033_v47 }
  0xe6   : > { %v1273_v9 = vadd.s32 536870912, %v9391_v0  ;;  %v1352_v44 = vsel %vm1348_vm15, %v1332_v11, %v9316_v26  ;;  %v1354_v35 = vsel %vm1350_vm0, %v9318_v50, %v1353_v49  ;;  %vm1039_vm3 = vcmp.lt.s32.totalorder %v9401_v4, 4  ;;  %v526_v11 = vpop.permute.xlu0 %525 }
  0xe7   : > { %v9430_v62 = vor.u32 %v1022_v15, %v1021_v60  ;;  %v9432_v1 = vor.u32 %v1025_v28, %v1024_v54  ;;  %v1029_v25 = vor.u32 %v1028_v53, %v1027_v43  ;;  %v470_v5 = vadd.f32 %v9080_v40, %v434_v32 }
  0xe8   : > { %v1374_v51 = vadd.s32 1, %v9385_v19  ;;  %v1045_v26 = vsel %vm1039_vm3, %v1032_v45, 920167782  ;;  %v7957_v47 = vadd.s32 4294967169, %v1112_v20  ;;  %v968_v22 = vclz %v7950_v52  ;;  %v9464_v20 = vpop.permute.xlu1 %315 }
  0xe9   : > { %vm1373_vm4 = vc.u32 %v9395_v7, %v9384_v24  ;;  %v1012_v50 = vor.u32 8388608, %v1011_v56  ;;  %v1049_v49 = vsel %vm1039_vm3, %v1035_v33, 1326507024  ;;  %v9443_v43 = vshrl.u32 %v1273_v9, 30 }
  0xea   : > { %v1355_v32 = vsel %vm1349_vm2, %v1352_v44, %v1354_v35  ;;  %vm1036_vm5 = vcmp.lt.s32.totalorder %v9401_v4, 1  ;;  %vm1038_vm6 = vcmp.lt.s32.totalorder %v9401_v4, 3  ;;  %v1118_v28 = vadd.s32 1, %v7957_v47 }
  0xeb   : > { %17382 = vst [vmem:[#allocation13_spill] sm:$0xff] %v9443_v43  ;;  %v1044_v15 = vsel %vm1036_vm5, %v9430_v62, %v9432_v1  ;;  %v1046_v56 = vsel %vm1038_vm6, %v1029_v25, %v1045_v26  ;;  %v635_v33 = vmul.f32 %v9085_v41, %v526_v11  ;;  %v1375_v9 = vsel %vm1373_vm4, %v1374_v51, %v9385_v19 }
  0xec   : > { %v628_v13 = vmul.f32 %v9085_v41, %v9182_v18  ;;  %v1048_v53 = vsel %vm1036_vm5, %v9432_v1, %v1029_v25  ;;  %v1050_v52 = vsel %vm1038_vm6, %v1032_v45, %v1049_v49  ;;  %v7951_v60 = vadd.s32 4294967294, %v968_v22 }
  0xed   : > { %v1371_v54 = vmul.u32 %v9375_v6, %v1355_v32  ;;  %vm1037_vm7 = vcmp.lt.s32.totalorder %v9401_v4, 2  ;;  %vm1119_vm8 = vcmp.gt.s32.totalorder %v1118_v28, 0  ;;  %v1275_v19 = vshll.u32 %v9443_v43, 30 }
  0xee   : > { %v1047_v18 = vsel %vm1037_vm7, %v1044_v15, %v1046_v56  ;;  %v9471_v44 = vshll.u32 %v1012_v50, 8  ;;  %v1120_v35 = vsel %vm1119_vm8, %v1118_v28, 0  ;;  %v1051_v45 = vsel %vm1037_vm7, %v1048_v53, %v1050_v52  ;;  %v9505_v28 = vpop.permute.xlu1 %320 }
  0xef   : > { %v9473_v51 = vadd.s32 %v1375_v9, %v1371_v54  ;;  %v1122_v26 = vand.u32 31, %v1120_v35  ;;  %v9477_v22 = vadd.f32 %v635_v33, %v470_v5  ;;  %v9480_v6 = vsub.s32 32, %v9377_v57 }
  0xf0   : > { %v9483_v47 = vadd.f32 %v9080_v40, %v448_v8  ;;  %v452_v11 = vmul.f32 %v9070_v36, %v9144_v31  ;;  %v9488_v50 = vadd.f32 %v628_v13, %v9258_v42  ;;  %vm7952_vm9 = vcmp.lt.s32.totalorder %v7951_v60, 0 }
  0xf1   : > { %17383 = vst [vmem:[#allocation14_spill] sm:$0xff] %v9477_v22  ;;  %17384 = vst [vmem:[#allocation15_spill] sm:$0xff] %v9480_v6  ;;  %v9491_v49 = vmul.u32.u64.low %v9471_v44, %v1047_v18  ;;  %v9492_v32 = vmul.u32.u64.high %v9471_v44, %v1047_v18, %v9491_v49  ;;  %v9495_v5 = vsub.s32 32, %v1122_v26  ;;  %v9498_v15 = vsub.s32 %v9391_v0, %v1275_v19 }
  0xf2   : > { %17385 = vst [vmem:[#allocation16_spill] sm:$0xff] %v9483_v47  ;;  %17386 = vst [vmem:[#allocation17_spill] sm:$0xff] %v9488_v50  ;;  %v9501_v8 = vmul.u32.u64.low %v9471_v44, %v1051_v45  ;;  %v9502_v56 = vmul.u32.u64.high %v9471_v44, %v1051_v45, %v9501_v8  ;;  %v1377_v42 = vadd.s32 536870912, %v9473_v51  ;;  %v1041_v33 = vsel %vm1039_vm3, %v1029_v25, 2102212464  ;;  %v534_v23 = vpop.permute.xlu1 %533 }
  0xf3   : > { %v1134_v9 = vshll.u32 %v16940_v14, %v1122_v26  ;;  %v1423_v13 = vand.u32 2139095040, %v9477_v22  ;;  %v1126_v0 = vshrl.u32 %v16931_v12, %v9495_v5  ;;  %v1129_v53 = vshrl.u32 %v16935_v17, %v9495_v5 }
  0xf4   : > { %v1132_v52 = vshrl.u32 %v16940_v14, %v9495_v5  ;;  %v1135_v54 = vshrl.u32 %v16944_v3, %v9495_v5  ;;  %v17387_v19 = vmov 683565275   ;;  %v9522_v25 = vshrl.u32 %v1120_v35, 5 }
  0xf5   : > { %v1020_v18 = vshrl.u32 %v17387_v19, %v9357_v48  ;;  %v1137_v45 = vshll.u32 %v16944_v3, %v1122_v26  ;;  %v17388_v8 = vmov 1326507024   ;;  %v1125_v12 = vshll.u32 %v17387_v19, %v1122_v26 }
  0xf6   : > { %v1138_v31 = vshrl.u32 %v17388_v8, %v9495_v5  ;;  %v17389_v43 = vmov 2475754826   ;;  %v17390_v37 = vmov 2131351028   ;;  %v1136_v14 = vor.u32 %v1135_v54, %v1134_v9 }
  0xf7   : > { %v1128_v17 = vshll.u32 %v17389_v43, %v1122_v26  ;;  %v1131_v55 = vshll.u32 %v17390_v37, %v1122_v26  ;;  %v1040_v57 = vsel %vm1036_vm5, %v1020_v18, %v9430_v62  ;;  %v1042_v48 = vsel %vm1038_vm6, %v9432_v1, %v1041_v33 }
  0xf8   : > { %v17391_v35 = vand.u32 2147483647, %v9359_v39  ;;  %v1139_v6 = vor.u32 %v1138_v31, %v1137_v45  ;;  %v1127_v38 = vor.u32 %v1126_v0, %v1125_v12  ;;  %v1424_v21 = vshrl.u32 %v1423_v13, 23 }
  0xf9   : > { %v1130_v47 = vor.u32 %v1129_v53, %v1128_v17  ;;  %v1133_v63 = vor.u32 %v1132_v52, %v1131_v55  ;;  %v9539_v26 = vsel %vm7952_vm9, 0, %v7951_v60  ;;  %v9541_v9 = vshrl.u32 %v1377_v42, 30 }
  0xfa   : > { %v1115_v3 = vand.u32 8388607, %v17391_v35  ;;  %v1062_v62 = vadd.s32 1, %v9492_v32  ;;  %vm1143_vm10 = vcmp.lt.s32.totalorder %v9522_v25, 4  ;;  %v1278_v1 = vsub.s32 0, %v9498_v15 }
  0xfb   : > { %17392 = vst [vmem:[#allocation18_spill] sm:$0xff] %v9541_v9  ;;  %vm1061_vm11 = vc.u32 %v9502_v56, %v9491_v49  ;;  %v1149_v12 = vsel %vm1143_vm10, %v1136_v14, 920167782  ;;  %v1153_v17 = vsel %vm1143_vm10, %v1139_v6, 1326507024  ;;  %v1043_v55 = vsel %vm1037_vm7, %v1040_v57, %v1042_v48 }
  0xfc   : > { %vm1140_vm12 = vcmp.lt.s32.totalorder %v9522_v25, 1  ;;  %vm1142_vm13 = vcmp.lt.s32.totalorder %v9522_v25, 3  ;;  %v637_v60 = vmul.f32 %v9085_v41, %v534_v23  ;;  %v1116_v31 = vor.u32 8388608, %v1115_v3 }
  0xfd   : > { %v1148_v42 = vsel %vm1140_vm12, %v1127_v38, %v1130_v47  ;;  %v1150_v33 = vsel %vm1142_vm13, %v1133_v63, %v1149_v12  ;;  %v7969_v13 = vadd.s32 4294967169, %v1424_v21  ;;  %v1379_v0 = vshll.u32 %v9541_v9, 30 }
  0xfe   : > { %v1063_v6 = vsel %vm1061_vm11, %v1062_v62, %v9492_v32  ;;  %v1152_v57 = vsel %vm1140_vm12, %v1130_v47, %v1133_v63  ;;  %v1154_v4 = vsel %vm1142_vm13, %v1136_v14, %v1153_v17  ;;  %v9568_v23 = vadd.f32 %v9080_v40, %v452_v11 }
  0xff   : > { %v1059_v3 = vmul.u32 %v9471_v44, %v1043_v55  ;;  %vm1141_vm14 = vcmp.lt.s32.totalorder %v9522_v25, 2  ;;  %v1430_v53 = vadd.s32 1, %v7969_v13  ;;  %v976_v21 = vsub.s32 4294967266, %v9539_v26 }
 0x100   : > { %17393 = vst [vmem:[#allocation19_spill] sm:$0xff] %v9568_v23  ;;  %v9575_v52 = vmul.f32 %v9070_v36, %v9166_v59  ;;  %v695_v32 = vand.u32 2139095040, %v9488_v50  ;;  %v1151_v54 = vsel %vm1141_vm14, %v1148_v42, %v1150_v33  ;;  %v1155_v11 = vsel %vm1141_vm14, %v1152_v57, %v1154_v4 }
 0x101   : > { %v9580_v14 = vadd.s32 %v1063_v6, %v1059_v3  ;;  %v9584_v44 = vshll.u32 %v1116_v31, 8  ;;  %vm1431_vm15 = vcmp.gt.s32.totalorder %v1430_v53, 0  ;;  %v7962_v18 = vmin.u32 %v1278_v1, %v9498_v15 }
 0x102   : > { %v9588_v45 = vsub.s32 %v9473_v51, %v1379_v0  ;;  %v1432_v59 = vsel %vm1431_vm15, %v1430_v53, 0  ;;  %v9591_v48 = vadd.f32 %v637_v60, %v9267_v34  ;;  %v1145_v35 = vsel %vm1143_vm10, %v1133_v63, 2102212464 }
 0x103   : > { %v9596_v62 = vmul.u32.u64.low %v9584_v44, %v1151_v54  ;;  %v9597_v12 = vmul.u32.u64.high %v9584_v44, %v1151_v54, %v9596_v62  ;;  %v1434_v17 = vand.u32 31, %v1432_v59  ;;  %v1124_v55 = vshrl.u32 %v17387_v19, %v9495_v5 }
 0x104   : > { %17394 = vst [vmem:[#allocation20_spill] sm:$0xff] %v9591_v48  ;;  %v9603_v1 = vmul.u32.u64.low %v9584_v44, %v1155_v11  ;;  %v9604_v51 = vmul.u32.u64.high %v9584_v44, %v1155_v11, %v9603_v1  ;;  %v16951_v31 = vand.u32 2147483647, %v9477_v22  ;;  %v696_v34 = vshrl.u32 %v695_v32, 23 }
 0x105   : > { %v9609_v60 = vmul.f32 %v9070_v36, %v9428_v61  ;;  %v1065_v63 = vadd.s32 536870912, %v9580_v14  ;;  %v9612_v42 = vsub.s32 32, %v1434_v17  ;;  %v9614_v33 = vadd.s32 127, %v976_v21 }
 0x106   : > { %v1280_v13 = vclz %v7962_v18  ;;  %v1144_v5 = vsel %vm1140_vm12, %v1124_v55, %v1127_v38  ;;  %v1146_v0 = vsel %vm1142_vm13, %v1130_v47, %v1145_v35  ;;  %v1382_v6 = vsub.s32 0, %v9588_v45 }
 0x107   : > { %v1438_v57 = vshrl.u32 %v17389_v43, %v9612_v42  ;;  %v1441_v61 = vshrl.u32 %v17390_v37, %v9612_v42  ;;  %v1631_v4 = vand.u32 2139095040, %v9591_v48  ;;  %v1427_v3 = vand.u32 8388607, %v16951_v31 }
 0x108   : > { %v1437_v53 = vshll.u32 %v17387_v19, %v1434_v17  ;;  %v1440_v38 = vshll.u32 %v17389_v43, %v1434_v17  ;;  %v17395_v21 = vmov 2102212464   ;;  %v9632_v32 = vshrl.u32 %v1065_v63, 30 }
 0x109   : > { %v1444_v47 = vshrl.u32 %v17395_v21, %v9612_v42  ;;  %v1147_v54 = vsel %vm1141_vm14, %v1144_v5, %v1146_v0  ;;  %v9636_v11 = vshrl.u32 %v1432_v59, 5  ;;  %v1443_v18 = vshll.u32 %v17390_v37, %v1434_v17 }
 0x10a   : > { %17396 = vst [vmem:[#allocation21_spill] sm:$0xff] %v9632_v32  ;;  %v9639_v35 = vor.u32 %v1438_v57, %v1437_v53  ;;  %v9641_v55 = vor.u32 %v1441_v61, %v1440_v38  ;;  %v1446_v1 = vshll.u32 %v17395_v21, %v1434_v17  ;;  %v17397_v31 = vmov 920167782  }
 0x10b   : > { %v1447_v23 = vshrl.u32 %v17397_v31, %v9612_v42  ;;  %v1166_v9 = vadd.s32 1, %v9597_v12  ;;  %v1449_v63 = vshll.u32 %v17397_v31, %v1434_v17  ;;  %v1450_v25 = vshrl.u32 %v17388_v8, %v9612_v42 }
 0x10c   : > { %v1632_v59 = vshrl.u32 %v1631_v4, 23  ;;  %v7963_v5 = vadd.s32 4294967294, %v1280_v13  ;;  %vm1165_vm0 = vc.u32 %v9604_v51, %v9596_v62  ;;  %v1445_v0 = vor.u32 %v1444_v47, %v1443_v18 }
 0x10d   : > { %v1448_v57 = vor.u32 %v1447_v23, %v1446_v1  ;;  %v1067_v61 = vshll.u32 %v9632_v32, 30  ;;  %v1428_v53 = vor.u32 8388608, %v1427_v3  ;;  %v1451_v38 = vor.u32 %v1450_v25, %v1449_v63 }
 0x10e   : > { %vm1452_vm1 = vcmp.lt.s32.totalorder %v9636_v11, 1  ;;  %v7966_v50 = vmin.u32 %v1382_v6, %v9588_v45  ;;  %v1163_v17 = vmul.u32 %v9584_v44, %v1147_v54  ;;  %vm1455_vm2 = vcmp.lt.s32.totalorder %v9636_v11, 4 }
 0x10f   : > { %v1460_v13 = vsel %vm1452_vm1, %v9639_v35, %v9641_v55  ;;  %v1167_v4 = vsel %vm1165_vm0, %v1166_v9, %v9597_v12  ;;  %vm1454_vm3 = vcmp.lt.s32.totalorder %v9636_v11, 3  ;;  %v1461_v23 = vsel %vm1455_vm2, %v1448_v57, 920167782 }
 0x110   : > { %v7977_v3 = vadd.s32 4294967169, %v1632_v59  ;;  %vm1453_vm4 = vcmp.lt.s32.totalorder %v9636_v11, 2  ;;  %v1462_v44 = vsel %vm1454_vm3, %v1445_v0, %v1461_v23  ;;  %v1464_v6 = vsel %vm1452_vm1, %v9641_v55, %v1445_v0 }
 0x111   : > { %v1465_v47 = vsel %vm1455_vm2, %v1451_v38, 1326507024  ;;  %v9674_v9 = vsub.s32 %v9580_v14, %v1067_v61  ;;  %v1463_v12 = vsel %vm1453_vm4, %v1460_v13, %v1462_v44  ;;  %v9680_v18 = vshll.u32 %v1428_v53, 8 }
 0x112   : > { %v1466_v54 = vsel %vm1454_vm3, %v1448_v57, %v1465_v47  ;;  %v956_v1 = vadd.s32 %v9175_v10, %v9180_v16  ;;  %v9686_v63 = vadd.f32 %v9080_v40, %v9575_v52  ;;  %v7941_v25 = vadd.s32 4294967169, %v696_v34  ;;  %v530_v52 = vpop.permute.xlu0 %529 }
 0x113   : > { %v9688_v59 = vadd.s32 %v1167_v4, %v1163_v17  ;;  %v1467_v14 = vsel %vm1453_vm4, %v1464_v6, %v1466_v54  ;;  %v9693_v61 = vmul.u32.u64.low %v9680_v18, %v1463_v12  ;;  %v9694_v38 = vmul.u32.u64.high %v9680_v18, %v1463_v12, %v9693_v61 }
 0x114   : > { %17398 = vst [vmem:[#allocation22_spill] sm:$0xff] %v9686_v63  ;;  %v1638_v57 = vadd.s32 1, %v7977_v3  ;;  %v972_v53 = vsub.s32 32, %v9539_v26  ;;  %v978_v10 = vshll.u32 %v9614_v33, 23  ;;  %vm7964_vm5 = vcmp.lt.s32.totalorder %v7963_v5, 0 }
 0x115   : > { %v471_v16 = vadd.f32 %v9080_v40, %v9609_v60  ;;  %v1384_v34 = vclz %v7966_v50  ;;  %v1070_v17 = vsub.s32 0, %v9674_v9  ;;  %v16956_v13 = vand.u32 2147483647, %v9591_v48 }
 0x116   : > { %vm1639_vm6 = vcmp.gt.s32.totalorder %v1638_v57, 0  ;;  %v1169_v4 = vadd.s32 536870912, %v9688_v59  ;;  %v9705_v23 = vmul.u32.u64.low %v9680_v18, %v1467_v14  ;;  %v9706_v3 = vmul.u32.u64.high %v9680_v18, %v1467_v14, %v9705_v23 }
 0x117   : > { %v1640_v44 = vsel %vm1639_vm6, %v1638_v57, 0  ;;  %v9710_v6 = vadd.s32 1, %v7941_v25  ;;  %v9714_v40 = vmul.f32 %v9070_v36, %v9464_v20  ;;  %v636_v50 = vmul.f32 %v9085_v41, %v530_v52 }
 0x118   : > { %v974_v60 = vshrl.u32 %v956_v1, %v972_v53  ;;  %v1436_v47 = vshrl.u32 %v17387_v19, %v9612_v42  ;;  %v1457_v12 = vsel %vm1455_vm2, %v1445_v0, 2102212464  ;;  %v1642_v54 = vand.u32 31, %v1640_v44 }
 0x119   : > { %v9721_v14 = vor.u32 4788187, %v978_v10  ;;  %v9724_v57 = vsel %vm7964_vm5, 0, %v7963_v5  ;;  %v7967_v25 = vadd.s32 4294967294, %v1384_v34  ;;  %v7954_v23 = vmin.u32 %v1070_v17, %v9674_v9 }
 0x11a   : > { %v9727_v36 = vshrl.u32 %v1169_v4, 30  ;;  %v1456_v41 = vsel %vm1452_vm1, %v1436_v47, %v9639_v35  ;;  %v1635_v20 = vand.u32 8388607, %v16956_v13  ;;  %v1643_v42 = vsub.s32 32, %v1642_v54 }
 0x11b   : > { %v1458_v0 = vsel %vm1454_vm3, %v9641_v55, %v1457_v12  ;;  %v1478_v5 = vadd.s32 1, %v9694_v38  ;;  %v1645_v1 = vshll.u32 %v17387_v19, %v1642_v54  ;;  %v9739_v53 = vadd.f32 %v636_v50, %v471_v16 }
 0x11c   : > { %17399 = vst [vmem:[#allocation23_spill] sm:$0xff] %v9727_v36  ;;  %v1646_v10 = vshrl.u32 %v17389_v43, %v1643_v42  ;;  %v1648_v52 = vshll.u32 %v17389_v43, %v1642_v54  ;;  %v1649_v35 = vshrl.u32 %v17390_v37, %v1643_v42  ;;  %v1652_v34 = vshrl.u32 %v17395_v21, %v1643_v42 }
 0x11d   : > { %v9745_v17 = vshrl.u32 %v1640_v44, 5  ;;  %v1651_v4 = vshll.u32 %v17390_v37, %v1642_v54  ;;  %v1654_v55 = vshll.u32 %v17395_v21, %v1642_v54  ;;  %v1655_v47 = vshrl.u32 %v17397_v31, %v1643_v42 }
 0x11e   : > { %vm7968_vm7 = vcmp.lt.s32.totalorder %v7967_v25, 0  ;;  %vm1477_vm8 = vc.u32 %v9706_v3, %v9693_v61  ;;  %v1647_v16 = vor.u32 %v1646_v10, %v1645_v1  ;;  %v1650_v50 = vor.u32 %v1649_v35, %v1648_v52 }
 0x11f   : > { %v1072_v12 = vclz %v7954_v23  ;;  %v1636_v13 = vor.u32 8388608, %v1635_v20  ;;  %v1653_v33 = vor.u32 %v1652_v34, %v1651_v4  ;;  %v1656_v63 = vor.u32 %v1655_v47, %v1654_v55 }
 0x120   : > { %v1171_v32 = vshll.u32 %v9727_v36, 30  ;;  %v1459_v44 = vsel %vm1453_vm4, %v1456_v41, %v1458_v0  ;;  %v1657_v48 = vshll.u32 %v17397_v31, %v1642_v54  ;;  %v1658_v22 = vshrl.u32 %v17388_v8, %v1643_v42 }
 0x121   : > { %v1479_v39 = vsel %vm1477_vm8, %v1478_v5, %v9694_v38  ;;  %vm1660_vm9 = vcmp.lt.s32.totalorder %v9745_v17, 1  ;;  %vm1663_vm10 = vcmp.lt.s32.totalorder %v9745_v17, 4  ;;  %v1527_v23 = vand.u32 2139095040, %v9739_v53 }
 0x122   : > { %v1659_v20 = vor.u32 %v1658_v22, %v1657_v48  ;;  %vm1662_vm11 = vcmp.lt.s32.totalorder %v9745_v17, 3  ;;  %v1668_v1 = vsel %vm1660_vm9, %v1647_v16, %v1650_v50  ;;  %v1669_v11 = vsel %vm1663_vm10, %v1656_v63, 920167782 }
 0x123   : > { %v9767_v54 = vsel %vm7968_vm7, 0, %v7967_v25  ;;  %v1475_v38 = vmul.u32 %v9680_v18, %v1459_v44  ;;  %vm1661_vm12 = vcmp.lt.s32.totalorder %v9745_v17, 2  ;;  %v1670_v41 = vsel %vm1662_vm11, %v1653_v33, %v1669_v11 }
 0x124   : > { %v1671_v22 = vsel %vm1661_vm12, %v1668_v1, %v1670_v41  ;;  %v1672_v48 = vsel %vm1660_vm9, %v1650_v50, %v1653_v33  ;;  %v1673_v0 = vsel %vm1663_vm10, %v1659_v20, 1326507024  ;;  %v1676_v5 = vshll.u32 %v1636_v13, 8 }
 0x125   : > { %v7955_v10 = vadd.s32 4294967294, %v1072_v12  ;;  %v9780_v25 = vsub.s32 %v9688_v59, %v1171_v32  ;;  %v9782_v18 = vadd.s32 %v1479_v39, %v1475_v38  ;;  %v1674_v52 = vsel %vm1662_vm11, %v1656_v63, %v1673_v0 }
 0x126   : > { %v1675_v35 = vsel %vm1661_vm12, %v1672_v48, %v1674_v52  ;;  %v9788_v34 = vmul.u32.u64.low %v1676_v5, %v1671_v22  ;;  %v9789_v4 = vmul.u32.u64.high %v1676_v5, %v1671_v22, %v9788_v34  ;;  %v1528_v55 = vshrl.u32 %v1527_v23, 23 }
 0x127   : > { %v17400_v13 = vshll.u32 %v9345_v30, %v9539_v26  ;;  %v1665_v32 = vsel %vm1663_vm10, %v1653_v33, 2102212464  ;;  %v9797_v39 = vmul.u32.u64.low %v1676_v5, %v1675_v35  ;;  %v9798_v59 = vmul.u32.u64.high %v1676_v5, %v1675_v35, %v9797_v39  ;;  %v538_v26 = vpop.permute.xlu1 %537  ;;  %v9833_v35 = vld [vmem:[%s16919_s2] ss:$0 sm:$0xff] }
 0x128   : > { %v980_v63 = vand.u32 2147483647, %v9721_v14  ;;  %vm703_vm13 = vcmp.gt.s32.totalorder %v9710_v6, 0  ;;  %v1644_v12 = vshrl.u32 %v17387_v19, %v1643_v42  ;;  %v7973_v44 = vadd.s32 4294967169, %v1528_v55 }
 0x129   : > { %v975_v47 = vor.u32 %v974_v60, %v17400_v13  ;;  %v1288_v20 = vsub.s32 4294967266, %v9724_v57  ;;  %v1392_v23 = vsub.s32 4294967266, %v9767_v54  ;;  %vm7956_vm14 = vcmp.lt.s32.totalorder %v7955_v10, 0 }
 0x12a   : > { %v1174_v30 = vsub.s32 0, %v9780_v25  ;;  %v1481_v33 = vadd.s32 536870912, %v9782_v18  ;;  %v1664_v60 = vsel %vm1660_vm9, %v1644_v12, %v1647_v16  ;;  %v1666_v14 = vsel %vm1662_vm11, %v1650_v50, %v1665_v32  ;;  %v9822_v16 = vld [vmem:[%s16918_s1 + $0x1] ss:$0 sm:$0xff] }
 0x12b   : > { %v1534_v1 = vadd.s32 1, %v7973_v44  ;;  %v982_v11 = vcvt.s32.f32 %v975_v47  ;;  %v1268_v42 = vadd.s32 %v9289_v58, %v9305_v27  ;;  %v1284_v38 = vsub.s32 32, %v9724_v57 }
 0x12c   : > { %v1686_v41 = vadd.s32 1, %v9789_v4  ;;  %v9815_v22 = vsel %vm7956_vm14, 0, %v7955_v10  ;;  %vm1685_vm15 = vc.u32 %v9798_v59, %v9788_v34  ;;  %v638_v50 = vmul.f32 %v9822_v16, %v538_v26 }
 0x12d   : > { %vm1535_vm0 = vcmp.gt.s32.totalorder %v1534_v1, 0  ;;  %v1289_v48 = vadd.s32 127, %v1288_v20  ;;  %v1388_v58 = vsub.s32 32, %v9767_v54  ;;  %v7958_v27 = vmin.u32 %v1174_v30, %v9780_v25 }
 0x12e   : > { %v1667_v0 = vsel %vm1661_vm12, %v1664_v60, %v1666_v14  ;;  %vm902_vm1 = vcmp.lt.s32.totalorder %v9091_v46, 0  ;;  %v983_v10 = vmul.f32 %v982_v11, %v980_v63  ;;  %v1393_v52 = vadd.s32 127, %v1392_v23 }
 0x12f   : > { %v473_v55 = vadd.f32 %v9833_v35, %v9714_v40  ;;  %v9837_v13 = vshrl.u32 %v1481_v33, 30  ;;  %v1372_v47 = vadd.s32 %v9384_v24, %v9395_v7  ;;  %v1080_v17 = vsub.s32 4294967266, %v9815_v22 }
 0x130   : > { %v1687_v32 = vsel %vm1685_vm15, %v1686_v41, %v9789_v4  ;;  %v1536_v39 = vsel %vm1535_vm0, %v1534_v1, 0  ;;  %v1286_v63 = vshrl.u32 %v1268_v42, %v1284_v38  ;;  %v704_v12 = vsel %vm703_vm13, %v9710_v6, 0 }
 0x131   : > { %17401 = vst [vmem:[#allocation24_spill] sm:$0xff] %v9837_v13  ;;  %v1683_v40 = vmul.u32 %v1676_v5, %v1667_v0  ;;  %v9850_v44 = vadd.f32 %v638_v50, %v473_v55  ;;  %v1285_v24 = vshll.u32 %v9498_v15, %v9724_v57  ;;  %v1290_v7 = vshll.u32 %v1289_v48, 23  ;;  %v9865_v15 = vld [vmem:[%s16918_s1] ss:$0 sm:$0xff] }
 0x132   : > { %v1390_v20 = vshrl.u32 %v1372_v47, %v1388_v58  ;;  %v1176_v23 = vclz %v7958_v27  ;;  %v1394_v30 = vshll.u32 %v1393_v52, 23  ;;  %v1483_v26 = vshll.u32 %v9837_v13, 30 }
 0x133   : > { %v9855_v4 = vadd.s32 %v1687_v32, %v1683_v40  ;;  %v1538_v33 = vand.u32 31, %v1536_v39  ;;  %v984_v60 = vxor.u32 2147483648, %v983_v10  ;;  %v1389_v14 = vshll.u32 %v9588_v45, %v9767_v54 }
 0x134   : > { %v1076_v6 = vsub.s32 32, %v9815_v22  ;;  %v1081_v5 = vadd.s32 127, %v1080_v17  ;;  %v1287_v1 = vor.u32 %v1286_v63, %v1285_v24  ;;  %v9860_v11 = vand.u32 31, %v704_v12  ;;  %v8651_v17 = vld [vmem:[%s16920_s3] sm:$0xff]  }
 0x135   : > { %v438_v57 = vmul.f32 %v9865_v15, %v9505_v28  ;;  %v1735_v42 = vand.u32 2139095040, %v9850_v44  ;;  %v1291_v38 = vor.u32 4788187, %v1290_v7  ;;  %v1391_v41 = vor.u32 %v1390_v20, %v1389_v14  ;;  %8265 = vmatprep.subr.bf16.mxu0 %v8651_v17 }
 0x136   : > { %17402 = vst [vmem:[#allocation25_spill] sm:$0xff] %v9860_v11  ;;  %v1060_v45 = vadd.s32 %v9491_v49, %v9502_v56  ;;  %v7959_v54 = vadd.s32 4294967294, %v1176_v23  ;;  %v1395_v50 = vor.u32 4788187, %v1394_v30  ;;  %v9873_v48 = vsub.s32 %v9782_v18, %v1483_v26  ;;  %8266 = vmatpush3.bf16.msra.mxu0 %v8651_v17 }
 0x137   : > { %v1689_v58 = vadd.s32 536870912, %v9855_v4  ;;  %v9876_v27 = vsub.s32 32, %v1538_v33  ;;  %v9880_v0 = vsel %vm902_vm1, %v984_v60, %v983_v10  ;;  %v9882_v28 = vshrl.u32 %v704_v12, 5  ;;  %v542_v60 = vpop.permute.xlu0 %541 }
 0x138   : > { %17403 = vst [vmem:[#allocation26_spill] sm:$0xff] %v9880_v0  ;;  %v1078_v52 = vshrl.u32 %v1060_v45, %v1076_v6  ;;  %v1082_v55 = vshll.u32 %v1081_v5, 23  ;;  %v1294_v47 = vcvt.s32.f32 %v1287_v1  ;;  %v9885_v49 = vsub.s32 32, %v9860_v11 }
 0x139   : > { %17404 = vst [vmem:[#allocation27_spill] sm:$0xff] %v9882_v28  ;;  %v474_v56 = vadd.f32 %v9833_v35, %v438_v57  ;;  %v1736_v18 = vshrl.u32 %v1735_v42, 23  ;;  %v1292_v32 = vand.u32 2147483647, %v1291_v38  ;;  %v1398_v63 = vcvt.s32.f32 %v1391_v41 }
 0x13a   : > { %17405 = vst [vmem:[#allocation28_spill] sm:$0xff] %v9885_v49  ;;  %v1077_v10 = vshll.u32 %v9674_v9, %v9815_v22  ;;  %vm7960_vm2 = vcmp.lt.s32.totalorder %v7959_v54, 0  ;;  %v1396_v12 = vand.u32 2147483647, %v1395_v50  ;;  %v1486_v40 = vsub.s32 0, %v9873_v48 }
 0x13b   : > { %v9894_v24 = vshrl.u32 %v1689_v58, 30  ;;  %v1551_v7 = vshrl.u32 %v17397_v31, %v9876_v27  ;;  %v1083_v23 = vor.u32 4788187, %v1082_v55  ;;  %v16970_v30 = vand.u32 2147483647, %v9739_v53 }
 0x13c   : > { %v1079_v20 = vor.u32 %v1078_v52, %v1077_v10  ;;  %v1554_v26 = vshrl.u32 %v17388_v8, %v9876_v27  ;;  %v9901_v9 = vsel %vm7960_vm2, 0, %v7959_v54  ;;  %v9903_v22 = vshrl.u32 %v1536_v39, 5 }
 0x13d   : > { %17406 = vst [vmem:[#allocation29_spill] sm:$0xff] %v9894_v24  ;;  %v1550_v14 = vshll.u32 %v17395_v21, %v1538_v33  ;;  %v7981_v6 = vadd.s32 4294967169, %v1736_v18  ;;  %v1542_v5 = vshrl.u32 %v17389_v43, %v9876_v27  ;;  %v1545_v1 = vshrl.u32 %v17390_v37, %v9876_v27 }
 0x13e   : > { %v1548_v57 = vshrl.u32 %v17395_v21, %v9876_v27  ;;  %v1553_v42 = vshll.u32 %v17397_v31, %v1538_v33  ;;  %v7970_v38 = vmin.u32 %v1486_v40, %v9873_v48  ;;  %v1691_v41 = vshll.u32 %v9894_v24, 30 }
 0x13f   : > { %v1552_v39 = vor.u32 %v1551_v7, %v1550_v14  ;;  %v639_v45 = vmul.f32 %v9822_v16, %v542_v60  ;;  %v1541_v54 = vshll.u32 %v17387_v19, %v1538_v33  ;;  %v1544_v50 = vshll.u32 %v17389_v43, %v1538_v33 }
 0x140   : > { %v1547_v58 = vshll.u32 %v17390_v37, %v1538_v33  ;;  %v1555_v52 = vor.u32 %v1554_v26, %v1553_v42  ;;  %v1084_v55 = vand.u32 2147483647, %v1083_v23  ;;  %v1184_v18 = vsub.s32 4294967266, %v9901_v9 }
 0x141   : > { %v1531_v17 = vand.u32 8388607, %v16970_v30  ;;  %v1742_v10 = vadd.s32 1, %v7981_v6  ;;  %v9922_v40 = vor.u32 %v1542_v5, %v1541_v54  ;;  %v9924_v24 = vor.u32 %v1545_v1, %v1544_v50  ;;  %v8652_v1 = vld [vmem:[%s16920_s3 + $0x8] sm:$0xff]   ;;  %v326_v50 = vpop.permute.xlu1 %325 }
 0x142   : > { %v1549_v7 = vor.u32 %v1548_v57, %v1547_v58  ;;  %vm1559_vm3 = vcmp.lt.s32.totalorder %v9903_v22, 4  ;;  %v1295_v60 = vmul.f32 %v1294_v47, %v1292_v32  ;;  %v1399_v14 = vmul.f32 %v1398_v63, %v1396_v12  ;;  %8267 = vmatprep.subr.bf16.mxu0 %v8652_v1 }
 0x143   : > { %v9928_v13 = vsub.s32 %v9855_v4, %v1691_v41  ;;  %v1565_v33 = vsel %vm1559_vm3, %v1552_v39, 920167782  ;;  %v1086_v23 = vcvt.s32.f32 %v1079_v20  ;;  %v1488_v26 = vclz %v7970_v38  ;;  %v17408_v4 = vld [vmem:[#allocation6_spill] sm:$0xff]  ;;  %8268 = vmatpush3.bf16.msra.mxu0 %v8652_v1 }
 0x144   : > { %v1569_v6 = vsel %vm1559_vm3, %v1555_v52, 1326507024  ;;  %v9934_v5 = vadd.f32 %v639_v45, %v474_v56  ;;  %vm1214_vm4 = vcmp.lt.s32.totalorder %v9114_v2, 0  ;;  %vm1318_vm5 = vcmp.lt.s32.totalorder %v9139_v29, 0 }
 0x145   : > { %vm1006_vm6 = vcmp.lt.s32.totalorder %v17408_v4, 0  ;;  %v1185_v47 = vadd.s32 127, %v1184_v18  ;;  %vm1556_vm7 = vcmp.lt.s32.totalorder %v9903_v22, 1  ;;  %vm1558_vm8 = vcmp.lt.s32.totalorder %v9903_v22, 3 }
 0x146   : > { %17407 = vst [vmem:[#allocation30_spill] sm:$0xff] %v9934_v5  ;;  %vm1743_vm9 = vcmp.gt.s32.totalorder %v1742_v10, 0  ;;  %v1087_v32 = vmul.f32 %v1086_v23, %v1084_v55  ;;  %v1532_v63 = vor.u32 8388608, %v1531_v17  ;;  %v1564_v56 = vsel %vm1556_vm7, %v9922_v40, %v9924_v24 }
 0x147   : > { %v1566_v12 = vsel %vm1558_vm8, %v1549_v7, %v1565_v33  ;;  %v1180_v20 = vsub.s32 32, %v9901_v9  ;;  %v1694_v57 = vsub.s32 0, %v9928_v13  ;;  %v1568_v42 = vsel %vm1556_vm7, %v9924_v24, %v1549_v7 }
 0x148   : > { %v1570_v38 = vsel %vm1558_vm8, %v1552_v39, %v1569_v6  ;;  %v7971_v41 = vadd.s32 4294967294, %v1488_v26  ;;  %vm1557_vm10 = vcmp.lt.s32.totalorder %v9903_v22, 2  ;;  %v1744_v45 = vsel %vm1743_vm9, %v1742_v10, 0 }
 0x149   : > { %v1839_v54 = vand.u32 2139095040, %v9934_v5  ;;  %v1296_v58 = vxor.u32 2147483648, %v1295_v60  ;;  %v1164_v52 = vadd.s32 %v9596_v62, %v9604_v51  ;;  %v1186_v55 = vshll.u32 %v1185_v47, 23 }
 0x14a   : > { %v1567_v18 = vsel %vm1557_vm10, %v1564_v56, %v1566_v12  ;;  %v1400_v17 = vxor.u32 2147483648, %v1399_v14  ;;  %v1088_v33 = vxor.u32 2147483648, %v1087_v32  ;;  %v1571_v39 = vsel %vm1557_vm10, %v1568_v42, %v1570_v38 }
 0x14b   : > { %v9965_v23 = vshll.u32 %v1532_v63, 8  ;;  %v1182_v26 = vshrl.u32 %v1164_v52, %v1180_v20  ;;  %v7978_v10 = vmin.u32 %v1694_v57, %v9928_v13  ;;  %v1746_v6 = vand.u32 31, %v1744_v45 }
 0x14c   : > { %v439_v1 = vmul.f32 %v9865_v15, %v326_v50  ;;  %vm7972_vm11 = vcmp.lt.s32.totalorder %v7971_v41, 0  ;;  %v1840_v47 = vshrl.u32 %v1839_v54, 23  ;;  %v9974_v56 = vor.u32 4788187, %v1186_v55 }
 0x14d   : > { %v9970_v62 = vmul.u32.u64.low %v9965_v23, %v1567_v18  ;;  %v9971_v51 = vmul.u32.u64.high %v9965_v23, %v1567_v18, %v9970_v62  ;;  %v9977_v12 = vmul.u32.u64.low %v9965_v23, %v1571_v39  ;;  %v9978_v42 = vmul.u32.u64.high %v9965_v23, %v1571_v39, %v9977_v12 }
 0x14e   : > { %v16969_v63 = vand.u32 2147483647, %v9850_v44  ;;  %v9983_v20 = vsel %vm1214_vm4, %v1296_v58, %v1295_v60  ;;  %v9987_v57 = vsel %vm1318_vm5, %v1400_v17, %v1399_v14  ;;  %v9991_v38 = vsel %vm1006_vm6, %v1088_v33, %v1087_v32  ;;  %v546_v17 = vpop.permute.xlu0 %545 }
 0x14f   : > { %17409 = vst [vmem:[#allocation31_spill] sm:$0xff] %v9983_v20  ;;  %17410 = vst [vmem:[#allocation32_spill] sm:$0xff] %v9987_v57  ;;  %v1181_v54 = vshll.u32 %v9780_v25, %v9901_v9  ;;  %v1476_v50 = vadd.s32 %v9693_v61, %v9706_v3  ;;  %v9997_v52 = vsel %vm7972_vm11, 0, %v7971_v41  ;;  %v1696_v55 = vclz %v7978_v10 }
 0x150   : > { %17411 = vst [vmem:[#allocation33_spill] sm:$0xff] %v9991_v38  ;;  %v9999_v18 = vsub.s32 32, %v1746_v6  ;;  %v1540_v14 = vshrl.u32 %v17387_v19, %v9876_v27  ;;  %v1561_v32 = vsel %vm1559_vm3, %v1549_v7, 2102212464  ;;  %v7985_v58 = vadd.s32 4294967169, %v1840_v47 }
 0x151   : > { %v10001_v60 = vor.u32 %v1182_v26, %v1181_v54  ;;  %v10010_v61 = vadd.s32 %v9788_v34, %v9798_v59  ;;  %v1739_v3 = vand.u32 8388607, %v16969_v63  ;;  %v475_v9 = vadd.f32 %v9833_v35, %v439_v1 }
 0x152   : > { %v1492_v41 = vsub.s32 32, %v9997_v52  ;;  %v1496_v27 = vsub.s32 4294967266, %v9997_v52  ;;  %v1560_v7 = vsel %vm1556_vm7, %v1540_v14, %v9922_v40  ;;  %v1846_v33 = vadd.s32 1, %v7985_v58 }
 0x153   : > { %v7979_v39 = vadd.s32 4294967294, %v1696_v55  ;;  %v1562_v34 = vsel %vm1558_vm8, %v9924_v24, %v1561_v32  ;;  %v1759_v59 = vshrl.u32 %v17397_v31, %v9999_v18  ;;  %v640_v26 = vmul.f32 %v9822_v16, %v546_v17 }
 0x154   : > { %v1582_v10 = vadd.s32 1, %v9971_v51  ;;  %v10027_v1 = vshrl.u32 %v1744_v45, 5  ;;  %v1762_v47 = vshrl.u32 %v17388_v8, %v9999_v18  ;;  %vm1847_vm12 = vcmp.gt.s32.totalorder %v1846_v33, 0 }
 0x155   : > { %vm1581_vm13 = vc.u32 %v9978_v42, %v9970_v62  ;;  %v1750_v40 = vshrl.u32 %v17389_v43, %v9999_v18  ;;  %v1758_v24 = vshll.u32 %v17395_v21, %v1746_v6  ;;  %v1848_v12 = vsel %vm1847_vm12, %v1846_v33, 0 }
 0x156   : > { %v1753_v54 = vshrl.u32 %v17390_v37, %v9999_v18  ;;  %v1756_v45 = vshrl.u32 %v17395_v21, %v9999_v18  ;;  %v1761_v55 = vshll.u32 %v17397_v31, %v1746_v6  ;;  %v1850_v14 = vand.u32 31, %v1848_v12 }
 0x157   : > { %v1740_v32 = vor.u32 8388608, %v1739_v3  ;;  %v1749_v58 = vshll.u32 %v17387_v19, %v1746_v6  ;;  %v1760_v17 = vor.u32 %v1759_v59, %v1758_v24  ;;  %v10042_v63 = vadd.f32 %v640_v26, %v475_v9 }
 0x158   : > { %v1563_v30 = vsel %vm1557_vm10, %v1560_v7, %v1562_v34  ;;  %v1752_v33 = vshll.u32 %v17389_v43, %v1746_v6  ;;  %v1755_v25 = vshll.u32 %v17390_v37, %v1746_v6  ;;  %v1763_v57 = vor.u32 %v1762_v47, %v1761_v55  ;;  %v8653_v6 = vld [vmem:[%s16920_s3 + $0x10] sm:$0xff]  }
 0x159   : > { %17412 = vst [vmem:[#allocation34_spill] sm:$0xff] %v10042_v63  ;;  %vm7980_vm14 = vcmp.lt.s32.totalorder %v7979_v39, 0  ;;  %v1583_v3 = vsel %vm1581_vm13, %v1582_v10, %v9971_v51  ;;  %v10054_v59 = vor.u32 %v1750_v40, %v1749_v58  ;;  %vm1767_vm15 = vcmp.lt.s32.totalorder %v10027_v1, 4  ;;  %8269 = vmatprep.subr.bf16.mxu0 %v8653_v6 }
 0x15a   : > { %v10056_v9 = vor.u32 %v1753_v54, %v1752_v33  ;;  %v1757_v22 = vor.u32 %v1756_v45, %v1755_v25  ;;  %v10059_v7 = vsub.s32 32, %v1850_v14  ;;  %v1579_v34 = vmul.u32 %v9965_v23, %v1563_v30  ;;  %8270 = vmatpush3.bf16.msra.mxu0 %v8653_v6 }
 0x15b   : > { %v1773_v26 = vsel %vm1767_vm15, %v1760_v17, 920167782  ;;  %v1943_v10 = vand.u32 2139095040, %v10042_v63  ;;  %v10069_v47 = vshrl.u32 %v1476_v50, %v1492_v41  ;;  %v10071_v25 = vadd.s32 127, %v1496_v27 }
 0x15c   : > { %v1777_v40 = vsel %vm1767_vm15, %v1763_v57, 1326507024  ;;  %v10075_v24 = vshll.u32 %v1740_v32, 8  ;;  %v10078_v54 = vsel %vm7980_vm14, 0, %v7979_v39  ;;  %v10080_v30 = vadd.s32 %v1583_v3, %v1579_v34 }
 0x15d   : > { %vm1764_vm0 = vcmp.lt.s32.totalorder %v10027_v1, 1  ;;  %vm1766_vm2 = vcmp.lt.s32.totalorder %v10027_v1, 3  ;;  %v1863_v50 = vshrl.u32 %v17397_v31, %v10059_v7  ;;  %v1866_v41 = vshrl.u32 %v17388_v8, %v10059_v7 }
 0x15e   : > { %v1772_v23 = vsel %vm1764_vm0, %v10054_v59, %v10056_v9  ;;  %v1774_v57 = vsel %vm1766_vm2, %v1757_v22, %v1773_v26  ;;  %vm1765_vm3 = vcmp.lt.s32.totalorder %v10027_v1, 2  ;;  %v1776_v27 = vsel %vm1764_vm0, %v10056_v9, %v1757_v22 }
 0x15f   : > { %v1778_v39 = vsel %vm1766_vm2, %v1760_v17, %v1777_v40  ;;  %v1944_v45 = vshrl.u32 %v1943_v10, 23  ;;  %v1854_v55 = vshrl.u32 %v17389_v43, %v10059_v7  ;;  %v1857_v32 = vshrl.u32 %v17390_v37, %v10059_v7 }
 0x160   : > { %v1862_v58 = vshll.u32 %v17395_v21, %v1850_v14  ;;  %v1865_v33 = vshll.u32 %v17397_v31, %v1850_v14  ;;  %v1498_v3 = vshll.u32 %v10071_v25, 23  ;;  %v1775_v6 = vsel %vm1765_vm3, %v1772_v23, %v1774_v57  ;;  %v10121_v23 = vpop.permute.xlu1 %335  ;;  %v8654_v57 = vld [vmem:[%s16920_s3 + $0x18] sm:$0xff]  }
 0x161   : > { %v10109_v34 = vshrl.u32 %v1848_v12, 5  ;;  %v1860_v17 = vshrl.u32 %v17395_v21, %v10059_v7  ;;  %v1853_v26 = vshll.u32 %v17387_v19, %v1850_v14  ;;  %v1856_v10 = vshll.u32 %v17389_v43, %v1850_v14  ;;  %8271 = vmatprep.subr.bf16.mxu0 %v8654_v57 }
 0x162   : > { %v1864_v40 = vor.u32 %v1863_v50, %v1862_v58  ;;  %v1867_v29 = vor.u32 %v1866_v41, %v1865_v33  ;;  %v1704_v51 = vsub.s32 4294967266, %v10078_v54  ;;  %v1779_v20 = vsel %vm1765_vm3, %v1776_v27, %v1778_v39  ;;  %8272 = vmatpush3.bf16.msra.mxu0 %v8654_v57 }
 0x163   : > { %v17413_v25 = vand.u32 2147483647, %v9934_v5  ;;  %v1859_v12 = vshll.u32 %v17390_v37, %v1850_v14  ;;  %v1585_v36 = vadd.s32 536870912, %v10080_v30  ;;  %v10127_v50 = vor.u32 %v1854_v55, %v1853_v26 }
 0x164   : > { %v10129_v41 = vor.u32 %v1857_v32, %v1856_v10  ;;  %v7989_v58 = vadd.s32 4294967169, %v1944_v45  ;;  %v10132_v27 = vmul.u32.u64.low %v10075_v24, %v1775_v6  ;;  %v10133_v39 = vmul.u32.u64.high %v10075_v24, %v1775_v6, %v10132_v27 }
 0x165   : > { %v1843_v2 = vand.u32 8388607, %v17413_v25  ;;  %v10136_v33 = vor.u32 %v1860_v17, %v1859_v12  ;;  %vm1871_vm7 = vcmp.lt.s32.totalorder %v10109_v34, 4  ;;  %v1748_v32 = vshrl.u32 %v17387_v19, %v9999_v18 }
 0x166   : > { %v10140_v14 = vmul.u32.u64.low %v10075_v24, %v1779_v20  ;;  %v10141_v25 = vmul.u32.u64.high %v10075_v24, %v1779_v20, %v10140_v14  ;;  %v1877_v55 = vsel %vm1871_vm7, %v1864_v40, 920167782  ;;  %v1881_v45 = vsel %vm1871_vm7, %v1867_v29, 1326507024  ;;  %v8655_v20 = vld [vmem:[%s16920_s3 + $0x20] sm:$0xff]  }
 0x167   : > { %v1769_v6 = vsel %vm1767_vm15, %v1757_v22, 2102212464  ;;  %vm1868_vm8 = vcmp.lt.s32.totalorder %v10109_v34, 1  ;;  %v1950_v17 = vadd.s32 1, %v7989_v58  ;;  %v10155_v26 = vshrl.u32 %v1585_v36, 30  ;;  %8273 = vmatprep.subr.bf16.mxu0 %v8655_v20 }
 0x168   : > { %v1844_v10 = vor.u32 8388608, %v1843_v2  ;;  %vm1870_vm9 = vcmp.lt.s32.totalorder %v10109_v34, 3  ;;  %v1876_v29 = vsel %vm1868_vm8, %v10127_v50, %v10129_v41  ;;  %v1880_v22 = vsel %vm1868_vm8, %v10129_v41, %v10136_v33  ;;  %v341_v2 = vpop.permute.xlu1 %340  ;;  %8274 = vmatpush3.bf16.msra.mxu0 %v8655_v20 }
 0x169   : > { %17414 = vst [vmem:[#allocation35_spill] sm:$0xff] %v10155_v26  ;;  %v1878_v18 = vsel %vm1870_vm9, %v10136_v33, %v1877_v55  ;;  %v1882_v36 = vsel %vm1870_vm9, %v1864_v40, %v1881_v45  ;;  %vm1951_vm10 = vcmp.gt.s32.totalorder %v1950_v17, 0  ;;  %v17415_v12 = vshll.u32 %v9873_v48, %v9997_v52  ;;  %v558_v52 = vpop.permute.xlu0 %557 }
 0x16a   : > { %v10177_v58 = vor.u32 4788187, %v1498_v3  ;;  %v1768_v14 = vsel %vm1764_vm0, %v1748_v32, %v10054_v59  ;;  %v1770_v55 = vsel %vm1766_vm2, %v10056_v9, %v1769_v6  ;;  %v1700_v40 = vsub.s32 32, %v10078_v54 }
 0x16b   : > { %v10175_v57 = vor.u32 %v10069_v47, %v17415_v12  ;;  %v10186_v45 = vadd.s32 127, %v1704_v51  ;;  %vm1869_vm11 = vcmp.lt.s32.totalorder %v10109_v34, 2  ;;  %v1952_v48 = vsel %vm1951_vm10, %v1950_v17, 0  ;;  %v8656_v47 = vld [vmem:[%s16920_s3 + $0x28] sm:$0xff]  }
 0x16c   : > { %v1879_v59 = vsel %vm1869_vm11, %v1876_v29, %v1878_v18  ;;  %v1883_v3 = vsel %vm1869_vm11, %v1880_v22, %v1882_v36  ;;  %v1954_v9 = vand.u32 31, %v1952_v48  ;;  %v442_v32 = vmul.f32 %v9865_v15, %v341_v2  ;;  %8275 = vmatprep.subr.bf16.mxu0 %v8656_v47 }
 0x16d   : > { %v1587_v51 = vshll.u32 %v10155_v26, 30  ;;  %v1771_v6 = vsel %vm1765_vm3, %v1768_v14, %v1770_v55  ;;  %v1790_v17 = vadd.s32 1, %v10133_v39  ;;  %v10201_v20 = vshll.u32 %v1844_v10, 8  ;;  %8276 = vmatpush3.bf16.msra.mxu0 %v8656_v47 }
 0x16e   : > { %vm1789_vm12 = vc.u32 %v10141_v25, %v10132_v27  ;;  %v10206_v18 = vsub.s32 32, %v1954_v9  ;;  %v643_v22 = vmul.f32 %v9822_v16, %v558_v52  ;;  %v478_v52 = vadd.f32 %v9833_v35, %v442_v32 }
 0x16f   : > { %v10210_v36 = vmul.u32.u64.low %v10201_v20, %v1883_v3  ;;  %v10211_v2 = vmul.u32.u64.high %v10201_v20, %v1883_v3, %v10210_v36  ;;  %v10214_v1 = vmul.u32.u64.low %v10201_v20, %v1879_v59  ;;  %v10215_v12 = vmul.u32.u64.high %v10201_v20, %v1879_v59, %v10214_v1 }
 0x170   : > { %v1958_v10 = vshrl.u32 %v17389_v43, %v10206_v18  ;;  %v1961_v14 = vshrl.u32 %v17390_v37, %v10206_v18  ;;  %v1964_v55 = vshrl.u32 %v17395_v21, %v10206_v18  ;;  %v1787_v47 = vmul.u32 %v10075_v24, %v1771_v6 }
 0x171   : > { %v10226_v3 = vshrl.u32 %v1952_v48, 5  ;;  %v1966_v36 = vshll.u32 %v17395_v21, %v1954_v9  ;;  %v1967_v59 = vshrl.u32 %v17397_v31, %v10206_v18  ;;  %v1791_v29 = vsel %vm1789_vm12, %v1790_v17, %v10133_v39 }
 0x172   : > { %v1957_v26 = vshll.u32 %v17387_v19, %v1954_v9  ;;  %v1960_v38 = vshll.u32 %v17389_v43, %v1954_v9  ;;  %v1963_v4 = vshll.u32 %v17390_v37, %v1954_v9  ;;  %v17416_v0 = vand.u32 2147483647, %v10042_v63 }
 0x173   : > { %v1968_v46 = vor.u32 %v1967_v59, %v1966_v36  ;;  %v1969_v24 = vshll.u32 %v17397_v31, %v1954_v9  ;;  %v1970_v48 = vshrl.u32 %v17388_v8, %v10206_v18  ;;  %v10244_v17 = vadd.f32 %v643_v22, %v478_v52 }
 0x174   : > { %v1947_v32 = vand.u32 8388607, %v17416_v0  ;;  %v10240_v6 = vor.u32 %v1958_v10, %v1957_v26  ;;  %v10242_v28 = vor.u32 %v1961_v14, %v1960_v38  ;;  %v1965_v39 = vor.u32 %v1964_v55, %v1963_v4  ;;  %v8657_v0 = vld [vmem:[%s16920_s3 + $0x30] sm:$0xff]  }
 0x175   : > { %17417 = vst [vmem:[#allocation36_spill] sm:$0xff] %v10244_v17  ;;  %v1702_v49 = vshrl.u32 %v10010_v61, %v1700_v40  ;;  %v1706_v11 = vshll.u32 %v10186_v45, 23  ;;  %v1971_v5 = vor.u32 %v1970_v48, %v1969_v24  ;;  %vm1975_vm13 = vcmp.lt.s32.totalorder %v10226_v3, 4  ;;  %8277 = vmatprep.subr.bf16.mxu0 %v8657_v0 }
 0x176   : > { %v10253_v9 = vsub.s32 %v10080_v30, %v1587_v51  ;;  %v10255_v26 = vadd.s32 %v1791_v29, %v1787_v47  ;;  %v1873_v4 = vsel %vm1871_vm7, %v10136_v33, 2102212464  ;;  %v1981_v38 = vsel %vm1975_vm13, %v1968_v46, 920167782  ;;  %8278 = vmatpush3.bf16.msra.mxu0 %v8657_v0 }
 0x177   : > { %v1852_v61 = vshrl.u32 %v17387_v19, %v10059_v7  ;;  %v1948_v40 = vor.u32 8388608, %v1947_v32  ;;  %vm1972_vm14 = vcmp.lt.s32.totalorder %v10226_v3, 1  ;;  %vm1974_vm15 = vcmp.lt.s32.totalorder %v10226_v3, 3  ;;  %v550_v7 = vpop.permute.xlu1 %549 }
 0x178   : > { %v1980_v30 = vsel %vm1972_vm14, %v10240_v6, %v10242_v28  ;;  %v1982_v33 = vsel %vm1974_vm15, %v1965_v39, %v1981_v38  ;;  %v1985_v45 = vsel %vm1975_vm13, %v1971_v5, 1326507024  ;;  %v2255_v51 = vand.u32 2139095040, %v10244_v17 }
 0x179   : > { %v1707_v29 = vor.u32 4788187, %v1706_v11  ;;  %v1872_v22 = vsel %vm1868_vm8, %v1852_v61, %v10127_v50  ;;  %v1874_v10 = vsel %vm1870_vm9, %v10129_v41, %v1873_v4  ;;  %v1894_v14 = vadd.s32 1, %v10215_v12 }
 0x17a   : > { %v1590_v55 = vsub.s32 0, %v10253_v9  ;;  %vm1893_vm0 = vc.u32 %v10211_v2, %v10214_v1  ;;  %vm1973_vm2 = vcmp.lt.s32.totalorder %v10226_v3, 2  ;;  %v2256_v5 = vshrl.u32 %v2255_v51, 23 }
 0x17b   : > { %v1983_v11 = vsel %vm1973_vm2, %v1980_v30, %v1982_v33  ;;  %v1984_v50 = vsel %vm1972_vm14, %v10242_v28, %v1965_v39  ;;  %v1986_v41 = vsel %vm1974_vm15, %v1968_v46, %v1985_v45  ;;  %v641_v52 = vmul.f32 %v9822_v16, %v550_v7  ;;  %v17418_v33 = vld [vmem:[#allocation9_spill] sm:$0xff] }
 0x17c   : > { %v1793_v47 = vadd.s32 536870912, %v10255_v26  ;;  %v1875_v36 = vsel %vm1869_vm11, %v1872_v22, %v1874_v10  ;;  %v10297_v59 = vshll.u32 %v1948_v40, 8  ;;  %v8001_v32 = vadd.s32 4294967169, %v2256_v5 }
 0x17d   : > { %v1500_v24 = vand.u32 2147483647, %v10177_v58  ;;  %v1701_v48 = vshll.u32 %v9928_v13, %v10078_v54  ;;  %v1895_v0 = vsel %vm1893_vm0, %v1894_v14, %v10215_v12  ;;  %v16988_v4 = vand.u32 2147483647, %v10244_v17 }
 0x17e   : > { %v1987_v46 = vsel %vm1973_vm2, %v1984_v50, %v1986_v41  ;;  %v10307_v38 = vmul.u32.u64.low %v10297_v59, %v1983_v11  ;;  %v10308_v61 = vmul.u32.u64.high %v10297_v59, %v1983_v11, %v10307_v38  ;;  %v2262_v34 = vadd.s32 1, %v8001_v32 }
 0x17f   : > { %v1703_v40 = vor.u32 %v1702_v49, %v1701_v48  ;;  %v1708_v30 = vand.u32 2147483647, %v1707_v29  ;;  %v1891_v58 = vmul.u32 %v10201_v20, %v1875_v36  ;;  %v10313_v45 = vadd.f32 %v641_v52, %v17418_v33 }
 0x180   : > { %v7974_v13 = vmin.u32 %v1590_v55, %v10253_v9  ;;  %v10316_v54 = vshrl.u32 %v1793_v47, 30  ;;  %v1977_v12 = vsel %vm1975_vm13, %v1965_v39, 2102212464  ;;  %vm2263_vm3 = vcmp.gt.s32.totalorder %v2262_v34, 0 }
 0x181   : > { %17419 = vst [vmem:[#allocation9_spill] sm:$0xff] %v10313_v45  ;;  %v10320_v51 = vadd.s32 %v1895_v0, %v1891_v58  ;;  %v1956_v7 = vshrl.u32 %v17387_v19, %v10206_v18  ;;  %v10325_v49 = vmul.u32.u64.low %v10297_v59, %v1987_v46  ;;  %v10326_v29 = vmul.u32.u64.high %v10297_v59, %v1987_v46, %v10325_v49 }
 0x182   : > { %17420 = vst [vmem:[#allocation37_spill] sm:$0xff] %v10316_v54  ;;  %v1190_v20 = vcvt.s32.f32 %v10001_v60  ;;  %v1502_v22 = vcvt.s32.f32 %v10175_v57  ;;  %v2259_v10 = vand.u32 8388607, %v16988_v4  ;;  %v2264_v14 = vsel %vm2263_vm3, %v2262_v34, 0 }
 0x183   : > { %v1710_v55 = vcvt.s32.f32 %v1703_v40  ;;  %v1976_v39 = vsel %vm1972_vm14, %v1956_v7, %v10240_v6  ;;  %v1978_v18 = vsel %vm1974_vm15, %v10242_v28, %v1977_v12  ;;  %v2047_v5 = vand.u32 2139095040, %v10313_v45 }
 0x184   : > { %v17421_v11 = vand.u32 2147483647, %v9974_v56  ;;  %v10343_v57 = vmul.f32 %v1502_v22, %v1500_v24  ;;  %v10347_v50 = vmul.f32 %v9865_v15, %v10121_v23  ;;  %v2266_v41 = vand.u32 31, %v2264_v14 }
 0x185   : > { %v10349_v52 = vmul.f32 %v1710_v55, %v1708_v30  ;;  %v1592_v6 = vclz %v7974_v13  ;;  %v1795_v47 = vshll.u32 %v10316_v54, 30  ;;  %v1897_v28 = vadd.s32 536870912, %v10320_v51  ;;  %v8658_v13 = vld [vmem:[%s16920_s3 + $0x38] sm:$0xff]  }
 0x186   : > { %v10341_v60 = vmul.f32 %v1190_v20, %v17421_v11  ;;  %v1979_v36 = vsel %vm1973_vm2, %v1976_v39, %v1978_v18  ;;  %v1998_v56 = vadd.s32 1, %v10308_v61  ;;  %v2260_v32 = vor.u32 8388608, %v2259_v10  ;;  %8279 = vmatprep.subr.bf16.mxu0 %v8658_v13 }
 0x187   : > { %v2267_v24 = vsub.s32 32, %v2266_v41  ;;  %v10356_v48 = vshrl.u32 %v2264_v14, 5  ;;  %v2269_v15 = vshll.u32 %v17387_v19, %v2266_v41  ;;  %v2272_v23 = vshll.u32 %v17389_v43, %v2266_v41  ;;  %8280 = vmatpush3.bf16.msra.mxu0 %v8658_v13 }
 0x188   : > { %v2048_v0 = vshrl.u32 %v2047_v5, 23  ;;  %v2275_v40 = vshll.u32 %v17390_v37, %v2266_v41  ;;  %vm1997_vm7 = vc.u32 %v10326_v29, %v10307_v38  ;;  %v2278_v30 = vshll.u32 %v17395_v21, %v2266_v41 }
 0x189   : > { %v2270_v46 = vshrl.u32 %v17389_v43, %v2267_v24  ;;  %v2273_v34 = vshrl.u32 %v17390_v37, %v2267_v24  ;;  %v2276_v3 = vshrl.u32 %v17395_v21, %v2267_v24  ;;  %v2279_v58 = vshrl.u32 %v17397_v31, %v2267_v24 }
 0x18a   : > { %v2281_v33 = vshll.u32 %v17397_v31, %v2266_v41  ;;  %v2282_v20 = vshrl.u32 %v17388_v8, %v2267_v24  ;;  %v7975_v22 = vadd.s32 4294967294, %v1592_v6  ;;  %v10374_v10 = vsub.s32 %v10255_v26, %v1795_v47 }
 0x18b   : > { %v2271_v12 = vor.u32 %v2270_v46, %v2269_v15  ;;  %v2274_v7 = vor.u32 %v2273_v34, %v2272_v23  ;;  %v2277_v49 = vor.u32 %v2276_v3, %v2275_v40  ;;  %v10376_v14 = vshrl.u32 %v1897_v28, 30 }
 0x18c   : > { %v2280_v55 = vor.u32 %v2279_v58, %v2278_v30  ;;  %v1995_v39 = vmul.u32 %v10297_v59, %v1979_v36  ;;  %v2283_v18 = vor.u32 %v2282_v20, %v2281_v33  ;;  %vm2284_vm8 = vcmp.lt.s32.totalorder %v10356_v48, 1 }
 0x18d   : > { %17422 = vst [vmem:[#allocation38_spill] sm:$0xff] %v10376_v14  ;;  %v7993_v5 = vadd.s32 4294967169, %v2048_v0  ;;  %v1999_v11 = vsel %vm1997_vm7, %v1998_v56, %v10308_v61  ;;  %vm2287_vm9 = vcmp.lt.s32.totalorder %v10356_v48, 4  ;;  %v2292_v26 = vsel %vm2284_vm8, %v2271_v12, %v2274_v7 }
 0x18e   : > { %v2300_v41 = vshll.u32 %v2260_v32, 8  ;;  %vm2286_vm10 = vcmp.lt.s32.totalorder %v10356_v48, 3  ;;  %v2293_v6 = vsel %vm2287_vm9, %v2280_v55, 920167782  ;;  %v2296_v59 = vsel %vm2284_vm8, %v2274_v7, %v2277_v49 }
 0x18f   : > { %v2297_v47 = vsel %vm2287_vm9, %v2283_v18, 1326507024  ;;  %v2268_v28 = vshrl.u32 %v17387_v19, %v2267_v24  ;;  %vm2285_vm11 = vcmp.lt.s32.totalorder %v10356_v48, 2  ;;  %v2289_v36 = vsel %vm2287_vm9, %v2277_v49, 2102212464 }
 0x190   : > { %v2294_v15 = vsel %vm2286_vm10, %v2277_v49, %v2293_v6  ;;  %v10392_v61 = vadd.s32 %v1999_v11, %v1995_v39  ;;  %v2298_v23 = vsel %vm2286_vm10, %v2280_v55, %v2297_v47  ;;  %v2054_v32 = vadd.s32 1, %v7993_v5 }
 0x191   : > { %v2295_v56 = vsel %vm2285_vm11, %v2292_v26, %v2294_v15  ;;  %v2288_v0 = vsel %vm2284_vm8, %v2268_v28, %v2271_v12  ;;  %v2299_v46 = vsel %vm2285_vm11, %v2296_v59, %v2298_v23  ;;  %v2290_v24 = vsel %vm2286_vm10, %v2274_v7, %v2289_v36  ;;  %v554_v12 = vpop.permute.xlu1 %553 }
 0x192   : > { %v10400_v34 = vmul.u32.u64.low %v2300_v41, %v2295_v56  ;;  %v10401_v40 = vmul.u32.u64.high %v2300_v41, %v2295_v56, %v10400_v34  ;;  %v10404_v3 = vmul.u32.u64.low %v2300_v41, %v2299_v46  ;;  %v10405_v30 = vmul.u32.u64.high %v2300_v41, %v2299_v46, %v10404_v3 }
 0x193   : > { %vm2055_vm12 = vcmp.gt.s32.totalorder %v2054_v32, 0  ;;  %v1192_v58 = vxor.u32 2147483648, %v10341_v60  ;;  %v1798_v33 = vsub.s32 0, %v10374_v10  ;;  %v1899_v13 = vshll.u32 %v10376_v14, 30 }
 0x194   : > { %v2056_v49 = vsel %vm2055_vm12, %v2054_v32, 0  ;;  %vm7976_vm13 = vcmp.lt.s32.totalorder %v7975_v22, 0  ;;  %v16989_v55 = vand.u32 2147483647, %v10313_v45  ;;  %v2001_v18 = vadd.s32 536870912, %v10392_v61 }
 0x195   : > { %v2058_v39 = vand.u32 31, %v2056_v49  ;;  %v2291_v5 = vsel %vm2285_vm11, %v2288_v0, %v2290_v24  ;;  %v2310_v11 = vadd.s32 1, %v10401_v40  ;;  %v477_v26 = vadd.f32 %v9833_v35, %v10347_v50  ;;  %v346_v4 = vpop.permute.xlu1 %345 }
 0x196   : > { %vm2309_vm14 = vc.u32 %v10405_v30, %v10400_v34  ;;  %v642_v59 = vmul.f32 %v9822_v16, %v554_v12  ;;  %v10422_v47 = vsel %vm7976_vm13, 0, %v7975_v22  ;;  %v7982_v28 = vmin.u32 %v1798_v33, %v10374_v10 }
 0x197   : > { %v2059_v6 = vsub.s32 32, %v2058_v39  ;;  %v10426_v36 = vsub.s32 %v10320_v51, %v1899_v13  ;;  %v2311_v48 = vsel %vm2309_vm14, %v2310_v11, %v10401_v40  ;;  %v2307_v15 = vmul.u32 %v2300_v41, %v2291_v5  ;;  %v17425_v13 = vld [vmem:[#allocation8_spill] sm:$0xff] }
 0x198   : > { %v2051_v56 = vand.u32 8388607, %v16989_v55  ;;  %v10433_v23 = vshrl.u32 %v2001_v18, 30  ;;  %v2061_v16 = vshll.u32 %v17387_v19, %v2058_v39  ;;  %v2064_v22 = vshll.u32 %v17389_v43, %v2058_v39 }
 0x199   : > { %v2062_v35 = vshrl.u32 %v17389_v43, %v2059_v6  ;;  %v2065_v50 = vshrl.u32 %v17390_v37, %v2059_v6  ;;  %v2068_v32 = vshrl.u32 %v17395_v21, %v2059_v6  ;;  %v10438_v51 = vadd.s32 %v2311_v48, %v2307_v15 }
 0x19a   : > { %17423 = vst [vmem:[#allocation39_spill] sm:$0xff] %v10433_v23  ;;  %v10440_v0 = vshrl.u32 %v2056_v49, 5  ;;  %v2067_v41 = vshll.u32 %v17390_v37, %v2058_v39  ;;  %v10443_v46 = vadd.f32 %v642_v59, %v477_v26  ;;  %v2070_v3 = vshll.u32 %v17395_v21, %v2058_v39  ;;  %v17426_v49 = vld [vmem:[#allocation14_spill] sm:$0xff] }
 0x19b   : > { %v2063_v40 = vor.u32 %v2062_v35, %v2061_v16  ;;  %v2066_v24 = vor.u32 %v2065_v50, %v2064_v22  ;;  %v2071_v33 = vshrl.u32 %v17397_v31, %v2059_v6  ;;  %vm1110_vm15 = vcmp.lt.s32.totalorder %v17425_v13, 0 }
 0x19c   : > { %17424 = vst [vmem:[#allocation40_spill] sm:$0xff] %v10443_v46  ;;  %v2052_v12 = vor.u32 8388608, %v2051_v56  ;;  %v2069_v18 = vor.u32 %v2068_v32, %v2067_v41  ;;  %v2073_v5 = vshll.u32 %v17397_v31, %v2058_v39  ;;  %v2074_v11 = vshrl.u32 %v17388_v8, %v2059_v6  ;;  %v17427_v56 = vld [vmem:[#allocation20_spill] sm:$0xff] }
 0x19d   : > { %vm1422_vm0 = vcmp.lt.s32.totalorder %v17426_v49, 0  ;;  %v1800_v48 = vclz %v7982_v28  ;;  %v1902_v26 = vsub.s32 0, %v10426_v36  ;;  %v2003_v59 = vshll.u32 %v10433_v23, 30 }
 0x19e   : > { %v2072_v15 = vor.u32 %v2071_v33, %v2070_v3  ;;  %v2313_v35 = vadd.s32 536870912, %v10438_v51  ;;  %v2075_v50 = vor.u32 %v2074_v11, %v2073_v5  ;;  %vm2076_vm2 = vcmp.lt.s32.totalorder %v10440_v0, 1 }
 0x19f   : > { %vm2079_vm3 = vcmp.lt.s32.totalorder %v10440_v0, 4  ;;  %vm17013_vm7 = vcmp.lt.s32.totalorder %v17427_v56, 0  ;;  %vm2078_vm8 = vcmp.lt.s32.totalorder %v10440_v0, 3  ;;  %v2084_v39 = vsel %vm2076_vm2, %v2063_v40, %v2066_v24 }
 0x1a0   : > { %v2085_v28 = vsel %vm2079_vm3, %v2072_v15, 920167782  ;;  %v2151_v16 = vand.u32 2139095040, %v10443_v46  ;;  %vm2077_vm9 = vcmp.lt.s32.totalorder %v10440_v0, 2  ;;  %v2088_v32 = vsel %vm2076_vm2, %v2066_v24, %v2069_v18 }
 0x1a1   : > { %v2086_v22 = vsel %vm2078_vm8, %v2069_v18, %v2085_v28  ;;  %v2092_v41 = vshll.u32 %v2052_v12, 8  ;;  %v7986_v3 = vmin.u32 %v1902_v26, %v10426_v36  ;;  %v10470_v33 = vsub.s32 %v10392_v61, %v2003_v59 }
 0x1a2   : > { %v2087_v5 = vsel %vm2077_vm9, %v2084_v39, %v2086_v22  ;;  %v2089_v11 = vsel %vm2079_vm3, %v2075_v50, 1326507024  ;;  %v10476_v55 = vshrl.u32 %v2313_v35, 30  ;;  %v7983_v12 = vadd.s32 4294967294, %v1800_v48 }
 0x1a3   : > { %v2090_v28 = vsel %vm2078_vm8, %v2072_v15, %v2089_v11  ;;  %v10480_v7 = vmul.u32.u64.low %v2092_v41, %v2087_v5  ;;  %v10481_v20 = vmul.u32.u64.high %v2092_v41, %v2087_v5, %v10480_v7  ;;  %v2081_v61 = vsel %vm2079_vm3, %v2069_v18, 2102212464 }
 0x1a4   : > { %17428 = vst [vmem:[#allocation41_spill] sm:$0xff] %v10476_v55  ;;  %v2091_v26 = vsel %vm2077_vm9, %v2088_v32, %v2090_v28  ;;  %v2152_v59 = vshrl.u32 %v2151_v16, 23  ;;  %v1600_v50 = vsub.s32 4294967266, %v10422_v47  ;;  %v2060_v35 = vshrl.u32 %v17387_v19, %v2059_v6 }
 0x1a5   : > { %17429 = vst [vmem:[#allocation42_spill] sm:$0xff] %v10480_v7  ;;  %v10490_v39 = vmul.u32.u64.low %v2092_v41, %v2091_v26  ;;  %v10491_v22 = vmul.u32.u64.high %v2092_v41, %v2091_v26, %v10490_v39  ;;  %v10498_v48 = vsel %vm1110_vm15, %v1192_v58, %v10341_v60  ;;  %v1904_v15 = vclz %v7986_v3  ;;  %v10515_v26 = vpop.permute.xlu1 %355 }
 0x1a6   : > { %17431 = vst [vmem:[#allocation44_spill] sm:$0xff] %v10498_v48  ;;  %v2006_v18 = vsub.s32 0, %v10470_v33  ;;  %v7997_v5 = vadd.s32 4294967169, %v2152_v59  ;;  %v17432_v16 = vxor.u32 2147483648, %v10343_v57  ;;  %v2315_v32 = vshll.u32 %v10476_v55, 30 }
 0x1a7   : > { %17430 = vst [vmem:[#allocation43_spill] sm:$0xff] %v10491_v22  ;;  %v2080_v11 = vsel %vm2076_vm2, %v2060_v35, %v2063_v40  ;;  %v2082_v60 = vsel %vm2078_vm8, %v2066_v24, %v2081_v61  ;;  %v1596_v58 = vsub.s32 32, %v10422_v47  ;;  %vm7984_vm10 = vcmp.lt.s32.totalorder %v7983_v12, 0  ;;  %v10581_v48 = vld [vmem:[%s16919_s2] ss:$0 sm:$0xff] }
 0x1a8   : > { %v10506_v6 = vsel %vm1422_vm0, %v17432_v16, %v10343_v57  ;;  %v2102_v3 = vadd.s32 1, %v10481_v20  ;;  %v2158_v28 = vadd.s32 1, %v7997_v5  ;;  %v17434_v57 = vxor.u32 2147483648, %v10349_v52 }
 0x1a9   : > { %17433 = vst [vmem:[#allocation45_spill] sm:$0xff] %v10506_v6  ;;  %v1580_v40 = vadd.s32 %v9970_v62, %v9978_v42  ;;  %v10526_v35 = vadd.s32 127, %v1600_v50  ;;  %vm2101_vm11 = vc.u32 %v10491_v22, %v10480_v7  ;;  %v7987_v24 = vadd.s32 4294967294, %v1904_v15 }
 0x1aa   : > { %v10522_v59 = vsel %vm17013_vm7, %v17434_v57, %v10349_v52  ;;  %v7990_v61 = vmin.u32 %v2006_v18, %v10470_v33  ;;  %v2083_v39 = vsel %vm2077_vm9, %v2080_v11, %v2082_v60  ;;  %vm2159_vm12 = vcmp.gt.s32.totalorder %v2158_v28, 0  ;;  %v562_v57 = vpop.permute.xlu0 %561 }
 0x1ab   : > { %17435 = vst [vmem:[#allocation46_spill] sm:$0xff] %v10522_v59  ;;  %v10533_v5 = vsel %vm7984_vm10, 0, %v7983_v12  ;;  %v10536_v52 = vsub.s32 %v10438_v51, %v2315_v32  ;;  %v16996_v16 = vand.u32 2147483647, %v10443_v46  ;;  %v2160_v62 = vsel %vm2159_vm12, %v2158_v28, 0 }
 0x1ac   : > { %v10541_v50 = vshrl.u32 %v1580_v40, %v1596_v58  ;;  %v2103_v15 = vsel %vm2101_vm11, %v2102_v3, %v10481_v20  ;;  %v2162_v18 = vand.u32 31, %v2160_v62  ;;  %v2099_v11 = vmul.u32 %v2092_v41, %v2083_v39  ;;  %v10548_v51 = vld [vmem:[%s16918_s1 + $0x1] ss:$0 sm:$0xff]  ;;  %v10556_v32 = vld [vmem:[%s16918_s1] ss:$0 sm:$0xff]  ;;  %v10560_v3 = vpop.permute.xlu1 %360 }
 0x1ad   : > { %v10551_v12 = vmul.f32 %v10548_v51, %v562_v57  ;;  %v443_v20 = vmul.f32 %v10556_v32, %v346_v4  ;;  %v1808_v60 = vsub.s32 4294967266, %v10533_v5  ;;  %vm7988_vm13 = vcmp.lt.s32.totalorder %v7987_v24, 0 }
 0x1ae   : > { %v2008_v58 = vclz %v7990_v61  ;;  %v2163_v41 = vsub.s32 32, %v2162_v18  ;;  %v2318_v28 = vsub.s32 0, %v10536_v52  ;;  %v10563_v40 = vadd.s32 %v2103_v15, %v2099_v11 }
 0x1af   : > { %v2155_v39 = vand.u32 8388607, %v16996_v16  ;;  %v2165_v57 = vshll.u32 %v17387_v19, %v2162_v18  ;;  %v2168_v4 = vshll.u32 %v17389_v43, %v2162_v18  ;;  %v2161_v55 = vshrl.u32 %v2160_v62, 5 }
 0x1b0   : > { %v2166_v0 = vshrl.u32 %v17389_v43, %v2163_v41  ;;  %v2169_v42 = vshrl.u32 %v17390_v37, %v2163_v41  ;;  %v2172_v61 = vshrl.u32 %v17395_v21, %v2163_v41  ;;  %v2171_v23 = vshll.u32 %v17390_v37, %v2162_v18 }
 0x1b1   : > { %v2174_v14 = vshll.u32 %v17395_v21, %v2162_v18  ;;  %v2175_v15 = vshrl.u32 %v17397_v31, %v2163_v41  ;;  %v1804_v11 = vsub.s32 32, %v10533_v5  ;;  %v10576_v16 = vadd.s32 127, %v1808_v60 }
 0x1b2   : > { %v2167_v54 = vor.u32 %v2166_v0, %v2165_v57  ;;  %v2170_v59 = vor.u32 %v2169_v42, %v2168_v4  ;;  %v2156_v56 = vor.u32 8388608, %v2155_v39  ;;  %v2173_v6 = vor.u32 %v2172_v61, %v2171_v23  ;;  %v566_v42 = vpop.permute.xlu1 %565 }
 0x1b3   : > { %v2176_v49 = vor.u32 %v2175_v15, %v2174_v14  ;;  %v479_v62 = vadd.f32 %v10581_v48, %v443_v20  ;;  %v10585_v13 = vsel %vm7988_vm13, 0, %v7987_v24  ;;  %v2105_v46 = vadd.s32 536870912, %v10563_v40 }
 0x1b4   : > { %v2177_v60 = vshll.u32 %v17397_v31, %v2162_v18  ;;  %v2178_v0 = vshrl.u32 %v17388_v8, %v2163_v41  ;;  %v7991_v39 = vadd.s32 4294967294, %v2008_v58  ;;  %v8002_v14 = vmin.u32 %v2318_v28, %v10536_v52 }
 0x1b5   : > { %vm2180_vm14 = vcmp.lt.s32.totalorder %v2161_v55, 1  ;;  %vm2183_vm2 = vcmp.lt.s32.totalorder %v2161_v55, 4  ;;  %vm2182_vm3 = vcmp.lt.s32.totalorder %v2161_v55, 3  ;;  %vm2181_vm8 = vcmp.lt.s32.totalorder %v2161_v55, 2 }
 0x1b6   : > { %v2179_v23 = vor.u32 %v2178_v0, %v2177_v60  ;;  %v2188_v57 = vsel %vm2180_vm14, %v2167_v54, %v2170_v59  ;;  %v2189_v20 = vsel %vm2183_vm2, %v2176_v49, 920167782  ;;  %v2196_v4 = vshll.u32 %v2156_v56, 8 }
 0x1b7   : > { %v2190_v24 = vsel %vm2182_vm3, %v2173_v6, %v2189_v20  ;;  %v645_v61 = vmul.f32 %v10548_v51, %v566_v42  ;;  %v10594_v18 = vshrl.u32 %v2105_v46, 30  ;;  %v2192_v58 = vsel %vm2180_vm14, %v2170_v59, %v2173_v6 }
 0x1b8   : > { %v2191_v15 = vsel %vm2181_vm8, %v2188_v57, %v2190_v24  ;;  %v2193_v28 = vsel %vm2183_vm2, %v2179_v23, 1326507024  ;;  %v1912_v45 = vsub.s32 4294967266, %v10585_v13  ;;  %v2320_v60 = vclz %v8002_v14  ;;  %v17437_v57 = vld [vmem:[#allocation10_spill] sm:$0xff] }
 0x1b9   : > { %17436 = vst [vmem:[#allocation47_spill] sm:$0xff] %v10594_v18  ;;  %v2185_v0 = vsel %vm2183_vm2, %v2173_v6, 2102212464  ;;  %v2194_v7 = vsel %vm2182_vm3, %v2176_v49, %v2193_v28  ;;  %v2164_v22 = vshrl.u32 %v17387_v19, %v2163_v41  ;;  %vm7992_vm9 = vcmp.lt.s32.totalorder %v7991_v39, 0 }
 0x1ba   : > { %v2195_v20 = vsel %vm2181_vm8, %v2192_v58, %v2194_v7  ;;  %v10602_v56 = vmul.u32.u64.low %v2196_v4, %v2191_v15  ;;  %v10603_v17 = vmul.u32.u64.high %v2196_v4, %v2191_v15, %v10602_v56  ;;  %v10610_v23 = vadd.f32 %v645_v61, %v17437_v57 }
 0x1bb   : > { %v10606_v46 = vmul.u32.u64.low %v2196_v4, %v2195_v20  ;;  %v10607_v42 = vmul.u32.u64.high %v2196_v4, %v2195_v20, %v10606_v46  ;;  %v1788_v6 = vadd.s32 %v10132_v27, %v10141_v25  ;;  %v2107_v49 = vshll.u32 %v10594_v18, 30 }
 0x1bc   : > { %17438 = vst [vmem:[#allocation10_spill] sm:$0xff] %v10610_v23  ;;  %v2184_v41 = vsel %vm2180_vm14, %v2164_v22, %v2167_v54  ;;  %v2186_v7 = vsel %vm2182_vm3, %v2170_v59, %v2185_v0  ;;  %v17439_v14 = vshll.u32 %v10253_v9, %v10422_v47  ;;  %v17440_v15 = vshll.u32 %v10526_v35, 23 }
 0x1bd   : > { %v1913_v61 = vadd.s32 127, %v1912_v45  ;;  %v8003_v28 = vadd.s32 4294967294, %v2320_v60  ;;  %v1806_v20 = vshrl.u32 %v1788_v6, %v1804_v11  ;;  %v2011_v46 = vsel %vm7992_vm9, 0, %v7991_v39 }
 0x1be   : > { %v10621_v24 = vor.u32 %v10541_v50, %v17439_v14  ;;  %v1603_v58 = vor.u32 4788187, %v17440_v15  ;;  %v2206_v27 = vadd.s32 1, %v10603_v17  ;;  %v10627_v25 = vadd.f32 %v10551_v12, %v479_v62  ;;  %v574_v14 = vpop.permute.xlu0 %573 }
 0x1bf   : > { %v1810_v54 = vshll.u32 %v10576_v16, 23  ;;  %v1908_v22 = vsub.s32 32, %v10585_v13  ;;  %v2187_v9 = vsel %vm2181_vm8, %v2184_v41, %v2186_v7  ;;  %v2463_v47 = vand.u32 2139095040, %v10610_v23 }
 0x1c0   : > { %17441 = vst [vmem:[#allocation48_spill] sm:$0xff] %v10627_v25  ;;  %v1805_v59 = vshll.u32 %v10374_v10, %v10533_v5  ;;  %v1892_v45 = vadd.s32 %v10214_v1, %v10211_v2  ;;  %v10638_v35 = vsub.s32 %v10563_v40, %v2107_v49  ;;  %vm2205_vm10 = vc.u32 %v10607_v42, %v10602_v56 }
 0x1c1   : > { %v1914_v50 = vshll.u32 %v1913_v61, 23  ;;  %v2016_v16 = vsub.s32 4294967266, %v2011_v46  ;;  %vm8004_vm11 = vcmp.lt.s32.totalorder %v8003_v28, 0  ;;  %v2207_v55 = vsel %vm2205_vm10, %v2206_v27, %v10603_v17 }
 0x1c2   : > { %v1606_v12 = vcvt.s32.f32 %v10621_v24  ;;  %v2012_v11 = vsub.s32 32, %v2011_v46  ;;  %v2203_v62 = vmul.u32 %v2196_v4, %v2187_v9  ;;  %v2359_v10 = vand.u32 2139095040, %v10627_v25 }
 0x1c3   : > { %v1807_v5 = vor.u32 %v1806_v20, %v1805_v59  ;;  %v1811_v39 = vor.u32 4788187, %v1810_v54  ;;  %v1910_v2 = vshrl.u32 %v1892_v45, %v1908_v22  ;;  %v2464_v1 = vshrl.u32 %v2463_v47, 23 }
 0x1c4   : > { %v1996_v40 = vadd.s32 %v10307_v38, %v10326_v29  ;;  %v10647_v60 = vsel %vm8004_vm11, 0, %v8003_v28  ;;  %v2110_v0 = vsub.s32 0, %v10638_v35  ;;  %v10650_v57 = vadd.s32 %v2207_v55, %v2203_v62 }
 0x1c5   : > { %v1909_v17 = vshll.u32 %v10426_v36, %v10585_v13  ;;  %v1915_v6 = vor.u32 4788187, %v1914_v50  ;;  %v2017_v4 = vadd.s32 127, %v2016_v16  ;;  %v8009_v49 = vadd.s32 4294967169, %v2464_v1 }
 0x1c6   : > { %v1604_v41 = vand.u32 2147483647, %v1603_v58  ;;  %v2014_v7 = vshrl.u32 %v1996_v40, %v2012_v11  ;;  %v2360_v24 = vshrl.u32 %v2359_v10, 23  ;;  %v446_v15 = vmul.f32 %v10556_v32, %v10560_v3 }
 0x1c7   : > { %v1911_v38 = vor.u32 %v1910_v2, %v1909_v17  ;;  %v2328_v29 = vsub.s32 4294967266, %v10647_v60  ;;  %v647_v61 = vmul.f32 %v10548_v51, %v574_v14  ;;  %v2470_v28 = vadd.s32 1, %v8009_v49  ;;  %v570_v2 = vpop.permute.xlu1 %569 }
 0x1c8   : > { %v1812_v20 = vand.u32 2147483647, %v1811_v39  ;;  %v2013_v27 = vshll.u32 %v10470_v33, %v2011_v46  ;;  %v7994_v36 = vmin.u32 %v2110_v0, %v10638_v35  ;;  %v2209_v13 = vadd.s32 536870912, %v10650_v57 }
 0x1c9   : > { %v1814_v58 = vcvt.s32.f32 %v1807_v5  ;;  %v1916_v54 = vand.u32 2147483647, %v1915_v6  ;;  %v2018_v22 = vshll.u32 %v2017_v4, 23  ;;  %vm2471_vm12 = vcmp.gt.s32.totalorder %v2470_v28, 0 }
 0x1ca   : > { %v10661_v9 = vor.u32 %v2014_v7, %v2013_v27  ;;  %v8005_v3 = vadd.s32 4294967169, %v2360_v24  ;;  %v445_v47 = vmul.f32 %v10556_v32, %v10515_v26  ;;  %v482_v59 = vadd.f32 %v10581_v48, %v446_v15 }
 0x1cb   : > { %v1918_v45 = vcvt.s32.f32 %v1911_v38  ;;  %v2324_v50 = vsub.s32 32, %v10647_v60  ;;  %v2329_v33 = vadd.s32 127, %v2328_v29  ;;  %v2472_v46 = vsel %vm2471_vm12, %v2470_v28, 0 }
 0x1cc   : > { %v10667_v16 = vmul.f32 %v1606_v12, %v1604_v41  ;;  %v10669_v55 = vmul.f32 %v1814_v58, %v1812_v20  ;;  %v2112_v11 = vclz %v7994_v36  ;;  %v10671_v62 = vshrl.u32 %v2209_v13, 30 }
 0x1cd   : > { %v10673_v10 = vmul.f32 %v1918_v45, %v1916_v54  ;;  %v10675_v5 = vor.u32 4788187, %v2018_v22  ;;  %v2308_v26 = vadd.s32 %v10400_v34, %v10405_v30  ;;  %v2474_v39 = vand.u32 31, %v2472_v46  ;;  %v10709_v54 = vpop.permute.xlu1 %365 }
 0x1ce   : > { %17442 = vst [vmem:[#allocation49_spill] sm:$0xff] %v10671_v62  ;;  %v2022_v1 = vcvt.s32.f32 %v10661_v9  ;;  %v2366_v40 = vadd.s32 1, %v8005_v3  ;;  %v481_v12 = vadd.f32 %v10581_v48, %v445_v47  ;;  %v10681_v0 = vadd.f32 %v647_v61, %v482_v59 }
 0x1cf   : > { %v2325_v17 = vshll.u32 %v10536_v52, %v10647_v60  ;;  %v2326_v6 = vshrl.u32 %v2308_v26, %v2324_v50  ;;  %v2330_v4 = vshll.u32 %v2329_v33, 23  ;;  %v10685_v49 = vsub.s32 32, %v2474_v39  ;;  %v578_v50 = vpop.permute.xlu0 %577 }
 0x1d0   : > { %17443 = vst [vmem:[#allocation50_spill] sm:$0xff] %v10681_v0  ;;  %v7995_v41 = vadd.s32 4294967294, %v2112_v11  ;;  %v2211_v7 = vshll.u32 %v10671_v62, 30  ;;  %v17010_v34 = vand.u32 2147483647, %v10610_v23  ;;  %v646_v30 = vmul.f32 %v10548_v51, %v570_v2 }
 0x1d1   : > { %v10690_v14 = vshrl.u32 %v2472_v46, 5  ;;  %v2478_v24 = vshrl.u32 %v17389_v43, %v10685_v49  ;;  %v2481_v15 = vshrl.u32 %v17390_v37, %v10685_v49  ;;  %v2484_v52 = vshrl.u32 %v17395_v21, %v10685_v49 }
 0x1d2   : > { %v2486_v60 = vshll.u32 %v17395_v21, %v2474_v39  ;;  %v2487_v38 = vshrl.u32 %v17397_v31, %v10685_v49  ;;  %v2489_v29 = vshll.u32 %v17397_v31, %v2474_v39  ;;  %v2490_v61 = vshrl.u32 %v17388_v8, %v10685_v49 }
 0x1d3   : > { %vm2367_vm13 = vcmp.gt.s32.totalorder %v2366_v40, 0  ;;  %v2477_v28 = vshll.u32 %v17387_v19, %v2474_v39  ;;  %v2480_v20 = vshll.u32 %v17389_v43, %v2474_v39  ;;  %v2483_v27 = vshll.u32 %v17390_v37, %v2474_v39 }
 0x1d4   : > { %vm7996_vm14 = vcmp.lt.s32.totalorder %v7995_v41, 0  ;;  %v2467_v36 = vand.u32 8388607, %v17010_v34  ;;  %v2488_v13 = vor.u32 %v2487_v38, %v2486_v60  ;;  %v2491_v58 = vor.u32 %v2490_v61, %v2489_v29  ;;  %v10761_v61 = vpop.permute.xlu0 %589 }
 0x1d5   : > { %v10711_v22 = vor.u32 %v2478_v24, %v2477_v28  ;;  %v10713_v9 = vor.u32 %v2481_v15, %v2480_v20  ;;  %v10715_v3 = vor.u32 %v2484_v52, %v2483_v27  ;;  %v10717_v47 = vadd.f32 %v646_v30, %v481_v12  ;;  %v10754_v30 = vpop.permute.xlu1 %375  ;;  %v17445_v15 = vld [vmem:[#allocation30_spill] sm:$0xff] }
 0x1d6   : > { %v2020_v59 = vand.u32 2147483647, %v10675_v5  ;;  %v10721_v45 = vsub.s32 %v10650_v57, %v2211_v7  ;;  %v2671_v33 = vand.u32 2139095040, %v10681_v0  ;;  %vm2495_vm2 = vcmp.lt.s32.totalorder %v10690_v14, 4 }
 0x1d7   : > { %17444 = vst [vmem:[#allocation51_spill] sm:$0xff] %v10717_v47  ;;  %v2327_v46 = vor.u32 %v2326_v6, %v2325_v17  ;;  %v2331_v11 = vor.u32 4788187, %v2330_v4  ;;  %v2501_v26 = vsel %vm2495_vm2, %v2488_v13, 920167782  ;;  %vm1526_vm3 = vcmp.lt.s32.totalorder %v9739_v53, 0 }
 0x1d8   : > { %v2505_v39 = vsel %vm2495_vm2, %v2491_v58, 1326507024  ;;  %v10731_v5 = vsel %vm7996_vm14, 0, %v7995_v41  ;;  %v10734_v57 = vsel %vm2367_vm13, %v2366_v40, 0  ;;  %vm2492_vm8 = vcmp.lt.s32.totalorder %v10690_v14, 1 }
 0x1d9   : > { %vm2494_vm9 = vcmp.lt.s32.totalorder %v10690_v14, 3  ;;  %vm1734_vm10 = vcmp.lt.s32.totalorder %v9850_v44, 0  ;;  %v2468_v2 = vor.u32 8388608, %v2467_v36  ;;  %v2500_v12 = vsel %vm2492_vm8, %v10711_v22, %v10713_v9 }
 0x1da   : > { %v2502_v17 = vsel %vm2494_vm9, %v10715_v3, %v2501_v26  ;;  %v2567_v6 = vand.u32 2139095040, %v10717_v47  ;;  %v2214_v40 = vsub.s32 0, %v10721_v45  ;;  %v2672_v4 = vshrl.u32 %v2671_v33, 23 }
 0x1db   : > { %v2504_v41 = vsel %vm2492_vm8, %v10713_v9, %v10715_v3  ;;  %v2506_v7 = vsel %vm2494_vm9, %v2488_v13, %v2505_v39  ;;  %v1608_v24 = vxor.u32 2147483648, %v10667_v16  ;;  %vm17042_vm11 = vcmp.lt.s32.totalorder %v17445_v15, 0 }
 0x1dc   : > { %v2023_v52 = vmul.f32 %v2022_v1, %v2020_v59  ;;  %v2120_v60 = vsub.s32 4294967266, %v10731_v5  ;;  %vm2493_vm12 = vcmp.lt.s32.totalorder %v10690_v14, 2  ;;  %v1816_v38 = vxor.u32 2147483648, %v10669_v55 }
 0x1dd   : > { %v2332_v29 = vand.u32 2147483647, %v2331_v11  ;;  %v2503_v28 = vsel %vm2493_vm12, %v2500_v12, %v2502_v17  ;;  %v2568_v20 = vshrl.u32 %v2567_v6, 23  ;;  %v1920_v27 = vxor.u32 2147483648, %v10673_v10 }
 0x1de   : > { %v10767_v36 = vand.u32 31, %v10734_v57  ;;  %v2507_v1 = vsel %vm2493_vm12, %v2504_v41, %v2506_v7  ;;  %v10771_v13 = vshll.u32 %v2468_v2, 8  ;;  %v2334_v58 = vcvt.s32.f32 %v2327_v46  ;;  %v10783_v2 = vpop.permute.xlu1 %380 }
 0x1df   : > { %v7998_v59 = vmin.u32 %v2214_v40, %v10721_v45  ;;  %v8017_v33 = vadd.s32 4294967169, %v2672_v4  ;;  %v8013_v11 = vadd.s32 4294967169, %v2568_v20  ;;  %v2024_v26 = vxor.u32 2147483648, %v2023_v52 }
 0x1e0   : > { %17446 = vst [vmem:[#allocation30_spill] sm:$0xff] %v10767_v36  ;;  %v2121_v39 = vadd.s32 127, %v2120_v60  ;;  %v10775_v12 = vmul.u32.u64.low %v10771_v13, %v2503_v28  ;;  %v10776_v17 = vmul.u32.u64.high %v10771_v13, %v2503_v28, %v10775_v12  ;;  %v2335_v6 = vmul.f32 %v2334_v58, %v2332_v29  ;;  %v594_v28 = vpop.permute.xlu0 %593 }
 0x1e1   : > { %v10780_v34 = vmul.u32.u64.low %v10771_v13, %v2507_v1  ;;  %v10781_v0 = vmul.u32.u64.high %v10771_v13, %v2507_v1, %v10780_v34  ;;  %v2574_v41 = vadd.s32 1, %v8013_v11  ;;  %v10788_v46 = vsel %vm1526_vm3, %v1608_v24, %v10667_v16  ;;  %v17449_v16 = vld [vmem:[#allocation43_spill] sm:$0xff]  ;;  %v17450_v24 = vld [vmem:[#allocation42_spill] sm:$0xff] }
 0x1e2   : > { %vm17041_vm13 = vcmp.lt.s32.totalorder %v10042_v63, 0  ;;  %v2116_v40 = vsub.s32 32, %v10731_v5  ;;  %v10793_v4 = vsub.s32 32, %v10767_v36  ;;  %v10798_v7 = vsel %vm1734_vm10, %v1816_v38, %v10669_v55  ;;  %v17448_v34 = vld [vmem:[#allocation36_spill] sm:$0xff] }
 0x1e3   : > { %vm17040_vm14 = vcmp.lt.s32.totalorder %v17448_v34, 0  ;;  %v2216_v60 = vclz %v7998_v59  ;;  %v2678_v29 = vadd.s32 1, %v8017_v33  ;;  %vm2575_vm7 = vcmp.gt.s32.totalorder %v2574_v41, 0 }
 0x1e4   : > { %17447 = vst [vmem:[#allocation52_spill] sm:$0xff] %v10793_v4  ;;  %v2100_v20 = vadd.s32 %v17450_v24, %v17449_v16  ;;  %v2122_v1 = vshll.u32 %v2121_v39, 23  ;;  %v10804_v58 = vmul.f32 %v10548_v51, %v578_v50  ;;  %v2497_v11 = vsel %vm2495_vm2, %v10715_v3, 2102212464 }
 0x1e5   : > { %v10812_v55 = vsel %vm17042_vm11, %v1920_v27, %v10673_v10  ;;  %v10816_v38 = vsel %vm17041_vm13, %v2024_v26, %v2023_v52  ;;  %v2336_v59 = vxor.u32 2147483648, %v2335_v6  ;;  %v2476_v33 = vshrl.u32 %v17387_v19, %v10685_v49  ;;  %v582_v27 = vpop.permute.xlu1 %581 }
 0x1e6   : > { %17451 = vst [vmem:[#allocation43_spill] sm:$0xff] %v10816_v38  ;;  %v2118_v39 = vshrl.u32 %v2100_v20, %v2116_v40  ;;  %v2383_v50 = vshrl.u32 %v17397_v31, %v10793_v4  ;;  %v2386_v3 = vshrl.u32 %v17388_v8, %v10793_v4  ;;  %v2576_v16 = vsel %vm2575_vm7, %v2574_v41, 0 }
 0x1e7   : > { %v7999_v24 = vadd.s32 4294967294, %v2216_v60  ;;  %vm2679_vm2 = vcmp.gt.s32.totalorder %v2678_v29, 0  ;;  %v2496_v10 = vsel %vm2492_vm8, %v2476_v33, %v10711_v22  ;;  %v2498_v52 = vsel %vm2494_vm9, %v10713_v9, %v2497_v11  ;;  %v606_v9 = vpop.permute.xlu0 %605 }
 0x1e8   : > { %v2117_v49 = vshll.u32 %v10638_v35, %v10731_v5  ;;  %v2123_v26 = vor.u32 4788187, %v2122_v1  ;;  %v10833_v40 = vshrl.u32 %v10734_v57, 5  ;;  %v2518_v41 = vadd.s32 1, %v10776_v17 }
 0x1e9   : > { %v2382_v60 = vshll.u32 %v17395_v21, %v10767_v36  ;;  %v2385_v22 = vshll.u32 %v17397_v31, %v10767_v36  ;;  %vm2517_vm7 = vc.u32 %v10781_v0, %v10775_v12  ;;  %v2578_v20 = vand.u32 31, %v2576_v16 }
 0x1ea   : > { %17452 = vst [vmem:[#allocation42_spill] sm:$0xff] %v10833_v40  ;;  %v2119_v11 = vor.u32 %v2118_v39, %v2117_v49  ;;  %v2680_v33 = vsel %vm2679_vm2, %v2678_v29, 0  ;;  %v2499_v35 = vsel %vm2493_vm12, %v2496_v10, %v2498_v52  ;;  %v649_v5 = vmul.f32 %v10548_v51, %v582_v27 }
 0x1eb   : > { %vm8000_vm8 = vcmp.lt.s32.totalorder %v7999_v24, 0  ;;  %v10845_v57 = vor.u32 %v2383_v50, %v2382_v60  ;;  %v2387_v1 = vor.u32 %v2386_v3, %v2385_v22  ;;  %v10849_v4 = vmul.f32 %v10548_v51, %v10761_v61 }
 0x1ec   : > { %v10853_v36 = vsel %vm17040_vm14, %v2336_v59, %v2335_v6  ;;  %v2124_v25 = vand.u32 2147483647, %v2123_v26  ;;  %v10856_v29 = vmul.f32 %v10548_v51, %v594_v28  ;;  %v2519_v14 = vsel %vm2517_vm7, %v2518_v41, %v10776_v17  ;;  %v17456_v6 = vld [vmem:[#allocation16_spill] sm:$0xff] }
 0x1ed   : > { %17453 = vst [vmem:[#allocation53_spill] sm:$0xff] %v10845_v57  ;;  %17454 = vst [vmem:[#allocation54_spill] sm:$0xff] %v10853_v36  ;;  %v2204_v39 = vadd.s32 %v10602_v56, %v10607_v42  ;;  %v10861_v50 = vand.u32 31, %v2680_v33  ;;  %v2515_v3 = vmul.u32 %v10771_v13, %v2499_v35  ;;  %v10864_v10 = vsub.s32 32, %v2578_v20  ;;  %v610_v13 = vpop.permute.xlu0 %609 }
 0x1ee   : > { %v2126_v61 = vcvt.s32.f32 %v2119_v11  ;;  %v2219_v52 = vsel %vm8000_vm8, 0, %v7999_v24  ;;  %vm17030_vm9 = vcmp.lt.s32.totalorder %v10833_v40, 4  ;;  %v10868_v59 = vadd.f32 %v649_v5, %v17456_v6 }
 0x1ef   : > { %17455 = vst [vmem:[#allocation55_spill] sm:$0xff] %v10861_v50  ;;  %v10873_v17 = vsel %vm17030_vm9, %v10845_v57, 920167782  ;;  %v10877_v56 = vsel %vm17030_vm9, %v2387_v1, 1326507024  ;;  %v10879_v42 = vadd.s32 %v2519_v14, %v2515_v3  ;;  %v447_v28 = vmul.f32 %v10556_v32, %v10709_v54 }
 0x1f0   : > { %17457 = vst [vmem:[#allocation16_spill] sm:$0xff] %v10868_v59  ;;  %17458 = vst [vmem:[#allocation56_spill] sm:$0xff] %v10873_v17  ;;  %v10883_v24 = vmul.f32 %v2126_v61, %v2124_v25  ;;  %v10885_v27 = vshrl.u32 %v2680_v33, 5  ;;  %v10888_v49 = vmul.f32 %v10548_v51, %v606_v9  ;;  %v10891_v26 = vmul.f32 %v10548_v51, %v610_v13 }
 0x1f1   : > { %17459 = vst [vmem:[#allocation57_spill] sm:$0xff] %v10877_v56  ;;  %v2220_v41 = vsub.s32 32, %v2219_v52  ;;  %v2224_v60 = vsub.s32 4294967266, %v2219_v52  ;;  %v10894_v22 = vsub.s32 32, %v10861_v50  ;;  %v2591_v11 = vshrl.u32 %v17397_v31, %v10864_v10 }
 0x1f2   : > { %17460 = vst [vmem:[#allocation58_spill] sm:$0xff] %v10885_v27  ;;  %17461 = vst [vmem:[#allocation59_spill] sm:$0xff] %v10891_v26  ;;  %v10900_v25 = vshll.u32 %v17395_v21, %v10861_v50  ;;  %v2594_v9 = vshrl.u32 %v17388_v8, %v10864_v10  ;;  %v2879_v33 = vand.u32 2139095040, %v10868_v59  ;;  %v2521_v35 = vadd.s32 536870912, %v10879_v42 }
 0x1f3   : > { %17462 = vst [vmem:[#allocation60_spill] sm:$0xff] %v10894_v22  ;;  %v10907_v5 = vshrl.u32 %v2576_v16, 5  ;;  %v2590_v1 = vshll.u32 %v17395_v21, %v2578_v20  ;;  %v483_v14 = vadd.f32 %v10581_v48, %v447_v28  ;;  %v2582_v3 = vshrl.u32 %v17389_v43, %v10864_v10 }
 0x1f4   : > { %v2585_v61 = vshrl.u32 %v17390_v37, %v10864_v10  ;;  %v2588_v6 = vshrl.u32 %v17395_v21, %v10864_v10  ;;  %v2593_v13 = vshll.u32 %v17397_v31, %v2578_v20  ;;  %v2222_v54 = vshrl.u32 %v2204_v39, %v2220_v41 }
 0x1f5   : > { %v2225_v57 = vadd.s32 127, %v2224_v60  ;;  %v2581_v16 = vshll.u32 %v17387_v19, %v2578_v20  ;;  %v2592_v56 = vor.u32 %v2591_v11, %v2590_v1  ;;  %v2584_v17 = vshll.u32 %v17389_v43, %v2578_v20 }
 0x1f6   : > { %v2587_v28 = vshll.u32 %v17390_v37, %v2578_v20  ;;  %v2595_v40 = vor.u32 %v2594_v9, %v2593_v13  ;;  %v2880_v36 = vshrl.u32 %v2879_v33, 23  ;;  %v2221_v34 = vshll.u32 %v10721_v45, %v2219_v52 }
 0x1f7   : > { %v10922_v62 = vshrl.u32 %v2521_v35, 30  ;;  %v17464_v18 = vand.u32 2147483647, %v10717_v47  ;;  %v10927_v63 = vadd.f32 %v10804_v58, %v483_v14  ;;  %v2583_v39 = vor.u32 %v2582_v3, %v2581_v16  ;;  %v586_v14 = vpop.permute.xlu1 %585 }
 0x1f8   : > { %v10929_v41 = vor.u32 %v2585_v61, %v2584_v17  ;;  %v2589_v60 = vor.u32 %v2588_v6, %v2587_v28  ;;  %vm2599_vm12 = vcmp.lt.s32.totalorder %v10907_v5, 4  ;;  %v2226_v11 = vshll.u32 %v2225_v57, 23 }
 0x1f9   : > { %17463 = vst [vmem:[#allocation61_spill] sm:$0xff] %v10922_v62  ;;  %v2571_v38 = vand.u32 8388607, %v17464_v18  ;;  %17465 = vst [vmem:[#allocation62_spill] sm:$0xff] %v10927_v63  ;;  %v10935_v45 = vshll.u32 %v17397_v31, %v10861_v50  ;;  %v2605_v52 = vsel %vm2599_vm12, %v2592_v56, 920167782  ;;  %v10939_v18 = vor.u32 %v2222_v54, %v2221_v34 }
 0x1fa   : > { %v10943_v58 = vshrl.u32 %v17397_v31, %v10894_v22  ;;  %v2609_v17 = vsel %vm2599_vm12, %v2595_v40, 1326507024  ;;  %v8025_v9 = vadd.s32 4294967169, %v2880_v36  ;;  %vm2596_vm2 = vcmp.lt.s32.totalorder %v10907_v5, 1 }
 0x1fb   : > { %v2572_v33 = vor.u32 8388608, %v2571_v38  ;;  %vm2598_vm7 = vcmp.lt.s32.totalorder %v10907_v5, 3  ;;  %v2775_v57 = vand.u32 2139095040, %v10927_v63  ;;  %v2523_v35 = vshll.u32 %v10922_v62, 30 }
 0x1fc   : > { %v2604_v34 = vsel %vm2596_vm2, %v2583_v39, %v10929_v41  ;;  %v2606_v54 = vsel %vm2598_vm7, %v2589_v60, %v2605_v52  ;;  %v2886_v1 = vadd.s32 1, %v8025_v9  ;;  %v10956_v40 = vor.u32 4788187, %v2226_v11 }
 0x1fd   : > { %v2608_v36 = vsel %vm2596_vm2, %v10929_v41, %v2589_v60  ;;  %v2610_v38 = vsel %vm2598_vm7, %v2592_v56, %v2609_v17  ;;  %v449_v3 = vmul.f32 %v10556_v32, %v10754_v30  ;;  %v10967_v61 = vshrl.u32 %v17388_v8, %v10894_v22 }
 0x1fe   : > { %vm2597_vm8 = vcmp.lt.s32.totalorder %v10907_v5, 2  ;;  %v450_v6 = vmul.f32 %v10556_v32, %v10783_v2  ;;  %vm2887_vm9 = vcmp.gt.s32.totalorder %v2886_v1, 0  ;;  %v10974_v16 = vshll.u32 %v2572_v33, 8 }
 0x1ff   : > { %v2607_v13 = vsel %vm2597_vm8, %v2604_v34, %v2606_v54  ;;  %v2888_v28 = vsel %vm2887_vm9, %v2886_v1, 0  ;;  %v650_v56 = vmul.f32 %v10548_v51, %v586_v14  ;;  %v10978_v30 = vsub.s32 %v10879_v42, %v2523_v35 }
 0x200   : > { %v2611_v11 = vsel %vm2597_vm8, %v2608_v36, %v2610_v38  ;;  %v2776_v52 = vshrl.u32 %v2775_v57, 23  ;;  %v17031_v17 = vand.u32 2147483647, %v10868_v59  ;;  %v485_v9 = vadd.f32 %v10581_v48, %v449_v3  ;;  %v17482_v59 = vld [vmem:[#allocation27_spill] sm:$0xff] }
 0x201   : > { %v2890_v33 = vand.u32 31, %v2888_v28  ;;  %v2580_v34 = vshrl.u32 %v17387_v19, %v10864_v10  ;;  %v10989_v54 = vmul.u32.u64.low %v10974_v16, %v2607_v13  ;;  %v10990_v42 = vmul.u32.u64.high %v10974_v16, %v2607_v13, %v10989_v54 }
 0x202   : > { %v10994_v35 = vadd.f32 %v10581_v48, %v450_v6  ;;  %v10997_v57 = vmul.u32.u64.low %v10974_v16, %v2611_v11  ;;  %v10998_v1 = vmul.u32.u64.high %v10974_v16, %v2611_v11, %v10997_v57  ;;  %v11002_v36 = vadd.f32 %v650_v56, %v485_v9 }
 0x203   : > { %v11000_v14 = vsub.s32 32, %v2890_v33  ;;  %v2526_v38 = vsub.s32 0, %v10978_v30  ;;  %v2600_v10 = vsel %vm2596_vm2, %v2580_v34, %v2583_v39  ;;  %v8021_v3 = vadd.s32 4294967169, %v2776_v52 }
 0x204   : > { %17466 = vst [vmem:[#allocation63_spill] sm:$0xff] %v11002_v36  ;;  %v2883_v13 = vand.u32 8388607, %v17031_v17  ;;  %v2601_v48 = vsel %vm2599_vm12, %v2589_v60, 2102212464  ;;  %v11011_v6 = vshrl.u32 %v2888_v28, 5  ;;  %v2893_v11 = vshll.u32 %v17387_v19, %v2890_v33 }
 0x205   : > { %v2894_v56 = vshrl.u32 %v17389_v43, %v11000_v14  ;;  %v2896_v9 = vshll.u32 %v17389_v43, %v2890_v33  ;;  %v2897_v57 = vshrl.u32 %v17390_v37, %v11000_v14  ;;  %v2899_v39 = vshll.u32 %v17390_v37, %v2890_v33 }
 0x206   : > { %v2900_v52 = vshrl.u32 %v17395_v21, %v11000_v14  ;;  %v2902_v60 = vshll.u32 %v17395_v21, %v2890_v33  ;;  %v2903_v28 = vshrl.u32 %v17397_v31, %v11000_v14  ;;  %v2983_v17 = vand.u32 2139095040, %v11002_v36 }
 0x207   : > { %v2895_v34 = vor.u32 %v2894_v56, %v2893_v11  ;;  %v2898_v20 = vor.u32 %v2897_v57, %v2896_v9  ;;  %v2905_v32 = vshll.u32 %v17397_v31, %v2890_v33  ;;  %v2906_v63 = vshrl.u32 %v17388_v8, %v11000_v14  ;;  %v17467_v56 = vld [vmem:[#allocation9_spill] sm:$0xff] }
 0x208   : > { %v2901_v2 = vor.u32 %v2900_v52, %v2899_v39  ;;  %v2602_v50 = vsel %vm2598_vm7, %v10929_v41, %v2601_v48  ;;  %v2884_v22 = vor.u32 8388608, %v2883_v13  ;;  %v2904_v11 = vor.u32 %v2903_v28, %v2902_v60 }
 0x209   : > { %vm2908_vm9 = vcmp.lt.s32.totalorder %v11011_v6, 1  ;;  %vm17054_vm12 = vcmp.lt.s32.totalorder %v17467_v56, 0  ;;  %v2622_v62 = vadd.s32 1, %v10990_v42  ;;  %v2907_v26 = vor.u32 %v2906_v63, %v2905_v32 }
 0x20a   : > { %vm2911_vm2 = vcmp.lt.s32.totalorder %v11011_v6, 4  ;;  %v2916_v33 = vsel %vm2908_vm9, %v2895_v34, %v2898_v20  ;;  %vm17053_vm14 = vcmp.lt.s32.totalorder %v10885_v27, 4  ;;  %vm2621_vm13 = vc.u32 %v10998_v1, %v10989_v54 }
 0x20b   : > { %vm2910_vm7 = vcmp.lt.s32.totalorder %v11011_v6, 3  ;;  %v2917_v41 = vsel %vm2911_vm2, %v2904_v11, 920167782  ;;  %v2984_v13 = vshrl.u32 %v2983_v17, 23  ;;  %vm2909_vm11 = vcmp.lt.s32.totalorder %v11011_v6, 2 }
 0x20c   : > { %v2918_v63 = vsel %vm2910_vm7, %v2901_v2, %v2917_v41  ;;  %v2920_v32 = vsel %vm2908_vm9, %v2898_v20, %v2901_v2  ;;  %v2921_v48 = vsel %vm2911_vm2, %v2907_v26, 1326507024  ;;  %v2603_v9 = vsel %vm2597_vm8, %v2600_v10, %v2602_v50 }
 0x20d   : > { %v2782_v57 = vadd.s32 1, %v8021_v3  ;;  %v2919_v39 = vsel %vm2909_vm11, %v2916_v33, %v2918_v63  ;;  %v11055_v52 = vshll.u32 %v2884_v22, 8  ;;  %v8010_v17 = vmin.u32 %v2526_v38, %v10978_v30 }
 0x20e   : > { %v2623_v60 = vsel %vm2621_vm13, %v2622_v62, %v10990_v42  ;;  %v2922_v28 = vsel %vm2910_vm7, %v2904_v11, %v2921_v48  ;;  %v17043_v41 = vand.u32 2147483647, %v11002_v36  ;;  %v8029_v10 = vadd.s32 4294967169, %v2984_v13 }
 0x20f   : > { %v2923_v26 = vsel %vm2909_vm11, %v2920_v32, %v2922_v28  ;;  %v11065_v50 = vmul.u32.u64.low %v11055_v52, %v2919_v39  ;;  %v11066_v5 = vmul.u32.u64.high %v11055_v52, %v2919_v39, %v11065_v50  ;;  %v11071_v22 = vor.u32 %v10943_v58, %v10900_v25 }
 0x210   : > { %v2619_v62 = vmul.u32 %v10974_v16, %v2603_v9  ;;  %v11075_v42 = vmul.u32.u64.low %v11055_v52, %v2923_v26  ;;  %v11076_v38 = vmul.u32.u64.high %v11055_v52, %v2923_v26, %v11075_v42  ;;  %v17469_v3 = vand.u32 2147483647, %v10956_v40  ;;  %v622_v16 = vpop.permute.xlu0 %621 }
 0x211   : > { %17468 = vst [vmem:[#allocation64_spill] sm:$0xff] %v11071_v22  ;;  %v17470_v11 = vcvt.s32.f32 %v10939_v18  ;;  %v2699_v63 = vor.u32 %v10967_v61, %v10935_v45  ;;  %v2913_v13 = vsel %vm2911_vm2, %v2901_v2, 2102212464  ;;  %v2990_v25 = vadd.s32 1, %v8029_v10 }
 0x212   : > { %v2528_v58 = vclz %v8010_v17  ;;  %v11088_v32 = vadd.s32 %v2623_v60, %v2619_v62  ;;  %v11092_v48 = vadd.f32 %v10849_v4, %v10994_v35  ;;  %v2892_v18 = vshrl.u32 %v17387_v19, %v11000_v14 }
 0x213   : > { %v11082_v33 = vmul.f32 %v17470_v11, %v17469_v3  ;;  %v17472_v40 = vxor.u32 2147483648, %v10883_v24  ;;  %vm2783_vm13 = vcmp.gt.s32.totalorder %v2782_v57, 0  ;;  %v2987_v61 = vand.u32 8388607, %v17043_v41 }
 0x214   : > { %17471 = vst [vmem:[#allocation65_spill] sm:$0xff] %v11092_v48  ;;  %vm2991_vm8 = vcmp.gt.s32.totalorder %v2990_v25, 0  ;;  %v11108_v4 = vsel %vm17053_vm14, %v11071_v22, 920167782  ;;  %v2912_v2 = vsel %vm2908_vm9, %v2892_v18, %v2895_v34  ;;  %v2914_v35 = vsel %vm2910_vm7, %v2898_v20, %v2913_v13 }
 0x215   : > { %v11101_v45 = vsel %vm17054_vm12, %v17472_v40, %v10883_v24  ;;  %17474 = vst [vmem:[#allocation67_spill] sm:$0xff] %v11108_v4  ;;  %v2992_v14 = vsel %vm2991_vm8, %v2990_v25, 0  ;;  %v11117_v9 = vsel %vm17053_vm14, %v2699_v63, 1326507024  ;;  %v11120_v39 = vmul.f32 %v10548_v51, %v622_v16 }
 0x216   : > { %17473 = vst [vmem:[#allocation66_spill] sm:$0xff] %v11101_v45  ;;  %17475 = vst [vmem:[#allocation68_spill] sm:$0xff] %v11117_v9  ;;  %v2994_v17 = vand.u32 31, %v2992_v14  ;;  %v11122_v60 = vadd.s32 4294967294, %v2528_v58  ;;  %v2625_v28 = vadd.s32 536870912, %v11088_v32  ;;  %v11125_v26 = vsel %vm2783_vm13, %v2782_v57, 0 }
 0x217   : > { %17476 = vst [vmem:[#allocation69_spill] sm:$0xff] %v11120_v39  ;;  %v2915_v20 = vsel %vm2909_vm11, %v2912_v2, %v2914_v35  ;;  %v2934_v10 = vadd.s32 1, %v11066_v5  ;;  %v2988_v62 = vor.u32 8388608, %v2987_v61  ;;  %vm2933_vm9 = vc.u32 %v11076_v38, %v11065_v50  ;;  %v17478_v35 = vld [vmem:[#allocation17_spill] sm:$0xff] }
 0x218   : > { %v2995_v42 = vsub.s32 32, %v2994_v17  ;;  %v11133_v51 = vshrl.u32 %v2992_v14, 5  ;;  %v2997_v3 = vshll.u32 %v17387_v19, %v2994_v17  ;;  %v3000_v11 = vshll.u32 %v17389_v43, %v2994_v17 }
 0x219   : > { %v3003_v6 = vshll.u32 %v17390_v37, %v2994_v17  ;;  %v3006_v13 = vshll.u32 %v17395_v21, %v2994_v17  ;;  %v3009_v16 = vshll.u32 %v17397_v31, %v2994_v17  ;;  %v11145_v40 = vshrl.u32 %v2625_v28, 30  ;;  %v17479_v17 = vld [vmem:[#allocation25_spill] sm:$0xff] }
 0x21a   : > { %v2998_v57 = vshrl.u32 %v17389_v43, %v2995_v42  ;;  %v3001_v63 = vshrl.u32 %v17390_v37, %v2995_v42  ;;  %v3004_v25 = vshrl.u32 %v17395_v21, %v2995_v42  ;;  %v3007_v58 = vshrl.u32 %v17397_v31, %v2995_v42 }
 0x21b   : > { %v3010_v18 = vshrl.u32 %v17388_v8, %v2995_v42  ;;  %17477 = vst [vmem:[#allocation70_spill] sm:$0xff] %v11145_v40  ;;  %v17045_v14 = vand.u32 2147483647, %v17478_v35  ;;  %v2931_v41 = vmul.u32 %v11055_v52, %v2915_v20  ;;  %v2935_v9 = vsel %vm2933_vm9, %v2934_v10, %v11066_v5 }
 0x21c   : > { %v2999_v61 = vor.u32 %v2998_v57, %v2997_v3  ;;  %v3002_v2 = vor.u32 %v3001_v63, %v3000_v11  ;;  %v3005_v24 = vor.u32 %v3004_v25, %v3003_v6  ;;  %v3008_v34 = vor.u32 %v3007_v58, %v3006_v13  ;;  %v17480_v6 = vld [vmem:[#allocation28_spill] sm:$0xff] }
 0x21d   : > { %v3011_v22 = vor.u32 %v3010_v18, %v3009_v16  ;;  %vm3012_vm11 = vcmp.lt.s32.totalorder %v11133_v51, 1  ;;  %vm3015_vm2 = vcmp.lt.s32.totalorder %v11133_v51, 4  ;;  %v709_v28 = vshll.u32 %v17387_v19, %v17479_v17 }
 0x21e   : > { %vm3014_vm7 = vcmp.lt.s32.totalorder %v11133_v51, 3  ;;  %v3020_v52 = vsel %vm3012_vm11, %v2999_v61, %v3002_v2  ;;  %v3021_v20 = vsel %vm3015_vm2, %v3008_v34, 920167782  ;;  %v11162_v3 = vshll.u32 %v2988_v62, 8 }
 0x21f   : > { %vm3013_vm13 = vcmp.lt.s32.totalorder %v11133_v51, 2  ;;  %v3022_v5 = vsel %vm3014_vm7, %v3005_v24, %v3021_v20  ;;  %v3024_v10 = vsel %vm3012_vm11, %v3002_v2, %v3005_v24  ;;  %v3025_v11 = vsel %vm3015_vm2, %v3011_v22, 1326507024 }
 0x220   : > { %v11171_v57 = vadd.s32 %v2935_v9, %v2931_v41  ;;  %v3023_v63 = vsel %vm3013_vm13, %v3020_v52, %v3022_v5  ;;  %v3026_v62 = vsel %vm3014_vm7, %v3008_v34, %v3025_v11  ;;  %v710_v13 = vshrl.u32 %v17389_v43, %v17480_v6 }
 0x221   : > { %vm8012_vm8 = vcmp.lt.s32.totalorder %v11122_v60, 0  ;;  %v3027_v25 = vsel %vm3013_vm13, %v3024_v10, %v3026_v62  ;;  %v11183_v58 = vmul.u32.u64.low %v11162_v3, %v3023_v63  ;;  %v11184_v16 = vmul.u32.u64.high %v11162_v3, %v3023_v63, %v11183_v58 }
 0x222   : > { %v712_v41 = vshll.u32 %v17389_v43, %v17479_v17  ;;  %v2996_v22 = vshrl.u32 %v17387_v19, %v2995_v42  ;;  %v3017_v9 = vsel %vm3015_vm2, %v3005_v24, 2102212464  ;;  %v713_v52 = vshrl.u32 %v17390_v37, %v17480_v6 }
 0x223   : > { %v11193_v34 = vmul.u32.u64.low %v11162_v3, %v3027_v25  ;;  %v11194_v18 = vmul.u32.u64.high %v11162_v3, %v3027_v25, %v11193_v34  ;;  %v715_v20 = vshll.u32 %v17390_v37, %v17479_v17  ;;  %v716_v5 = vshrl.u32 %v17395_v21, %v17480_v6 }
 0x224   : > { %v718_v10 = vshll.u32 %v17395_v21, %v17479_v17  ;;  %v699_v42 = vand.u32 8388607, %v17045_v14  ;;  %v719_v24 = vshrl.u32 %v17397_v31, %v17480_v6  ;;  %v721_v11 = vshll.u32 %v17397_v31, %v17479_v17  ;;  %v17481_v17 = vld [vmem:[#allocation40_spill] sm:$0xff] }
 0x225   : > { %v722_v63 = vshrl.u32 %v17388_v8, %v17480_v6  ;;  %v2937_v62 = vadd.s32 536870912, %v11171_v57  ;;  %v3016_v25 = vsel %vm3012_vm11, %v2996_v22, %v2999_v61  ;;  %v3018_v34 = vsel %vm3014_vm7, %v3002_v2, %v3017_v9 }
 0x226   : > { %v708_v14 = vshrl.u32 %v17387_v19, %v17480_v6  ;;  %v3038_v4 = vadd.s32 1, %v11184_v16  ;;  %v711_v27 = vor.u32 %v710_v13, %v709_v28  ;;  %v714_v39 = vor.u32 %v713_v52, %v712_v41 }
 0x227   : > { %v720_v45 = vor.u32 %v719_v24, %v718_v10  ;;  %vm17081_vm9 = vcmp.lt.s32.totalorder %v17481_v17, 0  ;;  %vm3037_vm2 = vc.u32 %v11194_v18, %v11183_v58  ;;  %v717_v56 = vor.u32 %v716_v5, %v715_v20 }
 0x228   : > { %v723_v36 = vor.u32 %v722_v63, %v721_v11  ;;  %vm724_vm11 = vcmp.lt.s32.totalorder %v17482_v59, 1  ;;  %v2627_v61 = vshll.u32 %v11145_v40, 30  ;;  %v700_v2 = vor.u32 8388608, %v699_v42 }
 0x229   : > { %vm726_vm7 = vcmp.lt.s32.totalorder %v17482_v59, 3  ;;  %vm727_vm14 = vcmp.lt.s32.totalorder %v17482_v59, 4  ;;  %v11227_v6 = vshrl.u32 %v2937_v62, 30  ;;  %v3019_v28 = vsel %vm3013_vm13, %v3016_v25, %v3018_v34 }
 0x22a   : > { %v729_v13 = vsel %vm727_vm14, %v717_v56, 2102212464  ;;  %v733_v41 = vsel %vm727_vm14, %v720_v45, 920167782  ;;  %v3039_v22 = vsel %vm3037_vm2, %v3038_v4, %v11184_v16  ;;  %vm725_vm12 = vcmp.lt.s32.totalorder %v17482_v59, 2 }
 0x22b   : > { %17483 = vst [vmem:[#allocation17_spill] sm:$0xff] %v11227_v6  ;;  %v728_v9 = vsel %vm724_vm11, %v708_v14, %v711_v27  ;;  %v732_v52 = vsel %vm724_vm11, %v711_v27, %v714_v39  ;;  %v730_v20 = vsel %vm726_vm7, %v714_v39, %v729_v13  ;;  %v734_v5 = vsel %vm726_vm7, %v717_v56, %v733_v41 }
 0x22c   : > { %v736_v10 = vsel %vm724_vm11, %v714_v39, %v717_v56  ;;  %v737_v42 = vsel %vm727_vm14, %v723_v36, 1326507024  ;;  %v11240_v51 = vsel %vm8012_vm8, 0, %v11122_v60  ;;  %v11243_v24 = vand.u32 31, %v11125_v26 }
 0x22d   : > { %v17485_v4 = vand.u32 2139095040, %v11092_v48  ;;  %v3035_v27 = vmul.u32 %v11162_v3, %v3019_v28  ;;  %v11249_v16 = vsub.s32 %v11088_v32, %v2627_v61  ;;  %v735_v56 = vsel %vm725_vm12, %v732_v52, %v734_v5 }
 0x22e   : > { %17484 = vst [vmem:[#allocation25_spill] sm:$0xff] %v11243_v24  ;;  %v738_v36 = vsel %vm726_vm7, %v720_v45, %v737_v42  ;;  %v740_v39 = vshll.u32 %v700_v2, 8  ;;  %v2939_v60 = vshll.u32 %v11227_v6, 30  ;;  %v731_v63 = vsel %vm725_vm12, %v728_v9, %v730_v20 }
 0x22f   : > { %v3088_v14 = vshrl.u32 %v17485_v4, 23  ;;  %v11256_v11 = vadd.s32 %v3039_v22, %v3035_v27  ;;  %v739_v3 = vsel %vm725_vm12, %v736_v10, %v738_v36  ;;  %v17486_v45 = vxor.u32 2147483648, %v11082_v33  ;;  %v17490_v4 = vld [vmem:[#allocation5_spill] sm:$0xff] }
 0x230   : > { %v11262_v62 = vmul.u32.u64.low %v740_v39, %v739_v3  ;;  %v11263_v32 = vmul.u32.u64.high %v740_v39, %v739_v3, %v11262_v62  ;;  %v11265_v25 = vmul.u32.u64.low %v740_v39, %v735_v56  ;;  %v11266_v34 = vmul.u32.u64.high %v740_v39, %v735_v56, %v11265_v25  ;;  %v17491_v3 = vld [vmem:[#allocation15_spill] sm:$0xff] }
 0x231   : > { %v11274_v61 = vsel %vm17081_vm9, %v17486_v45, %v11082_v33  ;;  %v2516_v2 = vadd.s32 %v10775_v12, %v10781_v0  ;;  %v11279_v59 = vsub.s32 32, %v11243_v24  ;;  %v8033_v28 = vadd.s32 4294967169, %v3088_v14 }
 0x232   : > { %17487 = vst [vmem:[#allocation28_spill] sm:$0xff] %v11274_v61  ;;  %v2532_v13 = vsub.s32 32, %v11240_v51  ;;  %v2536_v41 = vsub.s32 4294967266, %v11240_v51  ;;  %v2630_v22 = vsub.s32 0, %v11249_v16  ;;  %v11285_v9 = vshrl.u32 %v11125_v26, 5 }
 0x233   : > { %17488 = vst [vmem:[#allocation27_spill] sm:$0xff] %v11279_v59  ;;  %v2798_v33 = vshll.u32 %v17395_v21, %v11243_v24  ;;  %v11291_v52 = vshll.u32 %v17397_v31, %v11243_v24  ;;  %v11294_v0 = vsub.s32 %v11171_v57, %v2939_v60  ;;  %v747_v12 = vmul.u32 %v740_v39, %v731_v63 }
 0x234   : > { %17489 = vst [vmem:[#allocation71_spill] sm:$0xff] %v11285_v9  ;;  %v3041_v5 = vadd.s32 536870912, %v11256_v11  ;;  %vm749_vm14 = vc.u32 %v11263_v32, %v11265_v25  ;;  %v750_v26 = vadd.s32 1, %v11266_v34  ;;  %v2799_v10 = vshrl.u32 %v17397_v31, %v11279_v59 }
 0x235   : > { %v11306_v42 = vshrl.u32 %v17388_v8, %v11279_v59  ;;  %v3094_v57 = vadd.s32 1, %v8033_v28  ;;  %v17063_v14 = vand.u32 2147483647, %v17490_v4  ;;  %v11309_v27 = vshrl.u32 %v2516_v2, %v2532_v13  ;;  %v17493_v13 = vld [vmem:[#allocation12_spill] sm:$0xff] }
 0x236   : > { %v11311_v56 = vadd.s32 127, %v2536_v41  ;;  %v8014_v36 = vmin.u32 %v2630_v22, %v11249_v16  ;;  %v751_v39 = vsel %vm749_vm14, %v750_v26, %v11266_v34  ;;  %v2942_v60 = vsub.s32 0, %v11294_v0 }
 0x237   : > { %v752_v63 = vadd.s32 %v751_v39, %v747_v12  ;;  %v814_v62 = vshrl.u32 %v17389_v43, %v17491_v3  ;;  %v817_v45 = vshrl.u32 %v17390_v37, %v17491_v3  ;;  %v11320_v28 = vshrl.u32 %v3041_v5, 30 }
 0x238   : > { %v820_v2 = vshrl.u32 %v17395_v21, %v17491_v3  ;;  %v822_v41 = vshll.u32 %v17395_v21, %v17493_v13  ;;  %v823_v34 = vshrl.u32 %v17397_v31, %v17491_v3  ;;  %v803_v12 = vand.u32 8388607, %v17063_v14 }
 0x239   : > { %17492 = vst [vmem:[#allocation5_spill] sm:$0xff] %v11320_v28  ;;  %v753_v22 = vadd.s32 536870912, %v752_v63  ;;  %v813_v26 = vshll.u32 %v17387_v19, %v17493_v13  ;;  %v816_v5 = vshll.u32 %v17389_v43, %v17493_v13  ;;  %v819_v39 = vshll.u32 %v17390_v37, %v17493_v13 }
 0x23a   : > { %v824_v20 = vor.u32 %v823_v34, %v822_v41  ;;  %v825_v48 = vshll.u32 %v17397_v31, %v17493_v13  ;;  %v826_v6 = vshrl.u32 %v17388_v8, %v17491_v3  ;;  %v2632_v24 = vclz %v8014_v36  ;;  %v17495_v13 = vld [vmem:[#allocation11_spill] sm:$0xff] }
 0x23b   : > { %v11340_v59 = vshrl.u32 %v753_v22, 30  ;;  %v815_v14 = vor.u32 %v814_v62, %v813_v26  ;;  %v818_v40 = vor.u32 %v817_v45, %v816_v5  ;;  %v11342_v61 = vor.u32 %v2799_v10, %v2798_v33 }
 0x23c   : > { %v3043_v17 = vshll.u32 %v11320_v28, 30  ;;  %v821_v47 = vor.u32 %v820_v2, %v819_v39  ;;  %v827_v23 = vor.u32 %v826_v6, %v825_v48  ;;  %vm3095_vm12 = vcmp.gt.s32.totalorder %v3094_v57, 0 }
 0x23d   : > { %17494 = vst [vmem:[#allocation15_spill] sm:$0xff] %v11342_v61  ;;  %v8026_v41 = vmin.u32 %v2942_v60, %v11294_v0  ;;  %v755_v34 = vshll.u32 %v11340_v59, 30  ;;  %vm831_vm13 = vcmp.lt.s32.totalorder %v17495_v13, 4  ;;  %v2538_v8 = vshll.u32 %v11311_v56, 23 }
 0x23e   : > { %v804_v36 = vor.u32 8388608, %v803_v12  ;;  %vm828_vm8 = vcmp.lt.s32.totalorder %v17495_v13, 1  ;;  %v837_v33 = vsel %vm831_vm13, %v824_v20, 920167782  ;;  %v8015_v10 = vadd.s32 4294967294, %v2632_v24 }
 0x23f   : > { %v11352_v62 = vsub.s32 %v752_v63, %v755_v34  ;;  %vm830_vm2 = vcmp.lt.s32.totalorder %v17495_v13, 3  ;;  %v836_v48 = vsel %vm828_vm8, %v815_v14, %v818_v40  ;;  %v11358_v6 = vsub.s32 %v11256_v11, %v3043_v17 }
 0x240   : > { %v838_v56 = vsel %vm830_vm2, %v821_v47, %v837_v33  ;;  %v840_v60 = vsel %vm828_vm8, %v818_v40, %v821_v47  ;;  %v841_v45 = vsel %vm831_vm13, %v827_v23, 1326507024  ;;  %v2944_v24 = vclz %v8026_v41 }
 0x241   : > { %v758_v63 = vsub.s32 0, %v11352_v62  ;;  %v812_v2 = vshrl.u32 %v17387_v19, %v17491_v3  ;;  %vm829_vm11 = vcmp.lt.s32.totalorder %v17495_v13, 2  ;;  %v833_v17 = vsel %vm831_vm13, %v821_v47, 2102212464 }
 0x242   : > { %v839_v11 = vsel %vm829_vm11, %v836_v48, %v838_v56  ;;  %v842_v22 = vsel %vm830_vm2, %v824_v20, %v841_v45  ;;  %v844_v12 = vshll.u32 %v804_v36, 8  ;;  %vm8016_vm7 = vcmp.lt.s32.totalorder %v8015_v10, 0 }
 0x243   : > { %v3096_v23 = vsel %vm3095_vm12, %v3094_v57, 0  ;;  %v7942_v26 = vmin.u32 %v758_v63, %v11352_v62  ;;  %v843_v3 = vsel %vm829_vm11, %v840_v60, %v842_v22  ;;  %v3046_v5 = vsub.s32 0, %v11358_v6 }
 0x244   : > { %v832_v47 = vsel %vm828_vm8, %v812_v2, %v815_v14  ;;  %v11383_v39 = vmul.u32.u64.low %v844_v12, %v843_v3  ;;  %v11384_v41 = vmul.u32.u64.high %v844_v12, %v843_v3, %v11383_v39  ;;  %v834_v20 = vsel %vm830_vm2, %v818_v40, %v833_v17 }
 0x245   : > { %v760_v34 = vclz %v7942_v26  ;;  %v11388_v36 = vmul.u32.u64.low %v844_v12, %v839_v11  ;;  %v11389_v33 = vmul.u32.u64.high %v844_v12, %v839_v11, %v11388_v36  ;;  %v2620_v57 = vadd.s32 %v10989_v54, %v10998_v1 }
 0x246   : > { %v2635_v48 = vsel %vm8016_vm7, 0, %v8015_v10  ;;  %vm17079_vm14 = vcmp.lt.s32.totalorder %v11285_v9, 4  ;;  %v8027_v56 = vadd.s32 4294967294, %v2944_v24  ;;  %v17496_v14 = vshll.u32 %v10978_v30, %v11240_v51 }
 0x247   : > { %v2803_v40 = vor.u32 %v11306_v42, %v11291_v52  ;;  %v11406_v45 = vsel %vm17079_vm14, %v11342_v61, 920167782  ;;  %v7943_v63 = vadd.s32 4294967294, %v760_v34  ;;  %v11408_v54 = vor.u32 4788187, %v2538_v8 }
 0x248   : > { %v11399_v60 = vor.u32 %v11309_v27, %v17496_v14  ;;  %17497 = vst [vmem:[#allocation12_spill] sm:$0xff] %v11406_v45  ;;  %v11410_v1 = vand.u32 31, %v3096_v23  ;;  %v8030_v10 = vmin.u32 %v3046_v5, %v11358_v6  ;;  %v835_v30 = vsel %vm829_vm11, %v832_v47, %v834_v20 }
 0x249   : > { %v2636_v51 = vsub.s32 32, %v2635_v48  ;;  %vm7944_vm12 = vcmp.lt.s32.totalorder %v7943_v63, 0  ;;  %vm853_vm13 = vc.u32 %v11384_v41, %v11388_v36  ;;  %v854_v52 = vadd.s32 1, %v11389_v33 }
 0x24a   : > { %17498 = vst [vmem:[#allocation11_spill] sm:$0xff] %v11410_v1  ;;  %v2640_v42 = vsub.s32 4294967266, %v2635_v48  ;;  %vm8028_vm8 = vcmp.lt.s32.totalorder %v8027_v56, 0  ;;  %v748_v8 = vadd.s32 %v11265_v25, %v11263_v32  ;;  %v763_v27 = vsel %vm7944_vm12, 0, %v7943_v63 }
 0x24b   : > { %v764_v24 = vsub.s32 32, %v763_v27  ;;  %v765_v2 = vshll.u32 %v11352_v62, %v763_v27  ;;  %v768_v17 = vsub.s32 4294967266, %v763_v27  ;;  %v851_v11 = vmul.u32 %v844_v12, %v835_v30  ;;  %v386_v30 = vpop.permute.xlu1 %385 }
 0x24c   : > { %v11424_v22 = vsel %vm17079_vm14, %v2803_v40, 1326507024  ;;  %v3048_v26 = vclz %v8030_v10  ;;  %v855_v3 = vsel %vm853_vm13, %v854_v52, %v11389_v33  ;;  %v2947_v5 = vsel %vm8028_vm8, 0, %v8027_v56 }
 0x24d   : > { %17499 = vst [vmem:[#allocation72_spill] sm:$0xff] %v11424_v22  ;;  %v766_v47 = vshrl.u32 %v748_v8, %v764_v24  ;;  %v769_v39 = vadd.s32 127, %v768_v17  ;;  %v856_v34 = vadd.s32 %v855_v3, %v851_v11  ;;  %v2641_v25 = vadd.s32 127, %v2640_v42 }
 0x24e   : > { %v11428_v20 = vshrl.u32 %v3096_v23, 5  ;;  %v11431_v62 = vsub.s32 32, %v11410_v1  ;;  %v2638_v12 = vshrl.u32 %v2620_v57, %v2636_v51  ;;  %v2637_v10 = vshll.u32 %v11249_v16, %v2635_v48  ;;  %v11451_v16 = vld [vmem:[%s16918_s1] ss:$0 sm:$0xff]  ;;  %v17527_v23 = vld [vmem:[#allocation8_spill] sm:$0xff] }
 0x24f   : > { %v767_v14 = vor.u32 %v766_v47, %v765_v2  ;;  %v770_v63 = vshll.u32 %v769_v39, 23  ;;  %v857_v40 = vadd.s32 536870912, %v856_v34  ;;  %v11436_v33 = vshll.u32 %v17395_v21, %v11410_v1  ;;  %v17507_v39 = vld [vmem:[#allocation7_spill] sm:$0xff] }
 0x250   : > { %17500 = vst [vmem:[#allocation73_spill] sm:$0xff] %v11428_v20  ;;  %17501 = vst [vmem:[#allocation74_spill] sm:$0xff] %v11431_v62  ;;  %v2952_v56 = vsub.s32 4294967266, %v2947_v5  ;;  %v8031_v52 = vadd.s32 4294967294, %v3048_v26  ;;  %v17503_v42 = vand.u32 2147483647, %v17478_v35  ;;  %v451_v48 = vmul.f32 %v11451_v16, %v386_v30 }
 0x251   : > { %17502 = vst [vmem:[#allocation75_spill] sm:$0xff] %v11436_v33  ;;  %v771_v8 = vor.u32 4788187, %v770_v63  ;;  %v778_v57 = vsub.s32 4, %v11340_v59  ;;  %v11445_v51 = vshrl.u32 %v857_v40, 30  ;;  %v2642_v27 = vshll.u32 %v2641_v25, 23 }
 0x252   : > { %vm11440_vm2 = vcmp.le.f32.partialorder %v17503_v42, 0.7853982  ;;  %v2948_v24 = vsub.s32 32, %v2947_v5  ;;  %vm694_vm11 = vcmp.lt.s32.totalorder %v17478_v35, 0  ;;  %v11454_v2 = vor.u32 %v2638_v12, %v2637_v10  ;;  %v17508_v12 = vld [vmem:[#allocation2_spill] sm:$0xff] }
 0x253   : > { %v772_v17 = vand.u32 2147483647, %v771_v8  ;;  %v774_v11 = vcvt.s32.f32 %v767_v14  ;;  %v859_v26 = vshll.u32 %v11445_v51, 30  ;;  %v2932_v3 = vadd.s32 %v11065_v50, %v11076_v38  ;;  %v11476_v38 = vld [vmem:[%s16919_s2] ss:$0 sm:$0xff] }
 0x254   : > { %17506 = vst [vmem:[#allocation76_spill] sm:$0xff] %v11454_v2  ;;  %v2953_v47 = vadd.s32 127, %v2952_v56  ;;  %vm8032_vm7 = vcmp.lt.s32.totalorder %v8031_v52, 0  ;;  %v986_v25 = vsub.s32 4, %v17507_v39  ;;  %v779_v40 = vsel %vm694_vm11, %v778_v57, %v11340_v59  ;;  %v17513_v8 = vld [vmem:[#allocation26_spill] sm:$0xff] }
 0x255   : > { %v775_v63 = vmul.f32 %v774_v11, %v772_v17  ;;  %v11463_v42 = vsub.s32 %v856_v34, %v859_v26  ;;  %v17509_v30 = vand.u32 2147483647, %v17508_v12  ;;  %v11471_v10 = vor.u32 4788187, %v2642_v27 }
 0x256   : > { %v2950_v50 = vshrl.u32 %v2932_v3, %v2948_v24  ;;  %v487_v56 = vadd.f32 %v11476_v38, %v451_v48  ;;  %v2949_v34 = vshll.u32 %v11294_v0, %v2947_v5  ;;  %v11486_v57 = vadd.s32 %v11183_v58, %v11194_v18  ;;  %v17514_v0 = vld [vmem:[#allocation6_spill] sm:$0xff]  ;;  %v17518_v18 = vld [vmem:[#allocation21_spill] sm:$0xff]  ;;  %v17531_v58 = vld [vmem:[#allocation44_spill] sm:$0xff] }
 0x257   : > { %vm11467_vm12 = vcmp.le.f32.partialorder %v17509_v30, 0.7853982  ;;  %17512 = vst [vmem:[#allocation7_spill] sm:$0xff] %v11471_v10  ;;  %v11488_v27 = vsel %vm8032_vm7, 0, %v8031_v52  ;;  %v862_v24 = vsub.s32 0, %v11463_v42  ;;  %v2954_v17 = vshll.u32 %v2953_v47, 23 }
 0x258   : > { %v988_v59 = vsel %vm11467_vm12, %v17508_v12, %v17513_v8  ;;  %v776_v11 = vxor.u32 2147483648, %v775_v63  ;;  %v781_v48 = vsel %vm11440_vm2, 0, %v779_v40  ;;  %v987_v26 = vsel %vm902_vm1, %v986_v25, %v17507_v39  ;;  %v17521_v8 = vld [vmem:[#allocation33_spill] sm:$0xff]  ;;  %v17545_v10 = vld [vmem:[#allocation14_spill] sm:$0xff] }
 0x259   : > { %v7946_v3 = vmin.u32 %v862_v24, %v11463_v42  ;;  %8667 = vcosq.f32 %v988_v59  ;;  %v17515_v5 = vand.u32 2147483647, %v17514_v0  ;;  %v1090_v52 = vsub.s32 4, %v17518_v18 }
 0x25a   : > { %v11504_v47 = vor.u32 %v2950_v50, %v2949_v34  ;;  %v3056_v30 = vsub.s32 4294967266, %v11488_v27  ;;  %v11508_v40 = vadd.f32 %v10856_v29, %v487_v56  ;;  %v785_v25 = vadd.s32 3, %v781_v48 }
 0x25b   : > { %vm11499_vm13 = vcmp.le.f32.partialorder %v17515_v5, 0.7853982  ;;  %v864_v24 = vclz %v7946_v3  ;;  %v989_v5 = vsel %vm11467_vm12, 0, %v987_v26  ;;  %8669 = vsinq.f32 %v988_v59  ;;  %v396_v59 = vpop.permute.xlu1 %395 }
 0x25c   : > { %17519 = vst [vmem:[#allocation2_spill] sm:$0xff] %v11504_v47  ;;  %17520 = vst [vmem:[#allocation26_spill] sm:$0xff] %v11508_v40  ;;  %v1092_v39 = vsel %vm11499_vm13, %v17514_v0, %v17521_v8  ;;  %v11516_v13 = vor.u32 4788187, %v2954_v17  ;;  %v777_v50 = vsel %vm694_vm11, %v776_v11, %v775_v63  ;;  %v17523_v34 = vand.u32 2147483647, %v17490_v4 }
 0x25d   : > { %vm798_vm8 = vcmp.lt.s32.totalorder %v17490_v4, 0  ;;  %v7947_v56 = vadd.s32 4294967294, %v864_v24  ;;  %v882_v48 = vsub.s32 4, %v11445_v51  ;;  %v1091_v14 = vsel %vm1006_vm6, %v1090_v52, %v17518_v18  ;;  %v17526_v24 = vld [vmem:[#allocation23_spill] sm:$0xff] }
 0x25e   : > { %17522 = vst [vmem:[#allocation6_spill] sm:$0xff] %v11516_v13  ;;  %vm11522_vm1 = vcmp.le.f32.partialorder %v17523_v34, 0.7853982  ;;  %8671 = vsinq.f32 %v1092_v39  ;;  %v3191_v63 = vand.u32 2139095040, %v11508_v40  ;;  %v993_v17 = vadd.s32 3, %v989_v5 }
 0x25f   : > { %8673 = vcosq.f32 %v1092_v39  ;;  %v11533_v11 = vadd.s32 127, %v3056_v30  ;;  %v780_v26 = vsel %vm11440_vm2, %v17478_v35, %v777_v50  ;;  %v11538_v3 = vand.u32 3, %v785_v25 }
 0x260   : > { %vm7948_vm11 = vcmp.lt.s32.totalorder %v7947_v56, 0  ;;  %v852_v8 = vadd.s32 %v11388_v36, %v11384_v41  ;;  %v1093_v52 = vsel %vm11499_vm13, 0, %v1091_v14  ;;  %v1194_v34 = vsub.s32 4, %v17526_v24 }
 0x261   : > { %v867_v18 = vsel %vm7948_vm11, 0, %v7947_v56  ;;  %v883_v30 = vsel %vm798_vm8, %v882_v48, %v11445_v51  ;;  %v17528_v50 = vand.u32 2147483647, %v17527_v23  ;;  %8675 = vcosq.f32 %v780_v26 }
 0x262   : > { %v868_v5 = vsub.s32 32, %v867_v18  ;;  %v872_v39 = vsub.s32 4294967266, %v867_v18  ;;  %v3192_v41 = vshrl.u32 %v3191_v63, 23  ;;  %v11554_v36 = vand.u32 3, %v993_v17 }
 0x263   : > { %vm11550_vm6 = vcmp.le.f32.partialorder %v17528_v50, 0.7853982  ;;  %v8668_v14 = vpop.eup %8667  ;;  %8677 = vsinq.f32 %v780_v26  ;;  %v869_v32 = vshll.u32 %v11463_v42, %v867_v18  ;;  %v885_v50 = vsel %vm11522_vm1, 0, %v883_v30 }
 0x264   : > { %v1196_v56 = vsel %vm11550_vm6, %v17527_v23, %v17531_v58  ;;  %v870_v51 = vshrl.u32 %v852_v8, %v868_v5  ;;  %v873_v48 = vadd.s32 127, %v872_v39  ;;  %v1097_v40 = vadd.s32 3, %v1093_v52  ;;  %v17532_v58 = vld [vmem:[#allocation3_spill] sm:$0xff]  ;;  %v17536_v5 = vld [vmem:[#allocation13_spill] sm:$0xff] }
 0x265   : > { %v1195_v63 = vsel %vm1110_vm15, %v1194_v34, %v17526_v24  ;;  %8679 = vcosq.f32 %v1196_v56  ;;  %v8670_v17 = vpop.eup %8669  ;;  %v17533_v26 = vand.u32 2147483647, %v17532_v58  ;;  %v1000_v8 = vxor.u32 2147483648, %v8668_v14  ;;  %v17537_v39 = vld [vmem:[#allocation31_spill] sm:$0xff] }
 0x266   : > { %v871_v28 = vor.u32 %v870_v51, %v869_v32  ;;  %v874_v61 = vshll.u32 %v873_v48, 23  ;;  %8681 = vsinq.f32 %v1196_v56  ;;  %v453_v18 = vmul.f32 %v11451_v16, %v396_v59 }
 0x267   : > { %vm11568_vm2 = vcmp.le.f32.partialorder %v17533_v26, 0.7853982  ;;  %v1298_v52 = vsub.s32 4, %v17536_v5  ;;  %v889_v30 = vadd.s32 3, %v885_v50  ;;  %v11578_v56 = vadd.s32 4294967169, %v3192_v41 }
 0x268   : > { %v1300_v24 = vsel %vm11568_vm2, %v17532_v58, %v17537_v39  ;;  %v8672_v34 = vpop.eup %8671  ;;  %v875_v32 = vor.u32 4788187, %v874_v61  ;;  %v997_v48 = vxor.u32 2147483648, %v8670_v17  ;;  %vm999_vm15 = vcmp.eq.s32.totalorder %v11554_v36, 2 }
 0x269   : > { %8683 = vcosq.f32 %v1300_v24  ;;  %v8674_v51 = vpop.eup %8673  ;;  %v1098_v26 = vand.u32 3, %v1097_v40  ;;  %v1197_v59 = vsel %vm11550_vm6, 0, %v1195_v63  ;;  %v878_v45 = vcvt.s32.f32 %v871_v28  ;;  %v17538_v63 = vld [vmem:[#allocation4_spill] sm:$0xff] }
 0x26a   : > { %v876_v22 = vand.u32 2147483647, %v875_v32  ;;  %v1299_v39 = vsel %vm1214_vm4, %v1298_v52, %v17536_v5  ;;  %8685 = vsinq.f32 %v1300_v24  ;;  %vm791_vm7 = vcmp.eq.s32.totalorder %v11538_v3, 2  ;;  %v17543_v24 = vld [vmem:[#allocation32_spill] sm:$0xff] }
 0x26b   : > { %vm996_vm12 = vcmp.eq.s32.totalorder %v11554_v36, 0  ;;  %v1001_v61 = vsel %vm999_vm15, %v1000_v8, %v8670_v17  ;;  %v1101_v41 = vxor.u32 2147483648, %v8672_v34  ;;  %v11589_v50 = vadd.f32 %v11476_v38, %v453_v18  ;;  %v8676_v5 = vpop.eup %8675  ;;  %v17542_v8 = vld [vmem:[#allocation18_spill] sm:$0xff] }
 0x26c   : > { %v879_v40 = vmul.f32 %v878_v45, %v876_v22  ;;  %v11591_v9 = vand.u32 3, %v889_v30  ;;  %v1104_v25 = vxor.u32 2147483648, %v8674_v51  ;;  %v17539_v28 = vand.u32 2147483647, %v17538_v63 }
 0x26d   : > { %vm788_vm4 = vcmp.eq.s32.totalorder %v11538_v3, 0  ;;  %v1201_v52 = vadd.s32 3, %v1197_v59  ;;  %v1301_v17 = vsel %vm11568_vm2, 0, %v1299_v39  ;;  %v1402_v18 = vsub.s32 4, %v17542_v8  ;;  %v8678_v22 = vpop.eup %8677  ;;  %v17544_v39 = vld [vmem:[#allocation24_spill] sm:$0xff] }
 0x26e   : > { %vm11595_vm13 = vcmp.le.f32.partialorder %v17539_v28, 0.7853982  ;;  %v880_v30 = vxor.u32 2147483648, %v879_v40  ;;  %vm995_vm11 = vcmp.lt.s32.totalorder %v11554_v36, 2  ;;  %v998_v28 = vsel %vm996_vm12, %v8668_v14, %v997_v48 }
 0x26f   : > { %v1404_v45 = vsel %vm11595_vm13, %v17538_v63, %v17543_v24  ;;  %vm1099_vm6 = vcmp.lt.s32.totalorder %v1098_v26, 2  ;;  %vm1100_vm15 = vcmp.eq.s32.totalorder %v1098_v26, 0  ;;  %v8680_v59 = vpop.eup %8679  ;;  %vm1096_vm14 = vweird.f32 %v17514_v0 }
 0x270   : > { %v1102_v42 = vsel %vm1100_vm15, %v8674_v51, %v1101_v41  ;;  %vm1103_vm2 = vcmp.eq.s32.totalorder %v1098_v26, 2  ;;  %8687 = vcosq.f32 %v1404_v45  ;;  %v1506_v33 = vsub.s32 4, %v17544_v39  ;;  %v8682_v20 = vpop.eup %8681 }
 0x271   : > { %vm787_vm9 = vcmp.lt.s32.totalorder %v11538_v3, 2  ;;  %v792_v24 = vxor.u32 2147483648, %v8676_v5  ;;  %v881_v47 = vsel %vm798_vm8, %v880_v30, %v879_v40  ;;  %v1305_v62 = vadd.s32 3, %v1301_v17 }
 0x272   : > { %v1403_v14 = vsel %vm1318_vm5, %v1402_v18, %v17542_v8  ;;  %v884_v51 = vsel %vm11522_vm1, %v17490_v4, %v881_v47  ;;  %vm992_vm12 = vweird.f32 %v17508_v12  ;;  %v1105_v48 = vsel %vm1103_vm2, %v1104_v25, %v8672_v34 }
 0x273   : > { %v1202_v41 = vand.u32 3, %v1201_v52  ;;  %8689 = vsinq.f32 %v1404_v45  ;;  %v8684_v13 = vpop.eup %8683  ;;  %v789_v2 = vxor.u32 2147483648, %v8678_v22  ;;  %v1208_v1 = vxor.u32 2147483648, %v8680_v59  ;;  %v17549_v45 = vld [vmem:[#allocation45_spill] sm:$0xff] }
 0x274   : > { %8691 = vcosq.f32 %v884_v51  ;;  %v17546_v40 = vand.u32 2147483647, %v17545_v10  ;;  %vm784_vm5 = vweird.f32 %v17478_v35  ;;  %v1205_v29 = vxor.u32 2147483648, %v8682_v20  ;;  %v8686_v25 = vpop.eup %8685 }
 0x275   : > { %8693 = vsinq.f32 %v884_v51  ;;  %v1405_v47 = vsel %vm11595_vm13, 0, %v1403_v14  ;;  %v1507_v34 = vsel %vm1422_vm0, %v1506_v33, %v17544_v39  ;;  %v793_v52 = vsel %vm791_vm7, %v792_v24, %v8678_v22  ;;  %v17550_v24 = vld [vmem:[#allocation35_spill] sm:$0xff] }
 0x276   : > { %vm11624_vm8 = vcmp.le.f32.partialorder %v17546_v40, 0.7853982  ;;  %v1106_v8 = vsel %vm1099_vm6, %v1102_v42, %v1105_v48  ;;  %v1306_v18 = vand.u32 3, %v1305_v62  ;;  %vm1204_vm1 = vcmp.eq.s32.totalorder %v1202_v41, 0 }
 0x277   : > { %v1508_v30 = vsel %vm11624_vm8, %v17545_v10, %v17549_v45  ;;  %vm1207_vm15 = vcmp.eq.s32.totalorder %v1202_v41, 2  ;;  %v1309_v32 = vxor.u32 2147483648, %v8686_v25  ;;  %v1312_v14 = vxor.u32 2147483648, %v8684_v13 }
 0x278   : > { %v790_v51 = vsel %vm788_vm4, %v8676_v5, %v789_v2  ;;  %vm895_vm0 = vcmp.eq.s32.totalorder %v11591_v9, 2  ;;  %v1409_v33 = vadd.s32 3, %v1405_v47  ;;  %v1509_v26 = vsel %vm11624_vm8, 0, %v1507_v34 }
 0x279   : > { %8695 = vcosq.f32 %v1508_v30  ;;  %vm892_vm7 = vcmp.eq.s32.totalorder %v11591_v9, 0  ;;  %v1002_v62 = vsel %vm995_vm11, %v998_v28, %v1001_v61  ;;  %v1206_v22 = vsel %vm1204_vm1, %v8680_v59, %v1205_v29  ;;  %v401_v28 = vpop.permute.xlu1 %400 }
 0x27a   : > { %v1209_v42 = vsel %vm1207_vm15, %v1208_v1, %v8682_v20  ;;  %8697 = vsinq.f32 %v1508_v30  ;;  %vm891_vm13 = vcmp.lt.s32.totalorder %v11591_v9, 2  ;;  %v11652_v2 = vsel %vm1096_vm14, nan, %v1106_v8  ;;  %v8688_v5 = vpop.eup %8687 }
 0x27b   : > { %vm1203_vm4 = vcmp.lt.s32.totalorder %v1202_v41, 2  ;;  %vm1308_vm6 = vcmp.eq.s32.totalorder %v1306_v18, 0  ;;  %vm1311_vm2 = vcmp.eq.s32.totalorder %v1306_v18, 2  ;;  %v794_v39 = vsel %vm787_vm9, %v790_v51, %v793_v52 }
 0x27c   : > { %vm888_vm8 = vweird.f32 %v17490_v4  ;;  %v1310_v36 = vsel %vm1308_vm6, %v8684_v13, %v1309_v32  ;;  %v1313_v61 = vsel %vm1311_vm2, %v1312_v14, %v8686_v25  ;;  %v1513_v1 = vadd.s32 3, %v1509_v26 }
 0x27d   : > { %v1003_v20 = vsel %vm992_vm12, nan, %v1002_v62  ;;  %v1210_v59 = vsel %vm1203_vm4, %v1206_v22, %v1209_v42  ;;  %v1410_v0 = vand.u32 3, %v1409_v33  ;;  %v1610_v48 = vsub.s32 4, %v17550_v24  ;;  %v8690_v41 = vpop.eup %8689 }
 0x27e   : > { %v4021_v40 = vpack.c.bf16 %v11652_v2, %v1003_v20  ;;  %vm1200_vm14 = vweird.f32 %v17527_v23  ;;  %vm1304_vm9 = vweird.f32 %v17532_v58  ;;  %vm1307_vm11 = vcmp.lt.s32.totalorder %v1306_v18, 2  ;;  %v8692_v3 = vpop.eup %8691 }
 0x27f   : > { %v795_v13 = vsel %vm784_vm5, nan, %v794_v39  ;;  %v1314_v17 = vsel %vm1307_vm11, %v1310_v36, %v1313_v61  ;;  %v454_v12 = vmul.f32 %v11451_v16, %v401_v28  ;;  %v1416_v29 = vxor.u32 2147483648, %v8688_v5  ;;  %v8694_v47 = vpop.eup %8693  ;;  %v598_v36 = vpop.permute.xlu1 %597 }
 0x280   : > { %v896_v34 = vxor.u32 2147483648, %v8692_v3  ;;  %v1211_v25 = vsel %vm1200_vm14, nan, %v1210_v59  ;;  %v1514_v52 = vand.u32 3, %v1513_v1  ;;  %v17551_v8 = vand.u32 2147483647, %v9739_v53  ;;  %v17554_v59 = vld [vmem:[#allocation20_spill] sm:$0xff] }
 0x281   : > { %v893_v23 = vxor.u32 2147483648, %v8694_v47  ;;  %vm1412_vm1 = vcmp.eq.s32.totalorder %v1410_v0, 0  ;;  %v1611_v35 = vsel %vm1526_vm3, %v1610_v48, %v17550_v24  ;;  %v1315_v32 = vsel %vm1304_vm9, nan, %v1314_v17  ;;  %v17559_v17 = vld [vmem:[#allocation46_spill] sm:$0xff] }
 0x282   : > { %vm11668_vm12 = vcmp.le.f32.partialorder %v17551_v8, 0.7853982  ;;  %v897_v30 = vsel %vm895_vm0, %v896_v34, %v8694_v47  ;;  %v1413_v14 = vxor.u32 2147483648, %v8690_v41  ;;  %vm1415_vm5 = vcmp.eq.s32.totalorder %v1410_v0, 2 }
 0x283   : > { %v1612_v18 = vsel %vm11668_vm12, %v9739_v53, %v10788_v46  ;;  %v8696_v51 = vpop.eup %8695  ;;  %v894_v33 = vsel %vm892_vm7, %v8692_v3, %v893_v23  ;;  %v4022_v26 = vpack.c.bf16 %v1315_v32, %v1211_v25  ;;  %v1417_v62 = vsel %vm1415_vm5, %v1416_v29, %v8690_v41  ;;  %v17558_v41 = vld [vmem:[#allocation29_spill] sm:$0xff] }
 0x284   : > { %8699 = vcosq.f32 %v1612_v18  ;;  %v8698_v22 = vpop.eup %8697  ;;  %v898_v42 = vsel %vm891_vm13, %v894_v33, %v897_v30  ;;  %vm1515_vm3 = vcmp.lt.s32.totalorder %v1514_v52, 2  ;;  %v1520_v46 = vxor.u32 2147483648, %v8696_v51 }
 0x285   : > { %v1613_v2 = vsel %vm11668_vm12, 0, %v1611_v35  ;;  %v899_v58 = vsel %vm888_vm8, nan, %v898_v42  ;;  %v1517_v39 = vxor.u32 2147483648, %v8698_v22  ;;  %vm1519_vm15 = vcmp.eq.s32.totalorder %v1514_v52, 2 }
 0x286   : > { %8701 = vsinq.f32 %v1612_v18  ;;  %v4020_v61 = vpack.c.bf16 %v899_v58, %v795_v13  ;;  %v1414_v28 = vsel %vm1412_vm1, %v8688_v5, %v1413_v14  ;;  %vm1516_vm0 = vcmp.eq.s32.totalorder %v1514_v52, 0  ;;  %v11707_v13 = vld [vmem:[%s16918_s1 + $0x1] ss:$0 sm:$0xff]  ;;  %v17561_v52 = vld [vmem:[#allocation19_spill] sm:$0xff] }
 0x287   : > { %v1521_v1 = vsel %vm1519_vm15, %v1520_v46, %v8698_v22  ;;  %v1518_v20 = vsel %vm1516_vm0, %v8696_v51, %v1517_v39  ;;  %v1617_v9 = vadd.s32 3, %v1613_v2  ;;  %v17555_v24 = vand.u32 2147483647, %v17554_v59  ;;  %v17567_v58 = vld [vmem:[#allocation38_spill] sm:$0xff] }
 0x288   : > { %v1714_v4 = vsub.s32 4, %v17558_v41  ;;  %8281 = vmatprep.mubr.bf16.mxu0 %v4020_v61  ;;  %vm1411_vm13 = vcmp.lt.s32.totalorder %v1410_v0, 2  ;;  %v1522_v3 = vsel %vm1515_vm3, %v1518_v20, %v1521_v1  ;;  %v653_v29 = vmul.f32 %v11707_v13, %v598_v36 }
 0x289   : > { %vm11694_vm7 = vcmp.le.f32.partialorder %v17555_v24, 0.7853982  ;;  %8282 = vmatmul.mubr.bf16.vlgmr.msra.gmra.mrb[0].mxu0 %v4021_v40  ;;  %v490_v47 = vadd.f32 %v11476_v38, %v454_v12  ;;  %vm1408_vm4 = vweird.f32 %v17538_v63  ;;  %v1418_v0 = vsel %vm1411_vm13, %v1414_v28, %v1417_v62  ;;  %v17562_v12 = vld [vmem:[#allocation37_spill] sm:$0xff] }
 0x28a   : > { %v1716_v5 = vsel %vm11694_vm7, %v17554_v59, %v17559_v17  ;;  %vm1512_vm6 = vweird.f32 %v17545_v10  ;;  %8285 = vmatprep.mubr.bf16.mxu0 %v4022_v26  ;;  %vm17560_vm2 = vcmp.lt.s32.totalorder %v17554_v59, 0  ;;  %v11717_v8 = vadd.f32 %v653_v29, %v17561_v52 }
 0x28b   : > { %v1523_v34 = vsel %vm1512_vm6, nan, %v1522_v3  ;;  %v1715_v25 = vsel %vm17560_vm2, %v1714_v4, %v17558_v41  ;;  %8703 = vcosq.f32 %v1716_v5  ;;  %v1618_v45 = vand.u32 3, %v1617_v9  ;;  %v602_v41 = vpop.permute.xlu1 %601 }
 0x28c   : > { %v1717_v40 = vsel %vm11694_vm7, 0, %v1715_v25  ;;  %8705 = vsinq.f32 %v1716_v5  ;;  %v1818_v63 = vsub.s32 4, %v17562_v12  ;;  %v1419_v23 = vsel %vm1408_vm4, nan, %v1418_v0 }
 0x28d   : > { %v1721_v35 = vadd.s32 3, %v1717_v40  ;;  %v17086_v10 = vand.u32 2147483647, %v11717_v8  ;;  %v3295_v18 = vand.u32 2139095040, %v11717_v8  ;;  %v11725_v32 = vadd.f32 %v10888_v49, %v490_v47 }
 0x28e   : > { %v8700_v30 = vpop.eup %8699  ;;  %v4023_v14 = vpack.c.bf16 %v1523_v34, %v1419_v23  ;;  %v17564_v51 = vand.u32 2147483647, %v9850_v44  ;;  %v1819_v26 = vsel %vm1734_vm10, %v1818_v63, %v17562_v12  ;;  %vm1616_vm14 = vweird.f32 %v9739_v53 }
 0x28f   : > { %17563 = vst [vmem:[#allocation21_spill] sm:$0xff] %v11725_v32  ;;  %v1624_v62 = vxor.u32 2147483648, %v8700_v30  ;;  %v3296_v22 = vshrl.u32 %v3295_v18, 23  ;;  %vm1619_vm9 = vcmp.lt.s32.totalorder %v1618_v45, 2  ;;  %v3299_v46 = vand.u32 8388607, %v17086_v10 }
 0x290   : > { %vm11729_vm8 = vcmp.le.f32.partialorder %v17564_v51, 0.7853982  ;;  %v8702_v42 = vpop.eup %8701  ;;  %v1922_v39 = vsub.s32 4, %v17567_v58  ;;  %vm1620_vm10 = vcmp.eq.s32.totalorder %v1618_v45, 0  ;;  %vm1623_vm11 = vcmp.eq.s32.totalorder %v1618_v45, 2 }
 0x291   : > { %v1820_v49 = vsel %vm11729_vm8, %v9850_v44, %v10798_v7  ;;  %v1821_v2 = vsel %vm11729_vm8, 0, %v1819_v26  ;;  %v1621_v36 = vxor.u32 2147483648, %v8702_v42  ;;  %v1722_v61 = vand.u32 3, %v1721_v35  ;;  %8286 = vmatmul.mubr.bf16.gmra.mrb[4].mxu0 %v4023_v14 }
 0x292   : > { %v1625_v28 = vsel %vm1623_vm11, %v1624_v62, %v8702_v42  ;;  %vm1720_vm12 = vweird.f32 %v17554_v59  ;;  %v8041_v1 = vadd.s32 4294967169, %v3296_v22  ;;  %8707 = vcosq.f32 %v1820_v49 }
 0x293   : > { %v17568_v7 = vand.u32 2147483647, %v17445_v15  ;;  %v1622_v9 = vsel %vm1620_vm10, %v8700_v30, %v1621_v36  ;;  %8709 = vsinq.f32 %v1820_v49  ;;  %v1825_v24 = vadd.s32 3, %v1821_v2 }
 0x294   : > { %vm17571_vm5 = vcmp.lt.s32.totalorder %v17445_v15, 0  ;;  %v3300_v4 = vor.u32 8388608, %v3299_v46  ;;  %v3302_v3 = vadd.s32 1, %v8041_v1  ;;  %v1626_v47 = vsel %vm1619_vm9, %v1622_v9, %v1625_v28 }
 0x295   : > { %vm11749_vm1 = vcmp.le.f32.partialorder %v17568_v7, 0.7853982  ;;  %v1923_v48 = vsel %vm17571_vm5, %v1922_v39, %v17567_v58  ;;  %v8704_v29 = vpop.eup %8703  ;;  %vm1723_vm3 = vcmp.lt.s32.totalorder %v1722_v61, 2  ;;  %vm1724_vm15 = vcmp.eq.s32.totalorder %v1722_v61, 0 }
 0x296   : > { %v1924_v17 = vsel %vm11749_vm1, %v17445_v15, %v10812_v55  ;;  %v1925_v5 = vsel %vm11749_vm1, 0, %v1923_v48  ;;  %v11763_v0 = vand.u32 3, %v1825_v24  ;;  %v8706_v34 = vpop.eup %8705  ;;  %v1728_v25 = vxor.u32 2147483648, %v8704_v29 }
 0x297   : > { %vm3303_vm0 = vcmp.gt.s32.totalorder %v3302_v3, 0  ;;  %v1929_v52 = vadd.s32 3, %v1925_v5  ;;  %v654_v40 = vmul.f32 %v11707_v13, %v602_v41  ;;  %v1725_v12 = vxor.u32 2147483648, %v8706_v34 }
 0x298   : > { %vm1727_vm7 = vcmp.eq.s32.totalorder %v1722_v61, 2  ;;  %v3304_v63 = vsel %vm3303_vm0, %v3302_v3, 0  ;;  %8711 = vcosq.f32 %v1924_v17  ;;  %v1627_v55 = vsel %vm1616_vm14, nan, %v1626_v47 }
 0x299   : > { %v1729_v23 = vsel %vm1727_vm7, %v1728_v25, %v8706_v34  ;;  %v3306_v45 = vand.u32 31, %v3304_v63  ;;  %v11768_v35 = vshll.u32 %v3300_v4, 8  ;;  %v1726_v18 = vsel %vm1724_vm15, %v8704_v29, %v1725_v12 }
 0x29a   : > { %v11770_v30 = vshrl.u32 %v3304_v63, 5  ;;  %8713 = vsinq.f32 %v1924_v17  ;;  %v11772_v14 = vand.u32 3, %v1929_v52  ;;  %v1730_v51 = vsel %vm1723_vm3, %v1726_v18, %v1729_v23 }
 0x29b   : > { %v3307_v33 = vsub.s32 32, %v3306_v45  ;;  %v3309_v26 = vshll.u32 %v17387_v19, %v3306_v45  ;;  %vm1828_vm13 = vcmp.eq.s32.totalorder %v11763_v0, 0  ;;  %vm1831_vm4 = vcmp.eq.s32.totalorder %v11763_v0, 2 }
 0x29c   : > { %v11779_v53 = vadd.f32 %v654_v40, %v11589_v50  ;;  %v1731_v62 = vsel %vm1720_vm12, nan, %v1730_v51  ;;  %v3312_v22 = vshll.u32 %v17389_v43, %v3306_v45  ;;  %v3315_v49 = vshll.u32 %v17390_v37, %v3306_v45  ;;  %v8708_v46 = vpop.eup %8707 }
 0x29d   : > { %v3318_v42 = vshll.u32 %v17395_v21, %v3306_v45  ;;  %v4024_v2 = vpack.c.bf16 %v1731_v62, %v1627_v55  ;;  %v3310_v58 = vshrl.u32 %v17389_v43, %v3307_v33  ;;  %v3313_v39 = vshrl.u32 %v17390_v37, %v3307_v33  ;;  %v8710_v61 = vpop.eup %8709 }
 0x29e   : > { %17572 = vst [vmem:[#allocation33_spill] sm:$0xff] %v11779_v53  ;;  %v3321_v36 = vshll.u32 %v17397_v31, %v3306_v45  ;;  %v3308_v50 = vshrl.u32 %v17387_v19, %v3307_v33  ;;  %v3316_v59 = vshrl.u32 %v17395_v21, %v3307_v33  ;;  %v3319_v28 = vshrl.u32 %v17397_v31, %v3307_v33 }
 0x29f   : > { %v17573_v1 = vmov 1326507024   ;;  %8289 = vmatprep.mubr.bf16.mxu0 %v4024_v2  ;;  %v3311_v20 = vor.u32 %v3310_v58, %v3309_v26  ;;  %v3314_v9 = vor.u32 %v3313_v39, %v3312_v22  ;;  %vm3324_vm6 = vcmp.lt.s32.totalorder %v11770_v30, 1 }
 0x2a0   : > { %v3322_v7 = vshrl.u32 %v17573_v1, %v3307_v33  ;;  %vm3325_vm2 = vcmp.lt.s32.totalorder %v11770_v30, 2  ;;  %v3317_v24 = vor.u32 %v3316_v59, %v3315_v49  ;;  %v3320_v48 = vor.u32 %v3319_v28, %v3318_v42 }
 0x2a1   : > { %vm3326_vm8 = vcmp.lt.s32.totalorder %v11770_v30, 3  ;;  %vm3327_vm14 = vcmp.lt.s32.totalorder %v11770_v30, 4  ;;  %v3332_v4 = vsel %vm3324_vm6, %v3311_v20, %v3314_v9  ;;  %v1829_v3 = vxor.u32 2147483648, %v8710_v61 }
 0x2a2   : > { %v3323_v41 = vor.u32 %v3322_v7, %v3321_v36  ;;  %v1832_v17 = vxor.u32 2147483648, %v8708_v46  ;;  %v8712_v5 = vpop.eup %8711  ;;  %v3329_v29 = vsel %vm3327_vm14, %v3317_v24, 2102212464  ;;  %v3333_v47 = vsel %vm3327_vm14, %v3320_v48, 920167782 }
 0x2a3   : > { %v3336_v34 = vsel %vm3324_vm6, %v3314_v9, %v3317_v24  ;;  %v3328_v52 = vsel %vm3324_vm6, %v3308_v50, %v3311_v20  ;;  %v3330_v40 = vsel %vm3326_vm8, %v3314_v9, %v3329_v29  ;;  %v3334_v12 = vsel %vm3326_vm8, %v3317_v24, %v3333_v47  ;;  %v17578_v29 = vld [vmem:[#allocation11_spill] sm:$0xff] }
 0x2a4   : > { %v3337_v25 = vsel %vm3327_vm14, %v3323_v41, 1326507024  ;;  %v8714_v55 = vpop.eup %8713  ;;  %v3335_v23 = vsel %vm3325_vm2, %v3332_v4, %v3334_v12  ;;  %v1830_v18 = vsel %vm1828_vm13, %v8708_v46, %v1829_v3  ;;  %v1833_v51 = vsel %vm1831_vm4, %v1832_v17, %v8710_v61 }
 0x2a5   : > { %v3338_v63 = vsel %vm3326_vm8, %v3320_v48, %v3337_v25  ;;  %v11810_v62 = vmul.u32.u64.low %v11768_v35, %v3335_v23  ;;  %v11811_v22 = vmul.u32.u64.high %v11768_v35, %v3335_v23, %v11810_v62  ;;  %v17574_v49 = vsub.s32 32, %v11488_v27  ;;  %v17579_v25 = vld [vmem:[#allocation76_spill] sm:$0xff] }
 0x2a6   : > { %v3339_v45 = vsel %vm3325_vm2, %v3336_v34, %v3338_v63  ;;  %v3058_v2 = vshll.u32 %v11533_v11, 23  ;;  %v3198_v46 = vadd.s32 1, %v11578_v56  ;;  %vm1827_vm9 = vcmp.lt.s32.totalorder %v11763_v0, 2 }
 0x2a7   : > { %v11806_v33 = vmul.u32.u64.low %v11768_v35, %v3339_v45  ;;  %v11807_v26 = vmul.u32.u64.high %v11768_v35, %v3339_v45, %v11806_v33  ;;  %v3054_v42 = vshrl.u32 %v11486_v57, %v17574_v49  ;;  %v3503_v58 = vand.u32 2139095040, %v11725_v32  ;;  %v17582_v45 = vld [vmem:[#allocation2_spill] sm:$0xff] }
 0x2a8   : > { %v1834_v39 = vsel %vm1827_vm9, %v1830_v18, %v1833_v51  ;;  %v1933_v36 = vxor.u32 2147483648, %v8714_v55  ;;  %v1936_v61 = vxor.u32 2147483648, %v8712_v5  ;;  %v3331_v50 = vsel %vm3325_vm2, %v3328_v52, %v3330_v40 }
 0x2a9   : > { %vm1824_vm10 = vweird.f32 %v9850_v44  ;;  %vm1932_vm11 = vcmp.eq.s32.totalorder %v11772_v14, 0  ;;  %v3399_v57 = vand.u32 2139095040, %v11779_v53  ;;  %vm3349_vm12 = vc.u32 %v11807_v26, %v11810_v62 }
 0x2aa   : > { %v3350_v11 = vadd.s32 1, %v11811_v22  ;;  %v1934_v56 = vsel %vm1932_vm11, %v8712_v5, %v1933_v36  ;;  %vm1935_vm1 = vcmp.eq.s32.totalorder %v11772_v14, 2  ;;  %v1835_v0 = vsel %vm1824_vm10, nan, %v1834_v39 }
 0x2ab   : > { %vm1931_vm5 = vcmp.lt.s32.totalorder %v11772_v14, 2  ;;  %v1937_v59 = vsel %vm1935_vm1, %v1936_v61, %v8714_v55  ;;  %v3400_v30 = vshrl.u32 %v3399_v57, 23  ;;  %v3347_v28 = vmul.u32 %v11768_v35, %v3331_v50  ;;  %v17581_v55 = vld [vmem:[#allocation74_spill] sm:$0xff] }
 0x2ac   : > { %v3351_v44 = vsel %vm3349_vm12, %v3350_v11, %v11811_v22  ;;  %vm1928_vm3 = vweird.f32 %v17445_v15  ;;  %v1938_v7 = vsel %vm1931_vm5, %v1934_v56, %v1937_v59  ;;  %v3504_v20 = vshrl.u32 %v3503_v58, 23  ;;  %v17577_v15 = vld [vmem:[#allocation7_spill] sm:$0xff]  ;;  %v406_v22 = vpop.permute.xlu1 %405 }
 0x2ad   : > { %v1939_v9 = vsel %vm1928_vm3, nan, %v1938_v7  ;;  %v17085_v24 = vand.u32 2147483647, %v11779_v53  ;;  %v8045_v48 = vadd.s32 4294967169, %v3400_v30  ;;  %v3053_v41 = vshll.u32 %v11358_v6, %v11488_v27  ;;  %v17580_v6 = vld [vmem:[#allocation6_spill] sm:$0xff] }
 0x2ae   : > { %vm3199_vm15 = vcmp.gt.s32.totalorder %v3198_v46, 0  ;;  %v11837_v4 = vadd.s32 %v3351_v44, %v3347_v28  ;;  %v4025_v14 = vpack.c.bf16 %v1939_v9, %v1835_v0  ;;  %v17575_v3 = vand.u32 2147483647, %v11408_v54 }
 0x2af   : > { %v17576_v35 = vcvt.s32.f32 %v11399_v60  ;;  %v2644_v5 = vand.u32 2147483647, %v17577_v15  ;;  %v11848_v47 = vshll.u32 %v17397_v31, %v17578_v29  ;;  %v3406_v34 = vadd.s32 1, %v8045_v48 }
 0x2b0   : > { %v2646_v52 = vcvt.s32.f32 %v17579_v25  ;;  %v2956_v27 = vand.u32 2147483647, %v17580_v6  ;;  %v11852_v40 = vor.u32 %v3054_v42, %v3053_v41  ;;  %v11854_v12 = vor.u32 4788187, %v3058_v2  ;;  %8290 = vmatmul.mubr.bf16.gmra.mrb[8].mxu0 %v4025_v14 }
 0x2b1   : > { %v11843_v17 = vmul.f32 %v17576_v35, %v17575_v3  ;;  %v11856_v54 = vsel %vm3199_vm15, %v3198_v46, 0  ;;  %v8049_v60 = vadd.s32 4294967169, %v3504_v20  ;;  %v3403_v63 = vand.u32 8388607, %v17085_v24 }
 0x2b2   : > { %vm3407_vm0 = vcmp.gt.s32.totalorder %v3406_v34, 0  ;;  %v11862_v23 = vshrl.u32 %v17397_v31, %v17581_v55  ;;  %v2958_v18 = vcvt.s32.f32 %v17582_v45  ;;  %v3353_v51 = vadd.s32 536870912, %v11837_v4 }
 0x2b3   : > { %v3408_v33 = vsel %vm3407_vm0, %v3406_v34, 0  ;;  %v2544_v49 = vxor.u32 2147483648, %v11843_v17  ;;  %v11867_v42 = vmul.f32 %v2646_v52, %v2644_v5  ;;  %v11871_v2 = vshrl.u32 %v17573_v1, %v17581_v55 }
 0x2b4   : > { %v3410_v46 = vand.u32 31, %v3408_v33  ;;  %v11873_v58 = vmul.f32 %v2958_v18, %v2956_v27  ;;  %v3060_v39 = vand.u32 2147483647, %v11854_v12  ;;  %v3062_v36 = vcvt.s32.f32 %v11852_v40 }
 0x2b5   : > { %v11878_v61 = vand.u32 31, %v11856_v54  ;;  %v3510_v50 = vadd.s32 1, %v8049_v60  ;;  %v3404_v57 = vor.u32 8388608, %v3403_v63  ;;  %v455_v56 = vmul.f32 %v11451_v16, %v406_v22 }
 0x2b6   : > { %v3411_v11 = vsub.s32 32, %v3410_v46  ;;  %v11881_v0 = vshrl.u32 %v3353_v51, 30  ;;  %v3409_v59 = vshrl.u32 %v3408_v33, 5  ;;  %v3413_v30 = vshll.u32 %v17387_v19, %v3410_v46  ;;  %v17585_v33 = vld [vmem:[#allocation10_spill] sm:$0xff] }
 0x2b7   : > { %17583 = vst [vmem:[#allocation23_spill] sm:$0xff] %v11878_v61  ;;  %v3416_v28 = vshll.u32 %v17389_v43, %v3410_v46  ;;  %v3419_v20 = vshll.u32 %v17390_v37, %v3410_v46  ;;  %v3422_v9 = vshll.u32 %v17395_v21, %v3410_v46  ;;  %v3425_v14 = vshll.u32 %v17397_v31, %v3410_v46 }
 0x2b8   : > { %17584 = vst [vmem:[#allocation8_spill] sm:$0xff] %v11881_v0  ;;  %v3414_v44 = vshrl.u32 %v17389_v43, %v3411_v11  ;;  %v3417_v7 = vshrl.u32 %v17390_v37, %v3411_v11  ;;  %v3420_v48 = vshrl.u32 %v17395_v21, %v3411_v11  ;;  %v3423_v41 = vshrl.u32 %v17397_v31, %v3411_v11 }
 0x2b9   : > { %v3426_v3 = vshrl.u32 %v17573_v1, %v3411_v11  ;;  %vm3511_vm7 = vcmp.gt.s32.totalorder %v3510_v50, 0  ;;  %v491_v5 = vadd.f32 %v11476_v38, %v455_v56  ;;  %vm3428_vm13 = vcmp.lt.s32.totalorder %v3409_v59, 1 }
 0x2ba   : > { %v3415_v35 = vor.u32 %v3414_v44, %v3413_v30  ;;  %v3418_v15 = vor.u32 %v3417_v7, %v3416_v28  ;;  %v3421_v34 = vor.u32 %v3420_v48, %v3419_v20  ;;  %v3424_v25 = vor.u32 %v3423_v41, %v3422_v9  ;;  %v17587_v20 = vld [vmem:[#allocation73_spill] sm:$0xff] }
 0x2bb   : > { %v3427_v52 = vor.u32 %v3426_v3, %v3425_v14  ;;  %v3355_v6 = vshll.u32 %v11881_v0, 30  ;;  %vm3431_vm4 = vcmp.lt.s32.totalorder %v3409_v59, 4  ;;  %v3444_v40 = vshll.u32 %v3404_v57, 8  ;;  %v11922_v14 = vpop.permute.xlu1 %415  ;;  %v17589_v3 = vld [vmem:[#allocation75_spill] sm:$0xff] }
 0x2bc   : > { %v3436_v27 = vsel %vm3428_vm13, %v3415_v35, %v3418_v15  ;;  %vm3430_vm6 = vcmp.lt.s32.totalorder %v3409_v59, 3  ;;  %v3437_v12 = vsel %vm3431_vm4, %v3424_v25, 920167782  ;;  %v3440_v60 = vsel %vm3428_vm13, %v3418_v15, %v3421_v34 }
 0x2bd   : > { %v3441_v63 = vsel %vm3431_vm4, %v3427_v52, 1326507024  ;;  %vm3429_vm2 = vcmp.lt.s32.totalorder %v3409_v59, 2  ;;  %v3433_v45 = vsel %vm3431_vm4, %v3421_v34, 2102212464  ;;  %v3438_v18 = vsel %vm3430_vm6, %v3421_v34, %v3437_v12  ;;  %v17593_v52 = vld [vmem:[#allocation59_spill] sm:$0xff] }
 0x2be   : > { %v3442_v51 = vsel %vm3430_vm6, %v3424_v25, %v3441_v63  ;;  %vm2462_vm8 = vcmp.lt.s32.totalorder %v17585_v33, 0  ;;  %v11901_v22 = vsub.s32 32, %v11878_v61  ;;  %v3412_v46 = vshrl.u32 %v17387_v19, %v3411_v11  ;;  %v17591_v25 = vld [vmem:[#allocation16_spill] sm:$0xff] }
 0x2bf   : > { %v3439_v57 = vsel %vm3429_vm2, %v3436_v27, %v3438_v18  ;;  %v3443_v56 = vsel %vm3429_vm2, %v3440_v60, %v3442_v51  ;;  %v11907_v30 = vsel %vm3511_vm7, %v3510_v50, 0  ;;  %v11910_v28 = vsub.s32 %v11837_v4, %v3355_v6  ;;  %v17588_v50 = vld [vmem:[#allocation51_spill] sm:$0xff] }
 0x2c0   : > { %17586 = vst [vmem:[#allocation44_spill] sm:$0xff] %v11901_v22  ;;  %v11912_v44 = vmul.u32.u64.low %v3444_v40, %v3443_v56  ;;  %v11913_v7 = vmul.u32.u64.high %v3444_v40, %v3443_v56, %v11912_v44  ;;  %vm3119_vm14 = vcmp.lt.s32.totalorder %v17587_v20, 4  ;;  %v3432_v9 = vsel %vm3428_vm13, %v3412_v46, %v3415_v35  ;;  %v17592_v35 = vld [vmem:[#allocation63_spill] sm:$0xff] }
 0x2c1   : > { %v3434_v48 = vsel %vm3430_vm6, %v3418_v15, %v3433_v45  ;;  %v11918_v11 = vmul.u32.u64.low %v3444_v40, %v3439_v57  ;;  %v11919_v41 = vmul.u32.u64.high %v3444_v40, %v3439_v57, %v11918_v11  ;;  %vm2566_vm9 = vcmp.lt.s32.totalorder %v17588_v50, 0  ;;  %v17601_v46 = vld [vmem:[#allocation39_spill] sm:$0xff] }
 0x2c2   : > { %v11927_v4 = vor.u32 %v11862_v23, %v17589_v3  ;;  %v3115_v34 = vor.u32 %v11871_v2, %v11848_v47  ;;  %vm2878_vm10 = vcmp.lt.s32.totalorder %v17591_v25, 0  ;;  %vm2982_vm11 = vcmp.lt.s32.totalorder %v17592_v35, 0  ;;  %v17596_v23 = vld [vmem:[#allocation34_spill] sm:$0xff] }
 0x2c3   : > { %v3063_v15 = vmul.f32 %v3062_v36, %v3060_v39  ;;  %v11934_v6 = vadd.f32 %v17593_v52, %v491_v5  ;;  %v2648_v27 = vxor.u32 2147483648, %v11867_v42  ;;  %v2960_v12 = vxor.u32 2147483648, %v11873_v58  ;;  %v17600_v39 = vld [vmem:[#allocation43_spill] sm:$0xff] }
 0x2c4   : > { %17590 = vst [vmem:[#allocation3_spill] sm:$0xff] %v11927_v4  ;;  %v11939_v60 = vand.u32 31, %v11907_v30  ;;  %v17597_v63 = vand.u32 2147483647, %v17596_v23  ;;  %v3358_v47 = vsub.s32 0, %v11910_v28  ;;  %v3435_v2 = vsel %vm3429_vm2, %v3432_v9, %v3434_v48 }
 0x2c5   : > { %17594 = vst [vmem:[#allocation13_spill] sm:$0xff] %v11934_v6  ;;  %vm3453_vm1 = vc.u32 %v11913_v7, %v11918_v11  ;;  %v3215_v5 = vshrl.u32 %v17397_v31, %v11901_v22  ;;  %v3218_v18 = vshrl.u32 %v17573_v1, %v11901_v22  ;;  %v3454_v51 = vadd.s32 1, %v11919_v41 }
 0x2c6   : > { %17595 = vst [vmem:[#allocation31_spill] sm:$0xff] %v11939_v60  ;;  %vm11943_vm12 = vcmp.le.f32.partialorder %v17597_v63, 0.7853982  ;;  %v2026_v57 = vsub.s32 4, %v17601_v46  ;;  %v3064_v59 = vxor.u32 2147483648, %v3063_v15  ;;  %v11962_v56 = vshrl.u32 %v11856_v54, 5  ;;  %v421_v63 = vpop.permute.xlu1 %420 }
 0x2c7   : > { %v2028_v36 = vsel %vm11943_vm12, %v17596_v23, %v17600_v39  ;;  %v3214_v44 = vshll.u32 %v17395_v21, %v11878_v61  ;;  %v3607_v9 = vand.u32 2139095040, %v11934_v6  ;;  %v3217_v48 = vshll.u32 %v17397_v31, %v11878_v61 }
 0x2c8   : > { %17602 = vst [vmem:[#allocation4_spill] sm:$0xff] %v11962_v56  ;;  %v3451_v3 = vmul.u32 %v3444_v40, %v3435_v2  ;;  %v3455_v52 = vsel %vm3453_vm1, %v3454_v51, %v11919_v41  ;;  %8715 = vsinq.f32 %v2028_v36  ;;  %v11975_v54 = vsel %vm2462_vm8, %v2544_v49, %v11843_v17 }
 0x2c9   : > { %v11978_v39 = vsub.s32 32, %v11939_v60  ;;  %v8042_v24 = vmin.u32 %v3358_v47, %v11910_v28  ;;  %8717 = vcosq.f32 %v2028_v36  ;;  %v11981_v10 = vor.u32 %v3215_v5, %v3214_v44 }
 0x2ca   : > { %v3219_v40 = vor.u32 %v3218_v18, %v3217_v48  ;;  %v11983_v2 = vadd.s32 %v3455_v52, %v3451_v3  ;;  %vm17605_vm5 = vcmp.lt.s32.totalorder %v17596_v23, 0  ;;  %v11991_v17 = vsel %vm3119_vm14, %v11927_v4, 920167782  ;;  %v614_v48 = vpop.permute.xlu1 %613 }
 0x2cb   : > { %17603 = vst [vmem:[#allocation18_spill] sm:$0xff] %v11978_v39  ;;  %17604 = vst [vmem:[#allocation32_spill] sm:$0xff] %v11981_v10  ;;  %v2027_v41 = vsel %vm17605_vm5, %v2026_v57, %v17601_v46  ;;  %v11995_v49 = vsel %vm3119_vm14, %v3115_v34, 1326507024  ;;  %v3608_v47 = vshrl.u32 %v3607_v9, 23  ;;  %v458_v36 = vmul.f32 %v11451_v16, %v421_v63  ;;  %v17616_v63 = vld [vmem:[#allocation47_spill] sm:$0xff] }
 0x2cc   : > { %17606 = vst [vmem:[#allocation24_spill] sm:$0xff] %v11991_v17  ;;  %17607 = vst [vmem:[#allocation14_spill] sm:$0xff] %v11995_v49  ;;  %v12001_v5 = vsel %vm2566_vm9, %v2648_v27, %v11867_v42  ;;  %v12006_v18 = vsel %vm2878_vm10, %v2960_v12, %v11873_v58  ;;  %v12010_v51 = vsel %vm2982_vm11, %v3064_v59, %v3063_v15  ;;  %vm3223_vm3 = vcmp.lt.s32.totalorder %v11962_v56, 4  ;;  %v17612_v59 = vld [vmem:[#allocation9_spill] sm:$0xff] }
 0x2cd   : > { %17608 = vst [vmem:[#allocation45_spill] sm:$0xff] %v12006_v18  ;;  %17609 = vst [vmem:[#allocation35_spill] sm:$0xff] %v12010_v51  ;;  %v3527_v34 = vshrl.u32 %v17397_v31, %v11978_v39  ;;  %v12017_v16 = vshrl.u32 %v17573_v1, %v11978_v39  ;;  %v3360_v42 = vclz %v8042_v24  ;;  %v2029_v27 = vsel %vm11943_vm12, 0, %v2027_v41  ;;  %v17617_v41 = vld [vmem:[#allocation66_spill] sm:$0xff] }
 0x2ce   : > { %v12024_v58 = vsel %vm3223_vm3, %v11981_v10, 920167782  ;;  %v12028_v15 = vsel %vm3223_vm3, %v3219_v40, 1326507024  ;;  %v3526_v12 = vshll.u32 %v17395_v21, %v11939_v60  ;;  %v3457_v46 = vadd.s32 536870912, %v11983_v2 }
 0x2cf   : > { %17610 = vst [vmem:[#allocation20_spill] sm:$0xff] %v12024_v58  ;;  %17611 = vst [vmem:[#allocation29_spill] sm:$0xff] %v12028_v15  ;;  %v12035_v24 = vshll.u32 %v17397_v31, %v11939_v60  ;;  %v8053_v45 = vadd.s32 4294967169, %v3608_v47  ;;  %v494_v57 = vadd.f32 %v11476_v38, %v458_v36  ;;  %v17613_v44 = vand.u32 2147483647, %v17612_v59 }
 0x2d0   : > { %v12045_v3 = vshrl.u32 %v11907_v30, 5  ;;  %v2033_v52 = vadd.s32 3, %v2029_v27  ;;  %v2130_v40 = vsub.s32 4, %v17616_v63  ;;  %v12052_v6 = vor.u32 %v3527_v34, %v3526_v12  ;;  %v8932_v38 = vld [vmem:[%s16918_s1] ss:$0 sm:$0xff] }
 0x2d1   : > { %vm12040_vm15 = vcmp.le.f32.partialorder %v17613_v44, 0.7853982  ;;  %v12058_v36 = vadd.s32 %v11810_v62, %v11807_v26  ;;  %v8043_v44 = vadd.s32 4294967294, %v3360_v42  ;;  %v12060_v60 = vshrl.u32 %v3457_v46, 30  ;;  %v17620_v62 = vld [vmem:[#allocation69_spill] sm:$0xff] }
 0x2d2   : > { %v2132_v47 = vsel %vm12040_vm15, %v17612_v59, %v17617_v41  ;;  %v8716_v30 = vpop.eup %8715  ;;  %vm17619_vm0 = vcmp.lt.s32.totalorder %v17612_v59, 0  ;;  %v657_v41 = vmul.f32 %v11707_v13, %v614_v48  ;;  %v3614_v12 = vadd.s32 1, %v8053_v45  ;;  %v17624_v48 = vld [vmem:[#allocation40_spill] sm:$0xff] }
 0x2d3   : > { %17618 = vst [vmem:[#allocation46_spill] sm:$0xff] %v12060_v60  ;;  %v2131_v27 = vsel %vm17619_vm0, %v2130_v40, %v17616_v63  ;;  %8719 = vcosq.f32 %v2132_v47  ;;  %v8718_v34 = vpop.eup %8717  ;;  %v457_v26 = vmul.f32 %v8932_v38, %v11922_v14  ;;  %v12071_v42 = vadd.f32 %v17620_v62, %v494_v57  ;;  %v17622_v63 = vld [vmem:[#allocation22_spill] sm:$0xff]  ;;  %v17628_v14 = vld [vmem:[#allocation49_spill] sm:$0xff]  ;;  %v17629_v57 = vld [vmem:[#allocation28_spill] sm:$0xff] }
 0x2d4   : > { %v2133_v46 = vsel %vm12040_vm15, 0, %v2131_v27  ;;  %v2034_v39 = vand.u32 3, %v2033_v52  ;;  %8721 = vsinq.f32 %v2132_v47  ;;  %v12076_v40 = vadd.f32 %v657_v41, %v17622_v63 }
 0x2d5   : > { %17621 = vst [vmem:[#allocation19_spill] sm:$0xff] %v12071_v42  ;;  %v17625_v32 = vand.u32 2147483647, %v17624_v48  ;;  %vm8044_vm13 = vcmp.lt.s32.totalorder %v8043_v44, 0  ;;  %v2037_v0 = vxor.u32 2147483648, %v8716_v30  ;;  %v2234_v38 = vsub.s32 4, %v17628_v14 }
 0x2d6   : > { %17623 = vst [vmem:[#allocation37_spill] sm:$0xff] %v12076_v40  ;;  %v3459_v52 = vshll.u32 %v12060_v60, 30  ;;  %v2040_v47 = vxor.u32 2147483648, %v8718_v34  ;;  %v2137_v27 = vadd.s32 3, %v2133_v46  ;;  %v3711_v41 = vand.u32 2139095040, %v12076_v40 }
 0x2d7   : > { %vm12080_vm7 = vcmp.le.f32.partialorder %v17625_v32, 0.7853982  ;;  %v8933_v32 = vld [vmem:[%s16919_s2] ss:$0 sm:$0xff]  ;;  %v3919_v63 = vand.u32 2139095040, %v12071_v42  ;;  %vm17630_vm4 = vcmp.lt.s32.totalorder %v17624_v48, 0  ;;  %vm2032_vm1 = vweird.f32 %v17596_v23 }
 0x2d8   : > { %v2236_v9 = vsel %vm12080_vm7, %v17624_v48, %v17629_v57  ;;  %v12094_v62 = vadd.f32 %v8933_v32, %v457_v26  ;;  %v2235_v57 = vsel %vm17630_vm4, %v2234_v38, %v17628_v14  ;;  %vm3615_vm6 = vcmp.gt.s32.totalorder %v3614_v12, 0 }
 0x2d9   : > { %vm2036_vm2 = vcmp.eq.s32.totalorder %v2034_v39, 0  ;;  %v3712_v60 = vshrl.u32 %v3711_v41, 23  ;;  %8723 = vcosq.f32 %v2236_v9  ;;  %v12102_v46 = vsel %vm8044_vm13, 0, %v8043_v44 }
 0x2da   : > { %v2038_v15 = vsel %vm2036_vm2, %v8718_v34, %v2037_v0  ;;  %vm2039_vm12 = vcmp.eq.s32.totalorder %v2034_v39, 2  ;;  %v2237_v26 = vsel %vm12080_vm7, 0, %v2235_v57  ;;  %v12107_v32 = vsub.s32 %v11983_v2, %v3459_v52 }
 0x2db   : > { %v2041_v10 = vsel %vm2039_vm12, %v2040_v47, %v8716_v30  ;;  %v2138_v42 = vand.u32 3, %v2137_v27  ;;  %v8057_v58 = vadd.s32 4294967169, %v3712_v60  ;;  %v12109_v56 = vsel %vm3615_vm6, %v3614_v12, 0  ;;  %v17632_v30 = vld [vmem:[#allocation36_spill] sm:$0xff]  ;;  %v17636_v12 = vld [vmem:[#allocation41_spill] sm:$0xff] }
 0x2dc   : > { %v12111_v14 = vshrl.u32 %v3919_v63, 23  ;;  %v17631_v44 = vand.u32 2147483647, %v12076_v40  ;;  %vm2035_vm5 = vcmp.lt.s32.totalorder %v2034_v39, 2  ;;  %v2241_v41 = vadd.s32 3, %v2237_v26 }
 0x2dd   : > { %v8720_v0 = vpop.eup %8719  ;;  %v3718_v45 = vadd.s32 1, %v8057_v58  ;;  %v2042_v2 = vsel %vm2035_vm5, %v2038_v15, %v2041_v10  ;;  %v17633_v47 = vand.u32 2147483647, %v17632_v30  ;;  %v2338_v27 = vsub.s32 4, %v17636_v12 }
 0x2de   : > { %v3715_v38 = vand.u32 8388607, %v17631_v44  ;;  %v2144_v52 = vxor.u32 2147483648, %v8720_v0  ;;  %v8722_v63 = vpop.eup %8721  ;;  %v3462_v57 = vsub.s32 0, %v12107_v32  ;;  %vm2143_vm0 = vcmp.eq.s32.totalorder %v2138_v42, 2  ;;  %v17637_v44 = vld [vmem:[#allocation54_spill] sm:$0xff] }
 0x2df   : > { %vm12119_vm15 = vcmp.le.f32.partialorder %v17633_v47, 0.7853982  ;;  %vm3719_vm7 = vcmp.gt.s32.totalorder %v3718_v45, 0  ;;  %v2141_v10 = vxor.u32 2147483648, %v8722_v63  ;;  %8725 = vsinq.f32 %v2236_v9 }
 0x2e0   : > { %v2340_v39 = vsel %vm12119_vm15, %v17632_v30, %v17637_v44  ;;  %v2145_v58 = vsel %vm2143_vm0, %v2144_v52, %v8722_v63  ;;  %v3716_v15 = vor.u32 8388608, %v3715_v38  ;;  %vm2139_vm13 = vcmp.lt.s32.totalorder %v2138_v42, 2 }
 0x2e1   : > { %vm2140_vm4 = vcmp.eq.s32.totalorder %v2138_v42, 0  ;;  %v3720_v26 = vsel %vm3719_vm7, %v3718_v45, 0  ;;  %v12129_v47 = vand.u32 3, %v2241_v41  ;;  %vm17638_vm6 = vcmp.lt.s32.totalorder %v17632_v30, 0 }
 0x2e2   : > { %v2142_v34 = vsel %vm2140_vm4, %v8720_v0, %v2141_v10  ;;  %v3721_v40 = vshrl.u32 %v3720_v26, 5  ;;  %v2339_v53 = vsel %vm17638_vm6, %v2338_v27, %v17636_v12  ;;  %8727 = vcosq.f32 %v2340_v39 }
 0x2e3   : > { %v8724_v61 = vpop.eup %8723  ;;  %vm2136_vm2 = vweird.f32 %v17612_v59  ;;  %v2146_v44 = vsel %vm2139_vm13, %v2142_v34, %v2145_v58  ;;  %v3722_v22 = vand.u32 31, %v3720_v26  ;;  %8729 = vsinq.f32 %v2340_v39 }
 0x2e4   : > { %v12136_v9 = vmin.u32 %v3462_v57, %v12107_v32  ;;  %v2043_v42 = vsel %vm2032_vm1, nan, %v2042_v2  ;;  %v2147_v38 = vsel %vm2136_vm2, nan, %v2146_v44  ;;  %v12140_v0 = vshll.u32 %v3716_v15, 8 }
 0x2e5   : > { %v4026_v45 = vpack.c.bf16 %v2147_v38, %v2043_v42  ;;  %v3723_v41 = vsub.s32 32, %v3722_v22  ;;  %vm2247_vm12 = vcmp.eq.s32.totalorder %v12129_v47, 2  ;;  %v2341_v52 = vsel %vm12119_vm15, 0, %v2339_v53 }
 0x2e6   : > { %v3725_v59 = vshll.u32 %v17387_v19, %v3722_v22  ;;  %v3728_v34 = vshll.u32 %v17389_v43, %v3722_v22  ;;  %vm3740_vm5 = vcmp.lt.s32.totalorder %v3721_v40, 1  ;;  %v2248_v12 = vxor.u32 2147483648, %v8724_v61 }
 0x2e7   : > { %8293 = vmatprep.mubr.bf16.mxu0 %v4026_v45  ;;  %v3726_v23 = vshrl.u32 %v17389_v43, %v3723_v41  ;;  %v3729_v2 = vshrl.u32 %v17390_v37, %v3723_v41  ;;  %v3731_v27 = vshll.u32 %v17390_v37, %v3722_v22  ;;  %v3732_v63 = vshrl.u32 %v17395_v21, %v3723_v41 }
 0x2e8   : > { %vm2244_vm1 = vcmp.eq.s32.totalorder %v12129_v47, 0  ;;  %v3734_v60 = vshll.u32 %v17395_v21, %v3722_v22  ;;  %v3735_v53 = vshrl.u32 %v17397_v31, %v3723_v41  ;;  %v3737_v57 = vshll.u32 %v17397_v31, %v3722_v22 }
 0x2e9   : > { %v3738_v39 = vshrl.u32 %v17573_v1, %v3723_v41  ;;  %vm2243_vm15 = vcmp.lt.s32.totalorder %v12129_v47, 2  ;;  %v3724_v10 = vshrl.u32 %v17387_v19, %v3723_v41  ;;  %v3727_v58 = vor.u32 %v3726_v23, %v3725_v59  ;;  %v8726_v44 = vpop.eup %8725 }
 0x2ea   : > { %v3730_v15 = vor.u32 %v3729_v2, %v3728_v34  ;;  %v3733_v26 = vor.u32 %v3732_v63, %v3731_v27  ;;  %v3736_v42 = vor.u32 %v3735_v53, %v3734_v60  ;;  %vm3742_vm0 = vcmp.lt.s32.totalorder %v3721_v40, 3 }
 0x2eb   : > { %v3739_v38 = vor.u32 %v3738_v39, %v3737_v57  ;;  %vm3743_vm7 = vcmp.lt.s32.totalorder %v3721_v40, 4  ;;  %v3744_v45 = vsel %vm3740_vm5, %v3724_v10, %v3727_v58  ;;  %v2345_v41 = vadd.s32 3, %v2341_v52  ;;  %v618_v57 = vpop.permute.xlu1 %617 }
 0x2ec   : > { %v3745_v4 = vsel %vm3743_vm7, %v3733_v26, 2102212464  ;;  %v3748_v49 = vsel %vm3740_vm5, %v3727_v58, %v3730_v15  ;;  %v3752_v22 = vsel %vm3740_vm5, %v3730_v15, %v3733_v26  ;;  %v8728_v17 = vpop.eup %8727  ;;  %v3749_v29 = vsel %vm3743_vm7, %v3736_v42, 920167782 }
 0x2ed   : > { %v3746_v20 = vsel %vm3742_vm0, %v3730_v15, %v3745_v4  ;;  %v3753_v55 = vsel %vm3743_vm7, %v3739_v38, 1326507024  ;;  %v8730_v59 = vpop.eup %8729  ;;  %vm3741_vm13 = vcmp.lt.s32.totalorder %v3721_v40, 2  ;;  %v3750_v34 = vsel %vm3742_vm0, %v3733_v26, %v3749_v29 }
 0x2ee   : > { %v3754_v23 = vsel %vm3742_vm0, %v3736_v42, %v3753_v55  ;;  %v2245_v2 = vxor.u32 2147483648, %v8726_v44  ;;  %v3747_v27 = vsel %vm3741_vm13, %v3744_v45, %v3746_v20  ;;  %v3751_v63 = vsel %vm3741_vm13, %v3748_v49, %v3750_v34 }
 0x2ef   : > { %v3755_v60 = vsel %vm3741_vm13, %v3752_v22, %v3754_v23  ;;  %v2249_v53 = vsel %vm2247_vm12, %v2248_v12, %v8726_v44  ;;  %v12168_v4 = vmul.u32.u64.low %v12140_v0, %v3751_v63  ;;  %v12169_v58 = vmul.u32.u64.high %v12140_v0, %v3751_v63, %v12168_v4 }
 0x2f0   : > { %v12164_v39 = vmul.u32.u64.low %v12140_v0, %v3755_v60  ;;  %v12165_v10 = vmul.u32.u64.high %v12140_v0, %v3755_v60, %v12164_v39  ;;  %v2246_v29 = vsel %vm2244_vm1, %v8724_v61, %v2245_v2  ;;  %v2346_v55 = vand.u32 3, %v2345_v41  ;;  %v17642_v60 = vld [vmem:[#allocation30_spill] sm:$0xff] }
 0x2f1   : > { %v2349_v20 = vxor.u32 2147483648, %v8730_v59  ;;  %v2352_v49 = vxor.u32 2147483648, %v8728_v17  ;;  %v3365_v40 = vshll.u32 %v11910_v28, %v12102_v46  ;;  %v3368_v52 = vsub.s32 4294967266, %v12102_v46 }
 0x2f2   : > { %v2250_v12 = vsel %vm2243_vm15, %v2246_v29, %v2249_v53  ;;  %v658_v15 = vmul.f32 %v11707_v13, %v618_v57  ;;  %v3464_v26 = vclz %v12136_v9  ;;  %v3763_v44 = vmul.u32 %v12140_v0, %v3747_v27 }
 0x2f3   : > { %vm2240_vm4 = vweird.f32 %v17624_v48  ;;  %vm2348_vm6 = vcmp.eq.s32.totalorder %v2346_v55, 0  ;;  %vm3765_vm2 = vc.u32 %v12165_v10, %v12168_v4  ;;  %v3766_v61 = vadd.s32 1, %v12169_v58  ;;  %v17640_v48 = vld [vmem:[#allocation48_spill] sm:$0xff] }
 0x2f4   : > { %v2350_v42 = vsel %vm2348_vm6, %v8728_v17, %v2349_v20  ;;  %vm2351_vm12 = vcmp.eq.s32.totalorder %v2346_v55, 2  ;;  %v2251_v38 = vsel %vm2240_vm4, nan, %v2250_v12  ;;  %vm2347_vm5 = vcmp.lt.s32.totalorder %v2346_v55, 2 }
 0x2f5   : > { %v2353_v47 = vsel %vm2351_vm12, %v2352_v49, %v8730_v59  ;;  %v12187_v45 = vadd.f32 %v658_v15, %v12094_v62  ;;  %v3767_v13 = vsel %vm3765_vm2, %v3766_v61, %v12169_v58  ;;  %vm2344_vm1 = vweird.f32 %v17632_v30  ;;  %v17641_v62 = vld [vmem:[#allocation52_spill] sm:$0xff] }
 0x2f6   : > { %v2354_v9 = vsel %vm2347_vm5, %v2350_v42, %v2353_v47  ;;  %v17116_v0 = vand.u32 2147483647, %v17640_v48  ;;  %v12193_v22 = vand.u32 31, %v12109_v56  ;;  %v8065_v41 = vadd.s32 4294967169, %v12111_v14 }
 0x2f7   : > { %17639 = vst [vmem:[#allocation38_spill] sm:$0xff] %v12187_v45  ;;  %v3768_v17 = vadd.s32 %v3767_v13, %v3763_v44  ;;  %v2355_v34 = vsel %vm2344_vm1, nan, %v2354_v9  ;;  %v8047_v23 = vadd.s32 4294967294, %v3464_v26  ;;  %v3815_v59 = vand.u32 2139095040, %v12187_v45  ;;  %v17645_v13 = vld [vmem:[#allocation42_spill] sm:$0xff] }
 0x2f8   : > { %v4027_v2 = vpack.c.bf16 %v2355_v34, %v2251_v38  ;;  %v2374_v27 = vshrl.u32 %v17389_v43, %v17641_v62  ;;  %v2373_v30 = vshll.u32 %v17387_v19, %v17642_v60  ;;  %v2376_v53 = vshll.u32 %v17389_v43, %v17642_v60 }
 0x2f9   : > { %v3769_v63 = vadd.s32 536870912, %v3768_v17  ;;  %v2377_v57 = vshrl.u32 %v17390_v37, %v17641_v62  ;;  %v3816_v14 = vshrl.u32 %v3815_v59, 23  ;;  %v2363_v39 = vand.u32 8388607, %v17116_v0  ;;  %v17647_v59 = vld [vmem:[#allocation57_spill] sm:$0xff] }
 0x2fa   : > { %8294 = vmatmul.mubr.bf16.gmra.mrb[12].mxu0 %v4027_v2  ;;  %v2379_v58 = vshll.u32 %v17390_v37, %v17642_v60  ;;  %v2380_v29 = vshrl.u32 %v17395_v21, %v17641_v62  ;;  %v17643_v55 = vsub.s32 32, %v12102_v46  ;;  %v2375_v12 = vor.u32 %v2374_v27, %v2373_v30  ;;  %v17648_v27 = vld [vmem:[#allocation53_spill] sm:$0xff] }
 0x2fb   : > { %v12214_v49 = vshrl.u32 %v3769_v63, 30  ;;  %v12216_v15 = vor.u32 %v2377_v57, %v2376_v53  ;;  %v3369_v26 = vadd.s32 127, %v3368_v52  ;;  %v12220_v44 = vadd.s32 %v11918_v11, %v11913_v7  ;;  %v17646_v11 = vld [vmem:[#allocation56_spill] sm:$0xff] }
 0x2fc   : > { %v3366_v20 = vshrl.u32 %v12058_v36, %v17643_v55  ;;  %v8061_v61 = vadd.s32 4294967169, %v3816_v14  ;;  %v2381_v42 = vor.u32 %v2380_v29, %v2379_v58  ;;  %vm8048_vm15 = vcmp.lt.s32.totalorder %v8047_v23, 0 }
 0x2fd   : > { %17644 = vst [vmem:[#allocation7_spill] sm:$0xff] %v12214_v49  ;;  %v3771_v38 = vshll.u32 %v12214_v49, 30  ;;  %v17115_v47 = vand.u32 2147483647, %v12187_v45  ;;  %vm2388_vm0 = vcmp.lt.s32.totalorder %v17645_v13, 1  ;;  %v2364_v9 = vor.u32 8388608, %v2363_v39 }
 0x2fe   : > { %v3822_v36 = vadd.s32 1, %v8061_v61  ;;  %vm2390_vm7 = vcmp.lt.s32.totalorder %v17645_v13, 3  ;;  %v2400_v52 = vsel %vm2388_vm0, %v12216_v15, %v2381_v42  ;;  %v2396_v7 = vsel %vm2388_vm0, %v2375_v12, %v12216_v15 }
 0x2ff   : > { %v12229_v34 = vsub.s32 %v3768_v17, %v3771_v38  ;;  %v2398_v2 = vsel %vm2390_vm7, %v2381_v42, %v17646_v11  ;;  %v2402_v63 = vsel %vm2390_vm7, %v17648_v27, %v17647_v59  ;;  %v12241_v60 = vsel %vm8048_vm15, 0, %v8047_v23 }
 0x300   : > { %v12244_v30 = vsub.s32 32, %v12193_v22  ;;  %vm3823_vm13 = vcmp.gt.s32.totalorder %v3822_v36, 0  ;;  %vm2389_vm4 = vcmp.lt.s32.totalorder %v17645_v13, 2  ;;  %v12250_v17 = vor.u32 %v3366_v20, %v3365_v40 }
 0x301   : > { %v3370_v53 = vshll.u32 %v3369_v26, 23  ;;  %v3824_v57 = vsel %vm3823_vm13, %v3822_v36, 0  ;;  %v2403_v14 = vsel %vm2389_vm4, %v2400_v52, %v2402_v63  ;;  %v12254_v39 = vadd.s32 1, %v8065_v41 }
 0x302   : > { %v3826_v23 = vand.u32 31, %v3824_v57  ;;  %v2399_v58 = vsel %vm2389_vm4, %v2396_v7, %v2398_v2  ;;  %v12258_v29 = vshll.u32 %v2364_v9, 8  ;;  %v3472_v55 = vsub.s32 4294967266, %v12241_v60 }
 0x303   : > { %v3774_v61 = vsub.s32 0, %v12229_v34  ;;  %v3819_v28 = vand.u32 8388607, %v17115_v47  ;;  %v2372_v46 = vshrl.u32 %v17387_v19, %v17641_v62  ;;  %v12266_v40 = vshrl.u32 %v3824_v57, 5 }
 0x304   : > { %v3827_v41 = vsub.s32 32, %v3826_v23  ;;  %v12269_v20 = vmul.u32.u64.low %v12258_v29, %v2403_v14  ;;  %v12270_v26 = vmul.u32.u64.high %v12258_v29, %v2403_v14, %v12269_v20  ;;  %v3829_v38 = vshll.u32 %v17387_v19, %v3826_v23 }
 0x305   : > { %v3832_v36 = vshll.u32 %v17389_v43, %v3826_v23  ;;  %v12275_v9 = vmul.u32.u64.low %v12258_v29, %v2399_v58  ;;  %v12276_v52 = vmul.u32.u64.high %v12258_v29, %v2399_v58, %v12275_v9  ;;  %v3835_v11 = vshll.u32 %v17390_v37, %v3826_v23 }
 0x306   : > { %v3830_v7 = vshrl.u32 %v17389_v43, %v3827_v41  ;;  %v3833_v62 = vshrl.u32 %v17390_v37, %v3827_v41  ;;  %v3836_v2 = vshrl.u32 %v17395_v21, %v3827_v41  ;;  %v3838_v59 = vshll.u32 %v17395_v21, %v3826_v23 }
 0x307   : > { %v3839_v27 = vshrl.u32 %v17397_v31, %v3827_v41  ;;  %v3841_v63 = vshll.u32 %v17397_v31, %v3826_v23  ;;  %v3842_v57 = vshrl.u32 %v17573_v1, %v3827_v41  ;;  %vm17649_vm6 = vcmp.lt.s32.totalorder %v17645_v13, 4 }
 0x308   : > { %v3831_v14 = vor.u32 %v3830_v7, %v3829_v38  ;;  %v3834_v58 = vor.u32 %v3833_v62, %v3832_v36  ;;  %v3837_v20 = vor.u32 %v3836_v2, %v3835_v11  ;;  %v2393_v47 = vsel %vm17649_vm6, %v2381_v42, 2102212464 }
 0x309   : > { %v3371_v0 = vor.u32 4788187, %v3370_v53  ;;  %v3820_v45 = vor.u32 8388608, %v3819_v28  ;;  %v3840_v49 = vor.u32 %v3839_v27, %v3838_v59  ;;  %v3843_v51 = vor.u32 %v3842_v57, %v3841_v63 }
 0x30a   : > { %v3468_v35 = vsub.s32 32, %v12241_v60  ;;  %v3473_v18 = vadd.s32 127, %v3472_v55  ;;  %vm3844_vm2 = vcmp.lt.s32.totalorder %v12266_v40, 1  ;;  %v2392_v23 = vsel %vm2388_vm0, %v2372_v46, %v2375_v12 }
 0x30b   : > { %v8058_v25 = vmin.u32 %v3774_v61, %v12229_v34  ;;  %vm3847_vm12 = vcmp.lt.s32.totalorder %v12266_v40, 4  ;;  %v3852_v38 = vsel %vm3844_vm2, %v3831_v14, %v3834_v58  ;;  %v2394_v42 = vsel %vm2390_vm7, %v12216_v15, %v2393_v47 }
 0x30c   : > { %vm3846_vm5 = vcmp.lt.s32.totalorder %v12266_v40, 3  ;;  %v3853_v53 = vsel %vm3847_vm12, %v3840_v49, 920167782  ;;  %v3856_v55 = vsel %vm3844_vm2, %v3834_v58, %v3837_v20  ;;  %v3857_v12 = vsel %vm3847_vm12, %v3843_v51, 1326507024 }
 0x30d   : > { %vm3845_vm1 = vcmp.lt.s32.totalorder %v12266_v40, 2  ;;  %v3854_v61 = vsel %vm3846_vm5, %v3837_v20, %v3853_v53  ;;  %v3858_v28 = vsel %vm3846_vm5, %v3840_v49, %v3857_v12  ;;  %v12312_v15 = vshll.u32 %v3820_v45, 8 }
 0x30e   : > { %vm3535_vm15 = vcmp.lt.s32.totalorder %v12045_v3, 4  ;;  %vm3927_vm0 = vcmp.gt.s32.totalorder %v12254_v39, 0  ;;  %v3855_v47 = vsel %vm3845_vm1, %v3852_v38, %v3854_v61  ;;  %v3859_v51 = vsel %vm3845_vm1, %v3856_v55, %v3858_v28 }
 0x30f   : > { %v2395_v46 = vsel %vm2389_vm4, %v2392_v23, %v2394_v42  ;;  %v3474_v36 = vshll.u32 %v3473_v18, 23  ;;  %v3776_v7 = vclz %v8058_v25  ;;  %vm2413_vm7 = vc.u32 %v12270_v26, %v12275_v9 }
 0x310   : > { %v12323_v62 = vmul.u32.u64.low %v12312_v15, %v3859_v51  ;;  %v12324_v49 = vmul.u32.u64.high %v12312_v15, %v3859_v51, %v12323_v62  ;;  %v12327_v45 = vmul.u32.u64.low %v12312_v15, %v3855_v47  ;;  %v12328_v11 = vmul.u32.u64.high %v12312_v15, %v3855_v47, %v12327_v45 }
 0x311   : > { %v2414_v2 = vadd.s32 1, %v12276_v52  ;;  %v3470_v59 = vshrl.u32 %v12220_v44, %v3468_v35  ;;  %v12336_v13 = vshrl.u32 %v12109_v56, 5  ;;  %v3630_v25 = vshll.u32 %v17395_v21, %v12193_v22 }
 0x312   : > { %v2411_v18 = vmul.u32 %v12258_v29, %v2395_v46  ;;  %v3372_v27 = vand.u32 2147483647, %v3371_v0  ;;  %v3928_v63 = vsel %vm3927_vm0, %v12254_v39, 0  ;;  %v3849_v57 = vsel %vm3847_vm12, %v3837_v20, 2102212464 }
 0x313   : > { %v2415_v23 = vsel %vm2413_vm7, %v2414_v2, %v12276_v52  ;;  %v3469_v38 = vshll.u32 %v12107_v32, %v12241_v60  ;;  %v3475_v35 = vor.u32 4788187, %v3474_v36  ;;  %v3828_v56 = vshrl.u32 %v17387_v19, %v3827_v41 }
 0x314   : > { %v2416_v44 = vadd.s32 %v2415_v23, %v2411_v18  ;;  %v3374_v42 = vcvt.s32.f32 %v12250_v17  ;;  %v3631_v29 = vshrl.u32 %v17397_v31, %v12244_v30  ;;  %v3634_v0 = vshrl.u32 %v17573_v1, %v12244_v30 }
 0x315   : > { %v8059_v39 = vadd.s32 4294967294, %v3776_v7  ;;  %v3471_v53 = vor.u32 %v3470_v59, %v3469_v38  ;;  %v3848_v52 = vsel %vm3844_vm2, %v3828_v56, %v3831_v14  ;;  %v3850_v32 = vsel %vm3846_vm5, %v3834_v58, %v3849_v57 }
 0x316   : > { %v2417_v60 = vadd.s32 536870912, %v2416_v44  ;;  %v3375_v20 = vmul.f32 %v3374_v42, %v3372_v27  ;;  %v3633_v41 = vshll.u32 %v17397_v31, %v12193_v22  ;;  %v12359_v17 = vand.u32 31, %v3928_v63 }
 0x317   : > { %v3870_v55 = vadd.s32 1, %v12328_v11  ;;  %v12365_v12 = vsel %vm3535_vm15, %v12052_v6, 920167782  ;;  %v3476_v61 = vand.u32 2147483647, %v3475_v35  ;;  %vm3869_vm13 = vc.u32 %v12324_v49, %v12327_v45  ;;  %v17659_v35 = vld [vmem:[#allocation61_spill] sm:$0xff] }
 0x318   : > { %17650 = vst [vmem:[#allocation76_spill] sm:$0xff] %v12359_v17  ;;  %v12369_v14 = vshrl.u32 %v2417_v60, 30  ;;  %v12371_v58 = vor.u32 %v3631_v29, %v3630_v25  ;;  %v3635_v28 = vor.u32 %v3634_v0, %v3633_v41  ;;  %vm8060_vm4 = vcmp.lt.s32.totalorder %v8059_v39, 0  ;;  %v17665_v41 = vld [vmem:[#allocation70_spill] sm:$0xff] }
 0x319   : > { %v3851_v47 = vsel %vm3845_vm1, %v3848_v52, %v3850_v32  ;;  %v17652_v51 = vor.u32 %v12017_v16, %v12035_v24  ;;  %vm3294_vm6 = vcmp.lt.s32.totalorder %v11717_v8, 0  ;;  %v3478_v36 = vcvt.s32.f32 %v3471_v53 }
 0x31a   : > { %17651 = vst [vmem:[#allocation6_spill] sm:$0xff] %v12371_v58  ;;  %v2419_v7 = vshll.u32 %v12369_v14, 30  ;;  %v3376_v62 = vxor.u32 2147483648, %v3375_v20  ;;  %vm3639_vm2 = vcmp.lt.s32.totalorder %v12336_v13, 4  ;;  %v12386_v2 = vsub.s32 32, %v12359_v17 }
 0x31b   : > { %v12380_v46 = vsel %vm3535_vm15, %v17652_v51, 1326507024  ;;  %v3871_v40 = vsel %vm3869_vm13, %v3870_v55, %v12328_v11  ;;  %v12389_v59 = vmul.f32 %v3478_v36, %v3476_v61  ;;  %v12391_v16 = vsel %vm8060_vm4, 0, %v8059_v39 }
 0x31c   : > { %17653 = vst [vmem:[#allocation2_spill] sm:$0xff] %v12386_v2  ;;  %v3867_v24 = vmul.u32 %v12312_v15, %v3851_v47  ;;  %v12394_v25 = vsub.s32 %v2416_v44, %v2419_v7  ;;  %v12399_v18 = vsel %vm3639_vm2, %v12371_v58, 920167782  ;;  %v12403_v27 = vsel %vm3639_vm2, %v3635_v28, 1326507024 }
 0x31d   : > { %17654 = vst [vmem:[#allocation10_spill] sm:$0xff] %v12399_v18  ;;  %17655 = vst [vmem:[#allocation51_spill] sm:$0xff] %v12403_v27  ;;  %v12405_v57 = vshrl.u32 %v3928_v63, 5  ;;  %v12409_v11 = vshll.u32 %v17395_v21, %v12359_v17  ;;  %v12413_v15 = vshll.u32 %v17397_v31, %v12359_v17  ;;  %v2546_v56 = vsub.s32 4, %v17659_v35  ;;  %v17717_v18 = vld [vmem:[#allocation33_spill] sm:$0xff] }
 0x31e   : > { %v12415_v23 = vadd.s32 %v3871_v40, %v3867_v24  ;;  %v2422_v38 = vsub.s32 0, %v12394_v25  ;;  %v12421_v44 = vshrl.u32 %v17397_v31, %v12386_v2  ;;  %v12425_v63 = vshrl.u32 %v17573_v1, %v12386_v2  ;;  %v17678_v24 = vld [vmem:[#allocation67_spill] sm:$0xff] }
 0x31f   : > { %17656 = vst [vmem:[#allocation75_spill] sm:$0xff] %v12405_v57  ;;  %17657 = vst [vmem:[#allocation59_spill] sm:$0xff] %v12409_v11  ;;  %v3780_v42 = vsub.s32 32, %v12391_v16  ;;  %v3784_v29 = vsub.s32 4294967266, %v12391_v16  ;;  %v12431_v0 = vsel %vm3294_vm6, %v3376_v62, %v3375_v20  ;;  %v17662_v52 = vand.u32 2147483647, %v17585_v33 }
 0x320   : > { %17658 = vst [vmem:[#allocation34_spill] sm:$0xff] %v12413_v15  ;;  %17660 = vst [vmem:[#allocation43_spill] sm:$0xff] %v12421_v44  ;;  %v8006_v53 = vmin.u32 %v2422_v38, %v12394_v25  ;;  %v3764_v60 = vadd.s32 %v12168_v4, %v12165_v10  ;;  %vm2358_vm5 = vcmp.lt.s32.totalorder %v17640_v48, 0  ;;  %v2650_v55 = vsub.s32 4, %v17665_v41  ;;  %v17670_v38 = vld [vmem:[#allocation60_spill] sm:$0xff]  ;;  %v17684_v44 = vld [vmem:[#allocation71_spill] sm:$0xff] }
 0x321   : > { %17661 = vst [vmem:[#allocation39_spill] sm:$0xff] %v12425_v63  ;;  %vm12437_vm12 = vcmp.le.f32.partialorder %v17662_v52, 0.7853982  ;;  %v3873_v28 = vadd.s32 536870912, %v12415_v23  ;;  %v2547_v51 = vsel %vm2462_vm8, %v2546_v56, %v17659_v35  ;;  %v12457_v4 = vadd.s32 127, %v3784_v29 }
 0x322   : > { %v2548_v20 = vsel %vm12437_vm12, %v17585_v33, %v11975_v54  ;;  %v2424_v47 = vclz %v8006_v53  ;;  %v12455_v10 = vshrl.u32 %v3764_v60, %v3780_v42  ;;  %v2412_v36 = vadd.s32 %v12275_v9, %v12270_v26  ;;  %v17666_v54 = vld [vmem:[#allocation50_spill] sm:$0xff]  ;;  %v17672_v53 = vld [vmem:[#allocation55_spill] sm:$0xff] }
 0x323   : > { %v17127_v7 = vand.u32 2147483647, %v17666_v54  ;;  %8731 = vcosq.f32 %v2548_v20  ;;  %v17667_v40 = vand.u32 2147483647, %v17588_v50  ;;  %v2686_v35 = vshrl.u32 %v17389_v43, %v17670_v38 }
 0x324   : > { %v8007_v62 = vadd.s32 4294967294, %v2424_v47  ;;  %v2442_v56 = vsub.s32 4, %v12369_v14  ;;  %v2549_v42 = vsel %vm12437_vm12, 0, %v2547_v51  ;;  %v2651_v26 = vsel %vm2566_vm9, %v2650_v55, %v17665_v41 }
 0x325   : > { %vm12464_vm1 = vcmp.le.f32.partialorder %v17667_v40, 0.7853982  ;;  %v2689_v9 = vshrl.u32 %v17390_v37, %v17670_v38  ;;  %v12478_v29 = vshrl.u32 %v3873_v28, 30  ;;  %v2685_v52 = vshll.u32 %v17387_v19, %v17672_v53 }
 0x326   : > { %vm8008_vm8 = vcmp.lt.s32.totalorder %v8007_v62, 0  ;;  %v2688_v60 = vshll.u32 %v17389_v43, %v17672_v53  ;;  %v17673_v47 = vand.u32 2147483647, %v17640_v48  ;;  %v2675_v41 = vand.u32 8388607, %v17127_v7 }
 0x327   : > { %17671 = vst [vmem:[#allocation9_spill] sm:$0xff] %v12478_v29  ;;  %v2427_v51 = vsel %vm8008_vm8, 0, %v8007_v62  ;;  %v2691_v55 = vshll.u32 %v17390_v37, %v17672_v53  ;;  %v2692_v28 = vshrl.u32 %v17395_v21, %v17670_v38  ;;  %v2687_v39 = vor.u32 %v2686_v35, %v2685_v52 }
 0x328   : > { %vm12486_vm0 = vcmp.le.f32.partialorder %v17673_v47, 0.7853982  ;;  %v2428_v40 = vsub.s32 32, %v2427_v51  ;;  %v2432_v61 = vsub.s32 4294967266, %v2427_v51  ;;  %v2690_v1 = vor.u32 %v2689_v9, %v2688_v60 }
 0x329   : > { %8733 = vsinq.f32 %v2548_v20  ;;  %v2553_v31 = vadd.s32 3, %v2549_v42  ;;  %v2652_v62 = vsel %vm12464_vm1, %v17588_v50, %v12001_v5  ;;  %v2693_v47 = vor.u32 %v2692_v28, %v2691_v55  ;;  %v17676_v20 = vld [vmem:[#allocation58_spill] sm:$0xff] }
 0x32a   : > { %v2430_v17 = vshrl.u32 %v2412_v36, %v2428_v40  ;;  %v2433_v7 = vadd.s32 127, %v2432_v61  ;;  %v2443_v53 = vsel %vm2358_vm5, %v2442_v56, %v12369_v14  ;;  %v2653_v2 = vsel %vm12464_vm1, 0, %v2651_v26  ;;  %v17679_v40 = vld [vmem:[#allocation68_spill] sm:$0xff] }
 0x32b   : > { %v2429_v35 = vshll.u32 %v12394_v25, %v2427_v51  ;;  %v2676_v9 = vor.u32 8388608, %v2675_v41  ;;  %vm2700_vm9 = vcmp.lt.s32.totalorder %v17676_v20, 1  ;;  %vm17677_vm7 = vcmp.lt.s32.totalorder %v17676_v20, 4 }
 0x32c   : > { %v2705_v42 = vsel %vm17677_vm7, %v2693_v47, 2102212464  ;;  %v3875_v5 = vshll.u32 %v12478_v29, 30  ;;  %v2684_v61 = vshrl.u32 %v17387_v19, %v17670_v38  ;;  %vm2702_vm13 = vcmp.lt.s32.totalorder %v17676_v20, 3  ;;  %v17680_v38 = vld [vmem:[#allocation64_spill] sm:$0xff] }
 0x32d   : > { %v2708_v36 = vsel %vm2700_vm9, %v2687_v39, %v2690_v1  ;;  %v2431_v14 = vor.u32 %v2430_v17, %v2429_v35  ;;  %v2434_v56 = vshll.u32 %v2433_v7, 23  ;;  %v2710_v26 = vsel %vm2702_vm13, %v2693_v47, %v17678_v24  ;;  %v12514_v25 = vpop.eup %8731 }
 0x32e   : > { %v2712_v52 = vsel %vm2700_vm9, %v2690_v1, %v2693_v47  ;;  %v12516_v60 = vand.u32 3, %v2553_v31  ;;  %vm2701_vm4 = vcmp.lt.s32.totalorder %v17676_v20, 2  ;;  %v2704_v51 = vsel %vm2700_vm9, %v2684_v61, %v2687_v39  ;;  %v17681_v61 = vld [vmem:[#allocation62_spill] sm:$0xff] }
 0x32f   : > { %v2706_v41 = vsel %vm2702_vm13, %v2690_v1, %v2705_v42  ;;  %v2435_v55 = vor.u32 4788187, %v2434_v56  ;;  %v2711_v28 = vsel %vm2701_vm4, %v2708_v36, %v2710_v26  ;;  %v2714_v29 = vsel %vm2702_vm13, %v17680_v38, %v17679_v40 }
 0x330   : > { %v2716_v63 = vshll.u32 %v2676_v9, 8  ;;  %v12522_v17 = vsub.s32 %v12415_v23, %v3875_v5  ;;  %v2445_v7 = vsel %vm12486_vm0, 0, %v2443_v53  ;;  %v2657_v47 = vadd.s32 3, %v2653_v2 }
 0x331   : > { %v2715_v35 = vsel %vm2701_vm4, %v2712_v52, %v2714_v29  ;;  %v2436_v31 = vand.u32 2147483647, %v2435_v55  ;;  %v2438_v24 = vcvt.s32.f32 %v2431_v14  ;;  %8735 = vcosq.f32 %v2652_v62  ;;  %v17682_v14 = vld [vmem:[#allocation27_spill] sm:$0xff] }
 0x332   : > { %v12526_v15 = vmul.u32.u64.low %v2716_v63, %v2715_v35  ;;  %v12527_v20 = vmul.u32.u64.high %v2716_v63, %v2715_v35, %v12526_v15  ;;  %v2707_v1 = vsel %vm2701_vm4, %v2704_v51, %v2706_v41  ;;  %v3786_v23 = vshll.u32 %v12457_v4, 23  ;;  %v17683_v51 = vld [vmem:[#allocation25_spill] sm:$0xff] }
 0x333   : > { %v12529_v39 = vmul.u32.u64.low %v2716_v63, %v2711_v28  ;;  %v12530_v42 = vmul.u32.u64.high %v2716_v63, %v2711_v28, %v12529_v39  ;;  %v8734_v9 = vpop.eup %8733  ;;  %v2439_v5 = vmul.f32 %v2438_v24, %v2436_v31  ;;  %8737 = vsinq.f32 %v2652_v62 }
 0x334   : > { %v17132_v53 = vand.u32 2147483647, %v17681_v61  ;;  %v2449_v2 = vadd.s32 3, %v2445_v7  ;;  %v2560_v29 = vxor.u32 2147483648, %v12514_v25  ;;  %v12536_v36 = vand.u32 3, %v2657_v47 }
 0x335   : > { %v2790_v15 = vshrl.u32 %v17389_v43, %v17682_v14  ;;  %v3878_v56 = vsub.s32 0, %v12522_v17  ;;  %v2440_v26 = vxor.u32 2147483648, %v2439_v5  ;;  %vm2556_vm12 = vcmp.eq.s32.totalorder %v12516_v60, 0 }
 0x336   : > { %vm2559_vm1 = vcmp.eq.s32.totalorder %v12516_v60, 2  ;;  %v2723_v4 = vmul.u32 %v2716_v63, %v2707_v1  ;;  %vm2725_vm8 = vc.u32 %v12527_v20, %v12529_v39  ;;  %v2726_v62 = vadd.s32 1, %v12530_v42 }
 0x337   : > { %v2779_v52 = vand.u32 8388607, %v17132_v53  ;;  %v2789_v41 = vshll.u32 %v17387_v19, %v17683_v51  ;;  %v2792_v55 = vshll.u32 %v17389_v43, %v17683_v51  ;;  %v2441_v28 = vsel %vm2358_vm5, %v2440_v26, %v2439_v5 }
 0x338   : > { %v2793_v63 = vshrl.u32 %v17390_v37, %v17682_v14  ;;  %v2795_v40 = vshll.u32 %v17390_v37, %v17683_v51  ;;  %v2796_v38 = vshrl.u32 %v17395_v21, %v17682_v14  ;;  %v2444_v7 = vsel %vm12486_vm0, %v17640_v48, %v2441_v28  ;;  %v17687_v28 = vld [vmem:[#allocation72_spill] sm:$0xff] }
 0x339   : > { %v12563_v47 = vand.u32 3, %v2449_v2  ;;  %v2727_v35 = vsel %vm2725_vm8, %v2726_v62, %v12530_v42  ;;  %v2791_v31 = vor.u32 %v2790_v15, %v2789_v41  ;;  %8739 = vcosq.f32 %v2444_v7  ;;  %v17686_v15 = vld [vmem:[#allocation12_spill] sm:$0xff] }
 0x33a   : > { %v2728_v24 = vadd.s32 %v2727_v35, %v2723_v4  ;;  %v2794_v1 = vor.u32 %v2793_v63, %v2792_v55  ;;  %v2797_v5 = vor.u32 %v2796_v38, %v2795_v40  ;;  %v8062_v26 = vmin.u32 %v3878_v56, %v12522_v17  ;;  %v17688_v63 = vld [vmem:[#allocation15_spill] sm:$0xff] }
 0x33b   : > { %8741 = vsinq.f32 %v2444_v7  ;;  %v2557_v51 = vxor.u32 2147483648, %v8734_v9  ;;  %v2780_v53 = vor.u32 8388608, %v2779_v52  ;;  %vm2804_vm5 = vcmp.lt.s32.totalorder %v17684_v44, 1  ;;  %v12570_v32 = vpop.eup %8735 }
 0x33c   : > { %v2729_v57 = vadd.s32 536870912, %v2728_v24  ;;  %vm2805_vm9 = vcmp.lt.s32.totalorder %v17684_v44, 2  ;;  %vm2806_vm0 = vcmp.lt.s32.totalorder %v17684_v44, 3  ;;  %vm17685_vm7 = vcmp.lt.s32.totalorder %v17684_v44, 4 }
 0x33d   : > { %v2809_v42 = vsel %vm17685_vm7, %v2797_v5, 2102212464  ;;  %v2812_v2 = vsel %vm2804_vm5, %v2791_v31, %v2794_v1  ;;  %v2814_v56 = vsel %vm2806_vm0, %v2797_v5, %v17686_v15  ;;  %v2816_v4 = vsel %vm2804_vm5, %v2794_v1, %v2797_v5  ;;  %v12581_v62 = vpop.eup %8737 }
 0x33e   : > { %v12583_v52 = vshrl.u32 %v2729_v57, 30  ;;  %v2788_v41 = vshrl.u32 %v17387_v19, %v17682_v14  ;;  %v2815_v55 = vsel %vm2805_vm9, %v2812_v2, %v2814_v56  ;;  %v2818_v40 = vsel %vm2806_vm0, %v17688_v63, %v17687_v28 }
 0x33f   : > { %v2558_v38 = vsel %vm2556_vm12, %v12514_v25, %v2557_v51  ;;  %v2561_v7 = vsel %vm2559_vm1, %v2560_v29, %v8734_v9  ;;  %v2819_v57 = vsel %vm2805_vm9, %v2816_v4, %v2818_v40  ;;  %v2820_v35 = vshll.u32 %v2780_v53, 8 }
 0x340   : > { %v3880_v14 = vclz %v8062_v26  ;;  %v2731_v5 = vshll.u32 %v12583_v52, 30  ;;  %v2808_v2 = vsel %vm2804_vm5, %v2788_v41, %v2791_v31  ;;  %v2810_v15 = vsel %vm2806_vm0, %v2794_v1, %v2809_v42 }
 0x341   : > { %vm2448_vm13 = vweird.f32 %v17640_v48  ;;  %v12606_v56 = vmul.u32.u64.low %v2820_v35, %v2819_v57  ;;  %v12607_v25 = vmul.u32.u64.high %v2820_v35, %v2819_v57, %v12606_v56  ;;  %v12613_v29 = vor.u32 4788187, %v3786_v23  ;;  %v17689_v57 = vld [vmem:[#allocation16_spill] sm:$0xff] }
 0x342   : > { %v12609_v51 = vmul.u32.u64.low %v2820_v35, %v2815_v55  ;;  %v12610_v9 = vmul.u32.u64.high %v2820_v35, %v2815_v55, %v12609_v51  ;;  %vm2552_vm4 = vweird.f32 %v17585_v33  ;;  %vm2555_vm12 = vcmp.lt.s32.totalorder %v12516_v60, 2  ;;  %v17693_v56 = vld [vmem:[#allocation45_spill] sm:$0xff] }
 0x343   : > { %v12617_v53 = vsub.s32 %v2728_v24, %v2731_v5  ;;  %vm2451_vm1 = vcmp.lt.s32.totalorder %v12563_v47, 2  ;;  %vm2452_vm8 = vcmp.eq.s32.totalorder %v12563_v47, 0  ;;  %v2562_v31 = vsel %vm2555_vm12, %v2558_v38, %v2561_v7  ;;  %v8740_v1 = vpop.eup %8739 }
 0x344   : > { %vm2660_vm5 = vcmp.eq.s32.totalorder %v12536_v36, 0  ;;  %vm2455_vm0 = vcmp.eq.s32.totalorder %v12563_v47, 2  ;;  %v2664_v26 = vxor.u32 2147483648, %v12570_v32  ;;  %v2811_v42 = vsel %vm2805_vm9, %v2808_v2, %v2810_v15 }
 0x345   : > { %v2734_v23 = vsub.s32 0, %v12617_v53  ;;  %v8742_v60 = vpop.eup %8741  ;;  %v8063_v24 = vadd.s32 4294967294, %v3880_v14  ;;  %v2456_v4 = vxor.u32 2147483648, %v8740_v1  ;;  %vm2829_vm7 = vc.u32 %v12607_v25, %v12609_v51 }
 0x346   : > { %v2830_v41 = vadd.s32 1, %v12610_v9  ;;  %v2453_v55 = vxor.u32 2147483648, %v8742_v60  ;;  %v2563_v28 = vsel %vm2552_vm4, nan, %v2562_v31  ;;  %v2661_v63 = vxor.u32 2147483648, %v12581_v62 }
 0x347   : > { %v8018_v40 = vmin.u32 %v2734_v23, %v12617_v53  ;;  %v2457_v38 = vsel %vm2455_vm0, %v2456_v4, %v8742_v60  ;;  %v2827_v7 = vmul.u32 %v2820_v35, %v2811_v42  ;;  %v17690_v14 = vand.u32 2147483647, %v17689_v57  ;;  %v17694_v23 = vld [vmem:[#allocation17_spill] sm:$0xff] }
 0x348   : > { %v2831_v44 = vsel %vm2829_vm7, %v2830_v41, %v12610_v9  ;;  %v2454_v2 = vsel %vm2452_vm8, %v8740_v1, %v2453_v55  ;;  %v2754_v33 = vsub.s32 4, %v12583_v52  ;;  %vm8064_vm4 = vcmp.lt.s32.totalorder %v8063_v24, 0 }
 0x349   : > { %vm12637_vm9 = vcmp.le.f32.partialorder %v17690_v14, 0.7853982  ;;  %v2736_v15 = vclz %v8018_v40  ;;  %v2458_v35 = vsel %vm2451_vm1, %v2454_v2, %v2457_v38  ;;  %v2832_v9 = vadd.s32 %v2831_v44, %v2827_v7 }
 0x34a   : > { %v2964_v31 = vsel %vm12637_vm9, %v17689_v57, %v17693_v56  ;;  %v2962_v42 = vsub.s32 4, %v17694_v23  ;;  %v2459_v60 = vsel %vm2448_vm13, nan, %v2458_v35  ;;  %vm2663_vm12 = vcmp.eq.s32.totalorder %v12536_v36, 2  ;;  %v17698_v35 = vld [vmem:[#allocation5_spill] sm:$0xff] }
 0x34b   : > { %vm2670_vm8 = vcmp.lt.s32.totalorder %v17666_v54, 0  ;;  %v8019_v1 = vadd.s32 4294967294, %v2736_v15  ;;  %v4028_v4 = vpack.c.bf16 %v2563_v28, %v2459_v60  ;;  %v2665_v41 = vsel %vm2663_vm12, %v2664_v26, %v12581_v62 }
 0x34c   : > { %v2833_v55 = vadd.s32 536870912, %v2832_v9  ;;  %8743 = vcosq.f32 %v2964_v31  ;;  %v12656_v40 = vsel %vm8064_vm4, 0, %v8063_v24  ;;  %v2662_v47 = vsel %vm2660_vm5, %v12570_v32, %v2661_v63 }
 0x34d   : > { %vm8020_vm1 = vcmp.lt.s32.totalorder %v8019_v1, 0  ;;  %v2755_v48 = vsel %vm2670_vm8, %v2754_v33, %v12583_v52  ;;  %8297 = vmatprep.mubr.bf16.mxu0 %v4028_v4  ;;  %vm2659_vm13 = vcmp.lt.s32.totalorder %v12536_v36, 2  ;;  %v2963_v62 = vsel %vm2878_vm10, %v2962_v42, %v17694_v23  ;;  %v17699_v4 = vld [vmem:[#allocation65_spill] sm:$0xff] }
 0x34e   : > { %v2739_v38 = vsel %vm8020_vm1, 0, %v8019_v1  ;;  %v12665_v28 = vshrl.u32 %v2833_v55, 30  ;;  %v17695_v26 = vand.u32 2147483647, %v17666_v54  ;;  %v2724_v32 = vadd.s32 %v12529_v39, %v12527_v20 }
 0x34f   : > { %v2740_v52 = vsub.s32 32, %v2739_v38  ;;  %v2744_v63 = vsub.s32 4294967266, %v2739_v38  ;;  %v3884_v36 = vsub.s32 32, %v12656_v40  ;;  %v2666_v7 = vsel %vm2659_vm13, %v2662_v47, %v2665_v41 }
 0x350   : > { %vm12672_vm0 = vcmp.le.f32.partialorder %v17695_v26, 0.7853982  ;;  %v2835_v14 = vshll.u32 %v12665_v28, 30  ;;  %v2741_v2 = vshll.u32 %v12617_v53, %v2739_v38  ;;  %v2965_v56 = vsel %vm12637_vm9, 0, %v2963_v62 }
 0x351   : > { %v2757_v44 = vsel %vm12672_vm0, 0, %v2755_v48  ;;  %v2742_v15 = vshrl.u32 %v2724_v32, %v2740_v52  ;;  %v2745_v33 = vadd.s32 127, %v2744_v63  ;;  %v3868_v20 = vadd.s32 %v12327_v45, %v12324_v49  ;;  %v17704_v52 = vld [vmem:[#allocation35_spill] sm:$0xff] }
 0x352   : > { %vm2656_vm10 = vweird.f32 %v17588_v50  ;;  %v12688_v39 = vsub.s32 %v2832_v9, %v2835_v14  ;;  %v3066_v23 = vsub.s32 4, %v17698_v35  ;;  %v17134_v53 = vand.u32 2147483647, %v17699_v4  ;;  %v17700_v9 = vld [vmem:[#allocation63_spill] sm:$0xff] }
 0x353   : > { %v12691_v42 = vsel %vm2656_vm10, nan, %v2666_v7  ;;  %v2743_v60 = vor.u32 %v2742_v15, %v2741_v2  ;;  %v2746_v1 = vshll.u32 %v2745_v33, 23  ;;  %v2761_v5 = vadd.s32 3, %v2757_v44  ;;  %v17705_v33 = vld [vmem:[#allocation74_spill] sm:$0xff] }
 0x354   : > { %v2838_v55 = vsub.s32 0, %v12688_v39  ;;  %v2969_v47 = vadd.s32 3, %v2965_v56  ;;  %v12697_v49 = vshrl.u32 %v3868_v20, %v3884_v36  ;;  %v17701_v48 = vand.u32 2147483647, %v17700_v9 }
 0x355   : > { %v2747_v45 = vor.u32 4788187, %v2746_v1  ;;  %8745 = vsinq.f32 %v2964_v31  ;;  %v12712_v32 = vsel %vm2982_vm11, %v3066_v23, %v17698_v35  ;;  %v2750_v7 = vcvt.s32.f32 %v2743_v60  ;;  %v17706_v60 = vld [vmem:[#allocation11_spill] sm:$0xff] }
 0x356   : > { %vm12702_vm5 = vcmp.le.f32.partialorder %v17701_v48, 0.7853982  ;;  %v12706_v62 = vpop.eup %8743  ;;  %v8022_v26 = vmin.u32 %v2838_v55, %v12688_v39  ;;  %v2828_v44 = vadd.s32 %v12609_v51, %v12607_v25  ;;  %v3091_v14 = vand.u32 8388607, %v17134_v53 }
 0x357   : > { %v12718_v63 = vsel %vm12702_vm5, %v17700_v9, %v17704_v52  ;;  %v2748_v36 = vand.u32 2147483647, %v2747_v45  ;;  %v12724_v31 = vand.u32 3, %v2761_v5  ;;  %v12726_v15 = vand.u32 3, %v2969_v47 }
 0x358   : > { %v2840_v2 = vclz %v8022_v26  ;;  %v3102_v56 = vshrl.u32 %v17389_v43, %v17705_v33  ;;  %v2976_v35 = vxor.u32 2147483648, %v12706_v62  ;;  %v3069_v23 = vsel %vm12702_vm5, 0, %v12712_v32 }
 0x359   : > { %v2751_v20 = vmul.f32 %v2750_v7, %v2748_v36  ;;  %8747 = vcosq.f32 %v12718_v63  ;;  %vm2774_vm11 = vcmp.lt.s32.totalorder %v17681_v61, 0  ;;  %v2858_v51 = vsub.s32 4, %v12665_v28 }
 0x35a   : > { %v8023_v25 = vadd.s32 4294967294, %v2840_v2  ;;  %v3101_v1 = vshll.u32 %v17387_v19, %v17706_v60  ;;  %v3105_v5 = vshrl.u32 %v17390_v37, %v17705_v33  ;;  %v3092_v47 = vor.u32 8388608, %v3091_v14  ;;  %v17707_v14 = vld [vmem:[#allocation73_spill] sm:$0xff] }
 0x35b   : > { %v2752_v55 = vxor.u32 2147483648, %v2751_v20  ;;  %v3100_v45 = vshrl.u32 %v17387_v19, %v17705_v33  ;;  %v3104_v48 = vshll.u32 %v17389_v43, %v17706_v60  ;;  %v3107_v26 = vshll.u32 %v17390_v37, %v17706_v60 }
 0x35c   : > { %vm8024_vm7 = vcmp.lt.s32.totalorder %v8023_v25, 0  ;;  %v3103_v38 = vor.u32 %v3102_v56, %v3101_v1  ;;  %v3108_v32 = vshrl.u32 %v17395_v21, %v17705_v33  ;;  %vm3116_vm9 = vcmp.lt.s32.totalorder %v17707_v14, 1 }
 0x35d   : > { %v2753_v52 = vsel %vm2670_vm8, %v2752_v55, %v2751_v20  ;;  %v2843_v36 = vsel %vm8024_vm7, 0, %v8023_v25  ;;  %v3106_v7 = vor.u32 %v3105_v5, %v3104_v48  ;;  %v17708_v53 = vand.u32 2147483647, %v17681_v61  ;;  %v17711_v48 = vld [vmem:[#allocation24_spill] sm:$0xff] }
 0x35e   : > { %v2756_v2 = vsel %vm12672_vm0, %v17666_v54, %v2753_v52  ;;  %v2844_v60 = vsub.s32 32, %v2843_v36  ;;  %v2845_v33 = vshll.u32 %v12688_v39, %v2843_v36  ;;  %v2848_v1 = vsub.s32 4294967266, %v2843_v36 }
 0x35f   : > { %vm12757_vm4 = vcmp.le.f32.partialorder %v17708_v53, 0.7853982  ;;  %vm2972_vm12 = vcmp.eq.s32.totalorder %v12726_v15, 0  ;;  %vm2975_vm8 = vcmp.eq.s32.totalorder %v12726_v15, 2  ;;  %8749 = vcosq.f32 %v2756_v2  ;;  %v8746_v24 = vpop.eup %8745 }
 0x360   : > { %v3109_v20 = vor.u32 %v3108_v32, %v3107_v26  ;;  %vm3117_vm1 = vcmp.lt.s32.totalorder %v17707_v14, 2  ;;  %vm3118_vm13 = vcmp.lt.s32.totalorder %v17707_v14, 3  ;;  %8751 = vsinq.f32 %v2756_v2 }
 0x361   : > { %v2846_v53 = vshrl.u32 %v2828_v44, %v2844_v60  ;;  %v2849_v25 = vadd.s32 127, %v2848_v1  ;;  %v3120_v5 = vsel %vm3116_vm9, %v3100_v45, %v3103_v38  ;;  %v3124_v55 = vsel %vm3116_vm9, %v3103_v38, %v3106_v7  ;;  %v17712_v1 = vld [vmem:[#allocation14_spill] sm:$0xff] }
 0x362   : > { %v3121_v39 = vsel %vm3119_vm14, %v3109_v20, 2102212464  ;;  %v3126_v26 = vsel %vm3118_vm13, %v3109_v20, %v17711_v48  ;;  %v3128_v32 = vsel %vm3116_vm9, %v3106_v7, %v3109_v20  ;;  %vm2767_vm14 = vcmp.eq.s32.totalorder %v12724_v31, 2  ;;  %v17713_v48 = vld [vmem:[#allocation3_spill] sm:$0xff] }
 0x363   : > { %v2847_v52 = vor.u32 %v2846_v53, %v2845_v33  ;;  %v2850_v36 = vshll.u32 %v2849_v25, 23  ;;  %v3122_v44 = vsel %vm3118_vm13, %v3106_v7, %v3121_v39  ;;  %v3127_v45 = vsel %vm3117_vm1, %v3124_v55, %v3126_v26  ;;  %v12781_v2 = vpop.eup %8747  ;;  %v17714_v39 = vld [vmem:[#allocation26_spill] sm:$0xff] }
 0x364   : > { %v2859_v38 = vsel %vm2774_vm11, %v2858_v51, %v12665_v28  ;;  %v2973_v60 = vxor.u32 2147483648, %v8746_v24  ;;  %v3130_v33 = vsel %vm3118_vm13, %v17713_v48, %v17712_v1  ;;  %v3132_v20 = vshll.u32 %v3092_v47, 8 }
 0x365   : > { %vm2764_vm0 = vcmp.eq.s32.totalorder %v12724_v31, 0  ;;  %v2851_v7 = vor.u32 4788187, %v2850_v36  ;;  %v3123_v53 = vsel %vm3117_vm1, %v3120_v5, %v3122_v44  ;;  %v3131_v25 = vsel %vm3117_vm1, %v3128_v32, %v3130_v33 }
 0x366   : > { %v17135_v55 = vand.u32 2147483647, %v17714_v39  ;;  %vm2763_vm10 = vcmp.lt.s32.totalorder %v12724_v31, 2  ;;  %v12798_v28 = vmul.u32.u64.low %v3132_v20, %v3131_v25  ;;  %v12799_v51 = vmul.u32.u64.high %v3132_v20, %v3131_v25, %v12798_v28 }
 0x367   : > { %v12801_v26 = vmul.u32.u64.low %v3132_v20, %v3127_v45  ;;  %v12802_v41 = vmul.u32.u64.high %v3132_v20, %v3127_v45, %v12801_v26  ;;  %vm2760_vm5 = vweird.f32 %v17666_v54  ;;  %v2852_v47 = vand.u32 2147483647, %v2851_v7  ;;  %v17715_v45 = vld [vmem:[#allocation44_spill] sm:$0xff] }
 0x368   : > { %v2854_v36 = vcvt.s32.f32 %v2847_v52  ;;  %8753 = vsinq.f32 %v12718_v63  ;;  %v3073_v5 = vadd.s32 3, %v3069_v23  ;;  %v2861_v14 = vsel %vm12757_vm4, 0, %v2859_v38  ;;  %v17716_v63 = vld [vmem:[#allocation23_spill] sm:$0xff] }
 0x369   : > { %v12812_v32 = vsel %vm2972_vm12, %v12706_v62, %v2973_v60  ;;  %v2977_v44 = vsel %vm2975_vm8, %v2976_v35, %v8746_v24  ;;  %v3206_v1 = vshrl.u32 %v17389_v43, %v17715_v45  ;;  %v3139_v48 = vmul.u32 %v3132_v20, %v3123_v53  ;;  %v8750_v33 = vpop.eup %8749 }
 0x36a   : > { %v2855_v52 = vmul.f32 %v2854_v36, %v2852_v47  ;;  %v3205_v23 = vshll.u32 %v17387_v19, %v17716_v63  ;;  %v3209_v38 = vshrl.u32 %v17390_v37, %v17715_v45  ;;  %vm3141_vm7 = vc.u32 %v12799_v51, %v12801_v26  ;;  %v8752_v60 = vpop.eup %8751 }
 0x36b   : > { %v3142_v62 = vadd.s32 1, %v12802_v41  ;;  %v3195_v35 = vand.u32 8388607, %v17135_v55  ;;  %v3208_v24 = vshll.u32 %v17389_v43, %v17716_v63  ;;  %v2768_v20 = vxor.u32 2147483648, %v8750_v33 }
 0x36c   : > { %v2856_v7 = vxor.u32 2147483648, %v2855_v52  ;;  %v3207_v53 = vor.u32 %v3206_v1, %v3205_v23  ;;  %v3211_v25 = vshll.u32 %v17390_v37, %v17716_v63  ;;  %v2765_v28 = vxor.u32 2147483648, %v8752_v60 }
 0x36d   : > { %v3143_v47 = vsel %vm3141_vm7, %v3142_v62, %v12802_v41  ;;  %v3210_v36 = vor.u32 %v3209_v38, %v3208_v24  ;;  %v3212_v50 = vshrl.u32 %v17395_v21, %v17715_v45  ;;  %v2769_v55 = vsel %vm2767_vm14, %v2768_v20, %v8752_v60  ;;  %v17718_v24 = vld [vmem:[#allocation4_spill] sm:$0xff] }
 0x36e   : > { %v2857_v11 = vsel %vm2774_vm11, %v2856_v7, %v2855_v52  ;;  %v2865_v58 = vadd.s32 3, %v2861_v14  ;;  %v3144_v27 = vadd.s32 %v3143_v47, %v3139_v48  ;;  %vm3398_vm9 = vcmp.lt.s32.totalorder %v17717_v18, 0  ;;  %v17721_v60 = vld [vmem:[#allocation32_spill] sm:$0xff] }
 0x36f   : > { %v2766_v1 = vsel %vm2764_vm0, %v8750_v33, %v2765_v28  ;;  %v2860_v41 = vsel %vm12757_vm4, %v17681_v61, %v2857_v11  ;;  %v3196_v63 = vor.u32 8388608, %v3195_v35  ;;  %v3213_v23 = vor.u32 %v3212_v50, %v3211_v25  ;;  %v17720_v35 = vld [vmem:[#allocation29_spill] sm:$0xff] }
 0x370   : > { %v2770_v38 = vsel %vm2763_vm10, %v2766_v1, %v2769_v55  ;;  %8755 = vcosq.f32 %v2860_v41  ;;  %v3145_v62 = vadd.s32 536870912, %v3144_v27  ;;  %vm3220_vm11 = vcmp.lt.s32.totalorder %v17718_v24, 1  ;;  %v17719_v55 = vld [vmem:[#allocation20_spill] sm:$0xff] }
 0x371   : > { %v2771_v14 = vsel %vm2760_vm5, nan, %v2770_v38  ;;  %8757 = vsinq.f32 %v2860_v41  ;;  %vm3222_vm12 = vcmp.lt.s32.totalorder %v17718_v24, 3  ;;  %v3228_v52 = vsel %vm3220_vm11, %v3207_v53, %v3210_v36 }
 0x372   : > { %v12854_v56 = vpop.eup %8753  ;;  %v4029_v11 = vpack.c.bf16 %v2771_v14, %v12691_v42  ;;  %v3146_v50 = vshrl.u32 %v3145_v62, 30  ;;  %v3204_v31 = vshrl.u32 %v17387_v19, %v17715_v45  ;;  %v3230_v48 = vsel %vm3222_vm12, %v3213_v23, %v17719_v55 }
 0x373   : > { %vm3221_vm4 = vcmp.lt.s32.totalorder %v17718_v24, 2  ;;  %v3225_v54 = vsel %vm3223_vm3, %v3213_v23, 2102212464  ;;  %v3232_v33 = vsel %vm3220_vm11, %v3210_v36, %v3213_v23  ;;  %v3234_v42 = vsel %vm3222_vm12, %v17721_v60, %v17720_v35 }
 0x374   : > { %8298 = vmatmul.mubr.bf16.gmra.mrb[16].mxu0 %v4029_v11  ;;  %v3147_v20 = vshll.u32 %v3146_v50, 30  ;;  %v3231_v45 = vsel %vm3221_vm4, %v3228_v52, %v3230_v48  ;;  %v3235_v7 = vsel %vm3221_vm4, %v3232_v33, %v3234_v42  ;;  %v3236_v25 = vshll.u32 %v3196_v63, 8 }
 0x375   : > { %v17722_v28 = vsub.s32 4294967266, %v12656_v40  ;;  %vm2971_vm3 = vcmp.lt.s32.totalorder %v12726_v15, 2  ;;  %v12880_v1 = vand.u32 3, %v3073_v5  ;;  %v3224_v41 = vsel %vm3220_vm11, %v3204_v31, %v3207_v53 }
 0x376   : > { %v12884_v23 = vsub.s32 %v3144_v27, %v3147_v20  ;;  %v3226_v38 = vsel %vm3222_vm12, %v3210_v36, %v3225_v54  ;;  %v12888_v62 = vmul.u32.u64.low %v3236_v25, %v3235_v7  ;;  %v12889_v14 = vmul.u32.u64.high %v3236_v25, %v3235_v7, %v12888_v62 }
 0x377   : > { %v12877_v47 = vadd.s32 127, %v17722_v28  ;;  %v2866_v63 = vand.u32 3, %v2865_v58  ;;  %v2978_v52 = vsel %vm2971_vm3, %v12812_v32, %v2977_v44  ;;  %v17723_v15 = vxor.u32 2147483648, %v12389_v59 }
 0x378   : > { %v12892_v11 = vmul.u32.u64.low %v3236_v25, %v3231_v45  ;;  %v12893_v55 = vmul.u32.u64.high %v3236_v25, %v3231_v45, %v12892_v11  ;;  %v17724_v5 = vshll.u32 %v12229_v34, %v12391_v16  ;;  %v3788_v58 = vand.u32 2147483647, %v12613_v29  ;;  %v17732_v29 = vld [vmem:[#allocation46_spill] sm:$0xff] }
 0x379   : > { %v12901_v27 = vsel %vm3398_vm9, %v17723_v15, %v12389_v59  ;;  %v3150_v32 = vsub.s32 0, %v12884_v23  ;;  %v17725_v44 = vshll.u32 %v12522_v17, %v12656_v40  ;;  %v3890_v31 = vshll.u32 %v12877_v47, 23  ;;  %v17726_v47 = vld [vmem:[#allocation8_spill] sm:$0xff] }
 0x37a   : > { %v12907_v53 = vor.u32 %v12455_v10, %v17724_v5  ;;  %vm2968_vm8 = vweird.f32 %v17689_v57  ;;  %v3227_v34 = vsel %vm3221_vm4, %v3224_v41, %v3226_v38  ;;  %v8756_v59 = vpop.eup %8755  ;;  %vm2864_vm1 = vweird.f32 %v17681_v61 }
 0x37b   : > { %v12915_v36 = vor.u32 %v12697_v49, %v17725_v44  ;;  %v2979_v16 = vsel %vm2968_vm8, nan, %v2978_v52  ;;  %v8034_v10 = vmin.u32 %v3150_v32, %v12884_v23  ;;  %vm3245_vm13 = vc.u32 %v12889_v14, %v12892_v11  ;;  %v8758_v17 = vpop.eup %8757 }
 0x37c   : > { %vm2871_vm14 = vcmp.eq.s32.totalorder %v2866_v63, 2  ;;  %v2872_v40 = vxor.u32 2147483648, %v8756_v59  ;;  %vm3076_vm0 = vcmp.eq.s32.totalorder %v12880_v1, 0  ;;  %v3246_v49 = vadd.s32 1, %v12893_v55 }
 0x37d   : > { %v2869_v57 = vxor.u32 2147483648, %v8758_v17  ;;  %v3152_v48 = vclz %v8034_v10  ;;  %v3170_v24 = vsub.s32 4, %v3146_v50  ;;  %v3243_v54 = vmul.u32 %v3236_v25, %v3227_v34 }
 0x37e   : > { %vm2868_vm10 = vcmp.eq.s32.totalorder %v2866_v63, 0  ;;  %v2873_v33 = vsel %vm2871_vm14, %v2872_v40, %v8758_v17  ;;  %vm3086_vm5 = vcmp.lt.s32.totalorder %v17699_v4, 0  ;;  %v3247_v35 = vsel %vm3245_vm13, %v3246_v49, %v12893_v55 }
 0x37f   : > { %vm2867_vm7 = vcmp.lt.s32.totalorder %v2866_v63, 2  ;;  %v2870_v60 = vsel %vm2868_vm10, %v8756_v59, %v2869_v57  ;;  %v8035_v42 = vadd.s32 4294967294, %v3152_v48  ;;  %v3248_v20 = vadd.s32 %v3247_v35, %v3243_v54 }
 0x380   : > { %v2874_v45 = vsel %vm2867_vm7, %v2870_v60, %v2873_v33  ;;  %v3077_v7 = vxor.u32 2147483648, %v12854_v56  ;;  %v3080_v28 = vxor.u32 2147483648, %v12781_v2  ;;  %v3378_v41 = vsub.s32 4, %v17726_v47  ;;  %v17731_v60 = vld [vmem:[#allocation21_spill] sm:$0xff] }
 0x381   : > { %v2875_v25 = vsel %vm2864_vm1, nan, %v2874_v45  ;;  %vm8036_vm11 = vcmp.lt.s32.totalorder %v8035_v42, 0  ;;  %v3171_v38 = vsel %vm3086_vm5, %v3170_v24, %v3146_v50  ;;  %v3249_v62 = vadd.s32 536870912, %v3248_v20 }
 0x382   : > { %v4030_v52 = vpack.c.bf16 %v2979_v16, %v2875_v25  ;;  %vm3079_vm12 = vcmp.eq.s32.totalorder %v12880_v1, 2  ;;  %v17727_v63 = vand.u32 2147483647, %v17699_v4  ;;  %v3155_v15 = vsel %vm8036_vm11, 0, %v8035_v42 }
 0x383   : > { %v3140_v5 = vadd.s32 %v12801_v26, %v12799_v51  ;;  %v3156_v61 = vsub.s32 32, %v3155_v15  ;;  %v3160_v32 = vsub.s32 4294967266, %v3155_v15  ;;  %v12945_v44 = vshrl.u32 %v3249_v62, 30 }
 0x384   : > { %vm12939_vm4 = vcmp.le.f32.partialorder %v17727_v63, 0.7853982  ;;  %8301 = vmatprep.mubr.bf16.mxu0 %v4030_v52  ;;  %v3078_v50 = vsel %vm3076_vm0, %v12781_v2, %v3077_v7  ;;  %v3081_v34 = vsel %vm3079_vm12, %v3080_v28, %v12854_v56  ;;  %v3379_v16 = vsel %vm3294_vm6, %v3378_v41, %v17726_v47  ;;  %v12978_v7 = vpop.f32.mrb[0].mxu0 }
 0x385   : > { %v3173_v59 = vsel %vm12939_vm4, 0, %v3171_v38  ;;  %v3157_v51 = vshll.u32 %v12884_v23, %v3155_v15  ;;  %v3158_v26 = vshrl.u32 %v3140_v5, %v3156_v61  ;;  %v3161_v10 = vadd.s32 127, %v3160_v32 }
 0x386   : > { %v3251_v17 = vshll.u32 %v12945_v44, 30  ;;  %v3790_v40 = vcvt.s32.f32 %v12907_v53  ;;  %v12959_v49 = vor.u32 4788187, %v3890_v31  ;;  %vm3075_vm3 = vcmp.lt.s32.totalorder %v12880_v1, 2 }
 0x387   : > { %v17730_v2 = vand.u32 2147483647, %v11717_v8  ;;  %v3159_v56 = vor.u32 %v3158_v26, %v3157_v51  ;;  %v3162_v57 = vshll.u32 %v3161_v10, 23  ;;  %v3894_v54 = vcvt.s32.f32 %v12915_v36 }
 0x388   : > { %v12964_v48 = vsub.s32 %v3248_v20, %v3251_v17  ;;  %v12968_v23 = vmul.f32 %v3790_v40, %v3788_v58  ;;  %v3082_v33 = vsel %vm3075_vm3, %v3078_v50, %v3081_v34  ;;  %v3177_v53 = vadd.s32 3, %v3173_v59  ;;  %v17737_v59 = vld [vmem:[#allocation31_spill] sm:$0xff] }
 0x389   : > { %vm3293_vm8 = vcmp.le.f32.partialorder %v17730_v2, 0.7853982  ;;  %v3163_v31 = vor.u32 4788187, %v3162_v57  ;;  %v3500_v42 = vand.u32 2147483647, %v17731_v60  ;;  %vm3072_vm6 = vweird.f32 %v17700_v9 }
 0x38a   : > { %v3381_v24 = vsel %vm3293_vm8, 0, %v3379_v16  ;;  %v3254_v35 = vsub.s32 0, %v12964_v48  ;;  %v3380_v1 = vsel %vm3293_vm8, %v11717_v8, %v12431_v0  ;;  %v3892_v20 = vand.u32 2147483647, %v12959_v49 }
 0x38b   : > { %v3385_v45 = vadd.s32 3, %v3381_v24  ;;  %v3482_v58 = vsub.s32 4, %v17732_v29  ;;  %v12980_v28 = vsel %vm3072_vm6, nan, %v3082_v33  ;;  %v3164_v47 = vand.u32 2147483647, %v3163_v31 }
 0x38c   : > { %v3166_v41 = vcvt.s32.f32 %v3159_v56  ;;  %v8038_v25 = vmin.u32 %v3254_v35, %v12964_v48  ;;  %v12983_v38 = vand.u32 3, %v3177_v53  ;;  %v3244_v0 = vadd.s32 %v12892_v11, %v12889_v14  ;;  %v17736_v11 = vld [vmem:[#allocation18_spill] sm:$0xff] }
 0x38d   : > { %8759 = vcosq.f32 %v3380_v1  ;;  %v17733_v62 = vand.u32 2147483647, %v17717_v18  ;;  %v3507_v15 = vand.u32 8388607, %v3500_v42  ;;  %v12995_v5 = vand.u32 3, %v3385_v45 }
 0x38e   : > { %v3167_v52 = vmul.f32 %v3166_v41, %v3164_v47  ;;  %v3256_v63 = vclz %v8038_v25  ;;  %8761 = vsinq.f32 %v3380_v1  ;;  %v13000_v61 = vsel %vm3398_vm9, %v3482_v58, %v17732_v29 }
 0x38f   : > { %vm12989_vm1 = vcmp.le.f32.partialorder %v17733_v62, 0.7853982  ;;  %v3518_v32 = vshrl.u32 %v17389_v43, %v17736_v11  ;;  %vm3190_vm13 = vcmp.lt.s32.totalorder %v17714_v39, 0  ;;  %v3517_v16 = vshll.u32 %v17387_v19, %v17737_v59 }
 0x390   : > { %v3484_v14 = vsel %vm12989_vm1, %v17717_v18, %v12901_v27  ;;  %v3168_v50 = vxor.u32 2147483648, %v3167_v52  ;;  %v8039_v34 = vadd.s32 4294967294, %v3256_v63  ;;  %v3521_v51 = vshrl.u32 %v17390_v37, %v17736_v11 }
 0x391   : > { %v3274_v26 = vsub.s32 4, %v12945_v44  ;;  %v3520_v10 = vshll.u32 %v17389_v43, %v17737_v59  ;;  %v3523_v27 = vshll.u32 %v17390_v37, %v17737_v59  ;;  %v3524_v17 = vshrl.u32 %v17395_v21, %v17736_v11 }
 0x392   : > { %v3169_v40 = vsel %vm3086_vm5, %v3168_v50, %v3167_v52  ;;  %vm8040_vm9 = vcmp.lt.s32.totalorder %v8039_v34, 0  ;;  %v3508_v2 = vor.u32 8388608, %v3507_v15  ;;  %v3519_v56 = vor.u32 %v3518_v32, %v3517_v16  ;;  %v13044_v15 = vpop.f32.mrb[1].mxu0 }
 0x393   : > { %v3172_v57 = vsel %vm12939_vm4, %v17699_v4, %v3169_v40  ;;  %v3259_v24 = vsel %vm8040_vm9, 0, %v8039_v34  ;;  %v3522_v33 = vor.u32 %v3521_v51, %v3520_v10  ;;  %v3525_v53 = vor.u32 %v3524_v17, %v3523_v27  ;;  %v13053_v59 = vpop.f32.mrb[2].mxu0  ;;  %v17741_v40 = vld [vmem:[#allocation13_spill] sm:$0xff] }
 0x394   : > { %8763 = vcosq.f32 %v3172_v57  ;;  %v17738_v31 = vand.u32 2147483647, %v17714_v39  ;;  %v3260_v1 = vsub.s32 32, %v3259_v24  ;;  %v3264_v45 = vsub.s32 4294967266, %v3259_v24 }
 0x395   : > { %v3516_v29 = vshrl.u32 %v17387_v19, %v17736_v11  ;;  %8765 = vsinq.f32 %v3172_v57  ;;  %v3261_v58 = vshll.u32 %v12964_v48, %v3259_v24  ;;  %vm3532_vm0 = vcmp.lt.s32.totalorder %v12045_v3, 1 }
 0x396   : > { %vm13027_vm14 = vcmp.le.f32.partialorder %v17738_v31, 0.7853982  ;;  %vm3533_vm10 = vcmp.lt.s32.totalorder %v12045_v3, 2  ;;  %v3262_v55 = vshrl.u32 %v3244_v0, %v3260_v1  ;;  %v3265_v47 = vadd.s32 127, %v3264_v45 }
 0x397   : > { %vm3534_vm5 = vcmp.lt.s32.totalorder %v12045_v3, 3  ;;  %v3536_v41 = vsel %vm3532_vm0, %v3516_v29, %v3519_v56  ;;  %v13037_v25 = vpop.eup %8759  ;;  %v3537_v62 = vsel %vm3535_vm15, %v3525_v53, 2102212464  ;;  %v3540_v52 = vsel %vm3532_vm0, %v3519_v56, %v3522_v33 }
 0x398   : > { %v3542_v63 = vsel %vm3534_vm5, %v3525_v53, %v12365_v12  ;;  %v3544_v48 = vsel %vm3532_vm0, %v3522_v33, %v3525_v53  ;;  %v13046_v11 = vpop.eup %8761  ;;  %vm3183_vm7 = vcmp.eq.s32.totalorder %v12983_v38, 2  ;;  %v3263_v0 = vor.u32 %v3262_v55, %v3261_v58 }
 0x399   : > { %v3266_v32 = vshll.u32 %v3265_v47, 23  ;;  %v3538_v50 = vsel %vm3534_vm5, %v3522_v33, %v3537_v62  ;;  %v3543_v34 = vsel %vm3533_vm10, %v3540_v52, %v3542_v63  ;;  %vm3180_vm15 = vcmp.eq.s32.totalorder %v12983_v38, 0 }
 0x39a   : > { %v3275_v12 = vsel %vm3190_vm13, %v3274_v26, %v12945_v44  ;;  %8767 = vcosq.f32 %v3484_v14  ;;  %v3546_v16 = vsel %vm3534_vm5, %v12052_v6, %v12380_v46  ;;  %v3548_v51 = vshll.u32 %v3508_v2, 8 }
 0x39b   : > { %vm3179_vm11 = vcmp.lt.s32.totalorder %v12983_v38, 2  ;;  %v3267_v10 = vor.u32 4788187, %v3266_v32  ;;  %v3539_v27 = vsel %vm3533_vm10, %v3536_v41, %v3538_v50  ;;  %v3547_v17 = vsel %vm3533_vm10, %v3544_v48, %v3546_v16 }
 0x39c   : > { %v3604_v56 = vand.u32 2147483647, %v17741_v40  ;;  %vm3176_vm12 = vweird.f32 %v17699_v4  ;;  %v13070_v44 = vmul.u32.u64.low %v3548_v51, %v3547_v17  ;;  %v13071_v26 = vmul.u32.u64.high %v3548_v51, %v3547_v17, %v13070_v44 }
 0x39d   : > { %v13073_v57 = vmul.u32.u64.low %v3548_v51, %v3543_v34  ;;  %v13074_v24 = vmul.u32.u64.high %v3548_v51, %v3543_v34, %v13073_v57  ;;  %v3268_v6 = vand.u32 2147483647, %v3267_v10  ;;  %v3270_v46 = vcvt.s32.f32 %v3263_v0 }
 0x39e   : > { %v3485_v2 = vsel %vm12989_vm1, 0, %v13000_v61  ;;  %8769 = vsinq.f32 %v3484_v14  ;;  %v3277_v3 = vsel %vm13027_vm14, 0, %v3275_v12  ;;  %v3389_v33 = vxor.u32 2147483648, %v13046_v11  ;;  %v8764_v1 = vpop.eup %8763 }
 0x39f   : > { %v3392_v53 = vxor.u32 2147483648, %v13037_v25  ;;  %v3622_v31 = vshrl.u32 %v17389_v43, %v12244_v30  ;;  %v3271_v45 = vmul.f32 %v3270_v46, %v3268_v6  ;;  %v3555_v29 = vmul.u32 %v3548_v51, %v3539_v27  ;;  %v8766_v61 = vpop.eup %8765 }
 0x3a0   : > { %v3611_v58 = vand.u32 8388607, %v3604_v56  ;;  %v3625_v9 = vshrl.u32 %v17390_v37, %v12244_v30  ;;  %v3184_v14 = vxor.u32 2147483648, %v8764_v1  ;;  %vm3557_vm4 = vc.u32 %v13071_v26, %v13073_v57 }
 0x3a1   : > { %v3558_v55 = vadd.s32 1, %v13074_v24  ;;  %v3621_v47 = vshll.u32 %v17387_v19, %v12193_v22  ;;  %v3181_v41 = vxor.u32 2147483648, %v8766_v61  ;;  %v3272_v62 = vxor.u32 2147483648, %v3271_v45 }
 0x3a2   : > { %vm3391_vm3 = vcmp.eq.s32.totalorder %v12995_v5, 2  ;;  %v3624_v52 = vshll.u32 %v17389_v43, %v12193_v22  ;;  %v3627_v63 = vshll.u32 %v17390_v37, %v12193_v22  ;;  %v3185_v48 = vsel %vm3183_vm7, %v3184_v14, %v8766_v61 }
 0x3a3   : > { %v3559_v0 = vsel %vm3557_vm4, %v3558_v55, %v13074_v24  ;;  %v3623_v32 = vor.u32 %v3622_v31, %v3621_v47  ;;  %v3628_v50 = vshrl.u32 %v17395_v21, %v12244_v30  ;;  %v3182_v34 = vsel %vm3180_vm15, %v8764_v1, %v3181_v41 }
 0x3a4   : > { %v3273_v12 = vsel %vm3190_vm13, %v3272_v62, %v3271_v45  ;;  %v3560_v16 = vadd.s32 %v3559_v0, %v3555_v29  ;;  %v3626_v51 = vor.u32 %v3625_v9, %v3624_v52  ;;  %v13109_v10 = vpop.eup %8767  ;;  %v3186_v22 = vsel %vm3179_vm11, %v3182_v34, %v3185_v48  ;;  %v17744_v9 = vld [vmem:[#allocation6_spill] sm:$0xff] }
 0x3a5   : > { %v3276_v27 = vsel %vm13027_vm14, %v17714_v39, %v3273_v12  ;;  %v3281_v17 = vadd.s32 3, %v3277_v3  ;;  %v3629_v44 = vor.u32 %v3628_v50, %v3627_v63  ;;  %v3187_v24 = vsel %vm3176_vm12, nan, %v3186_v22  ;;  %v17742_v3 = vld [vmem:[#allocation10_spill] sm:$0xff] }
 0x3a6   : > { %8771 = vcosq.f32 %v3276_v27  ;;  %v3561_v6 = vadd.s32 536870912, %v3560_v16  ;;  %v3612_v46 = vor.u32 8388608, %v3611_v58  ;;  %v4031_v31 = vpack.c.bf16 %v3187_v24, %v12980_v28  ;;  %v17743_v58 = vld [vmem:[#allocation51_spill] sm:$0xff] }
 0x3a7   : > { %8773 = vsinq.f32 %v3276_v27  ;;  %vm3636_vm8 = vcmp.lt.s32.totalorder %v12336_v13, 1  ;;  %vm3638_vm6 = vcmp.lt.s32.totalorder %v12336_v13, 3  ;;  %v3620_v35 = vshrl.u32 %v17387_v19, %v12244_v30  ;;  %v17749_v24 = vld [vmem:[#allocation75_spill] sm:$0xff] }
 0x3a8   : > { %v13121_v38 = vpop.eup %8769  ;;  %v13123_v1 = vshrl.u32 %v3561_v6, 30  ;;  %v3644_v4 = vsel %vm3636_vm8, %v3623_v32, %v3626_v51  ;;  %v3646_v45 = vsel %vm3638_vm6, %v3629_v44, %v17742_v3  ;;  %8302 = vmatmul.mubr.bf16.gmra.mrb[20].mxu0 %v4031_v31  ;;  %vm3637_vm1 = vcmp.lt.s32.totalorder %v12336_v13, 2  ;;  %v17750_v6 = vld [vmem:[#allocation37_spill] sm:$0xff] }
 0x3a9   : > { %v3641_v28 = vsel %vm3639_vm2, %v3629_v44, 2102212464  ;;  %v3648_v29 = vsel %vm3636_vm8, %v3626_v51, %v3629_v44  ;;  %v3650_v30 = vsel %vm3638_vm6, %v17744_v9, %v17743_v58  ;;  %v3647_v14 = vsel %vm3637_vm1, %v3644_v4, %v3646_v45 }
 0x3aa   : > { %v3563_v61 = vshll.u32 %v13123_v1, 30  ;;  %v3651_v55 = vsel %vm3637_vm1, %v3648_v29, %v3650_v30  ;;  %v3652_v47 = vshll.u32 %v3612_v46, 8  ;;  %vm3388_vm13 = vcmp.eq.s32.totalorder %v12995_v5, 0 }
 0x3ab   : > { %v3393_v41 = vsel %vm3391_vm3, %v3392_v53, %v13046_v11  ;;  %v3489_v62 = vadd.s32 3, %v3485_v2  ;;  %v3640_v52 = vsel %vm3636_vm8, %v3620_v35, %v3623_v32  ;;  %v3642_v48 = vsel %vm3638_vm6, %v3626_v51, %v3641_v28  ;;  %v17745_v2 = vld [vmem:[#allocation59_spill] sm:$0xff] }
 0x3ac   : > { %v13152_v63 = vsub.s32 %v3560_v16, %v3563_v61  ;;  %v13156_v0 = vmul.u32.u64.low %v3652_v47, %v3651_v55  ;;  %v13157_v50 = vmul.u32.u64.high %v3652_v47, %v3651_v55, %v13156_v0  ;;  %v3282_v34 = vand.u32 3, %v3281_v17  ;;  %v17746_v53 = vld [vmem:[#allocation43_spill] sm:$0xff] }
 0x3ad   : > { %v3390_v12 = vsel %vm3388_vm13, %v13037_v25, %v3389_v33  ;;  %v13162_v22 = vmul.u32.u64.low %v3652_v47, %v3647_v14  ;;  %v13163_v27 = vmul.u32.u64.high %v3652_v47, %v3647_v14, %v13162_v22  ;;  %v13168_v32 = vor.u32 %v17746_v53, %v17745_v2 }
 0x3ae   : > { %v3792_v16 = vxor.u32 2147483648, %v12968_v23  ;;  %v13175_v51 = vmul.f32 %v3894_v54, %v3892_v20  ;;  %v3566_v11 = vsub.s32 0, %v13152_v63  ;;  %vm3280_vm2 = vweird.f32 %v17714_v39 }
 0x3af   : > { %vm3384_vm9 = vweird.f32 %v11717_v8  ;;  %vm3387_vm14 = vcmp.lt.s32.totalorder %v12995_v5, 2  ;;  %v3643_v25 = vsel %vm3637_vm1, %v3640_v52, %v3642_v48  ;;  %v3490_v44 = vand.u32 3, %v3489_v62  ;;  %v13193_v5 = vpop.f32.mrb[3].mxu0 }
 0x3b0   : > { %v8772_v33 = vpop.eup %8771  ;;  %v3394_v17 = vsel %vm3387_vm14, %v3390_v12, %v3393_v41  ;;  %v8050_v49 = vmin.u32 %v3566_v11, %v13152_v63  ;;  %vm3661_vm0 = vc.u32 %v13157_v50, %v13162_v22  ;;  %vm3287_vm10 = vcmp.eq.s32.totalorder %v3282_v34, 2  ;;  %v13198_v3 = vpop.f32.mrb[4].mxu0 }
 0x3b1   : > { %v8774_v36 = vpop.eup %8773  ;;  %v3288_v54 = vxor.u32 2147483648, %v8772_v33  ;;  %vm13188_vm5 = vcmp.le.f32.partialorder %v3500_v42, 0.7853982  ;;  %v3662_v13 = vadd.s32 1, %v13163_v27  ;;  %vm3951_vm7 = vcmp.lt.s32.totalorder %v17749_v24, 4 }
 0x3b2   : > { %vm3710_vm15 = vcmp.lt.s32.totalorder %v17750_v6, 0  ;;  %v3285_v46 = vxor.u32 2147483648, %v8774_v36  ;;  %v3568_v31 = vclz %v8050_v49  ;;  %v3586_v35 = vsub.s32 4, %v13123_v1 }
 0x3b3   : > { %v3659_v4 = vmul.u32 %v3652_v47, %v3643_v25  ;;  %vm3284_vm11 = vcmp.eq.s32.totalorder %v3282_v34, 0  ;;  %v3289_v42 = vsel %vm3287_vm10, %v3288_v54, %v8774_v36  ;;  %v3395_v45 = vsel %vm3384_vm9, nan, %v3394_v17 }
 0x3b4   : > { %v3663_v28 = vsel %vm3661_vm0, %v3662_v13, %v13163_v27  ;;  %vm3283_vm12 = vcmp.lt.s32.totalorder %v3282_v34, 2  ;;  %v3286_v29 = vsel %vm3284_vm11, %v8772_v33, %v3285_v46  ;;  %v8051_v58 = vadd.s32 4294967294, %v3568_v31  ;;  %v17751_v27 = vld [vmem:[#allocation7_spill] sm:$0xff] }
 0x3b5   : > { %v3664_v9 = vadd.s32 %v3663_v28, %v3659_v4  ;;  %v3290_v30 = vsel %vm3283_vm12, %v3286_v29, %v3289_v42  ;;  %v3493_v61 = vxor.u32 2147483648, %v13121_v38  ;;  %v3496_v14 = vxor.u32 2147483648, %v13109_v10  ;;  %v17753_v33 = vld [vmem:[#allocation39_spill] sm:$0xff] }
 0x3b6   : > { %vm3502_vm4 = vcmp.lt.s32.totalorder %v17731_v60, 0  ;;  %v3291_v8 = vsel %vm3280_vm2, nan, %v3290_v30  ;;  %vm8052_vm3 = vcmp.lt.s32.totalorder %v8051_v58, 0  ;;  %vm3492_vm8 = vcmp.eq.s32.totalorder %v3490_v44, 0  ;;  %v17758_v28 = vld [vmem:[#allocation19_spill] sm:$0xff] }
 0x3b7   : > { %v3587_v55 = vsel %vm3502_vm4, %v3586_v35, %v13123_v1  ;;  %v3665_v47 = vadd.s32 536870912, %v3664_v9  ;;  %v4032_v41 = vpack.c.bf16 %v3395_v45, %v3291_v8  ;;  %vm3495_vm6 = vcmp.eq.s32.totalorder %v3490_v44, 2  ;;  %v17757_v45 = vld [vmem:[#allocation38_spill] sm:$0xff] }
 0x3b8   : > { %v3571_v62 = vsel %vm8052_vm3, 0, %v8051_v58  ;;  %v3556_v52 = vadd.s32 %v13073_v57, %v13071_v26  ;;  %v3494_v39 = vsel %vm3492_vm8, %v13109_v10, %v3493_v61  ;;  %v3497_v12 = vsel %vm3495_vm6, %v3496_v14, %v13121_v38  ;;  %v17752_v57 = vld [vmem:[#allocation34_spill] sm:$0xff] }
 0x3b9   : > { %v3572_v48 = vsub.s32 32, %v3571_v62  ;;  %v3576_v0 = vsub.s32 4294967266, %v3571_v62  ;;  %v13216_v34 = vshrl.u32 %v3665_v47, 30  ;;  %8305 = vmatprep.mubr.bf16.mxu0 %v4032_v41  ;;  %v3589_v1 = vsel %vm13188_vm5, 0, %v3587_v55 }
 0x3ba   : > { %v3794_v2 = vsub.s32 4, %v17751_v27  ;;  %v3573_v53 = vshll.u32 %v13152_v63, %v3571_v62  ;;  %v3947_v17 = vor.u32 %v17753_v33, %v17752_v57  ;;  %v13230_v10 = vsel %vm3951_vm7, %v13168_v32, 920167782 }
 0x3bb   : > { %v3574_v11 = vshrl.u32 %v3556_v52, %v3572_v48  ;;  %v3577_v25 = vadd.s32 127, %v3576_v0  ;;  %v3667_v26 = vshll.u32 %v13216_v34, 30  ;;  %v3793_v38 = vsel %vm3710_vm15, %v3792_v16, %v12968_v23  ;;  %v17760_v48 = vld [vmem:[#allocation2_spill] sm:$0xff] }
 0x3bc   : > { %vm3491_vm1 = vcmp.lt.s32.totalorder %v3490_v44, 2  ;;  %v3896_v54 = vxor.u32 2147483648, %v13175_v51  ;;  %v3593_v46 = vadd.s32 3, %v3589_v1  ;;  %v17754_v31 = vand.u32 2147483647, %v17750_v6  ;;  %v17761_v1 = vld [vmem:[#allocation76_spill] sm:$0xff] }
 0x3bd   : > { %v3575_v63 = vor.u32 %v3574_v11, %v3573_v53  ;;  %v3578_v49 = vshll.u32 %v3577_v25, 23  ;;  %v13237_v36 = vsub.s32 %v3664_v9, %v3667_v26  ;;  %v3498_v13 = vsel %vm3491_vm1, %v3494_v39, %v3497_v12 }
 0x3be   : > { %vm13242_vm13 = vcmp.le.f32.partialorder %v17754_v31, 0.7853982  ;;  %v3795_v23 = vsel %vm3710_vm15, %v3794_v2, %v17751_v27  ;;  %v13255_v44 = vsel %vm3951_vm7, %v3947_v17, 1326507024  ;;  %vm3814_vm2 = vcmp.lt.s32.totalorder %v17757_v45, 0 }
 0x3bf   : > { %v3579_v4 = vor.u32 4788187, %v3578_v49  ;;  %v3670_v42 = vsub.s32 0, %v13237_v36  ;;  %v3796_v16 = vsel %vm13242_vm13, %v17750_v6, %v3793_v38  ;;  %v3916_v29 = vand.u32 2147483647, %v17758_v28 }
 0x3c0   : > { %vm3488_vm9 = vweird.f32 %v17717_v18  ;;  %v3582_v9 = vcvt.s32.f32 %v3575_v63  ;;  %v13264_v61 = vsel %vm3814_vm2, %v3896_v54, %v13175_v51  ;;  %v3797_v8 = vsel %vm13242_vm13, 0, %v3795_v23  ;;  %v17759_v18 = vld [vmem:[#allocation9_spill] sm:$0xff] }
 0x3c1   : > { %v3580_v58 = vand.u32 2147483647, %v3579_v4  ;;  %v8054_v30 = vmin.u32 %v3670_v42, %v13237_v36  ;;  %v13266_v14 = vsel %vm3488_vm9, nan, %v3498_v13  ;;  %8775 = vcosq.f32 %v3796_v16 }
 0x3c2   : > { %v13270_v47 = vand.u32 3, %v3593_v46  ;;  %v3898_v62 = vsub.s32 4, %v17759_v18  ;;  %v3660_v52 = vadd.s32 %v13162_v22, %v13157_v50  ;;  %8777 = vsinq.f32 %v3796_v16 }
 0x3c3   : > { %v3583_v55 = vmul.f32 %v3582_v9, %v3580_v58  ;;  %v3672_v41 = vclz %v8054_v30  ;;  %v3923_v51 = vand.u32 8388607, %v3916_v29  ;;  %v3934_v0 = vshrl.u32 %v17389_v43, %v17760_v48  ;;  %v13320_v58 = vld [vmem:[%s16919_s2 + $0x1] ss:$0 sm:$0xff] }
 0x3c4   : > { %vm3606_vm14 = vcmp.lt.s32.totalorder %v17741_v40, 0  ;;  %v3933_v27 = vshll.u32 %v17387_v19, %v17761_v1  ;;  %v3937_v2 = vshrl.u32 %v17390_v37, %v17760_v48  ;;  %v3801_v53 = vadd.s32 3, %v3797_v8 }
 0x3c5   : > { %v3584_v39 = vxor.u32 2147483648, %v3583_v55  ;;  %v8055_v12 = vadd.s32 4294967294, %v3672_v41  ;;  %v3936_v50 = vshll.u32 %v17389_v43, %v17761_v1  ;;  %v3939_v22 = vshll.u32 %v17390_v37, %v17761_v1 }
 0x3c6   : > { %v3940_v11 = vshrl.u32 %v17395_v21, %v17760_v48  ;;  %v3690_v26 = vsub.s32 4, %v13216_v34  ;;  %v3935_v57 = vor.u32 %v3934_v0, %v3933_v27  ;;  %v3924_v13 = vor.u32 8388608, %v3923_v51  ;;  %v13336_v0 = vpop.f32.mrb[5].mxu0 }
 0x3c7   : > { %v3585_v25 = vsel %vm3502_vm4, %v3584_v39, %v3583_v55  ;;  %vm8056_vm0 = vcmp.lt.s32.totalorder %v8055_v12, 0  ;;  %v3938_v38 = vor.u32 %v3937_v2, %v3936_v50  ;;  %vm13298_vm10 = vcmp.le.f32.partialorder %v3604_v56, 0.7853982 }
 0x3c8   : > { %v3588_v33 = vsel %vm13188_vm5, %v17731_v60, %v3585_v25  ;;  %v3675_v17 = vsel %vm8056_vm0, 0, %v8055_v12  ;;  %v3941_v63 = vor.u32 %v3940_v11, %v3939_v22  ;;  %v3932_v20 = vshrl.u32 %v17387_v19, %v17760_v48 }
 0x3c9   : > { %8779 = vcosq.f32 %v3588_v33  ;;  %v3676_v49 = vsub.s32 32, %v3675_v17  ;;  %v3680_v54 = vsub.s32 4294967266, %v3675_v17  ;;  %v3677_v31 = vshll.u32 %v13237_v36, %v3675_v17 }
 0x3ca   : > { %8781 = vsinq.f32 %v3588_v33  ;;  %vm3948_vm5 = vcmp.lt.s32.totalorder %v17749_v24, 1  ;;  %vm3949_vm15 = vcmp.lt.s32.totalorder %v17749_v24, 2  ;;  %vm3950_vm11 = vcmp.lt.s32.totalorder %v17749_v24, 3 }
 0x3cb   : > { %v3678_v35 = vshrl.u32 %v3660_v52, %v3676_v49  ;;  %v3681_v4 = vadd.s32 127, %v3680_v54  ;;  %v8776_v42 = vpop.eup %8775  ;;  %v3953_v56 = vsel %vm3951_vm7, %v3941_v63, 2102212464  ;;  %v3956_v23 = vsel %vm3948_vm5, %v3935_v57, %v3938_v38 }
 0x3cc   : > { %v3958_v36 = vsel %vm3950_vm11, %v3941_v63, %v13230_v10  ;;  %v3960_v16 = vsel %vm3948_vm5, %v3938_v38, %v3941_v63  ;;  %v13322_v8 = vand.u32 3, %v3801_v53  ;;  %v8778_v41 = vpop.eup %8777  ;;  %vm3596_vm7 = vcmp.eq.s32.totalorder %v13270_v47, 0 }
 0x3cd   : > { %v3679_v9 = vor.u32 %v3678_v35, %v3677_v31  ;;  %v3682_v30 = vshll.u32 %v3681_v4, 23  ;;  %v3959_v55 = vsel %vm3949_vm15, %v3956_v23, %v3958_v36  ;;  %v3691_v10 = vsel %vm3606_vm14, %v3690_v26, %v13216_v34 }
 0x3ce   : > { %v3952_v52 = vsel %vm3948_vm5, %v3932_v20, %v3935_v57  ;;  %v3962_v51 = vsel %vm3950_vm11, %v13168_v32, %v13255_v44  ;;  %v3964_v48 = vshll.u32 %v3924_v13, 8  ;;  %vm3595_vm12 = vcmp.lt.s32.totalorder %v13270_v47, 2 }
 0x3cf   : > { %v3683_v39 = vor.u32 4788187, %v3682_v30  ;;  %v3954_v12 = vsel %vm3950_vm11, %v3938_v38, %v3953_v56  ;;  %v3963_v34 = vsel %vm3949_vm15, %v3960_v16, %v3962_v51  ;;  %v13345_v1 = vadd.f32 %v12978_v7, %v13320_v58 }
 0x3d0   : > { %vm3592_vm4 = vweird.f32 %v17731_v60  ;;  %v13348_v27 = vmul.u32.u64.low %v3964_v48, %v3963_v34  ;;  %v13349_v32 = vmul.u32.u64.high %v3964_v48, %v3963_v34, %v13348_v27  ;;  %vm3599_vm3 = vcmp.eq.s32.totalorder %v13270_v47, 2 }
 0x3d1   : > { %17764 = vst [vmem:[#allocation47_spill] sm:$0xff] %v13345_v1  ;;  %v13351_v44 = vmul.u32.u64.low %v3964_v48, %v3959_v55  ;;  %v13352_v2 = vmul.u32.u64.high %v3964_v48, %v3959_v55, %v13351_v44  ;;  %v3684_v53 = vand.u32 2147483647, %v3683_v39  ;;  %v3686_v50 = vcvt.s32.f32 %v3679_v9 }
 0x3d2   : > { %v17765_v22 = vand.u32 2147483647, %v17757_v45  ;;  %v3899_v7 = vsel %vm3814_vm2, %v3898_v62, %v17759_v18  ;;  %vm3803_vm6 = vcmp.lt.s32.totalorder %v13322_v8, 2  ;;  %vm3804_vm1 = vcmp.eq.s32.totalorder %v13322_v8, 0 }
 0x3d3   : > { %v3808_v25 = vxor.u32 2147483648, %v8776_v42  ;;  %v3955_v26 = vsel %vm3949_vm15, %v3952_v52, %v3954_v12  ;;  %v4477_v57 = vand.u32 2139095040, %v13345_v1  ;;  %v8780_v33 = vpop.eup %8779  ;;  %v3687_v17 = vmul.f32 %v3686_v50, %v3684_v53 }
 0x3d4   : > { %vm13358_vm8 = vcmp.le.f32.partialorder %v17765_v22, 0.7853982  ;;  %v3693_v38 = vsel %vm13298_vm10, 0, %v3691_v10  ;;  %v3805_v63 = vxor.u32 2147483648, %v8778_v41  ;;  %vm3807_vm13 = vcmp.eq.s32.totalorder %v13322_v8, 2  ;;  %v8782_v49 = vpop.eup %8781 }
 0x3d5   : > { %v3600_v18 = vxor.u32 2147483648, %v8780_v33  ;;  %vm3973_vm2 = vc.u32 %v13349_v32, %v13351_v44  ;;  %v3974_v62 = vadd.s32 1, %v13352_v2  ;;  %v17141_v24 = vand.u32 2147483647, %v13345_v1 }
 0x3d6   : > { %v3597_v54 = vxor.u32 2147483648, %v8782_v49  ;;  %v3688_v13 = vxor.u32 2147483648, %v3687_v17  ;;  %v3971_v31 = vmul.u32 %v3964_v48, %v3955_v26  ;;  %v4478_v20 = vshrl.u32 %v4477_v57, 23 }
 0x3d7   : > { %v3601_v35 = vsel %vm3599_vm3, %v3600_v18, %v8782_v49  ;;  %v3697_v4 = vadd.s32 3, %v3693_v38  ;;  %v3809_v56 = vsel %vm3807_vm13, %v3808_v25, %v8778_v41  ;;  %v3975_v23 = vsel %vm3973_vm2, %v3974_v62, %v13352_v2  ;;  %v13423_v25 = vpop.f32.mrb[6].mxu0 }
 0x3d8   : > { %v3598_v36 = vsel %vm3596_vm7, %v8780_v33, %v3597_v54  ;;  %v3689_v16 = vsel %vm3606_vm14, %v3688_v13, %v3687_v17  ;;  %v3976_v9 = vadd.s32 %v3975_v23, %v3971_v31  ;;  %v8086_v30 = vadd.s32 4294967169, %v4478_v20 }
 0x3d9   : > { %v3602_v55 = vsel %vm3595_vm12, %v3598_v36, %v3601_v35  ;;  %v3692_v10 = vsel %vm13298_vm10, %v17741_v40, %v3689_v16  ;;  %v3806_v41 = vsel %vm3804_vm1, %v8776_v42, %v3805_v63  ;;  %v4481_v52 = vand.u32 8388607, %v17141_v24 }
 0x3da   : > { %v3603_v51 = vsel %vm3592_vm4, nan, %v3602_v55  ;;  %8783 = vcosq.f32 %v3692_v10  ;;  %v3977_v48 = vadd.s32 536870912, %v3976_v9  ;;  %v4484_v39 = vadd.s32 1, %v8086_v30 }
 0x3db   : > { %v4033_v12 = vpack.c.bf16 %v3603_v51, %v13266_v14  ;;  %8785 = vsinq.f32 %v3692_v10  ;;  %v3900_v47 = vsel %vm13358_vm8, %v17757_v45, %v13264_v61  ;;  %v3901_v46 = vsel %vm13358_vm8, 0, %v3899_v7 }
 0x3dc   : > { %v3698_v42 = vand.u32 3, %v3697_v4  ;;  %v3810_v34 = vsel %vm3803_vm6, %v3806_v41, %v3809_v56  ;;  %v13406_v60 = vshrl.u32 %v3977_v48, 30  ;;  %vm4485_vm9 = vcmp.gt.s32.totalorder %v4484_v39, 0 }
 0x3dd   : > { %8306 = vmatmul.mubr.bf16.gmra.mrb[24].mxu0 %v4033_v12  ;;  %v4482_v27 = vor.u32 8388608, %v4481_v52  ;;  %v4486_v2 = vsel %vm4485_vm9, %v4484_v39, 0  ;;  %vm3800_vm14 = vweird.f32 %v17750_v6  ;;  %8787 = vcosq.f32 %v3900_v47 }
 0x3de   : > { %v3979_v14 = vshll.u32 %v13406_v60, 30  ;;  %v4488_v53 = vand.u32 31, %v4486_v2  ;;  %v3811_v61 = vsel %vm3800_vm14, nan, %v3810_v34  ;;  %8789 = vsinq.f32 %v3900_v47 }
 0x3df   : > { %v13410_v50 = vadd.s32 3, %v3901_v46  ;;  %vm3699_vm0 = vcmp.lt.s32.totalorder %v3698_v42, 2  ;;  %vm3700_vm10 = vcmp.eq.s32.totalorder %v3698_v42, 0  ;;  %vm3696_vm5 = vweird.f32 %v17741_v40 }
 0x3e0   : > { %v13412_v8 = vsub.s32 %v3976_v9, %v3979_v14  ;;  %v4489_v22 = vsub.s32 32, %v4488_v53  ;;  %vm3703_vm15 = vcmp.eq.s32.totalorder %v3698_v42, 2  ;;  %v3972_v11 = vadd.s32 %v13351_v44, %v13349_v32 }
 0x3e1   : > { %v13417_v6 = vshll.u32 %v4482_v27, 8  ;;  %v13421_v7 = vadd.f32 %v13053_v59, %v13320_v58  ;;  %v4487_v57 = vshrl.u32 %v4486_v2, 5  ;;  %v4491_v33 = vshll.u32 %v17387_v19, %v4488_v53 }
 0x3e2   : > { %v3982_v26 = vsub.s32 0, %v13412_v8  ;;  %v4492_v17 = vshrl.u32 %v17389_v43, %v4489_v22  ;;  %v4494_v38 = vshll.u32 %v17389_v43, %v4488_v53  ;;  %v4495_v63 = vshrl.u32 %v17390_v37, %v4489_v22 }
 0x3e3   : > { %17768 = vst [vmem:[#allocation66_spill] sm:$0xff] %v13421_v7  ;;  %v4498_v32 = vshrl.u32 %v17395_v21, %v4489_v22  ;;  %v17769_v44 = vmov 920167782   ;;  %v4497_v62 = vshll.u32 %v17390_v37, %v4488_v53  ;;  %v4500_v54 = vshll.u32 %v17395_v21, %v4488_v53 }
 0x3e4   : > { %v4501_v49 = vshrl.u32 %v17769_v44, %v4489_v22  ;;  %v8784_v18 = vpop.eup %8783  ;;  %v8066_v59 = vmin.u32 %v3982_v26, %v13412_v8  ;;  %v17770_v13 = vmov 1326507024   ;;  %v4493_v4 = vor.u32 %v4492_v17, %v4491_v33 }
 0x3e5   : > { %v4504_v31 = vshrl.u32 %v17770_v13, %v4489_v22  ;;  %v8786_v20 = vpop.eup %8785  ;;  %v3704_v35 = vxor.u32 2147483648, %v8784_v18  ;;  %v4496_v56 = vor.u32 %v4495_v63, %v4494_v38  ;;  %v4503_v23 = vshll.u32 %v17769_v44, %v4488_v53 }
 0x3e6   : > { %v3701_v36 = vxor.u32 2147483648, %v8786_v20  ;;  %v3984_v16 = vclz %v8066_v59  ;;  %v4499_v9 = vor.u32 %v4498_v32, %v4497_v62  ;;  %v4502_v30 = vor.u32 %v4501_v49, %v4500_v54 }
 0x3e7   : > { %v3705_v55 = vsel %vm3703_vm15, %v3704_v35, %v8786_v20  ;;  %v4002_v10 = vsub.s32 4, %v13406_v60  ;;  %v4490_v41 = vshrl.u32 %v17387_v19, %v4489_v22  ;;  %v4581_v52 = vand.u32 2139095040, %v13421_v7  ;;  %v13441_v51 = vpop.eup %8787 }
 0x3e8   : > { %v3702_v48 = vsel %vm3700_vm10, %v8784_v18, %v3701_v36  ;;  %v8067_v39 = vadd.s32 4294967294, %v3984_v16  ;;  %v4505_v12 = vor.u32 %v4504_v31, %v4503_v23  ;;  %vm4506_vm11 = vcmp.lt.s32.totalorder %v4487_v57, 1  ;;  %v13444_v47 = vpop.eup %8789 }
 0x3e9   : > { %v3706_v46 = vsel %vm3699_vm0, %v3702_v48, %v3705_v55  ;;  %vm4508_vm7 = vcmp.lt.s32.totalorder %v4487_v57, 3  ;;  %vm4509_vm12 = vcmp.lt.s32.totalorder %v4487_v57, 4  ;;  %v4514_v34 = vsel %vm4506_vm11, %v4493_v4, %v4496_v56 }
 0x3ea   : > { %v3707_v27 = vsel %vm3696_vm5, nan, %v3706_v46  ;;  %vm8068_vm4 = vcmp.lt.s32.totalorder %v8067_v39, 0  ;;  %v4511_v2 = vsel %vm4509_vm12, %v4499_v9, 2102212464  ;;  %v4515_v14 = vsel %vm4509_vm12, %v4502_v30, 920167782 }
 0x3eb   : > { %v4034_v53 = vpack.c.bf16 %v3811_v61, %v3707_v27  ;;  %v3987_v22 = vsel %vm8068_vm4, 0, %v8067_v39  ;;  %vm4507_vm3 = vcmp.lt.s32.totalorder %v4487_v57, 2  ;;  %v4516_v26 = vsel %vm4508_vm7, %v4499_v9, %v4515_v14  ;;  %v13486_v46 = vpop.f32.mrb[7].mxu0 }
 0x3ec   : > { %v3988_v33 = vsub.s32 32, %v3987_v22  ;;  %v3992_v42 = vsub.s32 4294967266, %v3987_v22  ;;  %v4510_v17 = vsel %vm4506_vm11, %v4490_v41, %v4493_v4  ;;  %v4512_v38 = vsel %vm4508_vm7, %v4496_v56, %v4511_v2 }
 0x3ed   : > { %8309 = vmatprep.mubr.bf16.mxu0 %v4034_v53  ;;  %v4517_v40 = vsel %vm4507_vm3, %v4514_v34, %v4516_v26  ;;  %v4518_v63 = vsel %vm4506_vm11, %v4496_v56, %v4499_v9  ;;  %v4519_v32 = vsel %vm4509_vm12, %v4505_v12, 1326507024  ;;  %v4582_v49 = vshrl.u32 %v4581_v52, 23 }
 0x3ee   : > { %v3989_v61 = vshll.u32 %v13412_v8, %v3987_v22  ;;  %v3990_v18 = vshrl.u32 %v3972_v11, %v3988_v33  ;;  %v3993_v59 = vadd.s32 127, %v3992_v42  ;;  %v4520_v62 = vsel %vm4508_vm7, %v4502_v30, %v4519_v32 }
 0x3ef   : > { %v4513_v54 = vsel %vm4507_vm3, %v4510_v17, %v4512_v38  ;;  %v4521_v31 = vsel %vm4507_vm3, %v4518_v63, %v4520_v62  ;;  %v13463_v20 = vmul.u32.u64.low %v13417_v6, %v4517_v40  ;;  %v13464_v35 = vmul.u32.u64.high %v13417_v6, %v4517_v40, %v13463_v20 }
 0x3f0   : > { %v3991_v4 = vor.u32 %v3990_v18, %v3989_v61  ;;  %v3994_v56 = vshll.u32 %v3993_v59, 23  ;;  %v13468_v23 = vmul.u32.u64.low %v13417_v6, %v4521_v31  ;;  %v13469_v36 = vmul.u32.u64.high %v13417_v6, %v4521_v31, %v13468_v23 }
 0x3f1   : > { %v8090_v8 = vadd.s32 4294967169, %v4582_v49  ;;  %vm3918_vm8 = vcmp.lt.s32.totalorder %v17758_v28, 0  ;;  %v13473_v16 = vand.u32 3, %v13410_v50  ;;  %v4529_v9 = vmul.u32 %v13417_v6, %v4513_v54 }
 0x3f2   : > { %v3995_v11 = vor.u32 4788187, %v3994_v56  ;;  %v4003_v57 = vsel %vm3918_vm8, %v4002_v10, %v13406_v60  ;;  %v4532_v30 = vadd.s32 1, %v13464_v35  ;;  %v3998_v41 = vcvt.s32.f32 %v3991_v4 }
 0x3f3   : > { %vm4531_vm6 = vc.u32 %v13469_v36, %v13463_v20  ;;  %v4588_v52 = vadd.s32 1, %v8090_v8  ;;  %v3909_v48 = vxor.u32 2147483648, %v13444_v47  ;;  %v3912_v39 = vxor.u32 2147483648, %v13441_v51 }
 0x3f4   : > { %v3996_v55 = vand.u32 2147483647, %v3995_v11  ;;  %v4533_v50 = vsel %vm4531_vm6, %v4532_v30, %v13464_v35  ;;  %v17140_v12 = vand.u32 2147483647, %v13421_v7  ;;  %vm13490_vm1 = vcmp.le.f32.partialorder %v3916_v29, 0.7853982 }
 0x3f5   : > { %v4534_v10 = vadd.s32 %v4533_v50, %v4529_v9  ;;  %vm4589_vm13 = vcmp.gt.s32.totalorder %v4588_v52, 0  ;;  %vm3908_vm2 = vcmp.eq.s32.totalorder %v13473_v16, 0  ;;  %v4005_v34 = vsel %vm13490_vm1, 0, %v4003_v57 }
 0x3f6   : > { %v3999_v6 = vmul.f32 %v3998_v41, %v3996_v55  ;;  %v4590_v27 = vsel %vm4589_vm13, %v4588_v52, 0  ;;  %vm3911_vm9 = vcmp.eq.s32.totalorder %v13473_v16, 2  ;;  %v3910_v22 = vsel %vm3908_vm2, %v13441_v51, %v3909_v48 }
 0x3f7   : > { %v4535_v14 = vadd.s32 536870912, %v4534_v10  ;;  %v4592_v53 = vand.u32 31, %v4590_v27  ;;  %v3913_v29 = vsel %vm3911_vm9, %v3912_v39, %v13444_v47  ;;  %v13502_v26 = vadd.f32 %v13320_v58, %v13044_v15 }
 0x3f8   : > { %v4000_v2 = vxor.u32 2147483648, %v3999_v6  ;;  %v4585_v33 = vand.u32 8388607, %v17140_v12  ;;  %v4009_v17 = vadd.s32 3, %v4005_v34  ;;  %v4591_v38 = vshrl.u32 %v4590_v27, 5 }
 0x3f9   : > { %17773 = vst [vmem:[#allocation69_spill] sm:$0xff] %v13502_v26  ;;  %v4593_v40 = vsub.s32 32, %v4592_v53  ;;  %v13511_v51 = vshrl.u32 %v4535_v14, 30  ;;  %v4595_v47 = vshll.u32 %v17387_v19, %v4592_v53  ;;  %v4598_v15 = vshll.u32 %v17389_v43, %v4592_v53 }
 0x3fa   : > { %v4001_v42 = vsel %vm3918_vm8, %v4000_v2, %v3999_v6  ;;  %v4601_v49 = vshll.u32 %v17390_v37, %v4592_v53  ;;  %v4604_v61 = vshll.u32 %v17395_v21, %v4592_v53  ;;  %v4586_v54 = vor.u32 8388608, %v4585_v33 }
 0x3fb   : > { %v4004_v63 = vsel %vm13490_vm1, %v17758_v28, %v4001_v42  ;;  %17774 = vst [vmem:[#allocation22_spill] sm:$0xff] %v13511_v51  ;;  %v4596_v32 = vshrl.u32 %v17389_v43, %v4593_v40  ;;  %v4599_v18 = vshrl.u32 %v17390_v37, %v4593_v40  ;;  %v4602_v59 = vshrl.u32 %v17395_v21, %v4593_v40 }
 0x3fc   : > { %8791 = vcosq.f32 %v4004_v63  ;;  %v4605_v62 = vshrl.u32 %v17769_v44, %v4593_v40  ;;  %v4607_v35 = vshll.u32 %v17769_v44, %v4592_v53  ;;  %v4608_v4 = vshrl.u32 %v17770_v13, %v4593_v40 }
 0x3fd   : > { %8793 = vsinq.f32 %v4004_v63  ;;  %v4597_v31 = vor.u32 %v4596_v32, %v4595_v47  ;;  %v4600_v56 = vor.u32 %v4599_v18, %v4598_v15  ;;  %v4603_v23 = vor.u32 %v4602_v59, %v4601_v49 }
 0x3fe   : > { %v4606_v8 = vor.u32 %v4605_v62, %v4604_v61  ;;  %v13525_v11 = vadd.f32 %v13198_v3, %v13320_v58  ;;  %v4537_v57 = vshll.u32 %v13511_v51, 30  ;;  %v4269_v9 = vand.u32 2139095040, %v13502_v26 }
 0x3ff   : > { %v4609_v30 = vor.u32 %v4608_v4, %v4607_v35  ;;  %vm4610_vm14 = vcmp.lt.s32.totalorder %v4591_v38, 1  ;;  %v4010_v55 = vand.u32 3, %v4009_v17  ;;  %vm4613_vm0 = vcmp.lt.s32.totalorder %v4591_v38, 4 }
 0x400   : > { %17775 = vst [vmem:[#allocation40_spill] sm:$0xff] %v13525_v11  ;;  %v4618_v41 = vsel %vm4610_vm14, %v4597_v31, %v4600_v56  ;;  %v4622_v52 = vsel %vm4610_vm14, %v4600_v56, %v4603_v23  ;;  %vm4612_vm10 = vcmp.lt.s32.totalorder %v4591_v38, 3  ;;  %v4619_v48 = vsel %vm4613_vm0, %v4606_v8, 920167782 }
 0x401   : > { %v4623_v39 = vsel %vm4613_vm0, %v4609_v30, 1326507024  ;;  %v4626_v50 = vshll.u32 %v4586_v54, 8  ;;  %vm4611_vm5 = vcmp.lt.s32.totalorder %v4591_v38, 2  ;;  %v4615_v60 = vsel %vm4613_vm0, %v4603_v23, 2102212464 }
 0x402   : > { %v4620_v3 = vsel %vm4612_vm10, %v4603_v23, %v4619_v48  ;;  %v4624_v6 = vsel %vm4612_vm10, %v4606_v8, %v4623_v39  ;;  %v13533_v34 = vsub.s32 %v4534_v10, %v4537_v57  ;;  %v4594_v27 = vshrl.u32 %v17387_v19, %v4593_v40  ;;  %v13557_v38 = vpop.f32.mrb[8].mxu0 }
 0x403   : > { %v4621_v2 = vsel %vm4611_vm5, %v4618_v41, %v4620_v3  ;;  %v4625_v14 = vsel %vm4611_vm5, %v4622_v52, %v4624_v6  ;;  %vm3907_vm15 = vcmp.lt.s32.totalorder %v13473_v16, 2  ;;  %v4616_v10 = vsel %vm4612_vm10, %v4600_v56, %v4615_v60  ;;  %v13560_v30 = vpop.f32.mrb[9].mxu0 }
 0x404   : > { %v13538_v53 = vmul.u32.u64.low %v4626_v50, %v4625_v14  ;;  %v13539_v33 = vmul.u32.u64.high %v4626_v50, %v4625_v14, %v13538_v53  ;;  %v13541_v42 = vmul.u32.u64.low %v4626_v50, %v4621_v2  ;;  %v13542_v17 = vmul.u32.u64.high %v4626_v50, %v4621_v2, %v13541_v42  ;;  %v13566_v39 = vpop.f32.mrb[10].mxu0 }
 0x405   : > { %v4614_v47 = vsel %vm4610_vm14, %v4594_v27, %v4597_v31  ;;  %v3914_v40 = vsel %vm3907_vm15, %v3910_v22, %v3913_v29  ;;  %v4270_v49 = vshrl.u32 %v4269_v9, 23  ;;  %vm3904_vm11 = vweird.f32 %v17757_v45  ;;  %v13568_v60 = vpop.f32.mrb[11].mxu0 }
 0x406   : > { %v8792_v63 = vpop.eup %8791  ;;  %vm4015_vm7 = vcmp.eq.s32.totalorder %v4010_v55, 2  ;;  %v4540_v18 = vsub.s32 0, %v13533_v34  ;;  %vm4012_vm12 = vcmp.eq.s32.totalorder %v4010_v55, 0  ;;  %v4617_v62 = vsel %vm4611_vm5, %v4614_v47, %v4616_v10 }
 0x407   : > { %v8794_v15 = vpop.eup %8793  ;;  %v4016_v32 = vxor.u32 2147483648, %v8792_v63  ;;  %v4893_v16 = vand.u32 2139095040, %v13525_v11  ;;  %v3915_v54 = vsel %vm3904_vm11, nan, %v3914_v40  ;;  %vm4011_vm4 = vcmp.lt.s32.totalorder %v4010_v55, 2 }
 0x408   : > { %v4013_v61 = vxor.u32 2147483648, %v8794_v15  ;;  %vm4635_vm3 = vc.u32 %v13539_v33, %v13541_v42  ;;  %vm4008_vm8 = vweird.f32 %v17758_v28  ;;  %v8078_v45 = vadd.s32 4294967169, %v4270_v49 }
 0x409   : > { %v4017_v59 = vsel %vm4015_vm7, %v4016_v32, %v8794_v15  ;;  %v4636_v29 = vadd.s32 1, %v13542_v17  ;;  %v8087_v4 = vmin.u32 %v4540_v18, %v13533_v34  ;;  %v4633_v56 = vmul.u32 %v4626_v50, %v4617_v62 }
 0x40a   : > { %v4014_v31 = vsel %vm4012_vm12, %v8792_v63, %v4013_v61  ;;  %v4894_v57 = vshrl.u32 %v4893_v16, 23  ;;  %v4276_v55 = vadd.s32 1, %v8078_v45  ;;  %v13564_v48 = vadd.f32 %v13320_v58, %v13336_v0 }
 0x40b   : > { %v4018_v22 = vsel %vm4011_vm4, %v4014_v31, %v4017_v59  ;;  %v4637_v8 = vsel %vm4635_vm3, %v4636_v29, %v13542_v17  ;;  %v4542_v41 = vclz %v8087_v4  ;;  %v13574_v6 = vadd.f32 %v13320_v58, %v13193_v5 }
 0x40c   : > { %v4019_v35 = vsel %vm4008_vm8, nan, %v4018_v22  ;;  %v4638_v9 = vadd.s32 %v4637_v8, %v4633_v56  ;;  %v8102_v28 = vadd.s32 4294967169, %v4894_v57  ;;  %17776 = vst [vmem:[#allocation49_spill] sm:$0xff] %v13564_v48  ;;  %vm4277_vm6 = vcmp.gt.s32.totalorder %v4276_v55, 0 }
 0x40d   : > { %v4035_v23 = vpack.c.bf16 %v4019_v35, %v3915_v54  ;;  %17778 = vst [vmem:[#allocation36_spill] sm:$0xff] %v13574_v6  ;;  %v17138_v27 = vand.u32 2147483647, %v13525_v11  ;;  %v8088_v2 = vadd.s32 4294967294, %v4542_v41  ;;  %v4685_v53 = vand.u32 2139095040, %v13564_v48 }
 0x40e   : > { %v4639_v52 = vadd.s32 536870912, %v4638_v9  ;;  %v4900_v50 = vadd.s32 1, %v8102_v28  ;;  %v13579_v63 = vsel %vm4277_vm6, %v4276_v55, 0  ;;  %v4373_v47 = vand.u32 2139095040, %v13574_v6 }
 0x40f   : > { %8310 = vmatmul.mubr.bf16.gmra.mrb[28].mxu0 %v4035_v23  ;;  %v4897_v10 = vand.u32 8388607, %v17138_v27  ;;  %vm8089_vm13 = vcmp.lt.s32.totalorder %v8088_v2, 0  ;;  %v4686_v32 = vshrl.u32 %v4685_v53, 23  ;;  %v17137_v55 = vand.u32 2147483647, %v13564_v48 }
 0x410   : > { %v13570_v3 = vshrl.u32 %v4639_v52, 30  ;;  %vm4901_vm1 = vcmp.gt.s32.totalorder %v4900_v50, 0  ;;  %v13597_v4 = vsel %vm8089_vm13, 0, %v8088_v2  ;;  %vm17231_vm6 = vcmp.lt.s32.totalorder %v13345_v1, 0 }
 0x411   : > { %v4902_v0 = vsel %vm4901_vm1, %v4900_v50, 0  ;;  %v4898_v56 = vor.u32 8388608, %v4897_v10  ;;  %v8094_v41 = vadd.s32 4294967169, %v4686_v32  ;;  %v4550_v32 = vsub.s32 4294967266, %v13597_v4 }
 0x412   : > { %17777 = vst [vmem:[#allocation28_spill] sm:$0xff] %v13570_v3  ;;  %v4641_v14 = vshll.u32 %v13570_v3, 30  ;;  %v4904_v17 = vand.u32 31, %v4902_v0  ;;  %v4903_v40 = vshrl.u32 %v4902_v0, 5 }
 0x414   : > { %v4905_v15 = vsub.s32 32, %v4904_v17  ;;  %v13584_v5 = vsub.s32 %v4638_v9, %v4641_v14  ;;  %v4907_v49 = vshll.u32 %v17387_v19, %v4904_v17  ;;  %v4910_v18 = vshll.u32 %v17389_v43, %v4904_v17 }
 0x415   : > { %v4913_v62 = vshll.u32 %v17390_v37, %v4904_v17  ;;  %v4916_v54 = vshll.u32 %v17395_v21, %v4904_v17  ;;  %v4919_v29 = vshll.u32 %v17769_v44, %v4904_v17  ;;  %vm4922_vm2 = vcmp.lt.s32.totalorder %v4903_v40, 1 }
 0x416   : > { %v4908_v61 = vshrl.u32 %v17389_v43, %v4905_v15  ;;  %v4911_v59 = vshrl.u32 %v17390_v37, %v4905_v15  ;;  %v4914_v16 = vshrl.u32 %v17395_v21, %v4905_v15  ;;  %v4917_v31 = vshrl.u32 %v17769_v44, %v4905_v15 }
 0x417   : > { %v4920_v35 = vshrl.u32 %v17770_v13, %v4905_v15  ;;  %v4644_v57 = vsub.s32 0, %v13584_v5  ;;  %vm4924_vm9 = vcmp.lt.s32.totalorder %v4903_v40, 3  ;;  %vm4925_vm14 = vcmp.lt.s32.totalorder %v4903_v40, 4 }
 0x418   : > { %v4909_v22 = vor.u32 %v4908_v61, %v4907_v49  ;;  %v4912_v45 = vor.u32 %v4911_v59, %v4910_v18  ;;  %v4915_v23 = vor.u32 %v4914_v16, %v4913_v62  ;;  %v4918_v8 = vor.u32 %v4917_v31, %v4916_v54 }
 0x419   : > { %v4921_v9 = vor.u32 %v4920_v35, %v4919_v29  ;;  %v4906_v0 = vshrl.u32 %v17387_v19, %v4905_v15  ;;  %vm4923_vm0 = vcmp.lt.s32.totalorder %v4903_v40, 2  ;;  %v8091_v10 = vmin.u32 %v4644_v57, %v13584_v5 }
 0x41a   : > { %v4930_v28 = vsel %vm4922_vm2, %v4909_v22, %v4912_v45  ;;  %v4927_v52 = vsel %vm4925_vm14, %v4915_v23, 2102212464  ;;  %v4931_v50 = vsel %vm4925_vm14, %v4918_v8, 920167782  ;;  %v4934_v14 = vsel %vm4922_vm2, %v4912_v45, %v4915_v23 }
 0x41b   : > { %v4935_v2 = vsel %vm4925_vm14, %v4921_v9, 1326507024  ;;  %v4932_v53 = vsel %vm4924_vm9, %v4915_v23, %v4931_v50  ;;  %v4938_v18 = vshll.u32 %v4898_v56, 8  ;;  %v4926_v59 = vsel %vm4922_vm2, %v4906_v0, %v4909_v22 }
 0x41c   : > { %v4936_v17 = vsel %vm4924_vm9, %v4918_v8, %v4935_v2  ;;  %v4933_v49 = vsel %vm4923_vm0, %v4930_v28, %v4932_v53  ;;  %v4928_v62 = vsel %vm4924_vm9, %v4912_v45, %v4927_v52  ;;  %v4692_v16 = vadd.s32 1, %v8094_v41 }
 0x41d   : > { %v4937_v61 = vsel %vm4923_vm0, %v4934_v14, %v4936_v17  ;;  %v13615_v31 = vmul.u32.u64.low %v4938_v18, %v4933_v49  ;;  %v13616_v29 = vmul.u32.u64.high %v4938_v18, %v4933_v49, %v13615_v31  ;;  %v4689_v35 = vand.u32 8388607, %v17137_v55 }
 0x41e   : > { %v13612_v15 = vmul.u32.u64.low %v4938_v18, %v4937_v61  ;;  %v13613_v54 = vmul.u32.u64.high %v4938_v18, %v4937_v61, %v13612_v15  ;;  %vm4693_vm10 = vcmp.gt.s32.totalorder %v4692_v16, 0  ;;  %v4646_v23 = vclz %v8091_v10 }
 0x41f   : > { %v13621_v56 = vshrl.u32 %v4373_v47, 23  ;;  %v4929_v8 = vsel %vm4923_vm0, %v4926_v59, %v4928_v62  ;;  %v4694_v22 = vsel %vm4693_vm10, %v4692_v16, 0  ;;  %v4530_v45 = vadd.s32 %v13463_v20, %v13469_v36 }
 0x420   : > { %v4546_v57 = vsub.s32 32, %v13597_v4  ;;  %v13628_v9 = vand.u32 31, %v13579_v63  ;;  %v4696_v28 = vand.u32 31, %v4694_v22  ;;  %v4547_v41 = vshll.u32 %v13533_v34, %v13597_v4 }
 0x421   : > { %v4551_v52 = vadd.s32 127, %v4550_v32  ;;  %vm4947_vm5 = vc.u32 %v13613_v54, %v13615_v31  ;;  %v4948_v47 = vadd.s32 1, %v13616_v29  ;;  %v4945_v40 = vmul.u32 %v4938_v18, %v4929_v8 }
 0x422   : > { %17779 = vst [vmem:[#allocation41_spill] sm:$0xff] %v13628_v9  ;;  %v4690_v50 = vor.u32 8388608, %v4689_v35  ;;  %v4697_v14 = vsub.s32 32, %v4696_v28  ;;  %v13637_v20 = vadd.f32 %v13423_v25, %v13320_v58  ;;  %v8092_v36 = vadd.s32 4294967294, %v4646_v23 }
 0x423   : > { %v4949_v2 = vsel %vm4947_vm5, %v4948_v47, %v13616_v29  ;;  %v4695_v0 = vshrl.u32 %v4694_v22, 5  ;;  %v4699_v53 = vshll.u32 %v17387_v19, %v4696_v28  ;;  %v4702_v49 = vshll.u32 %v17389_v43, %v4696_v28 }
 0x424   : > { %17780 = vst [vmem:[#allocation54_spill] sm:$0xff] %v13637_v20  ;;  %v4950_v17 = vadd.s32 %v4949_v2, %v4945_v40  ;;  %v4700_v10 = vshrl.u32 %v17389_v43, %v4697_v14  ;;  %v4705_v61 = vshll.u32 %v17390_v37, %v4696_v28  ;;  %v4703_v18 = vshrl.u32 %v17390_v37, %v4697_v14 }
 0x425   : > { %v4706_v32 = vshrl.u32 %v17395_v21, %v4697_v14  ;;  %v4708_v25 = vshll.u32 %v17395_v21, %v4696_v28  ;;  %v4709_v59 = vshrl.u32 %v17769_v44, %v4697_v14  ;;  %v4712_v15 = vshrl.u32 %v17770_v13, %v4697_v14 }
 0x426   : > { %v4951_v62 = vadd.s32 536870912, %v4950_v17  ;;  %v4701_v16 = vor.u32 %v4700_v10, %v4699_v53  ;;  %v4997_v29 = vand.u32 2139095040, %v13637_v20  ;;  %v4704_v35 = vor.u32 %v4703_v18, %v4702_v49 }
 0x427   : > { %v4707_v23 = vor.u32 %v4706_v32, %v4705_v61  ;;  %v4710_v8 = vor.u32 %v4709_v59, %v4708_v25  ;;  %v4711_v22 = vshll.u32 %v17769_v44, %v4696_v28  ;;  %v4548_v47 = vshrl.u32 %v4530_v45, %v4546_v57  ;;  %v13656_v61 = vpop.f32.mrb[12].mxu0 }
 0x428   : > { %v4552_v40 = vshll.u32 %v4551_v52, 23  ;;  %v13651_v2 = vshrl.u32 %v4951_v62, 30  ;;  %vm4714_vm15 = vcmp.lt.s32.totalorder %v4695_v0, 1  ;;  %vm8093_vm11 = vcmp.lt.s32.totalorder %v8092_v36, 0 }
 0x429   : > { %v4713_v55 = vor.u32 %v4712_v15, %v4711_v22  ;;  %vm4717_vm7 = vcmp.lt.s32.totalorder %v4695_v0, 4  ;;  %v4722_v27 = vsel %vm4714_vm15, %v4701_v16, %v4704_v35  ;;  %vm4716_vm12 = vcmp.lt.s32.totalorder %v4695_v0, 3 }
 0x42a   : > { %17781 = vst [vmem:[#allocation48_spill] sm:$0xff] %v13651_v2  ;;  %v4953_v53 = vshll.u32 %v13651_v2, 30  ;;  %v4723_v10 = vsel %vm4717_vm7, %v4710_v8, 920167782  ;;  %v4998_v49 = vshrl.u32 %v4997_v29, 23  ;;  %vm4715_vm4 = vcmp.lt.s32.totalorder %v4695_v0, 2 }
 0x42b   : > { %v4719_v45 = vsel %vm4717_vm7, %v4707_v23, 2102212464  ;;  %v4724_v57 = vsel %vm4716_vm12, %v4707_v23, %v4723_v10  ;;  %v4730_v28 = vshll.u32 %v4690_v50, 8  ;;  %v4698_v18 = vshrl.u32 %v17387_v19, %v4697_v14 }
 0x42c   : > { %v13660_v52 = vsub.s32 %v4950_v17, %v4953_v53  ;;  %v4725_v32 = vsel %vm4715_vm4, %v4722_v27, %v4724_v57  ;;  %v4726_v25 = vsel %vm4714_vm15, %v4704_v35, %v4707_v23  ;;  %v4553_v59 = vor.u32 4788187, %v4552_v40 }
 0x42d   : > { %v4727_v62 = vsel %vm4717_vm7, %v4713_v55, 1326507024  ;;  %v13666_v15 = vmul.u32.u64.low %v4730_v28, %v4725_v32  ;;  %v13667_v29 = vmul.u32.u64.high %v4730_v28, %v4725_v32, %v13666_v15  ;;  %v4718_v22 = vsel %vm4714_vm15, %v4698_v18, %v4701_v16 }
 0x42e   : > { %v4720_v10 = vsel %vm4716_vm12, %v4704_v35, %v4719_v45  ;;  %v4728_v50 = vsel %vm4716_vm12, %v4710_v8, %v4727_v62  ;;  %v8106_v17 = vadd.s32 4294967169, %v4998_v49  ;;  %v13674_v14 = vsel %vm8093_vm11, 0, %v8092_v36  ;;  %v13691_v45 = vpop.f32.mrb[13].mxu0 }
 0x42f   : > { %v4729_v27 = vsel %vm4715_vm4, %v4726_v25, %v4728_v50  ;;  %v17139_v23 = vand.u32 2147483647, %v13637_v20  ;;  %v13680_v55 = vadd.f32 %v13320_v58, %v13486_v46  ;;  %v4956_v40 = vsub.s32 0, %v13660_v52 }
 0x430   : > { %v13683_v53 = vmul.u32.u64.low %v4730_v28, %v4729_v27  ;;  %v13684_v16 = vmul.u32.u64.high %v4730_v28, %v4729_v27, %v13683_v53  ;;  %v5004_v35 = vadd.s32 1, %v8106_v17  ;;  %v4549_v8 = vor.u32 %v4548_v47, %v4547_v41 }
 0x431   : > { %17782 = vst [vmem:[#allocation52_spill] sm:$0xff] %v13680_v55  ;;  %v4721_v36 = vsel %vm4715_vm4, %v4718_v22, %v4720_v10  ;;  %v4740_v49 = vadd.s32 1, %v13667_v29  ;;  %v13694_v57 = vshrl.u32 %v13579_v63, 5  ;;  %v13697_v46 = vsub.s32 32, %v13628_v9 }
 0x432   : > { %v13700_v18 = vadd.s32 4294967169, %v13621_v56  ;;  %vm5005_vm3 = vcmp.gt.s32.totalorder %v5004_v35, 0  ;;  %v4554_v32 = vand.u32 2147483647, %v4553_v59  ;;  %v4654_v34 = vsub.s32 4294967266, %v13674_v14 }
 0x433   : > { %17783 = vst [vmem:[#allocation30_spill] sm:$0xff] %v13694_v57  ;;  %17784 = vst [vmem:[#allocation42_spill] sm:$0xff] %v13697_v46  ;;  %v5001_v4 = vand.u32 8388607, %v17139_v23  ;;  %v5006_v41 = vsel %vm5005_vm3, %v5004_v35, 0  ;;  %v8103_v0 = vmin.u32 %v4956_v40, %v13660_v52  ;;  %v4737_v47 = vmul.u32 %v4730_v28, %v4721_v36 }
 0x434   : > { %vm4739_vm8 = vc.u32 %v13684_v16, %v13666_v15  ;;  %v4789_v63 = vand.u32 2139095040, %v13680_v55  ;;  %v4556_v25 = vcvt.s32.f32 %v4549_v8  ;;  %v13711_v56 = vshll.u32 %v17395_v21, %v13628_v9 }
 0x435   : > { %v4741_v59 = vsel %vm4739_vm8, %v4740_v49, %v13667_v29  ;;  %v5008_v62 = vand.u32 31, %v5006_v41  ;;  %v13716_v22 = vshll.u32 %v17769_v44, %v13628_v9  ;;  %v4634_v28 = vadd.s32 %v13541_v42, %v13539_v33 }
 0x436   : > { %v4742_v10 = vadd.s32 %v4741_v59, %v4737_v47  ;;  %v13722_v50 = vadd.f32 %v13557_v38, %v13320_v58  ;;  %v13724_v17 = vmul.f32 %v4556_v25, %v4554_v32  ;;  %v4650_v27 = vsub.s32 32, %v13674_v14 }
 0x437   : > { %v4655_v40 = vadd.s32 127, %v4654_v34  ;;  %v5009_v53 = vsub.s32 32, %v5008_v62  ;;  %v4958_v29 = vclz %v8103_v0  ;;  %v5002_v8 = vor.u32 8388608, %v5001_v4 }
 0x438   : > { %17785 = vst [vmem:[#allocation56_spill] sm:$0xff] %v13722_v50  ;;  %v4743_v35 = vadd.s32 536870912, %v4742_v10  ;;  %v4790_v36 = vshrl.u32 %v4789_v63, 23  ;;  %v5011_v49 = vshll.u32 %v17387_v19, %v5008_v62  ;;  %v5014_v33 = vshll.u32 %v17389_v43, %v5008_v62 }
 0x439   : > { %v5012_v23 = vshrl.u32 %v17389_v43, %v5009_v53  ;;  %v5015_v42 = vshrl.u32 %v17390_v37, %v5009_v53  ;;  %v5007_v38 = vshrl.u32 %v5006_v41, 5  ;;  %v5017_v32 = vshll.u32 %v17390_v37, %v5008_v62 }
 0x43a   : > { %v13731_v58 = vshrl.u32 %v4743_v35, 30  ;;  %v5018_v34 = vshrl.u32 %v17395_v21, %v5009_v53  ;;  %v5020_v4 = vshll.u32 %v17395_v21, %v5008_v62  ;;  %v5021_v63 = vshrl.u32 %v17769_v44, %v5009_v53 }
 0x43b   : > { %v5013_v47 = vor.u32 %v5012_v23, %v5011_v49  ;;  %v5016_v0 = vor.u32 %v5015_v42, %v5014_v33  ;;  %v4558_v25 = vxor.u32 2147483648, %v13724_v17  ;;  %v4652_v59 = vshrl.u32 %v4634_v28, %v4650_v27 }
 0x43c   : > { %17786 = vst [vmem:[#allocation57_spill] sm:$0xff] %v13731_v58  ;;  %v4656_v12 = vshll.u32 %v4655_v40, 23  ;;  %v5019_v24 = vor.u32 %v5018_v34, %v5017_v32  ;;  %v4745_v2 = vshll.u32 %v13731_v58, 30  ;;  %v5022_v35 = vor.u32 %v5021_v63, %v5020_v4 }
 0x43d   : > { %v5023_v41 = vshll.u32 %v17769_v44, %v5008_v62  ;;  %v5024_v3 = vshrl.u32 %v17770_v13, %v5009_v53  ;;  %v8104_v23 = vadd.s32 4294967294, %v4958_v29  ;;  %vm5026_vm1 = vcmp.lt.s32.totalorder %v5007_v38, 1 }
 0x43e   : > { %vm5029_vm13 = vcmp.lt.s32.totalorder %v5007_v38, 4  ;;  %v5042_v49 = vshll.u32 %v5002_v8, 8  ;;  %v5034_v51 = vsel %vm5026_vm1, %v5013_v47, %v5016_v0  ;;  %v8098_v28 = vadd.s32 4294967169, %v4790_v36 }
 0x43f   : > { %v5025_v33 = vor.u32 %v5024_v3, %v5023_v41  ;;  %v5031_v42 = vsel %vm5029_vm13, %v5019_v24, 2102212464  ;;  %v5010_v27 = vshrl.u32 %v17387_v19, %v5009_v53  ;;  %vm5027_vm2 = vcmp.lt.s32.totalorder %v5007_v38, 2  ;;  %v13755_v41 = vpop.f32.mrb[14].mxu0 }
 0x440   : > { %vm5028_vm9 = vcmp.lt.s32.totalorder %v5007_v38, 3  ;;  %v5035_v40 = vsel %vm5029_vm13, %v5022_v35, 920167782  ;;  %v13744_v32 = vsub.s32 %v4742_v10, %v4745_v2  ;;  %v5038_v34 = vsel %vm5026_vm1, %v5016_v0, %v5019_v24 }
 0x441   : > { %v5036_v62 = vsel %vm5028_vm9, %v5019_v24, %v5035_v40  ;;  %v5039_v4 = vsel %vm5029_vm13, %v5025_v33, 1326507024  ;;  %v17787_v29 = vand.u32 2147483647, %v13345_v1  ;;  %v17788_v8 = vmov 0 }
 0x442   : > { %v5030_v3 = vsel %vm5026_vm1, %v5010_v27, %v5013_v47  ;;  %v5032_v36 = vsel %vm5028_vm9, %v5016_v0, %v5031_v42  ;;  %v5037_v53 = vsel %vm5027_vm2, %v5034_v51, %v5036_v62  ;;  %v5040_v63 = vsel %vm5028_vm9, %v5022_v35, %v5039_v4 }
 0x443   : > { %vm13749_vm14 = vcmp.le.f32.partialorder %v17787_v29, 0.7853982  ;;  %vm8105_vm0 = vcmp.lt.s32.totalorder %v8104_v23, 0  ;;  %v5041_v2 = vsel %vm5027_vm2, %v5038_v34, %v5040_v63  ;;  %v4651_v33 = vshll.u32 %v13584_v5, %v13674_v14 }
 0x444   : > { %v17789_v8 = vsel %vm13749_vm14, 4294967295, %v17788_v8  ;;  %v13758_v10 = vmul.u32.u64.low %v5042_v49, %v5037_v53  ;;  %v13759_v24 = vmul.u32.u64.high %v5042_v49, %v5037_v53, %v13758_v10  ;;  %v4657_v40 = vor.u32 4788187, %v4656_v12 }
 0x445   : > { %17790 = vst [vmem:[#allocation53_spill] sm:$0xff] %v17789_v8  ;;  %v13764_v29 = vmul.u32.u64.low %v5042_v49, %v5041_v2  ;;  %v13765_v58 = vmul.u32.u64.high %v5042_v49, %v5041_v2, %v13764_v29  ;;  %v4293_v51 = vshrl.u32 %v17769_v44, %v13697_v46  ;;  %v4748_v47 = vsub.s32 0, %v13744_v32 }
 0x446   : > { %v5033_v0 = vsel %vm5027_vm2, %v5030_v3, %v5032_v36  ;;  %v4796_v35 = vadd.s32 1, %v8098_v28  ;;  %v13773_v42 = vshrl.u32 %v17770_v13, %v13697_v46  ;;  %v4653_v27 = vor.u32 %v4652_v59, %v4651_v33 }
 0x447   : > { %v13775_v62 = vsel %vm8105_vm0, 0, %v8104_v23  ;;  %v5309_v12 = vand.u32 2139095040, %v13722_v50  ;;  %v4559_v5 = vsel %vm17231_vm6, %v4558_v25, %v13724_v17  ;;  %v13782_v14 = vadd.s32 1, %v13700_v18 }
 0x448   : > { %v5052_v38 = vadd.s32 1, %v13759_v24  ;;  %vm4797_vm10 = vcmp.gt.s32.totalorder %v4796_v35, 0  ;;  %v4658_v28 = vand.u32 2147483647, %v4657_v40  ;;  %v5049_v34 = vmul.u32 %v5042_v49, %v5033_v0 }
 0x449   : > { %vm5051_vm5 = vc.u32 %v13765_v58, %v13758_v10  ;;  %v17150_v59 = vand.u32 2147483647, %v13680_v55  ;;  %v4966_v23 = vsub.s32 4294967266, %v13775_v62  ;;  %v8095_v4 = vmin.u32 %v4748_v47, %v13744_v32 }
 0x44a   : > { %v5053_v3 = vsel %vm5051_vm5, %v5052_v38, %v13759_v24  ;;  %v4798_v17 = vsel %vm4797_vm10, %v4796_v35, 0  ;;  %v13792_v18 = vor.u32 %v4293_v51, %v13711_v56  ;;  %v4660_v25 = vcvt.s32.f32 %v4653_v27 }
 0x44b   : > { %v5054_v36 = vadd.s32 %v5053_v3, %v5049_v34  ;;  %v5310_v53 = vshrl.u32 %v5309_v12, 23  ;;  %v13797_v49 = vsel %vm13749_vm14, %v13345_v1, %v4559_v5  ;;  %v4946_v2 = vadd.s32 %v13615_v31, %v13613_v54 }
 0x44c   : > { %17791 = vst [vmem:[#allocation61_spill] sm:$0xff] %v13792_v18  ;;  %v4800_v33 = vand.u32 31, %v4798_v17  ;;  %v13803_v24 = vmul.f32 %v4660_v25, %v4658_v28  ;;  %v4793_v56 = vand.u32 8388607, %v17150_v59  ;;  %v4962_v51 = vsub.s32 32, %v13775_v62 }
 0x44d   : > { %v5055_v40 = vadd.s32 536870912, %v5054_v36  ;;  %v4967_v47 = vadd.s32 127, %v4966_v23  ;;  %v4750_v0 = vclz %v8095_v4  ;;  %v4799_v12 = vshrl.u32 %v4798_v17, 5 }
 0x44e   : > { %v4801_v35 = vsub.s32 32, %v4800_v33  ;;  %v4803_v5 = vshll.u32 %v17387_v19, %v4800_v33  ;;  %v8118_v54 = vadd.s32 4294967169, %v5310_v53  ;;  %v4806_v38 = vshll.u32 %v17389_v43, %v4800_v33 }
 0x44f   : > { %v13809_v27 = vshrl.u32 %v5055_v40, 30  ;;  %v4809_v23 = vshll.u32 %v17390_v37, %v4800_v33  ;;  %v4812_v4 = vshll.u32 %v17395_v21, %v4800_v33  ;;  %v4963_v17 = vshll.u32 %v13660_v52, %v13775_v62 }
 0x450   : > { %v4804_v31 = vshrl.u32 %v17389_v43, %v4801_v35  ;;  %v4807_v28 = vshrl.u32 %v17390_v37, %v4801_v35  ;;  %v4810_v34 = vshrl.u32 %v17395_v21, %v4801_v35  ;;  %v4813_v25 = vshrl.u32 %v17769_v44, %v4801_v35 }
 0x451   : > { %17792 = vst [vmem:[#allocation70_spill] sm:$0xff] %v13809_v27  ;;  %v5057_v3 = vshll.u32 %v13809_v27, 30  ;;  %v4794_v53 = vor.u32 8388608, %v4793_v56  ;;  %vm17232_vm15 = vcmp.lt.s32.totalorder %v13694_v57, 4  ;;  %vm4381_vm11 = vcmp.gt.s32.totalorder %v13782_v14, 0 }
 0x452   : > { %v4805_v40 = vor.u32 %v4804_v31, %v4803_v5  ;;  %v4808_v59 = vor.u32 %v4807_v28, %v4806_v38  ;;  %v4811_v29 = vor.u32 %v4810_v34, %v4809_v23  ;;  %v4814_v63 = vor.u32 %v4813_v25, %v4812_v4 }
 0x453   : > { %v4815_v27 = vshll.u32 %v17769_v44, %v4800_v33  ;;  %v4816_v8 = vshrl.u32 %v17770_v13, %v4801_v35  ;;  %v4964_v1 = vshrl.u32 %v4946_v2, %v4962_v51  ;;  %v4968_v6 = vshll.u32 %v4967_v47, 23  ;;  %v13832_v51 = vpop.f32.mrb[15].mxu0 }
 0x454   : > { %v8096_v46 = vadd.s32 4294967294, %v4750_v0  ;;  %v5316_v9 = vadd.s32 1, %v8118_v54  ;;  %v13826_v26 = vsub.s32 %v5054_v36, %v5057_v3  ;;  %vm4818_vm7 = vcmp.lt.s32.totalorder %v4799_v12, 1 }
 0x455   : > { %v4817_v52 = vor.u32 %v4816_v8, %v4815_v27  ;;  %vm4821_vm12 = vcmp.lt.s32.totalorder %v4799_v12, 4  ;;  %v4802_v62 = vshrl.u32 %v17387_v19, %v4801_v35  ;;  %vm4820_vm4 = vcmp.lt.s32.totalorder %v4799_v12, 3 }
 0x456   : > { %v4826_v56 = vsel %vm4818_vm7, %v4805_v40, %v4808_v59  ;;  %v4827_v5 = vsel %vm4821_vm12, %v4814_v63, 920167782  ;;  %vm4819_vm3 = vcmp.lt.s32.totalorder %v4799_v12, 2  ;;  %v4823_v31 = vsel %vm4821_vm12, %v4811_v29, 2102212464 }
 0x457   : > { %v4828_v33 = vsel %vm4820_vm4, %v4811_v29, %v4827_v5  ;;  %v4830_v2 = vsel %vm4818_vm7, %v4808_v59, %v4811_v29  ;;  %v13834_v47 = vor.u32 %v4964_v1, %v4963_v17  ;;  %v4831_v36 = vsel %vm4821_vm12, %v4817_v52, 1326507024 }
 0x458   : > { %v4829_v8 = vsel %vm4819_vm3, %v4826_v56, %v4828_v33  ;;  %v4834_v0 = vshll.u32 %v4794_v53, 8  ;;  %v5060_v35 = vsub.s32 0, %v13826_v26  ;;  %v4822_v27 = vsel %vm4818_vm7, %v4802_v62, %v4805_v40 }
 0x459   : > { %v4832_v54 = vsel %vm4820_vm4, %v4814_v63, %v4831_v36  ;;  %vm5317_vm8 = vcmp.gt.s32.totalorder %v5316_v9, 0  ;;  %v4824_v38 = vsel %vm4820_vm4, %v4808_v59, %v4823_v31  ;;  %v13846_v1 = vor.u32 4788187, %v4968_v6 }
 0x45a   : > { %v4833_v28 = vsel %vm4819_vm3, %v4830_v2, %v4832_v54  ;;  %v13842_v29 = vmul.u32.u64.low %v4834_v0, %v4829_v8  ;;  %v13843_v34 = vmul.u32.u64.high %v4834_v0, %v4829_v8, %v13842_v29  ;;  %vm8097_vm1 = vcmp.lt.s32.totalorder %v8096_v46, 0 }
 0x45b   : > { %v13848_v3 = vmul.u32.u64.low %v4834_v0, %v4833_v28  ;;  %v13849_v23 = vmul.u32.u64.high %v4834_v0, %v4833_v28, %v13848_v3  ;;  %v13854_v4 = vsel %vm17232_vm15, %v13792_v18, 920167782  ;;  %v17794_v59 = vor.u32 %v13773_v42, %v13716_v22 }
 0x45c   : > { %17793 = vst [vmem:[#allocation50_spill] sm:$0xff] %v13854_v4  ;;  %v5318_v25 = vsel %vm5317_vm8, %v5316_v9, 0  ;;  %v8107_v6 = vmin.u32 %v5060_v35, %v13826_v26  ;;  %v4825_v17 = vsel %vm4819_vm3, %v4822_v27, %v4824_v38  ;;  %v17796_v53 = vand.u32 2147483647, %v13722_v50 }
 0x45d   : > { %v13861_v63 = vsel %vm17232_vm15, %v17794_v59, 1326507024  ;;  %v5320_v52 = vand.u32 31, %v5318_v25  ;;  %8795 = vcosq.f32 %v13797_v49  ;;  %v13871_v62 = vsel %vm4381_vm11, %v13782_v14, 0 }
 0x45e   : > { %17795 = vst [vmem:[#allocation60_spill] sm:$0xff] %v13861_v63  ;;  %v5313_v40 = vand.u32 8388607, %v17796_v53  ;;  %v13873_v22 = vsel %vm8097_vm1, 0, %v8096_v46  ;;  %v4844_v42 = vadd.s32 1, %v13843_v34  ;;  %8797 = vsinq.f32 %v13797_v49 }
 0x45f   : > { %v4841_v5 = vmul.u32 %v4834_v0, %v4825_v17  ;;  %vm4843_vm13 = vc.u32 %v13849_v23, %v13842_v29  ;;  %v5321_v31 = vsub.s32 32, %v5320_v52  ;;  %v13885_v46 = vld [vmem:[%s16919_s2 + $0x1] ss:$0 sm:$0xff]  ;;  %v4758_v49 = vsub.s32 4294967266, %v13873_v22 }
 0x460   : > { %v13889_v14 = vadd.f32 %v13885_v46, %v13560_v30  ;;  %v5062_v33 = vclz %v8107_v6  ;;  %v4845_v2 = vsel %vm4843_vm13, %v4844_v42, %v13843_v34  ;;  %v5314_v8 = vor.u32 8388608, %v5313_v40 }
 0x461   : > { %v4846_v36 = vadd.s32 %v4845_v2, %v4841_v5  ;;  %v5319_v0 = vshrl.u32 %v5318_v25, 5  ;;  %v5324_v35 = vshrl.u32 %v17389_v43, %v5321_v31  ;;  %v5327_v27 = vshrl.u32 %v17390_v37, %v5321_v31 }
 0x462   : > { %17797 = vst [vmem:[#allocation55_spill] sm:$0xff] %v13889_v14  ;;  %v5323_v54 = vshll.u32 %v17387_v19, %v5320_v52  ;;  %v5326_v38 = vshll.u32 %v17389_v43, %v5320_v52  ;;  %v5329_v28 = vshll.u32 %v17390_v37, %v5320_v52  ;;  %v5330_v30 = vshrl.u32 %v17395_v21, %v5321_v31 }
 0x463   : > { %v4754_v3 = vsub.s32 32, %v13873_v22  ;;  %v4847_v59 = vadd.s32 536870912, %v4846_v36  ;;  %v5332_v34 = vshll.u32 %v17395_v21, %v5320_v52  ;;  %v5333_v6 = vshrl.u32 %v17769_v44, %v5321_v31 }
 0x464   : > { %v4759_v25 = vadd.s32 127, %v4758_v49  ;;  %v5325_v17 = vor.u32 %v5324_v35, %v5323_v54  ;;  %v5328_v53 = vor.u32 %v5327_v27, %v5326_v38  ;;  %v5331_v40 = vor.u32 %v5330_v30, %v5329_v28 }
 0x465   : > { %vm17230_vm2 = vcmp.lt.s32.totalorder %v13421_v7, 0  ;;  %v13903_v42 = vshrl.u32 %v4847_v59, 30  ;;  %v5334_v5 = vor.u32 %v5333_v6, %v5332_v34  ;;  %v5335_v2 = vshll.u32 %v17769_v44, %v5320_v52 }
 0x466   : > { %v5336_v56 = vshrl.u32 %v17770_v13, %v5321_v31  ;;  %v8108_v12 = vadd.s32 4294967294, %v5062_v33  ;;  %vm5341_vm9 = vcmp.lt.s32.totalorder %v5319_v0, 4  ;;  %v5354_v9 = vshll.u32 %v5314_v8, 8 }
 0x467   : > { %17798 = vst [vmem:[#allocation58_spill] sm:$0xff] %v13903_v42  ;;  %v5101_v18 = vand.u32 2139095040, %v13889_v14  ;;  %v13908_v63 = vpop.eup %8795  ;;  %v4849_v49 = vshll.u32 %v13903_v42, 30  ;;  %vm5338_vm0 = vcmp.lt.s32.totalorder %v5319_v0, 1  ;;  %v5343_v27 = vsel %vm5341_vm9, %v5331_v40, 2102212464 }
 0x468   : > { %17799 = vst [vmem:[#allocation67_spill] sm:$0xff] %v13908_v63  ;;  %v5337_v35 = vor.u32 %v5336_v56, %v5335_v2  ;;  %v13912_v54 = vpop.eup %8797  ;;  %v5322_v38 = vshrl.u32 %v17387_v19, %v5321_v31  ;;  %vm5340_vm10 = vcmp.lt.s32.totalorder %v5319_v0, 3  ;;  %v5346_v52 = vsel %vm5338_vm0, %v5325_v17, %v5328_v53 }
 0x469   : > { %17800 = vst [vmem:[#allocation68_spill] sm:$0xff] %v13912_v54  ;;  %v5347_v33 = vsel %vm5341_vm9, %v5334_v5, 920167782  ;;  %v13916_v28 = vsub.s32 %v4846_v36, %v4849_v49  ;;  %vm5339_vm5 = vcmp.lt.s32.totalorder %v5319_v0, 2  ;;  %v5350_v30 = vsel %vm5338_vm0, %v5328_v53, %v5331_v40 }
 0x46a   : > { %v5348_v8 = vsel %vm5340_vm10, %v5331_v40, %v5347_v33  ;;  %v5342_v59 = vsel %vm5338_vm0, %v5322_v38, %v5325_v17  ;;  %v5344_v34 = vsel %vm5340_vm10, %v5328_v53, %v5343_v27  ;;  %v5351_v6 = vsel %vm5341_vm9, %v5337_v35, 1326507024 }
 0x46b   : > { %v5349_v56 = vsel %vm5339_vm5, %v5346_v52, %v5348_v8  ;;  %v4852_v2 = vsub.s32 0, %v13916_v28  ;;  %v5352_v42 = vsel %vm5340_vm10, %v5334_v5, %v5351_v6  ;;  %v4760_v54 = vshll.u32 %v4759_v25, 23 }
 0x46c   : > { %v13921_v63 = vmul.u32.u64.low %v5354_v9, %v5349_v56  ;;  %v13922_v31 = vmul.u32.u64.high %v5354_v9, %v5349_v56, %v13921_v63  ;;  %vm8109_vm11 = vcmp.lt.s32.totalorder %v8108_v12, 0  ;;  %v5353_v36 = vsel %vm5339_vm5, %v5350_v30, %v5352_v42 }
 0x46d   : > { %v5102_v49 = vshrl.u32 %v5101_v18, 23  ;;  %v8099_v40 = vmin.u32 %v4852_v2, %v13916_v28  ;;  %v13927_v17 = vmul.u32.u64.low %v5354_v9, %v5353_v36  ;;  %v13928_v53 = vmul.u32.u64.high %v5354_v9, %v5353_v36, %v13927_v17 }
 0x46e   : > { %v17169_v27 = vand.u32 2147483647, %v13889_v14  ;;  %v17801_v35 = vxor.u32 2147483648, %v13803_v24  ;;  %v4738_v25 = vadd.s32 %v13666_v15, %v13684_v16  ;;  %v5345_v42 = vsel %vm5339_vm5, %v5342_v59, %v5344_v34 }
 0x46f   : > { %v8110_v18 = vadd.s32 4294967169, %v5102_v49  ;;  %v17802_v38 = vand.u32 2147483647, %v13846_v1  ;;  %v17803_v52 = vcvt.s32.f32 %v13834_v47  ;;  %v13947_v8 = vsel %vm8109_vm11, 0, %v8108_v12 }
 0x470   : > { %v13936_v5 = vsel %vm17230_vm2, %v17801_v35, %v13803_v24  ;;  %v4854_v30 = vclz %v8099_v40  ;;  %v5364_v56 = vadd.s32 1, %v13922_v31  ;;  %v4755_v24 = vshll.u32 %v13744_v32, %v13873_v22 }
 0x471   : > { %v13945_v33 = vmul.f32 %v17803_v52, %v17802_v38  ;;  %v4756_v6 = vshrl.u32 %v4738_v25, %v4754_v3  ;;  %v13952_v2 = vor.u32 4788187, %v4760_v54  ;;  %v5108_v15 = vadd.s32 1, %v8110_v18 }
 0x472   : > { %v8100_v16 = vadd.s32 4294967294, %v4854_v30  ;;  %v5361_v0 = vmul.u32 %v5354_v9, %v5345_v42  ;;  %vm5363_vm7 = vc.u32 %v13928_v53, %v13921_v63  ;;  %v5105_v47 = vand.u32 8388607, %v17169_v27 }
 0x473   : > { %v5070_v1 = vsub.s32 4294967266, %v13947_v8  ;;  %v5365_v12 = vsel %vm5363_vm7, %v5364_v56, %v13922_v31  ;;  %vm5109_vm12 = vcmp.gt.s32.totalorder %v5108_v15, 0  ;;  %v13962_v32 = vadd.f32 %v13885_v46, %v13566_v39 }
 0x474   : > { %vm8101_vm4 = vcmp.lt.s32.totalorder %v8100_v16, 0  ;;  %v5366_v3 = vadd.s32 %v5365_v12, %v5361_v0  ;;  %v5110_v9 = vsel %vm5109_vm12, %v5108_v15, 0  ;;  %v13965_v54 = vor.u32 %v4756_v6, %v4755_v24  ;;  %v8659_v6 = vld [vmem:[%s16921_s4] sm:$0xff]  }
 0x475   : > { %17804 = vst [vmem:[#allocation64_spill] sm:$0xff] %v13962_v32  ;;  %v5050_v59 = vadd.s32 %v13758_v10, %v13765_v58  ;;  %v13969_v34 = vsel %vm8101_vm4, 0, %v8100_v16  ;;  %v5112_v36 = vand.u32 31, %v5110_v9  ;;  %v5066_v49 = vsub.s32 32, %v13947_v8  ;;  %8313 = vmatprep.subr.bf16.mxu1 %v8659_v6 }
 0x476   : > { %v5367_v40 = vadd.s32 536870912, %v5366_v3  ;;  %v5071_v17 = vadd.s32 127, %v5070_v1  ;;  %v5106_v35 = vor.u32 8388608, %v5105_v47  ;;  %v5413_v42 = vand.u32 2139095040, %v13962_v32  ;;  %8314 = vmatpush3.bf16.msra.mxu1 %v8659_v6 }
 0x477   : > { %v5113_v25 = vsub.s32 32, %v5112_v36  ;;  %v4862_v18 = vsub.s32 4294967266, %v13969_v34  ;;  %v13979_v58 = vshrl.u32 %v5110_v9, 5  ;;  %v5115_v10 = vshll.u32 %v17387_v19, %v5112_v36 }
 0x478   : > { %v13977_v38 = vshrl.u32 %v5367_v40, 30  ;;  %v5118_v30 = vshll.u32 %v17389_v43, %v5112_v36  ;;  %v5121_v16 = vshll.u32 %v17390_v37, %v5112_v36  ;;  %v5124_v0 = vshll.u32 %v17395_v21, %v5112_v36 }
 0x479   : > { %v5116_v52 = vshrl.u32 %v17389_v43, %v5113_v25  ;;  %v5119_v56 = vshrl.u32 %v17390_v37, %v5113_v25  ;;  %v5122_v24 = vshrl.u32 %v17395_v21, %v5113_v25  ;;  %v5125_v47 = vshrl.u32 %v17769_v44, %v5113_v25 }
 0x47a   : > { %17805 = vst [vmem:[#allocation62_spill] sm:$0xff] %v13977_v38  ;;  %v5369_v15 = vshll.u32 %v13977_v38, 30  ;;  %v5068_v1 = vshrl.u32 %v5050_v59, %v5066_v49  ;;  %v5072_v12 = vshll.u32 %v5071_v17, 23  ;;  %v17806_v27 = vand.u32 2147483647, %v13421_v7 }
 0x47b   : > { %v5117_v9 = vor.u32 %v5116_v52, %v5115_v10  ;;  %v5120_v40 = vor.u32 %v5119_v56, %v5118_v30  ;;  %v17807_v31 = vmov 0  ;;  %v5123_v22 = vor.u32 %v5122_v24, %v5121_v16 }
 0x47c   : > { %vm13995_vm3 = vcmp.le.f32.partialorder %v17806_v27, 0.7853982  ;;  %v13999_v39 = vsub.s32 %v5366_v3, %v5369_v15  ;;  %v5126_v38 = vor.u32 %v5125_v47, %v5124_v0  ;;  %v14001_v4 = vshll.u32 %v5106_v35, 8  ;;  %v14010_v3 = vpop.f32.mrb[16].mxu0 }
 0x47d   : > { %v17808_v31 = vsel %vm13995_vm3, 4294967295, %v17807_v31  ;;  %vm17195_vm8 = vcmp.lt.s32.totalorder %v13525_v11, 0  ;;  %v5127_v59 = vshll.u32 %v17769_v44, %v5112_v36  ;;  %v5128_v49 = vshrl.u32 %v17770_v13, %v5113_v25 }
 0x47e   : > { %17809 = vst [vmem:[#allocation27_spill] sm:$0xff] %v17808_v31  ;;  %v17172_v17 = vand.u32 2147483647, %v13962_v32  ;;  %v5414_v10 = vshrl.u32 %v5413_v42, 23  ;;  %v4863_v27 = vadd.s32 127, %v4862_v18  ;;  %v5114_v52 = vshrl.u32 %v17387_v19, %v5113_v25 }
 0x47f   : > { %vm5130_vm1 = vcmp.lt.s32.totalorder %v13979_v58, 1  ;;  %vm5133_vm13 = vcmp.lt.s32.totalorder %v13979_v58, 4  ;;  %v5129_v35 = vor.u32 %v5128_v49, %v5127_v59  ;;  %vm5132_vm9 = vcmp.lt.s32.totalorder %v13979_v58, 3 }
 0x480   : > { %v5138_v36 = vsel %vm5130_vm1, %v5117_v9, %v5120_v40  ;;  %v5139_v30 = vsel %vm5133_vm13, %v5126_v38, 920167782  ;;  %v5372_v56 = vsub.s32 0, %v13999_v39  ;;  %vm5131_vm0 = vcmp.lt.s32.totalorder %v13979_v58, 2 }
 0x481   : > { %v5135_v42 = vsel %vm5133_vm13, %v5123_v22, 2102212464  ;;  %v5140_v25 = vsel %vm5132_vm9, %v5123_v22, %v5139_v30  ;;  %v5142_v24 = vsel %vm5130_vm1, %v5120_v40, %v5123_v22  ;;  %v5143_v6 = vsel %vm5133_vm13, %v5129_v35, 1326507024 }
 0x482   : > { %v5141_v18 = vsel %vm5131_vm0, %v5138_v36, %v5140_v25  ;;  %v8122_v15 = vadd.s32 4294967169, %v5414_v10  ;;  %v17810_v16 = vand.u32 2147483647, %v13525_v11  ;;  %v17811_v0 = vmov 0 }
 0x483   : > { %v5073_v47 = vor.u32 4788187, %v5072_v12  ;;  %v4858_v59 = vsub.s32 32, %v13969_v34  ;;  %v5134_v49 = vsel %vm5130_vm1, %v5114_v52, %v5117_v9  ;;  %v5144_v36 = vsel %vm5132_vm9, %v5126_v38, %v5143_v6  ;;  %v14043_v12 = vpop.f32.mrb[17].mxu0 }
 0x484   : > { %vm14025_vm10 = vcmp.le.f32.partialorder %v17810_v16, 0.7853982  ;;  %v5136_v22 = vsel %vm5132_vm9, %v5120_v40, %v5135_v42  ;;  %v5145_v10 = vsel %vm5131_vm0, %v5142_v24, %v5144_v36  ;;  %v4864_v25 = vshll.u32 %v4863_v27, 23 }
 0x485   : > { %v17812_v0 = vsel %vm14025_vm10, 4294967295, %v17811_v0  ;;  %v14039_v35 = vmul.u32.u64.low %v14001_v4, %v5141_v18  ;;  %v14040_v30 = vmul.u32.u64.high %v14001_v4, %v5141_v18, %v14039_v35  ;;  %v8119_v16 = vmin.u32 %v5372_v56, %v13999_v39 }
 0x486   : > { %17813 = vst [vmem:[#allocation25_spill] sm:$0xff] %v17812_v0  ;;  %v14047_v9 = vmul.u32.u64.low %v14001_v4, %v5145_v10  ;;  %v14048_v52 = vmul.u32.u64.high %v14001_v4, %v5145_v10, %v14047_v9  ;;  %v14054_v38 = vsel %vm13995_vm3, %v13421_v7, %v13936_v5  ;;  %v4764_v40 = vcvt.s32.f32 %v13965_v54 }
 0x487   : > { %v5417_v42 = vand.u32 8388607, %v17172_v17  ;;  %v5420_v18 = vadd.s32 1, %v8122_v15  ;;  %v17814_v27 = vxor.u32 2147483648, %v13945_v33  ;;  %v17815_v24 = vshll.u32 %v13826_v26, %v13947_v8 }
 0x488   : > { %v4842_v5 = vadd.s32 %v13842_v29, %v13849_v23  ;;  %v5137_v54 = vsel %vm5131_vm0, %v5134_v49, %v5136_v22  ;;  %v17816_v36 = vand.u32 2147483647, %v13952_v2  ;;  %v5074_v15 = vand.u32 2147483647, %v5073_v47 }
 0x489   : > { %v4975_v56 = vsel %vm17195_vm8, %v17814_v27, %v13945_v33  ;;  %v5069_v6 = vor.u32 %v5068_v1, %v17815_v24  ;;  %v5156_v9 = vadd.s32 1, %v14040_v30  ;;  %vm5421_vm5 = vcmp.gt.s32.totalorder %v5420_v18, 0 }
 0x48a   : > { %v14073_v10 = vmul.f32 %v4764_v40, %v17816_v36  ;;  %v4860_v17 = vshrl.u32 %v4842_v5, %v4858_v59  ;;  %v14076_v33 = vor.u32 4788187, %v4864_v25  ;;  %v5374_v27 = vclz %v8119_v16 }
 0x48b   : > { %v14080_v26 = vadd.f32 %v13885_v46, %v13568_v60  ;;  %v5153_v29 = vmul.u32 %v14001_v4, %v5137_v54  ;;  %vm5155_vm11 = vc.u32 %v14048_v52, %v14039_v35  ;;  %v5418_v23 = vor.u32 8388608, %v5417_v42 }
 0x48c   : > { %v5422_v8 = vsel %vm5421_vm5, %v5420_v18, 0  ;;  %8799 = vcosq.f32 %v14054_v38  ;;  %v5076_v2 = vcvt.s32.f32 %v5069_v6  ;;  %v4859_v58 = vshll.u32 %v13916_v28, %v13969_v34 }
 0x48d   : > { %17817 = vst [vmem:[#allocation71_spill] sm:$0xff] %v14080_v26  ;;  %v5157_v1 = vsel %vm5155_vm11, %v5156_v9, %v14040_v30  ;;  %v14092_v60 = vsel %vm14025_vm10, %v13525_v11, %v4975_v56  ;;  %v5424_v59 = vand.u32 31, %v5422_v8  ;;  %v8120_v28 = vadd.s32 4294967294, %v5374_v27 }
 0x48e   : > { %v5158_v47 = vadd.s32 %v5157_v1, %v5153_v29  ;;  %v14095_v49 = vmul.f32 %v5076_v2, %v5074_v15  ;;  %v14097_v22 = vor.u32 %v4860_v17, %v4859_v58  ;;  %v14101_v40 = vshll.u32 %v5418_v23, 8 }
 0x48f   : > { %v5425_v30 = vsub.s32 32, %v5424_v59  ;;  %v5423_v42 = vshrl.u32 %v5422_v8, 5  ;;  %v5427_v18 = vshll.u32 %v17387_v19, %v5424_v59  ;;  %v5430_v56 = vshll.u32 %v17389_v43, %v5424_v59 }
 0x490   : > { %v5159_v34 = vadd.s32 536870912, %v5158_v47  ;;  %v5205_v24 = vand.u32 2139095040, %v14080_v26  ;;  %v5433_v54 = vshll.u32 %v17390_v37, %v5424_v59  ;;  %v5436_v15 = vshll.u32 %v17395_v21, %v5424_v59 }
 0x491   : > { %v5428_v17 = vshrl.u32 %v17389_v43, %v5425_v30  ;;  %v5431_v5 = vshrl.u32 %v17390_v37, %v5425_v30  ;;  %v5434_v36 = vshrl.u32 %v17395_v21, %v5425_v30  ;;  %v5437_v9 = vshrl.u32 %v17769_v44, %v5425_v30 }
 0x492   : > { %v14106_v6 = vshrl.u32 %v5159_v34, 30  ;;  %v5439_v27 = vshll.u32 %v17769_v44, %v5424_v59  ;;  %v5440_v2 = vshrl.u32 %v17770_v13, %v5425_v30  ;;  %vm17204_vm7 = vcmp.lt.s32.totalorder %v13564_v48, 0 }
 0x493   : > { %v5429_v23 = vor.u32 %v5428_v17, %v5427_v18  ;;  %v5432_v8 = vor.u32 %v5431_v5, %v5430_v56  ;;  %v5435_v58 = vor.u32 %v5434_v36, %v5433_v54  ;;  %v5438_v1 = vor.u32 %v5437_v9, %v5436_v15 }
 0x494   : > { %17818 = vst [vmem:[#allocation12_spill] sm:$0xff] %v14106_v6  ;;  %v5161_v29 = vshll.u32 %v14106_v6, 30  ;;  %vm5442_vm12 = vcmp.lt.s32.totalorder %v5423_v42, 1  ;;  %v5206_v34 = vshrl.u32 %v5205_v24, 23  ;;  %v5441_v25 = vor.u32 %v5440_v2, %v5439_v27 }
 0x495   : > { %vm5443_vm4 = vcmp.lt.s32.totalorder %v5423_v42, 2  ;;  %vm5445_vm1 = vcmp.lt.s32.totalorder %v5423_v42, 4  ;;  %vm5444_vm13 = vcmp.lt.s32.totalorder %v5423_v42, 3  ;;  %v5450_v18 = vsel %vm5442_vm12, %v5429_v23, %v5432_v8 }
 0x496   : > { %v14118_v16 = vsub.s32 %v5158_v47, %v5161_v29  ;;  %v14120_v4 = vpop.eup %8799  ;;  %v5447_v59 = vsel %vm5445_vm1, %v5435_v58, 2102212464  ;;  %v5451_v56 = vsel %vm5445_vm1, %v5438_v1, 920167782  ;;  %v17820_v17 = vand.u32 2147483647, %v13564_v48 }
 0x497   : > { %17819 = vst [vmem:[#allocation72_spill] sm:$0xff] %v14120_v4  ;;  %v17821_v5 = vmov 0  ;;  %v5426_v47 = vshrl.u32 %v17387_v19, %v5425_v30  ;;  %v5452_v54 = vsel %vm5444_vm13, %v5435_v58, %v5451_v56  ;;  %v5454_v36 = vsel %vm5442_vm12, %v5432_v8, %v5435_v58  ;;  %v8660_v30 = vld [vmem:[%s16921_s4 + $0x8] sm:$0xff]  }
 0x498   : > { %vm14125_vm9 = vcmp.le.f32.partialorder %v17820_v17, 0.7853982  ;;  %v5164_v24 = vsub.s32 0, %v14118_v16  ;;  %vm8121_vm0 = vcmp.lt.s32.totalorder %v8120_v28, 0  ;;  %v5453_v15 = vsel %vm5443_vm4, %v5450_v18, %v5452_v54  ;;  %8315 = vmatprep.subr.bf16.mxu1 %v8660_v30 }
 0x499   : > { %v17822_v5 = vsel %vm14125_vm9, 4294967295, %v17821_v5  ;;  %v5455_v9 = vsel %vm5445_vm1, %v5441_v25, 1326507024  ;;  %v8114_v27 = vadd.s32 4294967169, %v5206_v34  ;;  %v5446_v2 = vsel %vm5442_vm12, %v5426_v47, %v5429_v23  ;;  %8316 = vmatpush3.bf16.msra.mxu1 %v8660_v30 }
 0x49a   : > { %17823 = vst [vmem:[#allocation15_spill] sm:$0xff] %v17822_v5  ;;  %v8111_v29 = vmin.u32 %v5164_v24, %v14118_v16  ;;  %v5448_v17 = vsel %vm5444_vm13, %v5432_v8, %v5447_v59  ;;  %v5456_v6 = vsel %vm5444_vm13, %v5438_v1, %v5455_v9  ;;  %v4868_v56 = vcvt.s32.f32 %v14097_v22  ;;  %v14157_v1 = vpop.f32.mrb[18].mxu0 }
 0x49b   : > { %v5457_v58 = vsel %vm5443_vm4, %v5454_v36, %v5456_v6  ;;  %v14144_v18 = vmul.u32.u64.low %v14101_v40, %v5453_v15  ;;  %v14145_v25 = vmul.u32.u64.high %v14101_v40, %v5453_v15, %v14144_v18  ;;  %v14148_v34 = vsel %vm8121_vm0, 0, %v8120_v28 }
 0x49c   : > { %v5166_v23 = vclz %v8111_v29  ;;  %v14151_v8 = vmul.u32.u64.low %v14101_v40, %v5457_v58  ;;  %v14152_v59 = vmul.u32.u64.high %v14101_v40, %v5457_v58, %v14151_v8  ;;  %8801 = vsinq.f32 %v14054_v38 }
 0x49d   : > { %vm17183_vm5 = vcmp.lt.s32.totalorder %v13637_v20, 0  ;;  %v5449_v22 = vsel %vm5443_vm4, %v5446_v2, %v5448_v17  ;;  %v5212_v6 = vadd.s32 1, %v8114_v27  ;;  %8803 = vcosq.f32 %v14092_v60 }
 0x49e   : > { %v17824_v28 = vxor.u32 2147483648, %v14073_v10  ;;  %v5078_v47 = vxor.u32 2147483648, %v14095_v49  ;;  %v17825_v38 = vand.u32 2147483647, %v14076_v33  ;;  %v5382_v42 = vsub.s32 4294967266, %v14148_v34 }
 0x49f   : > { %v5468_v36 = vadd.s32 1, %v14145_v25  ;;  %v17826_v15 = vand.u32 2147483647, %v14080_v26  ;;  %vm5213_vm11 = vcmp.gt.s32.totalorder %v5212_v6, 0  ;;  %v8112_v27 = vadd.s32 4294967294, %v5166_v23 }
 0x4a0   : > { %v4767_v24 = vsel %vm17204_vm7, %v17824_v28, %v14073_v10  ;;  %v14168_v54 = vmul.f32 %v4868_v56, %v17825_v38  ;;  %v5465_v29 = vmul.u32 %v14101_v40, %v5449_v22  ;;  %vm5467_vm12 = vc.u32 %v14152_v59, %v14144_v18 }
 0x4a1   : > { %v5209_v9 = vand.u32 8388607, %v17826_v15  ;;  %v5214_v10 = vsel %vm5213_vm11, %v5212_v6, 0  ;;  %8805 = vsinq.f32 %v14092_v60  ;;  %v14181_v33 = vsel %vm14125_vm9, %v13564_v48, %v4767_v24 }
 0x4a2   : > { %v5469_v2 = vsel %vm5467_vm12, %v5468_v36, %v14145_v25  ;;  %v5216_v17 = vand.u32 31, %v5214_v10  ;;  %v14187_v30 = vsel %vm17183_vm5, %v5078_v47, %v14095_v49  ;;  %v5362_v56 = vadd.s32 %v13921_v63, %v13928_v53 }
 0x4a3   : > { %v5470_v58 = vadd.s32 %v5469_v2, %v5465_v29  ;;  %v5378_v60 = vsub.s32 32, %v14148_v34  ;;  %v5383_v23 = vadd.s32 127, %v5382_v42  ;;  %v5210_v8 = vor.u32 8388608, %v5209_v9 }
 0x4a4   : > { %v5217_v22 = vsub.s32 32, %v5216_v17  ;;  %vm8113_vm4 = vcmp.lt.s32.totalorder %v8112_v27, 0  ;;  %v5219_v25 = vshll.u32 %v17387_v19, %v5216_v17  ;;  %v5222_v28 = vshll.u32 %v17389_v43, %v5216_v17 }
 0x4a5   : > { %v5471_v6 = vadd.s32 536870912, %v5470_v58  ;;  %v5225_v47 = vshll.u32 %v17390_v37, %v5216_v17  ;;  %v5215_v38 = vshrl.u32 %v5214_v10, 5  ;;  %v5228_v42 = vshll.u32 %v17395_v21, %v5216_v17 }
 0x4a6   : > { %v5220_v49 = vshrl.u32 %v17389_v43, %v5217_v22  ;;  %v5223_v24 = vshrl.u32 %v17390_v37, %v5217_v22  ;;  %v5226_v63 = vshrl.u32 %v17395_v21, %v5217_v22  ;;  %v5229_v36 = vshrl.u32 %v17769_v44, %v5217_v22  ;;  %v14203_v15 = vpop.eup %8801 }
 0x4a7   : > { %v14199_v53 = vshrl.u32 %v5471_v6, 30  ;;  %17828 = vst [vmem:[#allocation45_spill] sm:$0xff] %v14203_v15  ;;  %v5380_v9 = vshrl.u32 %v5362_v56, %v5378_v60  ;;  %v14205_v0 = vpop.eup %8803  ;;  %v5384_v11 = vshll.u32 %v5383_v23, 23  ;;  %v5250_v48 = vshll.u32 %v5210_v8, 8 }
 0x4a8   : > { %v5221_v29 = vor.u32 %v5220_v49, %v5219_v25  ;;  %v5224_v2 = vor.u32 %v5223_v24, %v5222_v28  ;;  %v5227_v40 = vor.u32 %v5226_v63, %v5225_v47  ;;  %17829 = vst [vmem:[#allocation17_spill] sm:$0xff] %v14205_v0  ;;  %v5230_v4 = vor.u32 %v5229_v36, %v5228_v42 }
 0x4a9   : > { %17827 = vst [vmem:[#allocation16_spill] sm:$0xff] %v14199_v53  ;;  %v5473_v5 = vshll.u32 %v14199_v53, 30  ;;  %v17830_v6 = vand.u32 2147483647, %v13637_v20  ;;  %v17831_v10 = vmov 0  ;;  %v14215_v31 = vsel %vm8113_vm4, 0, %v8112_v27 }
 0x4aa   : > { %v5231_v56 = vshll.u32 %v17769_v44, %v5216_v17  ;;  %v5232_v60 = vshrl.u32 %v17770_v13, %v5217_v22  ;;  %v14221_v23 = vadd.f32 %v13885_v46, %v13656_v61  ;;  %vm17203_vm13 = vcmp.lt.s32.totalorder %v13680_v55, 0  ;;  %v14245_v53 = vpop.f32.mrb[19].mxu0 }
 0x4ab   : > { %vm14210_vm1 = vcmp.le.f32.partialorder %v17830_v6, 0.7853982  ;;  %v14224_v8 = vsub.s32 %v5470_v58, %v5473_v5  ;;  %vm5234_vm0 = vcmp.lt.s32.totalorder %v5215_v38, 1  ;;  %vm5236_vm11 = vcmp.lt.s32.totalorder %v5215_v38, 3  ;;  %v14226_v25 = vpop.eup %8805 }
 0x4ac   : > { %v17832_v10 = vsel %vm14210_vm1, 4294967295, %v17831_v10  ;;  %17834 = vst [vmem:[#allocation65_spill] sm:$0xff] %v14221_v23  ;;  %vm5237_vm12 = vcmp.lt.s32.totalorder %v5215_v38, 4  ;;  %17835 = vst [vmem:[#allocation63_spill] sm:$0xff] %v14226_v25  ;;  %v5233_v28 = vor.u32 %v5232_v60, %v5231_v56  ;;  %v5242_v49 = vsel %vm5234_vm0, %v5221_v29, %v5224_v2 }
 0x4ad   : > { %17833 = vst [vmem:[#allocation5_spill] sm:$0xff] %v17832_v10  ;;  %v5239_v27 = vsel %vm5237_vm12, %v5227_v40, 2102212464  ;;  %v5243_v17 = vsel %vm5237_vm12, %v5230_v4, 920167782  ;;  %v5476_v24 = vsub.s32 0, %v14224_v8  ;;  %v5218_v47 = vshrl.u32 %v17387_v19, %v5217_v22 }
 0x4ae   : > { %vm5235_vm4 = vcmp.lt.s32.totalorder %v5215_v38, 2  ;;  %v5244_v61 = vsel %vm5236_vm11, %v5227_v40, %v5243_v17  ;;  %v5174_v5 = vsub.s32 4294967266, %v14215_v31  ;;  %v5246_v63 = vsel %vm5234_vm0, %v5224_v2, %v5227_v40 }
 0x4af   : > { %v5245_v58 = vsel %vm5235_vm4, %v5242_v49, %v5244_v61  ;;  %v5247_v42 = vsel %vm5237_vm12, %v5233_v28, 1326507024  ;;  %v17836_v36 = vand.u32 2147483647, %v13680_v55  ;;  %v17837_v6 = vmov 0 }
 0x4b0   : > { %v8123_v56 = vmin.u32 %v5476_v24, %v14224_v8  ;;  %v5238_v22 = vsel %vm5234_vm0, %v5218_v47, %v5221_v29  ;;  %v5240_v60 = vsel %vm5236_vm11, %v5224_v2, %v5239_v27  ;;  %v5248_v17 = vsel %vm5236_vm11, %v5230_v4, %v5247_v42 }
 0x4b1   : > { %vm14237_vm5 = vcmp.le.f32.partialorder %v17836_v36, 0.7853982  ;;  %v5385_v49 = vor.u32 4788187, %v5384_v11  ;;  %v5249_v40 = vsel %vm5235_vm4, %v5246_v63, %v5248_v17  ;;  %v5379_v36 = vshll.u32 %v13999_v39, %v14148_v34 }
 0x4b2   : > { %v17838_v6 = vsel %vm14237_vm5, 4294967295, %v17837_v6  ;;  %v14248_v28 = vmul.u32.u64.low %v5250_v48, %v5245_v58  ;;  %v14249_v61 = vmul.u32.u64.high %v5250_v48, %v5245_v58, %v14248_v28  ;;  %v5170_v24 = vsub.s32 32, %v14215_v31 }
 0x4b3   : > { %17839 = vst [vmem:[#allocation35_spill] sm:$0xff] %v17838_v6  ;;  %v14255_v0 = vmul.u32.u64.low %v5250_v48, %v5249_v40  ;;  %v14256_v29 = vmul.u32.u64.high %v5250_v48, %v5249_v40, %v14255_v0  ;;  %8807 = vcosq.f32 %v14181_v33  ;;  %v5175_v4 = vadd.s32 127, %v5174_v5 }
 0x4b4   : > { %v5241_v2 = vsel %vm5235_vm4, %v5238_v22, %v5240_v60  ;;  %v5725_v11 = vand.u32 2139095040, %v14221_v23  ;;  %v5082_v27 = vsel %vm14210_vm1, %v13637_v20, %v14187_v30  ;;  %v5381_v47 = vor.u32 %v5380_v9, %v5379_v36 }
 0x4b5   : > { %v5154_v39 = vadd.s32 %v14039_v35, %v14048_v52  ;;  %v5478_v34 = vclz %v8123_v56  ;;  %v17840_v0 = vxor.u32 2147483648, %v14168_v54  ;;  %v5386_v38 = vand.u32 2147483647, %v5385_v49 }
 0x4b6   : > { %v5260_v58 = vadd.s32 1, %v14249_v61  ;;  %v5726_v63 = vshrl.u32 %v5725_v11, 23  ;;  %v5257_v22 = vmul.u32 %v5250_v48, %v5241_v2  ;;  %vm5259_vm0 = vc.u32 %v14256_v29, %v14248_v28 }
 0x4b7   : > { %v4871_v5 = vsel %vm17203_vm13, %v17840_v0, %v14168_v54  ;;  %v5172_v42 = vshrl.u32 %v5154_v39, %v5170_v24  ;;  %v14277_v30 = vadd.f32 %v13885_v46, %v13691_v45  ;;  %v5176_v35 = vshll.u32 %v5175_v4, 23 }
 0x4b8   : > { %v5261_v52 = vsel %vm5259_vm0, %v5260_v58, %v14249_v61  ;;  %v17187_v9 = vand.u32 2147483647, %v14221_v23  ;;  %v8134_v56 = vadd.s32 4294967169, %v5726_v63  ;;  %v5388_v54 = vcvt.s32.f32 %v5381_v47 }
 0x4b9   : > { %v5171_v60 = vshll.u32 %v14118_v16, %v14215_v31  ;;  %v8124_v17 = vadd.s32 4294967294, %v5478_v34  ;;  %v5262_v49 = vadd.s32 %v5261_v52, %v5257_v22  ;;  %v14284_v48 = vshrl.u32 %v13871_v62, 5 }
 0x4ba   : > { %8809 = vsinq.f32 %v14181_v33  ;;  %v4874_v45 = vsel %vm14237_vm5, %v13680_v55, %v4871_v5  ;;  %v5732_v40 = vadd.s32 1, %v8134_v56  ;;  %v5389_v61 = vmul.f32 %v5388_v54, %v5386_v38 }
 0x4bb   : > { %v5173_v36 = vor.u32 %v5172_v42, %v5171_v60  ;;  %v5263_v24 = vadd.s32 536870912, %v5262_v49  ;;  %v5517_v4 = vand.u32 2139095040, %v14277_v30  ;;  %8811 = vcosq.f32 %v5082_v27 }
 0x4bc   : > { %v5177_v2 = vor.u32 4788187, %v5176_v35  ;;  %v5729_v31 = vand.u32 8388607, %v17187_v9  ;;  %vm5733_vm11 = vcmp.gt.s32.totalorder %v5732_v40, 0  ;;  %8813 = vsinq.f32 %v5082_v27 }
 0x4bd   : > { %vm8125_vm12 = vcmp.lt.s32.totalorder %v8124_v17, 0  ;;  %v14293_v16 = vshrl.u32 %v5263_v24, 30  ;;  %v5734_v33 = vsel %vm5733_vm11, %v5732_v40, 0  ;;  %v14295_v11 = vpop.eup %8807  ;;  %v14298_v47 = vand.u32 31, %v13871_v62 }
 0x4be   : > { %17842 = vst [vmem:[#allocation11_spill] sm:$0xff] %v14295_v11  ;;  %8815 = vcosq.f32 %v4874_v45  ;;  %vm17194_vm4 = vcmp.lt.s32.totalorder %v13722_v50, 0  ;;  %v5736_v39 = vand.u32 31, %v5734_v33  ;;  %v5390_v34 = vxor.u32 2147483648, %v5389_v61 }
 0x4bf   : > { %17841 = vst [vmem:[#allocation74_spill] sm:$0xff] %v14293_v16  ;;  %8817 = vsinq.f32 %v4874_v45  ;;  %v5180_v0 = vcvt.s32.f32 %v5173_v36  ;;  %v5518_v5 = vshrl.u32 %v5517_v4, 23  ;;  %v5178_v38 = vand.u32 2147483647, %v5177_v2 }
 0x4c0   : > { %v14301_v58 = vsel %vm8125_vm12, 0, %v8124_v17  ;;  %v5730_v27 = vor.u32 8388608, %v5729_v31  ;;  %v5737_v63 = vsub.s32 32, %v5736_v39  ;;  %v5265_v42 = vshll.u32 %v14293_v16, 30 }
 0x4c1   : > { %v14304_v22 = vshrl.u32 %v5734_v33, 5  ;;  %v5739_v62 = vshll.u32 %v17387_v19, %v5736_v39  ;;  %v5742_v35 = vshll.u32 %v17389_v43, %v5736_v39  ;;  %v5745_v54 = vshll.u32 %v17390_v37, %v5736_v39 }
 0x4c2   : > { %v5740_v52 = vshrl.u32 %v17389_v43, %v5737_v63  ;;  %v5743_v56 = vshrl.u32 %v17390_v37, %v5737_v63  ;;  %v5746_v60 = vshrl.u32 %v17395_v21, %v5737_v63  ;;  %v5748_v17 = vshll.u32 %v17395_v21, %v5736_v39 }
 0x4c3   : > { %v5749_v45 = vshrl.u32 %v17769_v44, %v5737_v63  ;;  %v5752_v40 = vshrl.u32 %v17770_v13, %v5737_v63  ;;  %v8126_v36 = vadd.s32 4294967169, %v5518_v5  ;;  %v5751_v33 = vshll.u32 %v17769_v44, %v5736_v39 }
 0x4c4   : > { %v14315_v24 = vpop.eup %8809  ;;  %v5741_v4 = vor.u32 %v5740_v52, %v5739_v62  ;;  %v5744_v2 = vor.u32 %v5743_v56, %v5742_v35  ;;  %v5747_v31 = vor.u32 %v5746_v60, %v5745_v54  ;;  %v5391_v9 = vsel %vm17194_vm4, %v5390_v34, %v5389_v61  ;;  %v8661_v52 = vld [vmem:[%s16921_s4 + $0x10] sm:$0xff]  }
 0x4c5   : > { %17843 = vst [vmem:[#allocation73_spill] sm:$0xff] %v14315_v24  ;;  %v14320_v16 = vsub.s32 %v5262_v49, %v5265_v42  ;;  %v5750_v25 = vor.u32 %v5749_v45, %v5748_v17  ;;  %v14324_v10 = vadd.f32 %v13885_v46, %v13755_v41  ;;  %v14326_v20 = vpop.eup %8811  ;;  %v17846_v5 = vand.u32 2147483647, %v13722_v50  ;;  %8317 = vmatprep.subr.bf16.mxu1 %v8661_v52 }
 0x4c6   : > { %17845 = vst [vmem:[#allocation14_spill] sm:$0xff] %v14326_v20  ;;  %v17847_v62 = vmov 0  ;;  %v14334_v35 = vmul.f32 %v5180_v0, %v5178_v38  ;;  %v5753_v39 = vor.u32 %v5752_v40, %v5751_v33  ;;  %vm5754_vm11 = vcmp.lt.s32.totalorder %v14304_v22, 1  ;;  %v14339_v61 = vpop.eup %8813  ;;  %8318 = vmatpush3.bf16.msra.mxu1 %v8661_v52 }
 0x4c7   : > { %17844 = vst [vmem:[#allocation24_spill] sm:$0xff] %v14324_v10  ;;  %vm14330_vm0 = vcmp.le.f32.partialorder %v17846_v5, 0.7853982  ;;  %v14337_v49 = vshll.u32 %v5730_v27, 8  ;;  %17850 = vst [vmem:[#allocation26_spill] sm:$0xff] %v14339_v61  ;;  %v5486_v41 = vsub.s32 4294967266, %v14301_v58  ;;  %v5762_v46 = vsel %vm5754_vm11, %v5741_v4, %v5744_v2 }
 0x4c8   : > { %v17848_v62 = vsel %vm14330_vm0, 4294967295, %v17847_v62  ;;  %vm5757_vm12 = vcmp.lt.s32.totalorder %v14304_v22, 4  ;;  %v5524_v34 = vadd.s32 1, %v8126_v36  ;;  %v14345_v42 = vpop.eup %8815  ;;  %v5738_v0 = vshrl.u32 %v17387_v19, %v5737_v63 }
 0x4c9   : > { %17849 = vst [vmem:[#allocation3_spill] sm:$0xff] %v17848_v62  ;;  %17851 = vst [vmem:[#allocation44_spill] sm:$0xff] %v14345_v42  ;;  %vm5756_vm4 = vcmp.lt.s32.totalorder %v14304_v22, 3  ;;  %v5759_v38 = vsel %vm5757_vm12, %v5747_v31, 2102212464  ;;  %v14356_v56 = vpop.eup %8817  ;;  %v5268_v54 = vsub.s32 0, %v14320_v16  ;;  %v5766_v63 = vsel %vm5754_vm11, %v5744_v2, %v5747_v31 }
 0x4ca   : > { %v5763_v27 = vsel %vm5757_vm12, %v5750_v25, 920167782  ;;  %17852 = vst [vmem:[#allocation23_spill] sm:$0xff] %v14356_v56  ;;  %vm5755_vm8 = vcmp.lt.s32.totalorder %v14304_v22, 2  ;;  %v5758_v17 = vsel %vm5754_vm11, %v5738_v0, %v5741_v4  ;;  %v5767_v40 = vsel %vm5757_vm12, %v5753_v39, 1326507024 }
 0x4cb   : > { %v5764_v60 = vsel %vm5756_vm4, %v5747_v31, %v5763_v27  ;;  %v17197_v36 = vand.u32 2147483647, %v14277_v30  ;;  %v5760_v33 = vsel %vm5756_vm4, %v5744_v2, %v5759_v38  ;;  %v5768_v5 = vsel %vm5756_vm4, %v5750_v25, %v5767_v40  ;;  %v8662_v39 = vld [vmem:[%s16921_s4 + $0x18] sm:$0xff]  }
 0x4cc   : > { %v5765_v45 = vsel %vm5755_vm8, %v5762_v46, %v5764_v60  ;;  %v5482_v31 = vsub.s32 32, %v14301_v58  ;;  %v5487_v4 = vadd.s32 127, %v5486_v41  ;;  %v5769_v46 = vsel %vm5755_vm8, %v5766_v63, %v5768_v5  ;;  %8319 = vmatprep.subr.bf16.mxu1 %v8662_v39 }
 0x4cd   : > { %v14370_v20 = vmul.u32.u64.low %v14337_v49, %v5765_v45  ;;  %v14371_v27 = vmul.u32.u64.high %v14337_v49, %v5765_v45, %v14370_v20  ;;  %vm5525_vm11 = vcmp.gt.s32.totalorder %v5524_v34, 0  ;;  %v5466_v25 = vadd.s32 %v14144_v18, %v14152_v59  ;;  %8320 = vmatpush3.bf16.msra.mxu1 %v8662_v39 }
 0x4ce   : > { %v8115_v2 = vmin.u32 %v5268_v54, %v14320_v16  ;;  %v5526_v0 = vsel %vm5525_vm11, %v5524_v34, 0  ;;  %v5829_v38 = vand.u32 2139095040, %v14324_v10  ;;  %v5761_v52 = vsel %vm5755_vm8, %v5758_v17, %v5760_v33  ;;  %v8663_v33 = vld [vmem:[%s16921_s4 + $0x20] sm:$0xff]  }
 0x4cf   : > { %v14387_v41 = vmul.u32.u64.low %v14337_v49, %v5769_v46  ;;  %v14388_v60 = vmul.u32.u64.high %v14337_v49, %v5769_v46, %v14387_v41  ;;  %v5528_v63 = vand.u32 31, %v5526_v0  ;;  %v14393_v45 = vsel %vm14330_vm0, %v13722_v50, %v5391_v9  ;;  %8321 = vmatprep.subr.bf16.mxu1 %v8663_v33 }
 0x4d0   : > { %v5483_v59 = vshll.u32 %v14224_v8, %v14301_v58  ;;  %v5780_v34 = vadd.s32 1, %v14371_v27  ;;  %v5484_v22 = vshrl.u32 %v5466_v25, %v5482_v31  ;;  %v5488_v54 = vshll.u32 %v5487_v4, 23 }
 0x4d1   : > { %v5521_v17 = vand.u32 8388607, %v17197_v36  ;;  %v5529_v40 = vsub.s32 32, %v5528_v63  ;;  %v5270_v9 = vclz %v8115_v2  ;;  %v5777_v5 = vmul.u32 %v14337_v49, %v5761_v52  ;;  %8322 = vmatpush3.bf16.msra.mxu1 %v8663_v33  ;;  %v8664_v36 = vld [vmem:[%s16921_s4 + $0x28] sm:$0xff]  }
 0x4d2   : > { %v14405_v46 = vshrl.u32 %v5526_v0, 5  ;;  %v5830_v41 = vshrl.u32 %v5829_v38, 23  ;;  %vm5779_vm8 = vc.u32 %v14388_v60, %v14370_v20  ;;  %v5531_v8 = vshll.u32 %v17387_v19, %v5528_v63  ;;  %8323 = vmatprep.subr.bf16.mxu1 %v8664_v36 }
 0x4d3   : > { %v5532_v58 = vshrl.u32 %v17389_v43, %v5529_v40  ;;  %v5534_v31 = vshll.u32 %v17389_v43, %v5528_v63  ;;  %v5781_v4 = vsel %vm5779_vm8, %v5780_v34, %v14371_v27  ;;  %v5535_v39 = vshrl.u32 %v17390_v37, %v5529_v40 }
 0x4d4   : > { %v5537_v25 = vshll.u32 %v17390_v37, %v5528_v63  ;;  %v5540_v49 = vshll.u32 %v17395_v21, %v5528_v63  ;;  %v5782_v2 = vadd.s32 %v5781_v4, %v5777_v5  ;;  %v5538_v38 = vshrl.u32 %v17395_v21, %v5529_v40 }
 0x4d5   : > { %v5533_v0 = vor.u32 %v5532_v58, %v5531_v8  ;;  %v5541_v52 = vshrl.u32 %v17769_v44, %v5529_v40  ;;  %v5522_v18 = vor.u32 8388608, %v5521_v17  ;;  %v5536_v62 = vor.u32 %v5535_v39, %v5534_v31  ;;  %8324 = vmatpush3.bf16.msra.mxu1 %v8664_v36 }
 0x4d6   : > { %v5543_v27 = vshll.u32 %v17769_v44, %v5528_v63  ;;  %v5544_v34 = vshrl.u32 %v17770_v13, %v5529_v40  ;;  %v5489_v50 = vor.u32 4788187, %v5488_v54  ;;  %v5783_v61 = vadd.s32 536870912, %v5782_v2  ;;  %v8665_v54 = vld [vmem:[%s16921_s4 + $0x30] sm:$0xff]  }
 0x4d7   : > { %v5539_v42 = vor.u32 %v5538_v38, %v5537_v25  ;;  %v5542_v33 = vor.u32 %v5541_v52, %v5540_v49  ;;  %v8116_v5 = vadd.s32 4294967294, %v5270_v9  ;;  %vm5546_vm4 = vcmp.lt.s32.totalorder %v14405_v46, 1  ;;  %8325 = vmatprep.subr.bf16.mxu1 %v8665_v54  ;;  %v14445_v52 = vpop.f32.mrb[20].mxu0 }
 0x4d8   : > { %v5545_v8 = vor.u32 %v5544_v34, %v5543_v27  ;;  %v8138_v58 = vadd.s32 4294967169, %v5830_v41  ;;  %vm17215_vm12 = vcmp.lt.s32.totalorder %v13889_v14, 0  ;;  %v14425_v4 = vshrl.u32 %v5783_v61, 30 }
 0x4d9   : > { %v5530_v17 = vshrl.u32 %v17387_v19, %v5529_v40  ;;  %vm5549_vm11 = vcmp.lt.s32.totalorder %v14405_v46, 4  ;;  %v5554_v63 = vsel %vm5546_vm4, %v5533_v0, %v5536_v62  ;;  %vm5547_vm8 = vcmp.lt.s32.totalorder %v14405_v46, 2  ;;  %8326 = vmatpush3.bf16.msra.mxu1 %v8665_v54 }
 0x4da   : > { %17853 = vst [vmem:[#allocation33_spill] sm:$0xff] %v14425_v4  ;;  %vm5548_vm13 = vcmp.lt.s32.totalorder %v14405_v46, 3  ;;  %v5555_v36 = vsel %vm5549_vm11, %v5542_v33, 920167782  ;;  %v5558_v61 = vsel %vm5546_vm4, %v5536_v62, %v5539_v42  ;;  %v5785_v9 = vshll.u32 %v14425_v4, 30 }
 0x4db   : > { %v5551_v40 = vsel %vm5549_vm11, %v5539_v42, 2102212464  ;;  %v5556_v41 = vsel %vm5548_vm13, %v5539_v42, %v5555_v36  ;;  %v5559_v31 = vsel %vm5549_vm11, %v5545_v8, 1326507024  ;;  %v5485_v39 = vor.u32 %v5484_v22, %v5483_v59 }
 0x4dc   : > { %v5557_v25 = vsel %vm5547_vm8, %v5554_v63, %v5556_v41  ;;  %v5560_v49 = vsel %vm5548_vm13, %v5542_v33, %v5559_v31  ;;  %v5562_v38 = vshll.u32 %v5522_v18, 8  ;;  %vm8117_vm7 = vcmp.lt.s32.totalorder %v8116_v5, 0  ;;  %v14458_v18 = vpop.f32.mrb[21].mxu0  ;;  %v14484_v41 = vld [vmem:[%s16919_s2 + $0x1] ss:$0 sm:$0xff] }
 0x4dd   : > { %v14447_v27 = vsub.s32 %v5782_v2, %v5785_v9  ;;  %v5550_v34 = vsel %vm5546_vm4, %v5530_v17, %v5533_v0  ;;  %v5561_v42 = vsel %vm5547_vm8, %v5558_v61, %v5560_v49  ;;  %v5552_v59 = vsel %vm5548_vm13, %v5536_v62, %v5551_v40 }
 0x4de   : > { %v14455_v22 = vmul.u32.u64.low %v5562_v38, %v5561_v42  ;;  %v14456_v8 = vmul.u32.u64.high %v5562_v38, %v5561_v42, %v14455_v22  ;;  %v5836_v33 = vadd.s32 1, %v8138_v58  ;;  %v5490_v63 = vand.u32 2147483647, %v5489_v50 }
 0x4df   : > { %v5788_v54 = vsub.s32 0, %v14447_v27  ;;  %v14461_v2 = vmul.u32.u64.low %v5562_v38, %v5557_v25  ;;  %v14462_v36 = vmul.u32.u64.high %v5562_v38, %v5557_v25, %v14461_v2  ;;  %8819 = vcosq.f32 %v14393_v45 }
 0x4e0   : > { %v14466_v0 = vsel %vm8117_vm7, 0, %v8116_v5  ;;  %v17205_v17 = vand.u32 2147483647, %v14324_v10  ;;  %vm5837_vm13 = vcmp.gt.s32.totalorder %v5836_v33, 0  ;;  %v5492_v62 = vcvt.s32.f32 %v5485_v39 }
 0x4e1   : > { %v8135_v61 = vmin.u32 %v5788_v54, %v14447_v27  ;;  %v5553_v58 = vsel %vm5547_vm8, %v5550_v34, %v5552_v59  ;;  %v5838_v50 = vsel %vm5837_vm13, %v5836_v33, 0  ;;  %v17854_v9 = vxor.u32 2147483648, %v14334_v35 }
 0x4e2   : > { %vm5571_vm7 = vc.u32 %v14456_v8, %v14461_v2  ;;  %v5840_v5 = vand.u32 31, %v5838_v50  ;;  %v14488_v46 = vadd.f32 %v14484_v41, %v13832_v51  ;;  %v14490_v31 = vmul.f32 %v5492_v62, %v5490_v63 }
 0x4e3   : > { %v14477_v40 = vsel %vm17215_vm12, %v17854_v9, %v14334_v35  ;;  %v5278_v39 = vsub.s32 4294967266, %v14466_v0  ;;  %v5790_v25 = vclz %v8135_v61  ;;  %v5572_v35 = vadd.s32 1, %v14462_v36 }
 0x4e4   : > { %17855 = vst [vmem:[#allocation4_spill] sm:$0xff] %v14488_v46  ;;  %v5569_v49 = vmul.u32 %v5562_v38, %v5553_v58  ;;  %v5833_v34 = vand.u32 8388607, %v17205_v17  ;;  %v14496_v42 = vshrl.u32 %v5838_v50, 5  ;;  %v5841_v59 = vsub.s32 32, %v5840_v5 }
 0x4e5   : > { %v8136_v22 = vadd.s32 4294967294, %v5790_v25  ;;  %v5573_v33 = vsel %vm5571_vm7, %v5572_v35, %v14462_v36  ;;  %v5843_v51 = vshll.u32 %v17387_v19, %v5840_v5  ;;  %v5846_v63 = vshll.u32 %v17389_v43, %v5840_v5 }
 0x4e6   : > { %v5574_v54 = vadd.s32 %v5573_v33, %v5569_v49  ;;  %v5844_v62 = vshrl.u32 %v17389_v43, %v5841_v59  ;;  %v5847_v61 = vshrl.u32 %v17390_v37, %v5841_v59  ;;  %v5849_v38 = vshll.u32 %v17390_v37, %v5840_v5 }
 0x4e7   : > { %vm8137_vm4 = vcmp.lt.s32.totalorder %v8136_v22, 0  ;;  %v5850_v58 = vshrl.u32 %v17395_v21, %v5841_v59  ;;  %v5852_v50 = vshll.u32 %v17395_v21, %v5840_v5  ;;  %v5853_v9 = vshrl.u32 %v17769_v44, %v5841_v59 }
 0x4e8   : > { %v5575_v25 = vadd.s32 536870912, %v5574_v54  ;;  %v5845_v36 = vor.u32 %v5844_v62, %v5843_v51  ;;  %v5848_v35 = vor.u32 %v5847_v61, %v5846_v63  ;;  %v5856_v17 = vshrl.u32 %v17770_v13, %v5841_v59 }
 0x4e9   : > { %v5494_v49 = vxor.u32 2147483648, %v14490_v31  ;;  %v5258_v33 = vadd.s32 %v14248_v28, %v14256_v29  ;;  %v5274_v4 = vsub.s32 32, %v14466_v0  ;;  %v5834_v56 = vor.u32 8388608, %v5833_v34  ;;  %v14512_v11 = vpop.eup %8819 }
 0x4ea   : > { %17856 = vst [vmem:[#allocation20_spill] sm:$0xff] %v14512_v11  ;;  %v14514_v24 = vshrl.u32 %v5575_v25, 30  ;;  %v5851_v6 = vor.u32 %v5850_v58, %v5849_v38  ;;  %v5854_v55 = vor.u32 %v5853_v9, %v5852_v50  ;;  %v5855_v15 = vshll.u32 %v17769_v44, %v5840_v5 }
 0x4eb   : > { %v5275_v51 = vshll.u32 %v14320_v16, %v14466_v0  ;;  %v5279_v63 = vadd.s32 127, %v5278_v39  ;;  %v14520_v62 = vsel %vm8137_vm4, 0, %v8136_v22  ;;  %vm5858_vm11 = vcmp.lt.s32.totalorder %v14496_v42, 1 }
 0x4ec   : > { %17857 = vst [vmem:[#allocation29_spill] sm:$0xff] %v14514_v24  ;;  %v17858_v28 = vand.u32 2147483647, %v13889_v14  ;;  %v17859_v29 = vmov 0  ;;  %v5577_v34 = vshll.u32 %v14514_v24, 30  ;;  %v5857_v61 = vor.u32 %v5856_v17, %v5855_v15 }
 0x4ed   : > { %vm5861_vm13 = vcmp.lt.s32.totalorder %v14496_v42, 4  ;;  %v5866_v16 = vsel %vm5858_vm11, %v5845_v36, %v5848_v35  ;;  %vm17225_vm7 = vcmp.lt.s32.totalorder %v13962_v32, 0  ;;  %vm5860_vm4 = vcmp.lt.s32.totalorder %v14496_v42, 3 }
 0x4ee   : > { %vm14525_vm8 = vcmp.le.f32.partialorder %v17858_v28, 0.7853982  ;;  %v5867_v0 = vsel %vm5861_vm13, %v5854_v55, 920167782  ;;  %v5874_v5 = vshll.u32 %v5834_v56, 8  ;;  %v5621_v39 = vand.u32 2139095040, %v14488_v46 }
 0x4ef   : > { %v17860_v29 = vsel %vm14525_vm8, 4294967295, %v17859_v29  ;;  %v14538_v22 = vsub.s32 %v5574_v54, %v5577_v34  ;;  %vm5859_vm12 = vcmp.lt.s32.totalorder %v14496_v42, 2  ;;  %v5863_v15 = vsel %vm5861_vm13, %v5851_v6, 2102212464 }
 0x4f0   : > { %17861 = vst [vmem:[#allocation32_spill] sm:$0xff] %v17860_v29  ;;  %v5868_v17 = vsel %vm5860_vm4, %v5851_v6, %v5867_v0  ;;  %v5798_v38 = vsub.s32 4294967266, %v14520_v62  ;;  %v5842_v58 = vshrl.u32 %v17387_v19, %v5841_v59  ;;  %v5870_v56 = vsel %vm5858_vm11, %v5848_v35, %v5851_v6  ;;  %v14564_v6 = vpop.f32.mrb[22].mxu0 }
 0x4f1   : > { %v5869_v50 = vsel %vm5859_vm12, %v5866_v16, %v5868_v17  ;;  %v5580_v54 = vsub.s32 0, %v14538_v22  ;;  %v5871_v9 = vsel %vm5861_vm13, %v5857_v61, 1326507024  ;;  %v5864_v59 = vsel %vm5860_vm4, %v5848_v35, %v5863_v15 }
 0x4f2   : > { %v14554_v25 = vmul.u32.u64.low %v5874_v5, %v5869_v50  ;;  %v14555_v28 = vmul.u32.u64.high %v5874_v5, %v5869_v50, %v14554_v25  ;;  %v5862_v34 = vsel %vm5858_vm11, %v5842_v58, %v5845_v36  ;;  %v5872_v16 = vsel %vm5860_vm4, %v5854_v55, %v5871_v9 }
 0x4f3   : > { %v5622_v0 = vshrl.u32 %v5621_v39, 23  ;;  %v5276_v17 = vshrl.u32 %v5258_v33, %v5274_v4  ;;  %v8127_v24 = vmin.u32 %v5580_v54, %v14538_v22  ;;  %v5873_v61 = vsel %vm5859_vm12, %v5870_v56, %v5872_v16 }
 0x4f4   : > { %v17221_v50 = vand.u32 2147483647, %v14488_v46  ;;  %v5280_v11 = vshll.u32 %v5279_v63, 23  ;;  %v14570_v7 = vmul.u32.u64.low %v5874_v5, %v5873_v61  ;;  %v14571_v36 = vmul.u32.u64.high %v5874_v5, %v5873_v61, %v14570_v7 }
 0x4f5   : > { %v8130_v58 = vadd.s32 4294967169, %v5622_v0  ;;  %v5794_v35 = vsub.s32 32, %v14520_v62  ;;  %v5582_v15 = vclz %v8127_v24  ;;  %v5865_v55 = vsel %vm5859_vm12, %v5862_v34, %v5864_v59 }
 0x4f6   : > { %v5884_v4 = vadd.s32 1, %v14555_v28  ;;  %v14581_v33 = vsel %vm14525_vm8, %v13889_v14, %v14477_v40  ;;  %v5799_v39 = vadd.s32 127, %v5798_v38  ;;  %v14585_v7 = vadd.f32 %v14484_v41, %v14010_v3 }
 0x4f7   : > { %v5628_v63 = vadd.s32 1, %v8130_v58  ;;  %v5495_v24 = vsel %vm17225_vm7, %v5494_v49, %v14490_v31  ;;  %v14590_v42 = vor.u32 %v5276_v17, %v5275_v51  ;;  %v5778_v56 = vadd.s32 %v14370_v20, %v14388_v60 }
 0x4f8   : > { %17862 = vst [vmem:[#allocation8_spill] sm:$0xff] %v14585_v7  ;;  %v5625_v54 = vand.u32 8388607, %v17221_v50  ;;  %v8128_v40 = vadd.s32 4294967294, %v5582_v15  ;;  %v5881_v9 = vmul.u32 %v5874_v5, %v5865_v55  ;;  %vm5883_vm12 = vc.u32 %v14571_v36, %v14554_v25 }
 0x4f9   : > { %vm5629_vm11 = vcmp.gt.s32.totalorder %v5628_v63, 0  ;;  %v14598_v3 = vor.u32 4788187, %v5280_v11  ;;  %v5796_v38 = vshrl.u32 %v5778_v56, %v5794_v35  ;;  %v5885_v34 = vsel %vm5883_vm12, %v5884_v4, %v14555_v28 }
 0x4fa   : > { %v5630_v31 = vsel %vm5629_vm11, %v5628_v63, 0  ;;  %v14602_v49 = vsub.s32 32, %v14298_v47  ;;  %8821 = vsinq.f32 %v14393_v45  ;;  %v5800_v20 = vshll.u32 %v5799_v39, 23 }
 0x4fb   : > { %v5886_v60 = vadd.s32 %v5885_v34, %v5881_v9  ;;  %8823 = vcosq.f32 %v14581_v33  ;;  %v17863_v51 = vand.u32 2147483647, %v13962_v32  ;;  %v17864_v5 = vmov 0 }
 0x4fc   : > { %v5795_v11 = vshll.u32 %v14447_v27, %v14520_v62  ;;  %v5626_v28 = vor.u32 8388608, %v5625_v54  ;;  %vm8129_vm4 = vcmp.lt.s32.totalorder %v8128_v40, 0  ;;  %v5632_v16 = vand.u32 31, %v5630_v31 }
 0x4fd   : > { %vm14608_vm13 = vcmp.le.f32.partialorder %v17863_v51, 0.7853982  ;;  %v5887_v45 = vadd.s32 536870912, %v5886_v60  ;;  %v14624_v35 = vor.u32 4788187, %v5800_v20  ;;  %v5631_v62 = vshrl.u32 %v5630_v31, 5 }
 0x4fe   : > { %v17865_v5 = vsel %vm14608_vm13, 4294967295, %v17864_v5  ;;  %v14617_v59 = vsel %vm14608_vm13, %v13962_v32, %v5495_v24  ;;  %v14621_v61 = vor.u32 %v5796_v38, %v5795_v11  ;;  %v5633_v15 = vsub.s32 32, %v5632_v16 }
 0x4ff   : > { %17866 = vst [vmem:[#allocation21_spill] sm:$0xff] %v17865_v5  ;;  %v14626_v27 = vshrl.u32 %v5887_v45, 30  ;;  %v14628_v55 = vsel %vm8129_vm4, 0, %v8128_v40  ;;  %v5635_v4 = vshll.u32 %v17387_v19, %v5632_v16  ;;  %v14631_v39 = vshll.u32 %v5626_v28, 8 }
 0x500   : > { %v6141_v63 = vand.u32 2139095040, %v14585_v7  ;;  %v5636_v56 = vshrl.u32 %v17389_v43, %v5633_v15  ;;  %v5638_v54 = vshll.u32 %v17389_v43, %v5632_v16  ;;  %v5639_v9 = vshrl.u32 %v17390_v37, %v5633_v15 }
 0x501   : > { %17867 = vst [vmem:[#allocation46_spill] sm:$0xff] %v14626_v27  ;;  %v5889_v24 = vshll.u32 %v14626_v27, 30  ;;  %v5641_v38 = vshll.u32 %v17390_v37, %v5632_v16  ;;  %v5642_v34 = vshrl.u32 %v17395_v21, %v5633_v15  ;;  %v5644_v40 = vshll.u32 %v17395_v21, %v5632_v16 }
 0x502   : > { %v5645_v31 = vshrl.u32 %v17769_v44, %v5633_v15  ;;  %v5637_v51 = vor.u32 %v5636_v56, %v5635_v4  ;;  %v5640_v11 = vor.u32 %v5639_v9, %v5638_v54  ;;  %vm5650_vm12 = vcmp.lt.s32.totalorder %v5631_v62, 1 }
 0x503   : > { %v14642_v20 = vsub.s32 %v5886_v60, %v5889_v24  ;;  %v5643_v28 = vor.u32 %v5642_v34, %v5641_v38  ;;  %v5647_v50 = vshll.u32 %v17769_v44, %v5632_v16  ;;  %v5648_v17 = vshrl.u32 %v17770_v13, %v5633_v15 }
 0x504   : > { %v5646_v45 = vor.u32 %v5645_v31, %v5644_v40  ;;  %v14646_v0 = vpop.eup %8821  ;;  %vm5651_vm11 = vcmp.lt.s32.totalorder %v5631_v62, 2  ;;  %vm5653_vm4 = vcmp.lt.s32.totalorder %v5631_v62, 4  ;;  %v5658_v27 = vsel %vm5650_vm12, %v5637_v51, %v5640_v11 }
 0x505   : > { %17868 = vst [vmem:[#allocation18_spill] sm:$0xff] %v14646_v0  ;;  %v5892_v58 = vsub.s32 0, %v14642_v20  ;;  %v14650_v5 = vpop.eup %8823  ;;  %v5649_v60 = vor.u32 %v5648_v17, %v5647_v50  ;;  %vm5652_vm7 = vcmp.lt.s32.totalorder %v5631_v62, 3  ;;  %v6142_v24 = vshrl.u32 %v6141_v63, 23 }
 0x506   : > { %17869 = vst [vmem:[#allocation31_spill] sm:$0xff] %v14650_v5  ;;  %v5659_v4 = vsel %vm5653_vm4, %v5646_v45, 920167782  ;;  %v5655_v54 = vsel %vm5653_vm4, %v5643_v28, 2102212464  ;;  %v5662_v9 = vsel %vm5650_vm12, %v5640_v11, %v5643_v28  ;;  %v5590_v38 = vsub.s32 4294967266, %v14628_v55 }
 0x507   : > { %v8139_v56 = vmin.u32 %v5892_v58, %v14642_v20  ;;  %v5660_v16 = vsel %vm5652_vm7, %v5643_v28, %v5659_v4  ;;  %v5634_v34 = vshrl.u32 %v17387_v19, %v5633_v15  ;;  %v5663_v31 = vsel %vm5653_vm4, %v5649_v60, 1326507024  ;;  %v14664_v5 = vpop.f32.mrb[23].mxu0 }
 0x508   : > { %v5661_v40 = vsel %vm5651_vm11, %v5658_v27, %v5660_v16  ;;  %v5664_v0 = vsel %vm5652_vm7, %v5646_v45, %v5663_v31  ;;  %v5656_v63 = vsel %vm5652_vm7, %v5640_v11, %v5655_v54  ;;  %v8150_v28 = vadd.s32 4294967169, %v6142_v24 }
 0x509   : > { %v5894_v32 = vclz %v8139_v56  ;;  %v14658_v50 = vmul.u32.u64.low %v14631_v39, %v5661_v40  ;;  %v14659_v17 = vmul.u32.u64.high %v14631_v39, %v5661_v40, %v14658_v50  ;;  %v5654_v58 = vsel %vm5650_vm12, %v5634_v34, %v5637_v51 }
 0x50a   : > { %v5665_v4 = vsel %vm5651_vm11, %v5662_v9, %v5664_v0  ;;  %v5802_v15 = vand.u32 2147483647, %v14624_v35  ;;  %v5586_v27 = vsub.s32 32, %v14628_v55  ;;  %v5804_v56 = vcvt.s32.f32 %v14621_v61 }
 0x50b   : > { %v14669_v60 = vmul.u32.u64.low %v14631_v39, %v5665_v4  ;;  %v14670_v45 = vmul.u32.u64.high %v14631_v39, %v5665_v4, %v14669_v60  ;;  %v5570_v16 = vadd.s32 %v14461_v2, %v14456_v8  ;;  %v5591_v51 = vadd.s32 127, %v5590_v38 }
 0x50c   : > { %v6148_v11 = vadd.s32 1, %v8150_v28  ;;  %v8140_v54 = vadd.s32 4294967294, %v5894_v32  ;;  %v5657_v0 = vsel %vm5651_vm11, %v5654_v58, %v5656_v63  ;;  %v5676_v24 = vadd.s32 1, %v14659_v17  ;;  %v8666_v63 = vld [vmem:[%s16921_s4 + $0x38] sm:$0xff]  }
 0x50d   : > { %v17870_v35 = vand.u32 2147483647, %v14585_v7  ;;  %v14681_v34 = vshll.u32 %v17395_v21, %v14298_v47  ;;  %8825 = vsinq.f32 %v14581_v33  ;;  %v17871_v61 = vand.u32 2147483647, %v14598_v3  ;;  %8327 = vmatprep.subr.bf16.mxu1 %v8666_v63 }
 0x50e   : > { %v17872_v8 = vcvt.s32.f32 %v14590_v42  ;;  %vm6149_vm7 = vcmp.gt.s32.totalorder %v6148_v11, 0  ;;  %v14692_v32 = vshrl.u32 %v17769_v44, %v14602_v49  ;;  %8827 = vcosq.f32 %v14617_v59  ;;  %8328 = vmatpush3.bf16.msra.mxu1 %v8666_v63 }
 0x50f   : > { %v6145_v9 = vand.u32 8388607, %v17870_v35  ;;  %v14695_v62 = vmul.f32 %v5804_v56, %v5802_v15  ;;  %v5588_v38 = vshrl.u32 %v5570_v16, %v5586_v27  ;;  %v5592_v40 = vshll.u32 %v5591_v51, 23 }
 0x510   : > { %v14688_v2 = vmul.f32 %v17872_v8, %v17871_v61  ;;  %v5673_v31 = vmul.u32 %v14631_v39, %v5657_v0  ;;  %vm5675_vm12 = vc.u32 %v14670_v45, %v14658_v50  ;;  %v6150_v33 = vsel %vm6149_vm7, %v6148_v11, 0 }
 0x511   : > { %v5587_v42 = vshll.u32 %v14538_v22, %v14628_v55  ;;  %vm8141_vm11 = vcmp.lt.s32.totalorder %v8140_v54, 0  ;;  %v5677_v3 = vsel %vm5675_vm12, %v5676_v24, %v14659_v17  ;;  %v6146_v58 = vor.u32 8388608, %v6145_v9 }
 0x512   : > { %8829 = vsinq.f32 %v14617_v59  ;;  %v5678_v4 = vadd.s32 %v5677_v3, %v5673_v31  ;;  %v6152_v28 = vand.u32 31, %v6150_v33  ;;  %v14710_v27 = vadd.f32 %v14484_v41, %v14043_v12 }
 0x513   : > { %v14706_v39 = vor.u32 %v5588_v38, %v5587_v42  ;;  %v14714_v22 = vadd.f32 %v14484_v41, %v14157_v1  ;;  %v14716_v55 = vor.u32 4788187, %v5592_v40  ;;  %v14718_v17 = vsel %vm8141_vm11, 0, %v8140_v54 }
 0x514   : > { %17873 = vst [vmem:[#allocation13_spill] sm:$0xff] %v14710_v27  ;;  %v5679_v59 = vadd.s32 536870912, %v5678_v4  ;;  %v6153_v60 = vsub.s32 32, %v6152_v28  ;;  %v6151_v56 = vshrl.u32 %v6150_v33, 5  ;;  %v6155_v16 = vshll.u32 %v17387_v19, %v6152_v28 }
 0x515   : > { %17874 = vst [vmem:[#allocation10_spill] sm:$0xff] %v14714_v22  ;;  %v6158_v51 = vshll.u32 %v17389_v43, %v6152_v28  ;;  %v14722_v11 = vshll.u32 %v6146_v58, 8  ;;  %v6161_v24 = vshll.u32 %v17390_v37, %v6152_v28  ;;  %vm17246_vm4 = vcmp.lt.s32.totalorder %v14080_v26, 0 }
 0x516   : > { %v14724_v0 = vshrl.u32 %v5679_v59, 30  ;;  %v6156_v12 = vshrl.u32 %v17389_v43, %v6153_v60  ;;  %v6159_v1 = vshrl.u32 %v17390_v37, %v6153_v60  ;;  %v6162_v54 = vshrl.u32 %v17395_v21, %v6153_v60 }
 0x517   : > { %v6164_v35 = vshll.u32 %v17395_v21, %v6152_v28  ;;  %v6165_v9 = vshrl.u32 %v17769_v44, %v6153_v60  ;;  %v6167_v61 = vshll.u32 %v17769_v44, %v6152_v28  ;;  %v14734_v8 = vpop.eup %8825  ;;  %v6168_v33 = vshrl.u32 %v17770_v13, %v6153_v60 }
 0x518   : > { %17875 = vst [vmem:[#allocation51_spill] sm:$0xff] %v14724_v0  ;;  %17876 = vst [vmem:[#allocation6_spill] sm:$0xff] %v14734_v8  ;;  %v5681_v38 = vshll.u32 %v14724_v0, 30  ;;  %v6157_v40 = vor.u32 %v6156_v12, %v6155_v16  ;;  %v6160_v31 = vor.u32 %v6159_v1, %v6158_v51  ;;  %v14739_v42 = vpop.eup %8827  ;;  %v6163_v3 = vor.u32 %v6162_v54, %v6161_v24 }
 0x519   : > { %17877 = vst [vmem:[#allocation59_spill] sm:$0xff] %v14739_v42  ;;  %v6166_v58 = vor.u32 %v6165_v9, %v6164_v35  ;;  %vm6170_vm12 = vcmp.lt.s32.totalorder %v6151_v56, 1  ;;  %v5933_v59 = vand.u32 2139095040, %v14710_v27  ;;  %v6169_v28 = vor.u32 %v6168_v33, %v6167_v61 }
 0x51a   : > { %v14742_v15 = vsub.s32 %v5678_v4, %v5681_v38  ;;  %vm6171_vm11 = vcmp.lt.s32.totalorder %v6151_v56, 2  ;;  %vm6173_vm2 = vcmp.lt.s32.totalorder %v6151_v56, 4  ;;  %v17878_v16 = vand.u32 2147483647, %v14080_v26 }
 0x51b   : > { %v17879_v51 = vmov 0  ;;  %vm6172_vm15 = vcmp.lt.s32.totalorder %v6151_v56, 3  ;;  %v6175_v12 = vsel %vm6173_vm2, %v6163_v3, 2102212464  ;;  %v6178_v1 = vsel %vm6170_vm12, %v6157_v40, %v6160_v31 }
 0x51c   : > { %vm14749_vm6 = vcmp.le.f32.partialorder %v17878_v16, 0.7853982  ;;  %v6179_v4 = vsel %vm6173_vm2, %v6166_v58, 920167782  ;;  %v14756_v24 = vpop.eup %8829  ;;  %v17883_v54 = vand.u32 2147483647, %v14221_v23  ;;  %v6154_v61 = vshrl.u32 %v17387_v19, %v6153_v60 }
 0x51d   : > { %v17880_v51 = vsel %vm14749_vm6, 4294967295, %v17879_v51  ;;  %17882 = vst [vmem:[#allocation75_spill] sm:$0xff] %v14756_v24  ;;  %v17884_v35 = vmov 0  ;;  %v5684_v9 = vsub.s32 0, %v14742_v15  ;;  %v6180_v38 = vsel %vm6172_vm15, %v6163_v3, %v6179_v4 }
 0x51e   : > { %17881 = vst [vmem:[#allocation43_spill] sm:$0xff] %v17880_v51  ;;  %vm14760_vm7 = vcmp.le.f32.partialorder %v17883_v54, 0.7853982  ;;  %v6182_v33 = vsel %vm6170_vm12, %v6160_v31, %v6163_v3  ;;  %v5898_v16 = vsub.s32 32, %v14718_v17  ;;  %v6181_v0 = vsel %vm6171_vm11, %v6178_v1, %v6180_v38 }
 0x51f   : > { %v17885_v35 = vsel %vm14760_vm7, 4294967295, %v17884_v35  ;;  %v6183_v42 = vsel %vm6173_vm2, %v6169_v28, 1326507024  ;;  %v5934_v24 = vshrl.u32 %v5933_v59, 23  ;;  %v5902_v54 = vsub.s32 4294967266, %v14718_v17 }
 0x520   : > { %17886 = vst [vmem:[#allocation37_spill] sm:$0xff] %v17885_v35  ;;  %v6174_v8 = vsel %vm6170_vm12, %v6154_v61, %v6157_v40  ;;  %v6176_v29 = vsel %vm6172_vm15, %v6160_v31, %v6175_v12  ;;  %v6184_v60 = vsel %vm6172_vm15, %v6166_v58, %v6183_v42  ;;  %v8131_v4 = vmin.u32 %v5684_v9, %v14742_v15 }
 0x521   : > { %v6185_v3 = vsel %vm6171_vm11, %v6182_v33, %v6184_v60  ;;  %v14778_v14 = vmul.u32.u64.low %v14722_v11, %v6181_v0  ;;  %v14779_v57 = vmul.u32.u64.high %v14722_v11, %v6181_v0, %v14778_v14  ;;  %v17887_v63 = vxor.u32 2147483648, %v14688_v2 }
 0x522   : > { %v5882_v40 = vadd.s32 %v14554_v25, %v14571_v36  ;;  %v14790_v31 = vmul.u32.u64.low %v14722_v11, %v6185_v3  ;;  %v14791_v42 = vmul.u32.u64.high %v14722_v11, %v6185_v3, %v14790_v31  ;;  %v17888_v58 = vxor.u32 2147483648, %v14695_v62 }
 0x523   : > { %v5287_v59 = vsel %vm17246_vm4, %v17887_v63, %v14688_v2  ;;  %vm17889_vm15 = vcmp.lt.s32.totalorder %v14221_v23, 0  ;;  %v5594_v28 = vand.u32 2147483647, %v14716_v55  ;;  %v6177_v12 = vsel %vm6171_vm11, %v6174_v8, %v6176_v29 }
 0x524   : > { %v5807_v0 = vsel %vm17889_vm15, %v17888_v58, %v14695_v62  ;;  %v8142_v1 = vadd.s32 4294967169, %v5934_v24  ;;  %v5596_v2 = vcvt.s32.f32 %v14706_v39  ;;  %v5900_v9 = vshrl.u32 %v5882_v40, %v5898_v16 }
 0x525   : > { %v5903_v61 = vadd.s32 127, %v5902_v54  ;;  %v17243_v25 = vand.u32 2147483647, %v14710_v27  ;;  %v5686_v36 = vclz %v8131_v4  ;;  %v6196_v38 = vadd.s32 1, %v14779_v57 }
 0x526   : > { %v5940_v33 = vadd.s32 1, %v8142_v1  ;;  %v6245_v60 = vand.u32 2139095040, %v14714_v22  ;;  %v5290_v62 = vsel %vm14749_vm6, %v14080_v26, %v5287_v59  ;;  %v5899_v29 = vshll.u32 %v14642_v20, %v14718_v17 }
 0x527   : > { %v6193_v55 = vmul.u32 %v14722_v11, %v6177_v12  ;;  %vm6195_vm2 = vc.u32 %v14791_v42, %v14778_v14  ;;  %v14815_v39 = vsel %vm14760_vm7, %v14221_v23, %v5807_v0  ;;  %v14817_v56 = vmul.f32 %v5596_v2, %v5594_v28 }
 0x528   : > { %v6197_v8 = vsel %vm6195_vm2, %v6196_v38, %v14779_v57  ;;  %vm5941_vm12 = vcmp.gt.s32.totalorder %v5940_v33, 0  ;;  %v14820_v24 = vor.u32 %v5900_v9, %v5899_v29  ;;  %v5904_v16 = vshll.u32 %v5903_v61, 23 }
 0x529   : > { %v6198_v54 = vadd.s32 %v6197_v8, %v6193_v55  ;;  %v14824_v20 = vand.u32 8388607, %v17243_v25  ;;  %8831 = vcosq.f32 %v5290_v62  ;;  %v8132_v17 = vadd.s32 4294967294, %v5686_v36 }
 0x52a   : > { %v5942_v11 = vsel %vm5941_vm12, %v5940_v33, 0  ;;  %v6246_v4 = vshrl.u32 %v6245_v60, 23  ;;  %v14828_v3 = vshll.u32 %v17769_v44, %v14298_v47  ;;  %v14832_v57 = vshrl.u32 %v17770_v13, %v14602_v49 }
 0x52b   : > { %8833 = vsinq.f32 %v5290_v62  ;;  %v6199_v63 = vadd.s32 536870912, %v6198_v54  ;;  %v14836_v59 = vor.u32 %v14692_v32, %v14681_v34  ;;  %v5944_v31 = vand.u32 31, %v5942_v11 }
 0x52c   : > { %8835 = vcosq.f32 %v14815_v39  ;;  %v14840_v58 = vor.u32 4788187, %v5904_v16  ;;  %v5938_v12 = vor.u32 8388608, %v14824_v20  ;;  %vm8133_vm11 = vcmp.lt.s32.totalorder %v8132_v17, 0 }
 0x52d   : > { %v14843_v28 = vshrl.u32 %v6199_v63, 30  ;;  %v5945_v1 = vsub.s32 32, %v5944_v31  ;;  %v17247_v2 = vand.u32 2147483647, %v14714_v22  ;;  %v8154_v9 = vadd.s32 4294967169, %v6246_v4 }
 0x52e   : > { %v5943_v32 = vshrl.u32 %v5942_v11, 5  ;;  %v5947_v61 = vshll.u32 %v17387_v19, %v5944_v31  ;;  %v5950_v36 = vshll.u32 %v17389_v43, %v5944_v31  ;;  %v5953_v60 = vshll.u32 %v17390_v37, %v5944_v31 }
 0x52f   : > { %17890 = vst [vmem:[#allocation7_spill] sm:$0xff] %v14843_v28  ;;  %v6201_v34 = vshll.u32 %v14843_v28, 30  ;;  %v5948_v38 = vshrl.u32 %v17389_v43, %v5945_v1  ;;  %v5951_v33 = vshrl.u32 %v17390_v37, %v5945_v1  ;;  %v5954_v62 = vshrl.u32 %v17395_v21, %v5945_v1 }
 0x530   : > { %v5956_v55 = vshll.u32 %v17395_v21, %v5944_v31  ;;  %v5957_v8 = vshrl.u32 %v17769_v44, %v5945_v1  ;;  %v5959_v16 = vshll.u32 %v17769_v44, %v5944_v31  ;;  %v5960_v63 = vshrl.u32 %v17770_v13, %v5945_v1 }
 0x531   : > { %v14854_v29 = vsub.s32 %v6198_v54, %v6201_v34  ;;  %v5949_v20 = vor.u32 %v5948_v38, %v5947_v61  ;;  %v5952_v11 = vor.u32 %v5951_v33, %v5950_v36  ;;  %v5955_v4 = vor.u32 %v5954_v62, %v5953_v60 }
 0x532   : > { %v5906_v25 = vand.u32 2147483647, %v14840_v58  ;;  %v5958_v40 = vor.u32 %v5957_v8, %v5956_v55  ;;  %v6249_v54 = vand.u32 8388607, %v17247_v2  ;;  %v5689_v28 = vsel %vm8133_vm11, 0, %v8132_v17 }
 0x533   : > { %v6204_v0 = vsub.s32 0, %v14854_v29  ;;  %v14864_v34 = vpop.eup %8831  ;;  %v5961_v31 = vor.u32 %v5960_v63, %v5959_v16  ;;  %vm5962_vm2 = vcmp.lt.s32.totalorder %v5943_v32, 1  ;;  %v6252_v61 = vadd.s32 1, %v8154_v9 }
 0x534   : > { %17891 = vst [vmem:[#allocation34_spill] sm:$0xff] %v14864_v34  ;;  %vm5964_vm12 = vcmp.lt.s32.totalorder %v5943_v32, 3  ;;  %vm5965_vm4 = vcmp.lt.s32.totalorder %v5943_v32, 4  ;;  %v5970_v58 = vsel %vm5962_vm2, %v5949_v20, %v5952_v11  ;;  %v5974_v55 = vsel %vm5962_vm2, %v5952_v11, %v5955_v4 }
 0x535   : > { %v14868_v36 = vpop.eup %8833  ;;  %v8151_v38 = vmin.u32 %v6204_v0, %v14854_v29  ;;  %v5967_v60 = vsel %vm5965_vm4, %v5955_v4, 2102212464  ;;  %v5971_v62 = vsel %vm5965_vm4, %v5958_v40, 920167782  ;;  %v5975_v8 = vsel %vm5965_vm4, %v5961_v31, 1326507024 }
 0x536   : > { %17892 = vst [vmem:[#allocation39_spill] sm:$0xff] %v14868_v36  ;;  %v14872_v33 = vpop.eup %8835  ;;  %v5694_v2 = vsub.s32 4294967266, %v5689_v28  ;;  %v5946_v17 = vshrl.u32 %v17387_v19, %v5945_v1  ;;  %vm5963_vm11 = vcmp.lt.s32.totalorder %v5943_v32, 2  ;;  %v5972_v9 = vsel %vm5964_vm12, %v5955_v4, %v5971_v62 }
 0x537   : > { %17893 = vst [vmem:[#allocation38_spill] sm:$0xff] %v14872_v33  ;;  %v5690_v16 = vsub.s32 32, %v5689_v28  ;;  %v5973_v0 = vsel %vm5963_vm11, %v5970_v58, %v5972_v9  ;;  %v5976_v63 = vsel %vm5964_vm12, %v5958_v40, %v5975_v8  ;;  %v5978_v35 = vshll.u32 %v5938_v12, 8 }
 0x538   : > { %v5966_v23 = vsel %vm5962_vm2, %v5946_v17, %v5949_v20  ;;  %v5968_v33 = vsel %vm5964_vm12, %v5952_v11, %v5967_v60  ;;  %v5977_v34 = vsel %vm5963_vm11, %v5974_v55, %v5976_v63  ;;  %vm6253_vm15 = vcmp.gt.s32.totalorder %v6252_v61, 0 }
 0x539   : > { %v6206_v31 = vclz %v8151_v38  ;;  %v14882_v36 = vmul.u32.u64.low %v5978_v35, %v5977_v34  ;;  %v14883_v51 = vmul.u32.u64.high %v5978_v35, %v5977_v34, %v14882_v36  ;;  %v6254_v1 = vsel %vm6253_vm15, %v6252_v61, 0 }
 0x53a   : > { %v5695_v26 = vadd.s32 127, %v5694_v2  ;;  %v14885_v4 = vmul.u32.u64.low %v5978_v35, %v5973_v0  ;;  %v14886_v62 = vmul.u32.u64.high %v5978_v35, %v5973_v0, %v14885_v4  ;;  %v6250_v58 = vor.u32 8388608, %v6249_v54 }
 0x53b   : > { %8837 = vsinq.f32 %v14815_v39  ;;  %v5674_v40 = vadd.s32 %v14658_v50, %v14670_v45  ;;  %v5969_v12 = vsel %vm5963_vm11, %v5966_v23, %v5968_v33  ;;  %v6256_v20 = vand.u32 31, %v6254_v1 }
 0x53c   : > { %v17894_v11 = vxor.u32 2147483648, %v14817_v56  ;;  %vm17895_vm4 = vcmp.lt.s32.totalorder %v14277_v30, 0  ;;  %v17896_v2 = vcvt.s32.f32 %v14820_v24  ;;  %v5691_v54 = vshll.u32 %v14742_v15, %v5689_v28 }
 0x53d   : > { %v14905_v39 = vadd.f32 %v14484_v41, %v14245_v53  ;;  %v5692_v50 = vshrl.u32 %v5674_v40, %v5690_v16  ;;  %v8152_v45 = vadd.s32 4294967294, %v6206_v31  ;;  %vm5987_vm15 = vc.u32 %v14883_v51, %v14885_v4 }
 0x53e   : > { %v5599_v34 = vsel %vm17895_vm4, %v17894_v11, %v14817_v56  ;;  %v14900_v61 = vmul.f32 %v17896_v2, %v5906_v25  ;;  %v6257_v23 = vsub.s32 32, %v6256_v20  ;;  %v5696_v32 = vshll.u32 %v5695_v26, 23 }
 0x53f   : > { %v5985_v36 = vmul.u32 %v5978_v35, %v5969_v12  ;;  %v5988_v56 = vadd.s32 1, %v14886_v62  ;;  %v14910_v38 = vshll.u32 %v6250_v58, 8  ;;  %v6255_v25 = vshrl.u32 %v6254_v1, 5 }
 0x540   : > { %v6259_v24 = vshll.u32 %v17387_v19, %v6256_v20  ;;  %v6260_v15 = vshrl.u32 %v17389_v43, %v6257_v23  ;;  %v6263_v53 = vshrl.u32 %v17390_v37, %v6257_v23  ;;  %v6262_v33 = vshll.u32 %v17389_v43, %v6256_v20 }
 0x541   : > { %v5989_v28 = vsel %vm5987_vm15, %v5988_v56, %v14886_v62  ;;  %v6265_v60 = vshll.u32 %v17390_v37, %v6256_v20  ;;  %v6266_v26 = vshrl.u32 %v17395_v21, %v6257_v23  ;;  %v17897_v35 = vand.u32 2147483647, %v14277_v30 }
 0x542   : > { %v17898_v55 = vmov 0  ;;  %v5693_v8 = vor.u32 %v5692_v50, %v5691_v54  ;;  %vm8153_vm12 = vcmp.lt.s32.totalorder %v8152_v45, 0  ;;  %v5990_v17 = vadd.s32 %v5989_v28, %v5985_v36 }
 0x543   : > { %vm14921_vm2 = vcmp.le.f32.partialorder %v17897_v35, 0.7853982  ;;  %v6261_v9 = vor.u32 %v6260_v15, %v6259_v24  ;;  %v6264_v16 = vor.u32 %v6263_v53, %v6262_v33  ;;  %v6267_v0 = vor.u32 %v6266_v26, %v6265_v60 }
 0x544   : > { %v17899_v55 = vsel %vm14921_vm2, 4294967295, %v17898_v55  ;;  %v6268_v63 = vshll.u32 %v17395_v21, %v6256_v20  ;;  %v6269_v31 = vshrl.u32 %v17769_v44, %v6257_v23  ;;  %v5697_v1 = vor.u32 4788187, %v5696_v32 }
 0x545   : > { %v5991_v62 = vadd.s32 536870912, %v5990_v17  ;;  %v6271_v58 = vshll.u32 %v17769_v44, %v6256_v20  ;;  %v6272_v40 = vshrl.u32 %v17770_v13, %v6257_v23  ;;  %v14929_v12 = vsel %vm8153_vm12, 0, %v8152_v45  ;;  %v14932_v54 = vpop.eup %8837 }
 0x546   : > { %v6270_v11 = vor.u32 %v6269_v31, %v6268_v63  ;;  %vm6277_vm11 = vcmp.lt.s32.totalorder %v6255_v25, 4  ;;  %v6037_v2 = vand.u32 2139095040, %v14905_v39  ;;  %17900 = vst [vmem:[#allocation19_spill] sm:$0xff] %v14932_v54  ;;  %vm17263_vm4 = vcmp.lt.s32.totalorder %v14324_v10, 0 }
 0x547   : > { %v14935_v50 = vshrl.u32 %v5991_v62, 30  ;;  %v6273_v36 = vor.u32 %v6272_v40, %v6271_v58  ;;  %vm6274_vm15 = vcmp.lt.s32.totalorder %v6255_v25, 1  ;;  %v6279_v32 = vsel %vm6277_vm11, %v6267_v0, 2102212464 }
 0x548   : > { %v6258_v20 = vshrl.u32 %v17387_v19, %v6257_v23  ;;  %vm6276_vm7 = vcmp.lt.s32.totalorder %v6255_v25, 3  ;;  %v6282_v56 = vsel %vm6274_vm15, %v6261_v9, %v6264_v16  ;;  %v6283_v45 = vsel %vm6277_vm11, %v6270_v11, 920167782 }
 0x549   : > { %17901 = vst [vmem:[#allocation9_spill] sm:$0xff] %v14935_v50  ;;  %v5993_v24 = vshll.u32 %v14935_v50, 30  ;;  %vm6275_vm12 = vcmp.lt.s32.totalorder %v6255_v25, 2  ;;  %v6284_v15 = vsel %vm6276_vm7, %v6267_v0, %v6283_v45  ;;  %v6286_v53 = vsel %vm6274_vm15, %v6264_v16, %v6267_v0 }
 0x54a   : > { %v6278_v28 = vsel %vm6274_vm15, %v6258_v20, %v6261_v9  ;;  %v6280_v33 = vsel %vm6276_vm7, %v6264_v16, %v6279_v32  ;;  %v6285_v60 = vsel %vm6275_vm12, %v6282_v56, %v6284_v15  ;;  %v6287_v26 = vsel %vm6277_vm11, %v6273_v36, 1326507024 }
 0x54b   : > { %v14943_v35 = vsub.s32 %v5990_v17, %v5993_v24  ;;  %v6288_v63 = vsel %vm6276_vm7, %v6270_v11, %v6287_v26  ;;  %v14946_v23 = vmul.u32.u64.low %v14910_v38, %v6285_v60  ;;  %v14947_v31 = vmul.u32.u64.high %v14910_v38, %v6285_v60, %v14946_v23 }
 0x54c   : > { %v5602_v62 = vsel %vm14921_vm2, %v14277_v30, %v5599_v34  ;;  %v17902_v0 = vand.u32 2147483647, %v14324_v10  ;;  %v17903_v9 = vmov 0  ;;  %v5910_v16 = vxor.u32 2147483648, %v14900_v61 }
 0x54d   : > { %v6289_v17 = vsel %vm6275_vm12, %v6286_v53, %v6288_v63  ;;  %v6038_v58 = vshrl.u32 %v6037_v2, 23  ;;  %v5698_v40 = vand.u32 2147483647, %v5697_v1  ;;  %v5996_v11 = vsub.s32 0, %v14943_v35 }
 0x54e   : > { %vm14955_vm15 = vcmp.le.f32.partialorder %v17902_v0, 0.7853982  ;;  %v14963_v36 = vmul.u32.u64.low %v14910_v38, %v6289_v17  ;;  %v14964_v32 = vmul.u32.u64.high %v14910_v38, %v6289_v17, %v14963_v36  ;;  %v6210_v34 = vsub.s32 32, %v14929_v12 }
 0x54f   : > { %v17904_v9 = vsel %vm14955_vm15, 4294967295, %v17903_v9  ;;  %v6281_v20 = vsel %vm6275_vm12, %v6278_v28, %v6280_v33  ;;  %v17258_v56 = vand.u32 2147483647, %v14905_v39  ;;  %v8146_v45 = vadd.s32 4294967169, %v6038_v58 }
 0x550   : > { %17905 = vst [vmem:[#allocation2_spill] sm:$0xff] %v17904_v9  ;;  %v5700_v24 = vcvt.s32.f32 %v5693_v8  ;;  %v6214_v15 = vsub.s32 4294967266, %v14929_v12  ;;  %v8143_v53 = vmin.u32 %v5996_v11, %v14943_v35  ;;  %v6300_v1 = vadd.s32 1, %v14947_v31 }
 0x551   : > { %v5911_v2 = vsel %vm17263_vm4, %v5910_v16, %v14900_v61  ;;  %v6194_v60 = vadd.s32 %v14778_v14, %v14791_v42  ;;  %v6044_v26 = vadd.s32 1, %v8146_v45  ;;  %v14979_v25 = vadd.f32 %v14484_v41, %v14445_v52 }
 0x552   : > { %v14981_v28 = vmul.f32 %v5700_v24, %v5698_v40  ;;  %v5998_v8 = vclz %v8143_v53  ;;  %v6297_v33 = vmul.u32 %v14910_v38, %v6281_v20  ;;  %vm6299_vm7 = vc.u32 %v14964_v32, %v14946_v23 }
 0x553   : > { %17906 = vst [vmem:[#allocation76_spill] sm:$0xff] %v14979_v25  ;;  %v6212_v63 = vshrl.u32 %v6194_v60, %v6210_v34  ;;  %v6301_v0 = vsel %vm6299_vm7, %v6300_v1, %v14947_v31  ;;  %v6041_v61 = vand.u32 8388607, %v17258_v56  ;;  %vm6045_vm11 = vcmp.gt.s32.totalorder %v6044_v26, 0 }
 0x554   : > { %v6215_v14 = vadd.s32 127, %v6214_v15  ;;  %v8144_v42 = vadd.s32 4294967294, %v5998_v8  ;;  %v6302_v16 = vadd.s32 %v6301_v0, %v6297_v33  ;;  %v6046_v52 = vsel %vm6045_vm11, %v6044_v26, 0 }
 0x555   : > { %8839 = vcosq.f32 %v5602_v62  ;;  %v6211_v41 = vshll.u32 %v14854_v29, %v14929_v12  ;;  %v6048_v17 = vand.u32 31, %v6046_v52  ;;  %v6557_v38 = vand.u32 2139095040, %v14979_v25 }
 0x556   : > { %8841 = vsinq.f32 %v5602_v62  ;;  %v14995_v31 = vsel %vm14955_vm15, %v14324_v10, %v5911_v2  ;;  %vm8145_vm12 = vcmp.lt.s32.totalorder %v8144_v42, 0  ;;  %v6303_v58 = vadd.s32 536870912, %v6302_v16 }
 0x557   : > { %v14998_v11 = vor.u32 %v6212_v63, %v6211_v41  ;;  %v5986_v36 = vadd.s32 %v14885_v4, %v14883_v51  ;;  %v6049_v34 = vsub.s32 32, %v6048_v17  ;;  %v6216_v29 = vshll.u32 %v6215_v14, 23 }
 0x558   : > { %v15002_v12 = vsel %vm8145_vm12, 0, %v8144_v42  ;;  %v15004_v20 = vshrl.u32 %v6303_v58, 30  ;;  %v6042_v62 = vor.u32 8388608, %v6041_v61  ;;  %v6047_v45 = vshrl.u32 %v6046_v52, 5 }
 0x559   : > { %v6052_v24 = vshrl.u32 %v17389_v43, %v6049_v34  ;;  %v6055_v15 = vshrl.u32 %v17390_v37, %v6049_v34  ;;  %v6558_v53 = vshrl.u32 %v6557_v38, 23  ;;  %v6051_v2 = vshll.u32 %v17387_v19, %v6048_v17 }
 0x55a   : > { %17907 = vst [vmem:[#allocation77_spill] sm:$0xff] %v15004_v20  ;;  %v6305_v1 = vshll.u32 %v15004_v20, 30  ;;  %v6054_v60 = vshll.u32 %v17389_v43, %v6048_v17  ;;  %v6058_v51 = vshrl.u32 %v17395_v21, %v6049_v34  ;;  %v6006_v4 = vsub.s32 4294967266, %v15002_v12 }
 0x55b   : > { %v6057_v26 = vshll.u32 %v17390_v37, %v6048_v17  ;;  %v6060_v8 = vshll.u32 %v17395_v21, %v6048_v17  ;;  %v6061_v33 = vshrl.u32 %v17769_v44, %v6049_v34  ;;  %v15016_v63 = vor.u32 4788187, %v6216_v29 }
 0x55c   : > { %v15018_v0 = vsub.s32 %v6302_v16, %v6305_v1  ;;  %v6053_v61 = vor.u32 %v6052_v24, %v6051_v2  ;;  %v6056_v14 = vor.u32 %v6055_v15, %v6054_v60  ;;  %v6063_v41 = vshll.u32 %v17769_v44, %v6048_v17 }
 0x55d   : > { %v6059_v42 = vor.u32 %v6058_v51, %v6057_v26  ;;  %v6062_v52 = vor.u32 %v6061_v33, %v6060_v8  ;;  %v6064_v38 = vshrl.u32 %v17770_v13, %v6049_v34  ;;  %v6002_v58 = vsub.s32 32, %v15002_v12 }
 0x55e   : > { %v6308_v56 = vsub.s32 0, %v15018_v0  ;;  %v6082_v40 = vshll.u32 %v6042_v62, 8  ;;  %v6007_v29 = vadd.s32 127, %v6006_v4  ;;  %vm6066_vm7 = vcmp.lt.s32.totalorder %v6047_v45, 1 }
 0x55f   : > { %v15025_v50 = vpop.eup %8839  ;;  %v6065_v16 = vor.u32 %v6064_v38, %v6063_v41  ;;  %v8166_v24 = vadd.s32 4294967169, %v6558_v53  ;;  %vm6068_vm11 = vcmp.lt.s32.totalorder %v6047_v45, 3  ;;  %vm6069_vm12 = vcmp.lt.s32.totalorder %v6047_v45, 4 }
 0x560   : > { %17908 = vst [vmem:[#allocation78_spill] sm:$0xff] %v15025_v50  ;;  %v15027_v15 = vpop.eup %8841  ;;  %v8155_v1 = vmin.u32 %v6308_v56, %v15018_v0  ;;  %v6074_v17 = vsel %vm6066_vm7, %v6053_v61, %v6056_v14  ;;  %v6071_v2 = vsel %vm6069_vm12, %v6059_v42, 2102212464  ;;  %v6075_v60 = vsel %vm6069_vm12, %v6062_v52, 920167782 }
 0x561   : > { %17909 = vst [vmem:[#allocation79_spill] sm:$0xff] %v15027_v15  ;;  %v6078_v62 = vsel %vm6066_vm7, %v6056_v14, %v6059_v42  ;;  %v6079_v51 = vsel %vm6069_vm12, %v6065_v16, 1326507024  ;;  %v6004_v26 = vshrl.u32 %v5986_v36, %v6002_v58  ;;  %v6050_v8 = vshrl.u32 %v17387_v19, %v6049_v34 }
 0x562   : > { %vm6067_vm4 = vcmp.lt.s32.totalorder %v6047_v45, 2  ;;  %v6076_v4 = vsel %vm6068_vm11, %v6059_v42, %v6075_v60  ;;  %v6008_v53 = vshll.u32 %v6007_v29, 23  ;;  %v6080_v56 = vsel %vm6068_vm11, %v6062_v52, %v6079_v51 }
 0x563   : > { %v6077_v33 = vsel %vm6067_vm4, %v6074_v17, %v6076_v4  ;;  %v6564_v41 = vadd.s32 1, %v8166_v24  ;;  %v6310_v38 = vclz %v8155_v1  ;;  %v6070_v20 = vsel %vm6066_vm7, %v6050_v8, %v6053_v61 }
 0x564   : > { %v6072_v9 = vsel %vm6068_vm11, %v6056_v14, %v6071_v2  ;;  %v6081_v10 = vsel %vm6067_vm4, %v6078_v62, %v6080_v56  ;;  %v15042_v34 = vmul.u32.u64.low %v6082_v40, %v6077_v33  ;;  %v15043_v58 = vmul.u32.u64.high %v6082_v40, %v6077_v33, %v15042_v34 }
 0x565   : > { %v15039_v16 = vmul.u32.u64.low %v6082_v40, %v6081_v10  ;;  %v15040_v36 = vmul.u32.u64.high %v6082_v40, %v6081_v10, %v15039_v16  ;;  %8843 = vcosq.f32 %v14995_v31  ;;  %vm17272_vm12 = vcmp.lt.s32.totalorder %v14488_v46, 0 }
 0x566   : > { %v6003_v42 = vshll.u32 %v14943_v35, %v15002_v12  ;;  %vm6565_vm15 = vcmp.gt.s32.totalorder %v6564_v41, 0  ;;  %v6218_v61 = vand.u32 2147483647, %v15016_v63  ;;  %v6073_v14 = vsel %vm6067_vm4, %v6070_v20, %v6072_v9  ;;  %v15063_v35 = vld [vmem:[%s16919_s2 + $0x1] ss:$0 sm:$0xff] }
 0x567   : > { %v17910_v52 = vand.u32 2147483647, %v14979_v25  ;;  %v6566_v29 = vsel %vm6565_vm15, %v6564_v41, 0  ;;  %v17911_v24 = vxor.u32 2147483648, %v14981_v28  ;;  %v6220_v17 = vcvt.s32.f32 %v14998_v11 }
 0x568   : > { %v6005_v2 = vor.u32 %v6004_v26, %v6003_v42  ;;  %v15067_v9 = vadd.f32 %v15063_v35, %v14458_v18  ;;  %v6009_v12 = vor.u32 4788187, %v6008_v53  ;;  %v8156_v20 = vadd.s32 4294967294, %v6310_v38 }
 0x569   : > { %v6561_v10 = vand.u32 8388607, %v17910_v52  ;;  %v5703_v1 = vsel %vm17272_vm12, %v17911_v24, %v14981_v28  ;;  %vm6091_vm4 = vc.u32 %v15040_v36, %v15042_v34  ;;  %v6092_v45 = vadd.s32 1, %v15043_v58 }
 0x56a   : > { %17912 = vst [vmem:[#allocation80_spill] sm:$0xff] %v15067_v9  ;;  %8845 = vsinq.f32 %v14995_v31  ;;  %v17913_v28 = vand.u32 2147483647, %v14488_v46  ;;  %v17914_v11 = vmov 0  ;;  %v6089_v63 = vmul.u32 %v6082_v40, %v6073_v14 }
 0x56b   : > { %v6568_v60 = vand.u32 31, %v6566_v29  ;;  %v15084_v62 = vmul.f32 %v6220_v17, %v6218_v61  ;;  %v6093_v51 = vsel %vm6091_vm4, %v6092_v45, %v15043_v58  ;;  %v6562_v26 = vor.u32 8388608, %v6561_v10 }
 0x56c   : > { %vm15075_vm15 = vcmp.le.f32.partialorder %v17913_v28, 0.7853982  ;;  %v6012_v8 = vcvt.s32.f32 %v6005_v2  ;;  %v6094_v31 = vadd.s32 %v6093_v51, %v6089_v63  ;;  %v6349_v53 = vand.u32 2139095040, %v15067_v9 }
 0x56d   : > { %v17915_v11 = vsel %vm15075_vm15, 4294967295, %v17914_v11  ;;  %v15082_v18 = vsel %vm15075_vm15, %v14488_v46, %v5703_v1  ;;  %v6569_v4 = vsub.s32 32, %v6568_v60  ;;  %v6010_v33 = vand.u32 2147483647, %v6009_v12 }
 0x56e   : > { %17916 = vst [vmem:[#allocation81_spill] sm:$0xff] %v17915_v11  ;;  %vm8157_vm7 = vcmp.lt.s32.totalorder %v8156_v20, 0  ;;  %v15088_v56 = vshrl.u32 %v6566_v29, 5  ;;  %v6571_v40 = vshll.u32 %v17387_v19, %v6568_v60  ;;  %v6095_v41 = vadd.s32 536870912, %v6094_v31 }
 0x56f   : > { %v6574_v38 = vshll.u32 %v17389_v43, %v6568_v60  ;;  %v6577_v16 = vshll.u32 %v17390_v37, %v6568_v60  ;;  %v6580_v42 = vshll.u32 %v17395_v21, %v6568_v60  ;;  %v6572_v58 = vshrl.u32 %v17389_v43, %v6569_v4  ;;  %v15098_v10 = vpop.eup %8843 }
 0x570   : > { %v6575_v61 = vshrl.u32 %v17390_v37, %v6569_v4  ;;  %v6578_v14 = vshrl.u32 %v17395_v21, %v6569_v4  ;;  %v6581_v52 = vshrl.u32 %v17769_v44, %v6569_v4  ;;  %17917 = vst [vmem:[#allocation82_spill] sm:$0xff] %v15098_v10  ;;  %v15100_v29 = vshrl.u32 %v6095_v41, 30 }
 0x571   : > { %v6583_v24 = vshll.u32 %v17769_v44, %v6568_v60  ;;  %v6584_v1 = vshrl.u32 %v17770_v13, %v6569_v4  ;;  %v6350_v17 = vshrl.u32 %v6349_v53, 23  ;;  %v6573_v2 = vor.u32 %v6572_v58, %v6571_v40 }
 0x572   : > { %17918 = vst [vmem:[#allocation83_spill] sm:$0xff] %v15100_v29  ;;  %v6576_v12 = vor.u32 %v6575_v61, %v6574_v38  ;;  %v6579_v45 = vor.u32 %v6578_v14, %v6577_v16  ;;  %v6582_v28 = vor.u32 %v6581_v52, %v6580_v42  ;;  %v6222_v63 = vxor.u32 2147483648, %v15084_v62 }
 0x573   : > { %v6097_v51 = vshll.u32 %v15100_v29, 30  ;;  %v6585_v54 = vor.u32 %v6584_v1, %v6583_v24  ;;  %v17274_v11 = vand.u32 2147483647, %v15067_v9  ;;  %v15107_v46 = vmul.f32 %v6012_v8, %v6010_v33 }
 0x574   : > { %v15110_v41 = vsel %vm8157_vm7, 0, %v8156_v20  ;;  %vm6586_vm11 = vcmp.lt.s32.totalorder %v15088_v56, 1  ;;  %v6602_v60 = vshll.u32 %v6562_v26, 8  ;;  %v15113_v53 = vpop.eup %8845  ;;  %vm17280_vm4 = vcmp.lt.s32.totalorder %v14585_v7, 0 }
 0x575   : > { %17919 = vst [vmem:[#allocation84_spill] sm:$0xff] %v15113_v53  ;;  %v15116_v40 = vsub.s32 %v6094_v31, %v6097_v51  ;;  %vm6589_vm12 = vcmp.lt.s32.totalorder %v15088_v56, 4  ;;  %v6594_v38 = vsel %vm6586_vm11, %v6573_v2, %v6576_v12  ;;  %v8158_v16 = vadd.s32 4294967169, %v6350_v17 }
 0x576   : > { %vm6588_vm15 = vcmp.lt.s32.totalorder %v15088_v56, 3  ;;  %v6595_v8 = vsel %vm6589_vm12, %v6582_v28, 920167782  ;;  %v6598_v20 = vsel %vm6586_vm11, %v6576_v12, %v6579_v45  ;;  %v6599_v33 = vsel %vm6589_vm12, %v6585_v54, 1326507024 }
 0x577   : > { %v6100_v26 = vsub.s32 0, %v15116_v40  ;;  %vm6587_vm7 = vcmp.lt.s32.totalorder %v15088_v56, 2  ;;  %v6591_v42 = vsel %vm6589_vm12, %v6579_v45, 2102212464  ;;  %v6596_v31 = vsel %vm6588_vm15, %v6579_v45, %v6595_v8 }
 0x578   : > { %v6318_v58 = vsub.s32 4294967266, %v15110_v41  ;;  %v6570_v61 = vshrl.u32 %v17387_v19, %v6569_v4  ;;  %v6597_v14 = vsel %vm6587_vm7, %v6594_v38, %v6596_v31  ;;  %v6600_v52 = vsel %vm6588_vm15, %v6582_v28, %v6599_v33 }
 0x579   : > { %v6314_v54 = vsub.s32 32, %v15110_v41  ;;  %v8147_v24 = vmin.u32 %v6100_v26, %v15116_v40  ;;  %v6601_v1 = vsel %vm6587_vm7, %v6598_v20, %v6600_v52  ;;  %v6356_v17 = vadd.s32 1, %v8158_v16 }
 0x57a   : > { %v6590_v45 = vsel %vm6586_vm11, %v6570_v61, %v6573_v2  ;;  %v6592_v4 = vsel %vm6588_vm15, %v6576_v12, %v6591_v42  ;;  %v15142_v51 = vmul.u32.u64.low %v6602_v60, %v6601_v1  ;;  %v15143_v8 = vmul.u32.u64.high %v6602_v60, %v6601_v1, %v15142_v51 }
 0x57b   : > { %v6102_v38 = vclz %v8147_v24  ;;  %v15145_v31 = vmul.u32.u64.low %v6602_v60, %v6597_v14  ;;  %v15146_v28 = vmul.u32.u64.high %v6602_v60, %v6597_v14, %v15145_v31  ;;  %vm6357_vm12 = vcmp.gt.s32.totalorder %v6356_v17, 0 }
 0x57c   : > { %v6319_v33 = vadd.s32 127, %v6318_v58  ;;  %v6353_v20 = vand.u32 8388607, %v17274_v11  ;;  %v6358_v16 = vsel %vm6357_vm12, %v6356_v17, 0  ;;  %v15153_v2 = vadd.f32 %v15063_v35, %v14564_v6 }
 0x57d   : > { %v6298_v12 = vadd.s32 %v14946_v23, %v14964_v32  ;;  %v8148_v26 = vadd.s32 4294967294, %v6102_v38  ;;  %v6593_v42 = vsel %vm6587_vm7, %v6590_v45, %v6592_v4  ;;  %v6360_v61 = vand.u32 31, %v6358_v16 }
 0x57e   : > { %v15162_v58 = vsel %vm17280_vm4, %v6222_v63, %v15084_v62  ;;  %v6315_v52 = vshll.u32 %v15018_v0, %v15110_v41  ;;  %vm6611_vm15 = vc.u32 %v15143_v8, %v15145_v31  ;;  %v6090_v23 = vadd.s32 %v15042_v34, %v15040_v36 }
 0x57f   : > { %v6316_v6 = vshrl.u32 %v6298_v12, %v6314_v54  ;;  %v6612_v32 = vadd.s32 1, %v15146_v28  ;;  %v6361_v56 = vsub.s32 32, %v6360_v61  ;;  %v6320_v24 = vshll.u32 %v6319_v33, 23 }
 0x580   : > { %v6609_v1 = vmul.u32 %v6602_v60, %v6593_v42  ;;  %v6354_v17 = vor.u32 8388608, %v6353_v20  ;;  %v6661_v62 = vand.u32 2139095040, %v15153_v2  ;;  %vm8149_vm11 = vcmp.lt.s32.totalorder %v8148_v26, 0 }
 0x581   : > { %v6613_v63 = vsel %vm6611_vm15, %v6612_v32, %v15146_v28  ;;  %v6359_v45 = vshrl.u32 %v6358_v16, 5  ;;  %v6363_v0 = vshll.u32 %v17387_v19, %v6360_v61  ;;  %v6364_v54 = vshrl.u32 %v17389_v43, %v6361_v56 }
 0x582   : > { %v6614_v41 = vadd.s32 %v6613_v63, %v6609_v1  ;;  %v6366_v4 = vshll.u32 %v17389_v43, %v6360_v61  ;;  %v6367_v36 = vshrl.u32 %v17390_v37, %v6361_v56  ;;  %v6369_v34 = vshll.u32 %v17390_v37, %v6360_v61 }
 0x583   : > { %v6370_v60 = vshrl.u32 %v17395_v21, %v6361_v56  ;;  %v6372_v51 = vshll.u32 %v17395_v21, %v6360_v61  ;;  %v6373_v38 = vshrl.u32 %v17769_v44, %v6361_v56  ;;  %v6317_v33 = vor.u32 %v6316_v6, %v6315_v52 }
 0x584   : > { %v6321_v28 = vor.u32 4788187, %v6320_v24  ;;  %v6105_v20 = vsel %vm8149_vm11, 0, %v8148_v26  ;;  %v6615_v16 = vadd.s32 536870912, %v6614_v41  ;;  %v6365_v12 = vor.u32 %v6364_v54, %v6363_v0 }
 0x585   : > { %v6368_v42 = vor.u32 %v6367_v36, %v6366_v4  ;;  %v6371_v32 = vor.u32 %v6370_v60, %v6369_v34  ;;  %v6374_v1 = vor.u32 %v6373_v38, %v6372_v51  ;;  %v6375_v11 = vshll.u32 %v17769_v44, %v6360_v61 }
 0x586   : > { %v15182_v63 = vshrl.u32 %v6615_v16, 30  ;;  %v6376_v14 = vshrl.u32 %v17770_v13, %v6361_v56  ;;  %v6394_v29 = vshll.u32 %v6354_v17, 8  ;;  %v6106_v10 = vsub.s32 32, %v6105_v20 }
 0x587   : > { %v6110_v53 = vsub.s32 4294967266, %v6105_v20  ;;  %vm6381_vm7 = vcmp.lt.s32.totalorder %v6359_v45, 4  ;;  %v6662_v50 = vshrl.u32 %v6661_v62, 23  ;;  %v17921_v52 = vand.u32 2147483647, %v14585_v7 }
 0x588   : > { %17920 = vst [vmem:[#allocation85_spill] sm:$0xff] %v15182_v63  ;;  %v17922_v26 = vmov 0  ;;  %v6617_v6 = vshll.u32 %v15182_v63, 30  ;;  %v6377_v24 = vor.u32 %v6376_v14, %v6375_v11  ;;  %vm6378_vm11 = vcmp.lt.s32.totalorder %v6359_v45, 1 }
 0x589   : > { %vm15188_vm12 = vcmp.le.f32.partialorder %v17921_v52, 0.7853982  ;;  %v6383_v61 = vsel %vm6381_vm7, %v6371_v32, 2102212464  ;;  %v6362_v17 = vshrl.u32 %v17387_v19, %v6361_v56  ;;  %vm6380_vm4 = vcmp.lt.s32.totalorder %v6359_v45, 3 }
 0x58a   : > { %v17923_v26 = vsel %vm15188_vm12, 4294967295, %v17922_v26  ;;  %v6386_v0 = vsel %vm6378_vm11, %v6365_v12, %v6368_v42  ;;  %v6387_v62 = vsel %vm6381_vm7, %v6374_v1, 920167782  ;;  %v15197_v54 = vsub.s32 %v6614_v41, %v6617_v6 }
 0x58b   : > { %17924 = vst [vmem:[#allocation86_spill] sm:$0xff] %v17923_v26  ;;  %vm6379_vm2 = vcmp.lt.s32.totalorder %v6359_v45, 2  ;;  %v6388_v4 = vsel %vm6380_vm4, %v6371_v32, %v6387_v62  ;;  %v6390_v36 = vsel %vm6378_vm11, %v6368_v42, %v6371_v32  ;;  %v6382_v34 = vsel %vm6378_vm11, %v6362_v17, %v6365_v12 }
 0x58c   : > { %v6384_v60 = vsel %vm6380_vm4, %v6368_v42, %v6383_v61  ;;  %v6389_v51 = vsel %vm6379_vm2, %v6386_v0, %v6388_v4  ;;  %v6391_v11 = vsel %vm6381_vm7, %v6377_v24, 1326507024  ;;  %vm17288_vm15 = vcmp.lt.s32.totalorder %v14284_v48, 4 }
 0x58d   : > { %v6620_v14 = vsub.s32 0, %v15197_v54  ;;  %v6392_v56 = vsel %vm6380_vm4, %v6374_v1, %v6391_v11  ;;  %v15203_v38 = vmul.u32.u64.low %v6394_v29, %v6389_v51  ;;  %v15204_v16 = vmul.u32.u64.high %v6394_v29, %v6389_v51, %v15203_v38 }
 0x58e   : > { %v6322_v41 = vand.u32 2147483647, %v6321_v28  ;;  %v6324_v52 = vcvt.s32.f32 %v6317_v33  ;;  %v6393_v6 = vsel %vm6379_vm2, %v6390_v36, %v6392_v56  ;;  %v8170_v32 = vadd.s32 4294967169, %v6662_v50 }
 0x58f   : > { %v6108_v12 = vshrl.u32 %v6090_v23, %v6106_v10  ;;  %v6111_v42 = vadd.s32 127, %v6110_v53  ;;  %v15208_v61 = vmul.u32.u64.low %v6394_v29, %v6393_v6  ;;  %v15209_v17 = vmul.u32.u64.high %v6394_v29, %v6393_v6, %v15208_v61 }
 0x590   : > { %v8167_v24 = vmin.u32 %v6620_v14, %v15197_v54  ;;  %v6385_v0 = vsel %vm6379_vm2, %v6382_v34, %v6384_v60  ;;  %v17282_v1 = vand.u32 2147483647, %v15153_v2  ;;  %v6668_v62 = vadd.s32 1, %v8170_v32 }
 0x591   : > { %8847 = vcosq.f32 %v15082_v18  ;;  %v6107_v28 = vshll.u32 %v15116_v40, %v6105_v20  ;;  %v6404_v33 = vadd.s32 1, %v15204_v16  ;;  %v15219_v50 = vadd.f32 %v15063_v35, %v14664_v5 }
 0x592   : > { %v15225_v10 = vsel %vm15188_vm12, %v14585_v7, %v15162_v58  ;;  %v17925_v53 = vxor.u32 2147483648, %v15107_v46  ;;  %vm17926_vm2 = vcmp.lt.s32.totalorder %v14710_v27, 0  ;;  %v15232_v45 = vmul.f32 %v6324_v52, %v6322_v41 }
 0x593   : > { %vm6669_vm4 = vcmp.gt.s32.totalorder %v6668_v62, 0  ;;  %v15234_v40 = vor.u32 %v6108_v12, %v6107_v28  ;;  %v6112_v20 = vshll.u32 %v6111_v42, 23  ;;  %v6401_v5 = vmul.u32 %v6394_v29, %v6385_v0 }
 0x594   : > { %v6015_v23 = vsel %vm17926_vm2, %v17925_v53, %v15107_v46  ;;  %vm6403_vm7 = vc.u32 %v15209_v17, %v15203_v38  ;;  %v6622_v35 = vclz %v8167_v24  ;;  %v6665_v4 = vand.u32 8388607, %v17282_v1 }
 0x595   : > { %v6405_v58 = vsel %vm6403_vm7, %v6404_v33, %v15204_v16  ;;  %v6670_v36 = vsel %vm6669_vm4, %v6668_v62, 0  ;;  %8849 = vsinq.f32 %v15082_v18  ;;  %v6453_v60 = vand.u32 2139095040, %v15219_v50 }
 0x596   : > { %v6406_v46 = vadd.s32 %v6405_v58, %v6401_v5  ;;  %v6672_v34 = vand.u32 31, %v6670_v36  ;;  %v15248_v29 = vsel %vm17288_vm15, %v14836_v59, 920167782  ;;  %8851 = vcosq.f32 %v15225_v10 }
 0x597   : > { %v17927_v11 = vand.u32 2147483647, %v14710_v27  ;;  %v17928_v14 = vmov 0  ;;  %v15263_v16 = vor.u32 4788187, %v6112_v20  ;;  %v8168_v6 = vadd.s32 4294967294, %v6622_v35 }
 0x598   : > { %v6407_v41 = vadd.s32 536870912, %v6406_v46  ;;  %v6666_v32 = vor.u32 8388608, %v6665_v4  ;;  %v6673_v12 = vsub.s32 32, %v6672_v34  ;;  %v6675_v61 = vshll.u32 %v17387_v19, %v6672_v34 }
 0x599   : > { %vm15253_vm11 = vcmp.le.f32.partialorder %v17927_v11, 0.7853982  ;;  %v6678_v24 = vshll.u32 %v17389_v43, %v6672_v34  ;;  %v6454_v0 = vshrl.u32 %v6453_v60, 23  ;;  %v6681_v33 = vshll.u32 %v17390_v37, %v6672_v34 }
 0x59a   : > { %v17929_v14 = vsel %vm15253_vm11, 4294967295, %v17928_v14  ;;  %v15260_v18 = vsel %vm15253_vm11, %v14710_v27, %v6015_v23  ;;  %v15266_v42 = vshrl.u32 %v6407_v41, 30  ;;  %v6676_v62 = vshrl.u32 %v17389_v43, %v6673_v12 }
 0x59b   : > { %17930 = vst [vmem:[#allocation87_spill] sm:$0xff] %v17929_v14  ;;  %v6679_v28 = vshrl.u32 %v17390_v37, %v6673_v12  ;;  %v6682_v53 = vshrl.u32 %v17395_v21, %v6673_v12  ;;  %v15274_v23 = vpop.eup %8847  ;;  %v6671_v5 = vshrl.u32 %v6670_v36, 5  ;;  %v6684_v35 = vshll.u32 %v17395_v21, %v6672_v34 }
 0x59c   : > { %17931 = vst [vmem:[#allocation88_spill] sm:$0xff] %v15266_v42  ;;  %17932 = vst [vmem:[#allocation89_spill] sm:$0xff] %v15274_v23  ;;  %v6409_v20 = vshll.u32 %v15266_v42, 30  ;;  %v6685_v58 = vshrl.u32 %v17769_v44, %v6673_v12  ;;  %v6114_v4 = vand.u32 2147483647, %v15263_v16  ;;  %v6677_v60 = vor.u32 %v6676_v62, %v6675_v61 }
 0x59d   : > { %v6680_v11 = vor.u32 %v6679_v28, %v6678_v24  ;;  %v6683_v41 = vor.u32 %v6682_v53, %v6681_v33  ;;  %v15283_v52 = vshll.u32 %v6666_v32, 8  ;;  %v6687_v36 = vshll.u32 %v17769_v44, %v6672_v34 }
 0x59e   : > { %v15281_v1 = vsub.s32 %v6406_v46, %v6409_v20  ;;  %v6686_v51 = vor.u32 %v6685_v58, %v6684_v35  ;;  %v6688_v63 = vshrl.u32 %v17770_v13, %v6673_v12  ;;  %v8162_v42 = vadd.s32 4294967169, %v6454_v0  ;;  %v15291_v46 = vpop.f32.mrb[24].mxu0 }
 0x59f   : > { %v15288_v26 = vpop.eup %8849  ;;  %vm6690_vm7 = vcmp.lt.s32.totalorder %v6671_v5, 1  ;;  %vm6692_vm15 = vcmp.lt.s32.totalorder %v6671_v5, 3  ;;  %vm6693_vm2 = vcmp.lt.s32.totalorder %v6671_v5, 4  ;;  %v6674_v0 = vshrl.u32 %v17387_v19, %v6673_v12 }
 0x5a0   : > { %17933 = vst [vmem:[#allocation90_spill] sm:$0xff] %v15288_v26  ;;  %v6412_v16 = vsub.s32 0, %v15281_v1  ;;  %v15293_v61 = vpop.eup %8851  ;;  %v6689_v32 = vor.u32 %v6688_v63, %v6687_v36  ;;  %v6695_v24 = vsel %vm6693_vm2, %v6683_v41, 2102212464  ;;  %v6698_v62 = vsel %vm6690_vm7, %v6677_v60, %v6680_v11 }
 0x5a1   : > { %17934 = vst [vmem:[#allocation91_spill] sm:$0xff] %v15293_v61  ;;  %v6699_v28 = vsel %vm6693_vm2, %v6686_v51, 920167782  ;;  %vm6691_vm4 = vcmp.lt.s32.totalorder %v6671_v5, 2  ;;  %vm17935_vm12 = vcmp.lt.s32.totalorder %v8168_v6, 0  ;;  %v6702_v35 = vsel %vm6690_vm7, %v6680_v11, %v6683_v41 }
 0x5a2   : > { %v8159_v34 = vmin.u32 %v6412_v16, %v15281_v1  ;;  %v6700_v33 = vsel %vm6692_vm15, %v6683_v41, %v6699_v28  ;;  %v15300_v53 = vsel %vm17935_vm12, 0, %v8168_v6  ;;  %v6703_v58 = vsel %vm6693_vm2, %v6689_v32, 1326507024 }
 0x5a3   : > { %v6701_v20 = vsel %vm6691_vm4, %v6698_v62, %v6700_v33  ;;  %v6694_v36 = vsel %vm6690_vm7, %v6674_v0, %v6677_v60  ;;  %v6696_v56 = vsel %vm6692_vm15, %v6680_v11, %v6695_v24  ;;  %v6704_v16 = vsel %vm6692_vm15, %v6686_v51, %v6703_v58 }
 0x5a4   : > { %v6414_v63 = vclz %v8159_v34  ;;  %v6705_v12 = vsel %vm6691_vm4, %v6702_v35, %v6704_v16  ;;  %v15309_v61 = vmul.u32.u64.low %v15283_v52, %v6701_v20  ;;  %v15310_v28 = vmul.u32.u64.high %v15283_v52, %v6701_v20, %v15309_v61 }
 0x5a5   : > { %v6460_v6 = vadd.s32 1, %v8162_v42  ;;  %v6630_v62 = vsub.s32 4294967266, %v15300_v53  ;;  %v15315_v41 = vmul.u32.u64.low %v15283_v52, %v6705_v12  ;;  %v15316_v32 = vmul.u32.u64.high %v15283_v52, %v6705_v12, %v15315_v41 }
 0x5a6   : > { %v17936_v60 = vand.u32 2147483647, %v15219_v50  ;;  %8853 = vsinq.f32 %v15225_v10  ;;  %v17937_v51 = vxor.u32 2147483648, %v15232_v45  ;;  %vm17938_vm12 = vcmp.lt.s32.totalorder %v14714_v22, 0 }
 0x5a7   : > { %v8160_v24 = vadd.s32 4294967294, %v6414_v63  ;;  %vm6461_vm15 = vcmp.gt.s32.totalorder %v6460_v6, 0  ;;  %8855 = vcosq.f32 %v15260_v18  ;;  %v17939_v42 = vcvt.s32.f32 %v15234_v40 }
 0x5a8   : > { %v6457_v34 = vand.u32 8388607, %v17936_v60  ;;  %v6327_v11 = vsel %vm17938_vm12, %v17937_v51, %v15232_v45  ;;  %v6697_v33 = vsel %vm6691_vm4, %v6694_v36, %v6696_v56  ;;  %v6462_v20 = vsel %vm6461_vm15, %v6460_v6, 0  ;;  %v17944_v6 = vld [vmem:[#allocation69_spill] sm:$0xff] }
 0x5a9   : > { %v15329_v0 = vmul.f32 %v17939_v42, %v6114_v4  ;;  %8857 = vsinq.f32 %v15260_v18  ;;  %v17940_v10 = vand.u32 2147483647, %v14714_v22  ;;  %v17941_v35 = vmov 0 }
 0x5aa   : > { %v6626_v45 = vsub.s32 32, %v15300_v53  ;;  %v6716_v58 = vadd.s32 1, %v15310_v28  ;;  %v6610_v56 = vadd.s32 %v15145_v31, %v15143_v8  ;;  %v15348_v5 = vadd.s32 127, %v6630_v62 }
 0x5ab   : > { %vm15335_vm2 = vcmp.le.f32.partialorder %v17940_v10, 0.7853982  ;;  %v6458_v18 = vor.u32 8388608, %v6457_v34  ;;  %vm8161_vm4 = vcmp.lt.s32.totalorder %v8160_v24, 0  ;;  %v6713_v4 = vmul.u32 %v15283_v52, %v6697_v33 }
 0x5ac   : > { %v17942_v35 = vsel %vm15335_vm2, 4294967295, %v17941_v35  ;;  %v15344_v40 = vsel %vm15335_vm2, %v14714_v22, %v6327_v11  ;;  %vm6715_vm7 = vc.u32 %v15316_v32, %v15309_v61  ;;  %v6464_v63 = vand.u32 31, %v6462_v20 }
 0x5ad   : > { %17943 = vst [vmem:[#allocation92_spill] sm:$0xff] %v17942_v35  ;;  %v6118_v36 = vxor.u32 2147483648, %v15329_v0  ;;  %v6627_v16 = vshll.u32 %v15197_v54, %v15300_v53  ;;  %v6717_v12 = vsel %vm6715_vm7, %v6716_v58, %v15310_v28  ;;  %v6628_v8 = vshrl.u32 %v6610_v56, %v6626_v45 }
 0x5ae   : > { %v6718_v31 = vadd.s32 %v6717_v12, %v6713_v4  ;;  %v6463_v62 = vshrl.u32 %v6462_v20, 5  ;;  %v6465_v60 = vsub.s32 32, %v6464_v63  ;;  %v6632_v34 = vshll.u32 %v15348_v5, 23 }
 0x5af   : > { %v15359_v52 = vsel %vm8161_vm4, 0, %v8160_v24  ;;  %v6467_v51 = vshll.u32 %v17387_v19, %v6464_v63  ;;  %v15362_v11 = vshll.u32 %v6458_v18, 8  ;;  %v6470_v53 = vshll.u32 %v17389_v43, %v6464_v63 }
 0x5b0   : > { %v6719_v42 = vadd.s32 536870912, %v6718_v31  ;;  %v6468_v54 = vshrl.u32 %v17389_v43, %v6465_v60  ;;  %v6471_v28 = vshrl.u32 %v17390_v37, %v6465_v60  ;;  %v6473_v33 = vshll.u32 %v17390_v37, %v6464_v63  ;;  %v15372_v45 = vpop.eup %8853 }
 0x5b1   : > { %v6474_v20 = vshrl.u32 %v17395_v21, %v6465_v60  ;;  %v6476_v24 = vshll.u32 %v17395_v21, %v6464_v63  ;;  %v6477_v10 = vshrl.u32 %v17769_v44, %v6465_v60  ;;  %17945 = vst [vmem:[#allocation69_spill] sm:$0xff] %v15372_v45  ;;  %vm6482_vm15 = vcmp.lt.s32.totalorder %v6463_v62, 1  ;;  %v15376_v18 = vpop.eup %8855 }
 0x5b2   : > { %v15374_v58 = vshrl.u32 %v6719_v42, 30  ;;  %v6469_v56 = vor.u32 %v6468_v54, %v6467_v51  ;;  %v6472_v5 = vor.u32 %v6471_v28, %v6470_v53  ;;  %17947 = vst [vmem:[#allocation94_spill] sm:$0xff] %v15376_v18  ;;  %v6479_v41 = vshll.u32 %v17769_v44, %v6464_v63 }
 0x5b3   : > { %v6475_v4 = vor.u32 %v6474_v20, %v6473_v33  ;;  %v6478_v12 = vor.u32 %v6477_v10, %v6476_v24  ;;  %v6480_v35 = vshrl.u32 %v17770_v13, %v6465_v60  ;;  %v15380_v22 = vpop.eup %8857  ;;  %vm6484_vm4 = vcmp.lt.s32.totalorder %v6463_v62, 3 }
 0x5b4   : > { %17946 = vst [vmem:[#allocation93_spill] sm:$0xff] %v15374_v58  ;;  %17948 = vst [vmem:[#allocation95_spill] sm:$0xff] %v15380_v22  ;;  %v6721_v7 = vshll.u32 %v15374_v58, 30  ;;  %vm6485_vm7 = vcmp.lt.s32.totalorder %v6463_v62, 4  ;;  %v6490_v42 = vsel %vm6482_vm15, %v6469_v56, %v6472_v5  ;;  %v6466_v51 = vshrl.u32 %v17387_v19, %v6465_v60 }
 0x5b5   : > { %v6481_v54 = vor.u32 %v6480_v35, %v6479_v41  ;;  %v6487_v53 = vsel %vm6485_vm7, %v6475_v4, 2102212464  ;;  %v6491_v28 = vsel %vm6485_vm7, %v6478_v12, 920167782  ;;  %vm6483_vm12 = vcmp.lt.s32.totalorder %v6463_v62, 2 }
 0x5b6   : > { %v15385_v45 = vsub.s32 %v6718_v31, %v6721_v7  ;;  %v6492_v63 = vsel %vm6484_vm4, %v6475_v4, %v6491_v28  ;;  %v6494_v33 = vsel %vm6482_vm15, %v6472_v5, %v6475_v4  ;;  %v6486_v20 = vsel %vm6482_vm15, %v6466_v51, %v6469_v56 }
 0x5b7   : > { %v6488_v24 = vsel %vm6484_vm4, %v6472_v5, %v6487_v53  ;;  %v6493_v10 = vsel %vm6483_vm12, %v6490_v42, %v6492_v63  ;;  %v6495_v58 = vsel %vm6485_vm7, %v6481_v54, 1326507024  ;;  %v17949_v31 = vor.u32 %v14832_v57, %v14828_v3 }
 0x5b8   : > { %v6724_v18 = vsub.s32 0, %v15385_v45  ;;  %v6496_v35 = vsel %vm6484_vm4, %v6478_v12, %v6495_v58  ;;  %v15395_v41 = vmul.u32.u64.low %v15362_v11, %v6493_v10  ;;  %v15396_v7 = vmul.u32.u64.high %v15362_v11, %v6493_v10, %v15395_v41 }
 0x5b9   : > { %vm17950_vm2 = vcmp.lt.s32.totalorder %v14284_v48, 4  ;;  %8859 = vcosq.f32 %v15344_v40  ;;  %vm17951_vm15 = vcmp.lt.s32.totalorder %v14905_v39, 0  ;;  %v6497_v58 = vsel %vm6483_vm12, %v6494_v33, %v6496_v35 }
 0x5ba   : > { %v15404_v60 = vsel %vm17950_vm2, %v17949_v31, 1326507024  ;;  %v15410_v56 = vsel %vm17951_vm15, %v6118_v36, %v15329_v0  ;;  %v6629_v5 = vor.u32 %v6628_v8, %v6627_v16  ;;  %v8171_v4 = vmin.u32 %v6724_v18, %v15385_v45  ;;  %v17953_v36 = vld [vmem:[#allocation41_spill] sm:$0xff]  ;;  %v17954_v8 = vld [vmem:[#allocation42_spill] sm:$0xff] }
 0x5bb   : > { %v15415_v12 = vmul.u32.u64.low %v15362_v11, %v6497_v58  ;;  %v15416_v42 = vmul.u32.u64.high %v15362_v11, %v6497_v58, %v15415_v12  ;;  %v6633_v3 = vor.u32 4788187, %v6632_v34  ;;  %v6422_v57 = vsub.s32 4294967266, %v15359_v52 }
 0x5bc   : > { %v6489_v51 = vsel %vm6483_vm12, %v6486_v20, %v6488_v24  ;;  %v17952_v54 = vand.u32 2147483647, %v17944_v6  ;;  %v6726_v28 = vclz %v8171_v4  ;;  %v6508_v0 = vadd.s32 1, %v15396_v7 }
 0x5bd   : > { %v4283_v16 = vshll.u32 %v17387_v19, %v17953_v36  ;;  %v4284_v18 = vshrl.u32 %v17389_v43, %v17954_v8  ;;  %v4286_v63 = vshll.u32 %v17389_v43, %v17953_v36  ;;  %v4287_v34 = vshrl.u32 %v17390_v37, %v17954_v8 }
 0x5be   : > { %v4273_v53 = vand.u32 8388607, %v17952_v54  ;;  %v4289_v62 = vshll.u32 %v17390_v37, %v17953_v36  ;;  %v4290_v33 = vshrl.u32 %v17395_v21, %v17954_v8  ;;  %v6402_v20 = vadd.s32 %v15203_v38, %v15209_v17 }
 0x5bf   : > { %v6505_v24 = vmul.u32 %v15362_v11, %v6489_v51  ;;  %vm6507_vm2 = vc.u32 %v15416_v42, %v15395_v41  ;;  %v4285_v10 = vor.u32 %v4284_v18, %v4283_v16  ;;  %v8172_v35 = vadd.s32 4294967294, %v6726_v28  ;;  %v17959_v16 = vld [vmem:[#allocation30_spill] sm:$0xff] }
 0x5c0   : > { %v6509_v31 = vsel %vm6507_vm2, %v6508_v0, %v15396_v7  ;;  %v4288_v58 = vor.u32 %v4287_v34, %v4286_v63  ;;  %v4291_v4 = vor.u32 %v4290_v33, %v4289_v62  ;;  %v17955_v12 = vand.u32 2147483647, %v14905_v39 }
 0x5c1   : > { %v17956_v54 = vmov 0  ;;  %v6634_v36 = vand.u32 2147483647, %v6633_v3  ;;  %v6636_v22 = vcvt.s32.f32 %v6629_v5  ;;  %v6418_v38 = vsub.s32 32, %v15359_v52  ;;  %v17962_v5 = vld [vmem:[#allocation50_spill] sm:$0xff] }
 0x5c2   : > { %vm15443_vm12 = vcmp.le.f32.partialorder %v17955_v12, 0.7853982  ;;  %v6510_v17 = vadd.s32 %v6509_v31, %v6505_v24  ;;  %v6423_v11 = vadd.s32 127, %v6422_v57  ;;  %v4274_v51 = vor.u32 8388608, %v4273_v53  ;;  %v17963_v57 = vld [vmem:[#allocation60_spill] sm:$0xff]  ;;  %v17964_v53 = vld [vmem:[#allocation61_spill] sm:$0xff] }
 0x5c3   : > { %v17957_v54 = vsel %vm15443_vm12, 4294967295, %v17956_v54  ;;  %v4282_v28 = vshrl.u32 %v17387_v19, %v17954_v8  ;;  %vm4298_vm4 = vcmp.lt.s32.totalorder %v17959_v16, 1  ;;  %vm4300_vm7 = vcmp.lt.s32.totalorder %v17959_v16, 3  ;;  %v15454_v63 = vpop.eup %8859 }
 0x5c4   : > { %17958 = vst [vmem:[#allocation41_spill] sm:$0xff] %v17957_v54  ;;  %v6511_v7 = vadd.s32 536870912, %v6510_v17  ;;  %vm17960_vm15 = vcmp.lt.s32.totalorder %v17959_v16, 4  ;;  %v4306_v18 = vsel %vm4298_vm4, %v4285_v10, %v4288_v58  ;;  %17961 = vst [vmem:[#allocation42_spill] sm:$0xff] %v15454_v63  ;;  %vm8173_vm2 = vcmp.lt.s32.totalorder %v8172_v35, 0 }
 0x5c5   : > { %v4303_v0 = vsel %vm17960_vm15, %v4291_v4, 2102212464  ;;  %v4308_v3 = vsel %vm4300_vm7, %v4291_v4, %v17962_v5  ;;  %v4310_v34 = vsel %vm4298_vm4, %v4288_v58, %v4291_v4  ;;  %v4312_v62 = vsel %vm4300_vm7, %v17964_v53, %v17963_v57 }
 0x5c6   : > { %v6637_v33 = vmul.f32 %v6636_v22, %v6634_v36  ;;  %v15459_v8 = vshrl.u32 %v6511_v7, 30  ;;  %vm4299_vm11 = vcmp.lt.s32.totalorder %v17959_v16, 2  ;;  %v4302_v24 = vsel %vm4298_vm4, %v4282_v28, %v4285_v10  ;;  %v15472_v36 = vpop.f32.mrb[25].mxu0 }
 0x5c7   : > { %v4304_v31 = vsel %vm4300_vm7, %v4288_v58, %v4303_v0  ;;  %v4309_v12 = vsel %vm4299_vm11, %v4306_v18, %v4308_v3  ;;  %v4313_v14 = vsel %vm4299_vm11, %v4310_v34, %v4312_v62  ;;  %v4314_v27 = vshll.u32 %v4274_v51, 8 }
 0x5c8   : > { %17965 = vst [vmem:[#allocation30_spill] sm:$0xff] %v15459_v8  ;;  %v6420_v23 = vshrl.u32 %v6402_v20, %v6418_v38  ;;  %v6424_v26 = vshll.u32 %v6423_v11, 23  ;;  %v15462_v63 = vsel %vm8173_vm2, 0, %v8172_v35  ;;  %v6513_v5 = vshll.u32 %v15459_v8, 30  ;;  %v17966_v38 = vld [vmem:[#allocation36_spill] sm:$0xff] }
 0x5c9   : > { %v15465_v4 = vmul.u32.u64.low %v4314_v27, %v4313_v14  ;;  %v15466_v15 = vmul.u32.u64.high %v4314_v27, %v4313_v14, %v15465_v4  ;;  %v15468_v57 = vmul.u32.u64.low %v4314_v27, %v4309_v12  ;;  %v15469_v22 = vmul.u32.u64.high %v4314_v27, %v4309_v12, %v15468_v57 }
 0x5ca   : > { %v6419_v10 = vshll.u32 %v15281_v1, %v15359_v52  ;;  %v15476_v58 = vsub.s32 %v6510_v17, %v6513_v5  ;;  %v4305_v20 = vsel %vm4299_vm11, %v4302_v24, %v4304_v31  ;;  %v4370_v35 = vand.u32 2147483647, %v17966_v38 }
 0x5cb   : > { %8861 = vsinq.f32 %v15344_v40  ;;  %v15484_v14 = vsel %vm15443_vm12, %v14905_v39, %v15410_v56  ;;  %vm17310_vm4 = vcmp.lt.s32.totalorder %v14979_v25, 0  ;;  %v6638_v11 = vxor.u32 2147483648, %v6637_v33 }
 0x5cc   : > { %v6421_v51 = vor.u32 %v6420_v23, %v6419_v10  ;;  %v6425_v28 = vor.u32 4788187, %v6424_v26  ;;  %v6734_v1 = vsub.s32 4294967266, %v15462_v63  ;;  %v6516_v52 = vsub.s32 0, %v15476_v58 }
 0x5cd   : > { %v4321_v17 = vmul.u32 %v4314_v27, %v4305_v20  ;;  %vm4323_vm11 = vc.u32 %v15466_v15, %v15468_v57  ;;  %v4324_v40 = vadd.s32 1, %v15469_v22  ;;  %v4388_v16 = vshrl.u32 %v17389_v43, %v14602_v49 }
 0x5ce   : > { %v8163_v56 = vmin.u32 %v6516_v52, %v15476_v58  ;;  %v4377_v7 = vand.u32 8388607, %v4370_v35  ;;  %v4387_v26 = vshll.u32 %v17387_v19, %v14298_v47  ;;  %v4390_v23 = vshll.u32 %v17389_v43, %v14298_v47 }
 0x5cf   : > { %v4325_v27 = vsel %vm4323_vm11, %v4324_v40, %v15469_v22  ;;  %v4391_v0 = vshrl.u32 %v17390_v37, %v14602_v49  ;;  %v4393_v18 = vshll.u32 %v17390_v37, %v14298_v47  ;;  %v4394_v3 = vshrl.u32 %v17395_v21, %v14602_v49 }
 0x5d0   : > { %v6639_v34 = vsel %vm17310_vm4, %v6638_v11, %v6637_v33  ;;  %v6426_v53 = vand.u32 2147483647, %v6425_v28  ;;  %v6518_v62 = vclz %v8163_v56  ;;  %v4326_v24 = vadd.s32 %v4325_v27, %v4321_v17 }
 0x5d1   : > { %v6730_v31 = vsub.s32 32, %v15462_v63  ;;  %v4389_v12 = vor.u32 %v4388_v16, %v4387_v26  ;;  %v4392_v5 = vor.u32 %v4391_v0, %v4390_v23  ;;  %v4395_v4 = vor.u32 %v4394_v3, %v4393_v18 }
 0x5d2   : > { %8863 = vcosq.f32 %v15484_v14  ;;  %v17967_v22 = vand.u32 2147483647, %v14979_v25  ;;  %v17968_v47 = vmov 0  ;;  %v6735_v10 = vadd.s32 127, %v6734_v1 }
 0x5d3   : > { %v4327_v20 = vadd.s32 536870912, %v4326_v24  ;;  %v6428_v52 = vcvt.s32.f32 %v6421_v51  ;;  %v6714_v33 = vadd.s32 %v15309_v61, %v15316_v32  ;;  %v8164_v11 = vadd.s32 4294967294, %v6518_v62 }
 0x5d4   : > { %vm15514_vm7 = vcmp.le.f32.partialorder %v17967_v22, 0.7853982  ;;  %v4378_v28 = vor.u32 8388608, %v4377_v7  ;;  %vm4402_vm15 = vcmp.lt.s32.totalorder %v14284_v48, 1  ;;  %vm4404_vm2 = vcmp.lt.s32.totalorder %v14284_v48, 3 }
 0x5d5   : > { %v17969_v47 = vsel %vm15514_vm7, 4294967295, %v17968_v47  ;;  %v6642_v17 = vsel %vm15514_vm7, %v14979_v25, %v6639_v34  ;;  %v4328_v40 = vshrl.u32 %v4327_v20, 30  ;;  %v15525_v16 = vpop.eup %8861  ;;  %v6429_v56 = vmul.f32 %v6428_v52, %v6426_v53 }
 0x5d6   : > { %17970 = vst [vmem:[#allocation50_spill] sm:$0xff] %v17969_v47  ;;  %17971 = vst [vmem:[#allocation60_spill] sm:$0xff] %v15525_v16  ;;  %v6732_v1 = vshrl.u32 %v6714_v33, %v6730_v31  ;;  %v4410_v51 = vsel %vm4402_vm15, %v4389_v12, %v4392_v5  ;;  %v4412_v61 = vsel %vm4404_vm2, %v4395_v4, %v15248_v29  ;;  %vm17313_vm11 = vcmp.lt.s32.totalorder %v15067_v9, 0 }
 0x5d7   : > { %v6736_v32 = vshll.u32 %v6735_v10, 23  ;;  %v4329_v7 = vshll.u32 %v4328_v40, 30  ;;  %vm4403_vm4 = vcmp.lt.s32.totalorder %v14284_v48, 2  ;;  %vm17972_vm7 = vcmp.lt.s32.totalorder %v14284_v48, 4  ;;  %v17982_v48 = vld [vmem:[#allocation47_spill] sm:$0xff] }
 0x5d8   : > { %v4407_v26 = vsel %vm17972_vm7, %v4395_v4, 2102212464  ;;  %vm8165_vm12 = vcmp.lt.s32.totalorder %v8164_v11, 0  ;;  %v4414_v23 = vsel %vm4402_vm15, %v4392_v5, %v4395_v4  ;;  %v4416_v27 = vsel %vm4404_vm2, %v14836_v59, %v15404_v60 }
 0x5d9   : > { %v4418_v0 = vshll.u32 %v4378_v28, 8  ;;  %v15542_v29 = vsub.s32 %v4326_v24, %v4329_v7  ;;  %v4386_v18 = vshrl.u32 %v17387_v19, %v14602_v49  ;;  %v4413_v3 = vsel %vm4403_vm4, %v4410_v51, %v4412_v61  ;;  %v17981_v51 = vld [vmem:[#allocation22_spill] sm:$0xff] }
 0x5da   : > { %v4417_v34 = vsel %vm4403_vm4, %v4414_v23, %v4416_v27  ;;  %v17973_v53 = vand.u32 2147483647, %v15067_v9  ;;  %v17974_v62 = vmov 0  ;;  %v6430_v31 = vxor.u32 2147483648, %v6429_v56 }
 0x5db   : > { %v6731_v59 = vshll.u32 %v15385_v45, %v15462_v63  ;;  %v15558_v60 = vmul.u32.u64.low %v4418_v0, %v4417_v34  ;;  %v15559_v24 = vmul.u32.u64.high %v4418_v0, %v4417_v34, %v15558_v60  ;;  %v15561_v49 = vsel %vm8165_vm12, 0, %v8164_v11 }
 0x5dc   : > { %vm15552_vm7 = vcmp.le.f32.partialorder %v17973_v53, 0.7853982  ;;  %v4332_v4 = vsub.s32 0, %v15542_v29  ;;  %v4406_v22 = vsel %vm4402_vm15, %v4386_v18, %v4389_v12  ;;  %v4408_v10 = vsel %vm4404_vm2, %v4392_v5, %v4407_v26  ;;  %v15572_v45 = vpop.eup %8863 }
 0x5dd   : > { %v17975_v62 = vsel %vm15552_vm7, 4294967295, %v17974_v62  ;;  %v6733_v20 = vor.u32 %v6732_v1, %v6731_v59  ;;  %v6737_v52 = vor.u32 4788187, %v6736_v32  ;;  %17977 = vst [vmem:[#allocation36_spill] sm:$0xff] %v15572_v45  ;;  %8865 = vsinq.f32 %v15484_v14 }
 0x5de   : > { %17976 = vst [vmem:[#allocation61_spill] sm:$0xff] %v17975_v62  ;;  %v15568_v33 = vmul.u32.u64.low %v4418_v0, %v4413_v3  ;;  %v15569_v28 = vmul.u32.u64.high %v4418_v0, %v4413_v3, %v15568_v33  ;;  %v17978_v63 = vand.u32 2147483647, %v17944_v6  ;;  %v8079_v12 = vmin.u32 %v4332_v4, %v15542_v29  ;;  %v17984_v4 = vld [vmem:[#allocation28_spill] sm:$0xff] }
 0x5df   : > { %v4560_v5 = vsub.s32 4, %v17981_v51  ;;  %8867 = vcosq.f32 %v6642_v17  ;;  %v6526_v1 = vsub.s32 4294967266, %v15561_v49  ;;  %v4352_v61 = vsub.s32 4, %v4328_v40 }
 0x5e0   : > { %vm15577_vm12 = vcmp.le.f32.partialorder %v17978_v63, 0.7853982  ;;  %v4409_v32 = vsel %vm4403_vm4, %v4406_v22, %v4408_v10  ;;  %8869 = vsinq.f32 %v6642_v17  ;;  %vm4268_vm15 = vcmp.lt.s32.totalorder %v17944_v6, 0 }
 0x5e1   : > { %v4334_v14 = vclz %v8079_v12  ;;  %vm4427_vm2 = vc.u32 %v15559_v24, %v15568_v33  ;;  %v6431_v7 = vsel %vm17313_vm11, %v6430_v31, %v6429_v56  ;;  %v6738_v26 = vand.u32 2147483647, %v6737_v52  ;;  %v15600_v31 = vpop.f32.mrb[26].mxu0 }
 0x5e2   : > { %v6740_v23 = vcvt.s32.f32 %v6733_v20  ;;  %v4428_v27 = vadd.s32 1, %v15569_v28  ;;  %v6522_v18 = vsub.s32 32, %v15561_v49  ;;  %v4425_v34 = vmul.u32 %v4418_v0, %v4409_v32 }
 0x5e3   : > { %v8080_v3 = vadd.s32 4294967294, %v4334_v14  ;;  %vm17983_vm4 = vcmp.lt.s32.totalorder %v17982_v48, 0  ;;  %v6527_v53 = vadd.s32 127, %v6526_v1  ;;  %v4353_v59 = vsel %vm4268_vm15, %v4352_v61, %v4328_v40  ;;  %v17986_v1 = vld [vmem:[#allocation66_spill] sm:$0xff] }
 0x5e4   : > { %v4561_v17 = vsel %vm17983_vm4, %v4560_v5, %v17981_v51  ;;  %v4429_v60 = vsel %vm4427_vm2, %v4428_v27, %v15569_v28  ;;  %v4664_v56 = vsub.s32 4, %v17984_v4  ;;  %v15605_v22 = vsel %vm15552_vm7, %v15067_v9, %v6431_v7 }
 0x5e5   : > { %v6506_v0 = vadd.s32 %v15395_v41, %v15416_v42  ;;  %vm8081_vm11 = vcmp.lt.s32.totalorder %v8080_v3, 0  ;;  %v4430_v10 = vadd.s32 %v4429_v60, %v4425_v34  ;;  %v15609_v20 = vmul.f32 %v6740_v23, %v6738_v26 }
 0x5e6   : > { %v4322_v40 = vadd.s32 %v15468_v57, %v15466_v15  ;;  %v4337_v52 = vsel %vm8081_vm11, 0, %v8080_v3  ;;  %v4563_v63 = vsel %vm13749_vm14, 0, %v4561_v17  ;;  %v4355_v5 = vsel %vm15577_vm12, 0, %v4353_v59 }
 0x5e7   : > { %v4338_v12 = vsub.s32 32, %v4337_v52  ;;  %v4342_v51 = vsub.s32 4294967266, %v4337_v52  ;;  %vm17987_vm2 = vcmp.lt.s32.totalorder %v17986_v1, 0  ;;  %8871 = vcosq.f32 %v15605_v22  ;;  %v15621_v14 = vpop.eup %8865 }
 0x5e8   : > { %v4665_v41 = vsel %vm17987_vm2, %v4664_v56, %v17984_v4  ;;  %v6524_v42 = vshrl.u32 %v6506_v0, %v6522_v18  ;;  %v6528_v61 = vshll.u32 %v6527_v53, 23  ;;  %v4431_v32 = vadd.s32 536870912, %v4430_v10  ;;  %17988 = vst [vmem:[#allocation22_spill] sm:$0xff] %v15621_v14  ;;  %v17994_v0 = vld [vmem:[#allocation57_spill] sm:$0xff] }
 0x5e9   : > { %v4339_v15 = vshll.u32 %v15542_v29, %v4337_v52  ;;  %v4340_v57 = vshrl.u32 %v4322_v40, %v4338_v12  ;;  %v4343_v7 = vadd.s32 127, %v4342_v51  ;;  %v4567_v26 = vadd.s32 3, %v4563_v63  ;;  %v15624_v23 = vpop.eup %8867 }
 0x5ea   : > { %17989 = vst [vmem:[#allocation47_spill] sm:$0xff] %v15624_v23  ;;  %v6523_v27 = vshll.u32 %v15476_v58, %v15561_v49  ;;  %v4359_v3 = vadd.s32 3, %v4355_v5  ;;  %v4432_v34 = vshrl.u32 %v4431_v32, 30  ;;  %v4667_v59 = vsel %vm13995_vm3, 0, %v4665_v41  ;;  %v15630_v18 = vpop.eup %8869  ;;  %v17996_v32 = vld [vmem:[#allocation49_spill] sm:$0xff] }
 0x5eb   : > { %17991 = vst [vmem:[#allocation28_spill] sm:$0xff] %v15630_v18  ;;  %v4341_v60 = vor.u32 %v4340_v57, %v4339_v15  ;;  %v4344_v4 = vshll.u32 %v4343_v7, 23  ;;  %vm15635_vm14 = vcmp.le.f32.partialorder %v4370_v35, 0.7853982  ;;  %vm17316_vm11 = vcmp.lt.s32.totalorder %v17966_v38, 0  ;;  %v17995_v35 = vld [vmem:[#allocation68_spill] sm:$0xff] }
 0x5ec   : > { %v15640_v58 = vor.u32 %v6524_v42, %v6523_v27  ;;  %v4433_v49 = vshll.u32 %v4432_v34, 30  ;;  %v4671_v56 = vadd.s32 3, %v4667_v59  ;;  %v4768_v40 = vsub.s32 4, %v17994_v0  ;;  %v18000_v59 = vld [vmem:[#allocation72_spill] sm:$0xff] }
 0x5ed   : > { %v15643_v52 = vor.u32 4788187, %v6528_v61  ;;  %v4345_v28 = vor.u32 4788187, %v4344_v4  ;;  %v4456_v63 = vsub.s32 4, %v4432_v34  ;;  %v4568_v12 = vand.u32 3, %v4567_v26 }
 0x5ee   : > { %v15645_v51 = vand.u32 3, %v4359_v3  ;;  %v15647_v5 = vsub.s32 %v4430_v10, %v4433_v49  ;;  %v4571_v41 = vxor.u32 2147483648, %v17995_v35  ;;  %vm17997_vm3 = vcmp.lt.s32.totalorder %v17996_v32, 0  ;;  %v17998_v61 = vld [vmem:[#allocation67_spill] sm:$0xff]  ;;  %v17999_v10 = vld [vmem:[#allocation45_spill] sm:$0xff] }
 0x5ef   : > { %v4769_v42 = vsel %vm17997_vm3, %v4768_v40, %v17994_v0  ;;  %v4346_v15 = vand.u32 2147483647, %v4345_v28  ;;  %v4348_v57 = vcvt.s32.f32 %v4341_v60  ;;  %v4426_v7 = vadd.s32 %v15568_v33, %v15559_v24  ;;  %v18013_v60 = vld [vmem:[#allocation40_spill] sm:$0xff] }
 0x5f0   : > { %v4574_v27 = vxor.u32 2147483648, %v17998_v61  ;;  %v4436_v17 = vsub.s32 0, %v15647_v5  ;;  %v4672_v26 = vand.u32 3, %v4671_v56  ;;  %v4675_v3 = vxor.u32 2147483648, %v17999_v10 }
 0x5f1   : > { %v4678_v4 = vxor.u32 2147483648, %v18000_v59  ;;  %v4349_v49 = vmul.f32 %v4348_v57, %v4346_v15  ;;  %v4457_v0 = vsel %vm17316_vm11, %v4456_v63, %v4432_v34  ;;  %vm4570_vm2 = vcmp.eq.s32.totalorder %v4568_v12, 0  ;;  %v15664_v24 = vpop.eup %8871  ;;  %v18003_v15 = vld [vmem:[#allocation58_spill] sm:$0xff] }
 0x5f2   : > { %v4771_v40 = vsel %vm14125_vm9, 0, %v4769_v42  ;;  %18002 = vst [vmem:[#allocation53_spill] sm:$0xff] %v15664_v24  ;;  %v8083_v33 = vmin.u32 %v4436_v17, %v15647_v5  ;;  %vm4569_vm3 = vcmp.lt.s32.totalorder %v4568_v12, 2  ;;  %v4572_v28 = vsel %vm4570_vm2, %v17998_v61, %v4571_v41  ;;  %v18004_v61 = vld [vmem:[#allocation52_spill] sm:$0xff] }
 0x5f3   : > { %vm4573_vm4 = vcmp.eq.s32.totalorder %v4568_v12, 2  ;;  %v4350_v56 = vxor.u32 2147483648, %v4349_v49  ;;  %v4775_v23 = vadd.s32 3, %v4771_v40  ;;  %v4872_v57 = vsub.s32 4, %v18003_v15 }
 0x5f4   : > { %v4575_v53 = vsel %vm4573_vm4, %v4574_v27, %v17995_v35  ;;  %v4438_v47 = vclz %v8083_v33  ;;  %v4459_v34 = vsel %vm15635_vm14, 0, %v4457_v0  ;;  %vm4674_vm11 = vcmp.eq.s32.totalorder %v4672_v26, 0  ;;  %v18008_v33 = vld [vmem:[#allocation73_spill] sm:$0xff] }
 0x5f5   : > { %vm4677_vm9 = vcmp.eq.s32.totalorder %v4672_v26, 2  ;;  %v4351_v63 = vsel %vm4268_vm15, %v4350_v56, %v4349_v49  ;;  %v4676_v42 = vsel %vm4674_vm11, %v18000_v59, %v4675_v3  ;;  %vm18005_vm2 = vcmp.lt.s32.totalorder %v18004_v61, 0  ;;  %v18009_v56 = vld [vmem:[#allocation11_spill] sm:$0xff] }
 0x5f6   : > { %v4679_v41 = vsel %vm4677_vm9, %v4678_v4, %v17999_v10  ;;  %v4873_v35 = vsel %vm18005_vm2, %v4872_v57, %v18003_v15  ;;  %v4354_v27 = vsel %vm15577_vm12, %v17944_v6, %v4351_v63  ;;  %v8084_v17 = vadd.s32 4294967294, %v4438_v47  ;;  %v18010_v57 = vld [vmem:[#allocation48_spill] sm:$0xff] }
 0x5f7   : > { %v4576_v0 = vsel %vm4569_vm3, %v4572_v28, %v4575_v53  ;;  %v4875_v40 = vsel %vm14237_vm5, 0, %v4873_v35  ;;  %8873 = vcosq.f32 %v4354_v27  ;;  %v4463_v49 = vadd.s32 3, %v4459_v34  ;;  %v15699_v34 = vpop.f32.mrb[27].mxu0  ;;  %v18011_v35 = vld [vmem:[#allocation23_spill] sm:$0xff] }
 0x5f8   : > { %vm4673_vm15 = vcmp.lt.s32.totalorder %v4672_v26, 2  ;;  %v4776_v3 = vand.u32 3, %v4775_v23  ;;  %8875 = vsinq.f32 %v4354_v27  ;;  %vm8085_vm11 = vcmp.lt.s32.totalorder %v8084_v17, 0 }
 0x5f9   : > { %v4680_v59 = vsel %vm4673_vm15, %v4676_v42, %v4679_v41  ;;  %v4441_v4 = vsel %vm8085_vm11, 0, %v8084_v17  ;;  %vm18007_vm4 = vweird.f32 %v17982_v48  ;;  %vm4670_vm12 = vweird.f32 %v17986_v1  ;;  %v18012_v17 = vld [vmem:[#allocation44_spill] sm:$0xff] }
 0x5fa   : > { %v15688_v11 = vsel %vm18007_vm4, nan, %v4576_v0  ;;  %v4879_v47 = vadd.s32 3, %v4875_v40  ;;  %v4442_v53 = vsub.s32 32, %v4441_v4  ;;  %v4446_v12 = vsub.s32 4294967266, %v4441_v4 }
 0x5fb   : > { %v4779_v28 = vxor.u32 2147483648, %v18008_v33  ;;  %v4782_v26 = vxor.u32 2147483648, %v18009_v56  ;;  %v15693_v23 = vand.u32 3, %v4463_v49  ;;  %v15695_v15 = vsel %vm4670_vm12, nan, %v4680_v59 }
 0x5fc   : > { %vm4774_vm5 = vweird.f32 %v17996_v32  ;;  %vm4778_vm3 = vcmp.eq.s32.totalorder %v4776_v3, 0  ;;  %v4976_v48 = vsub.s32 4, %v18010_v57  ;;  %v4443_v1 = vshll.u32 %v15647_v5, %v4441_v4 }
 0x5fd   : > { %v4444_v63 = vshrl.u32 %v4426_v7, %v4442_v53  ;;  %v4447_v42 = vadd.s32 127, %v4446_v12  ;;  %v4880_v41 = vand.u32 3, %v4879_v47  ;;  %vm4781_vm9 = vcmp.eq.s32.totalorder %v4776_v3, 2  ;;  %v18016_v12 = vld [vmem:[#allocation70_spill] sm:$0xff] }
 0x5fe   : > { %v4883_v27 = vxor.u32 2147483648, %v18011_v35  ;;  %v4886_v0 = vxor.u32 2147483648, %v18012_v17  ;;  %vm18014_vm2 = vcmp.lt.s32.totalorder %v18013_v60, 0  ;;  %vm4362_vm15 = vcmp.eq.s32.totalorder %v15645_v51, 0 }
 0x5ff   : > { %v4977_v40 = vsel %vm18014_vm2, %v4976_v48, %v18010_v57  ;;  %vm4365_vm11 = vcmp.eq.s32.totalorder %v15645_v51, 2  ;;  %v4445_v49 = vor.u32 %v4444_v63, %v4443_v1  ;;  %v4448_v59 = vshll.u32 %v4447_v42, 23 }
 0x600   : > { %v4780_v5 = vsel %vm4778_vm3, %v18009_v56, %v4779_v28  ;;  %v4783_v7 = vsel %vm4781_vm9, %v4782_v26, %v18008_v33  ;;  %vm4777_vm4 = vcmp.lt.s32.totalorder %v4776_v3, 2  ;;  %v4979_v53 = vsel %vm14025_vm10, 0, %v4977_v40  ;;  %v18017_v33 = vld [vmem:[#allocation54_spill] sm:$0xff] }
 0x601   : > { %v5080_v10 = vsub.s32 4, %v18016_v12  ;;  %v4449_v57 = vor.u32 4788187, %v4448_v59  ;;  %vm4882_vm12 = vcmp.eq.s32.totalorder %v4880_v41, 0  ;;  %vm4885_vm2 = vcmp.eq.s32.totalorder %v4880_v41, 2  ;;  %v8874_v18 = vpop.eup %8873 }
 0x602   : > { %v4983_v48 = vadd.s32 3, %v4979_v53  ;;  %v4784_v1 = vsel %vm4777_vm4, %v4780_v5, %v4783_v7  ;;  %v4884_v63 = vsel %vm4882_vm12, %v18012_v17, %v4883_v27  ;;  %v4887_v28 = vsel %vm4885_vm2, %v4886_v0, %v18011_v35  ;;  %v8876_v3 = vpop.eup %8875  ;;  %v15727_v35 = vld [vmem:[%s16919_s2 + $0x1] ss:$0 sm:$0xff]  ;;  %v18021_v0 = vld [vmem:[#allocation63_spill] sm:$0xff]  ;;  %v18022_v7 = vld [vmem:[#allocation17_spill] sm:$0xff] }
 0x603   : > { %vm18018_vm3 = vcmp.lt.s32.totalorder %v18017_v33, 0  ;;  %v4366_v26 = vxor.u32 2147483648, %v8874_v18  ;;  %v4450_v42 = vand.u32 2147483647, %v4449_v57  ;;  %v4452_v40 = vcvt.s32.f32 %v4445_v49 }
 0x604   : > { %v5081_v56 = vsel %vm18018_vm3, %v5080_v10, %v18016_v12  ;;  %vm4361_vm10 = vcmp.lt.s32.totalorder %v15645_v51, 2  ;;  %v4363_v53 = vxor.u32 2147483648, %v8876_v3  ;;  %v4984_v4 = vand.u32 3, %v4983_v48  ;;  %v18023_v48 = vld [vmem:[#allocation26_spill] sm:$0xff]  ;;  %v15778_v51 = vpop.f32.mrb[28].mxu0 }
 0x605   : > { %v5083_v59 = vsel %vm14210_vm1, 0, %v5081_v56  ;;  %v15731_v10 = vadd.f32 %v15727_v35, %v15291_v46  ;;  %v4453_v27 = vmul.f32 %v4452_v40, %v4450_v42  ;;  %v15735_v17 = vsel %vm4774_vm5, nan, %v4784_v1 }
 0x606   : > { %v5087_v5 = vadd.s32 3, %v5083_v59  ;;  %vm4878_vm1 = vweird.f32 %v18004_v61  ;;  %v4987_v49 = vxor.u32 2147483648, %v18021_v0  ;;  %vm4881_vm9 = vcmp.lt.s32.totalorder %v4880_v41, 2  ;;  %v18024_v59 = vld [vmem:[#allocation14_spill] sm:$0xff]  ;;  %v18025_v41 = vld [vmem:[#allocation12_spill] sm:$0xff] }
 0x607   : > { %18020 = vst [vmem:[#allocation66_spill] sm:$0xff] %v15731_v10  ;;  %v4990_v12 = vxor.u32 2147483648, %v18022_v7  ;;  %v5091_v56 = vxor.u32 2147483648, %v18023_v48  ;;  %v4454_v47 = vxor.u32 2147483648, %v4453_v27  ;;  %v4888_v46 = vsel %vm4881_vm9, %v4884_v63, %v4887_v28 }
 0x608   : > { %v5088_v57 = vand.u32 3, %v5087_v5  ;;  %v5094_v42 = vxor.u32 2147483648, %v18024_v59  ;;  %v17320_v32 = vand.u32 2147483647, %v15731_v10  ;;  %v4364_v1 = vsel %vm4362_vm15, %v8874_v18, %v4363_v53 }
 0x609   : > { %v4367_v40 = vsel %vm4365_vm11, %v4366_v26, %v8876_v3  ;;  %vm4982_vm5 = vweird.f32 %v18013_v60  ;;  %vm4986_vm12 = vcmp.eq.s32.totalorder %v4984_v4, 0  ;;  %v5184_v5 = vsub.s32 4, %v18025_v41 }
 0x60a   : > { %vm18026_vm2 = vcmp.lt.s32.totalorder %v17966_v38, 0  ;;  %v4988_v63 = vsel %vm4986_vm12, %v18022_v7, %v4987_v49  ;;  %vm4989_vm3 = vcmp.eq.s32.totalorder %v4984_v4, 2  ;;  %vm5086_vm9 = vweird.f32 %v18017_v33 }
 0x60b   : > { %v4455_v25 = vsel %vm18026_vm2, %v4454_v47, %v4453_v27  ;;  %vm5090_vm4 = vcmp.eq.s32.totalorder %v5088_v57, 0  ;;  %v4991_v28 = vsel %vm4989_vm3, %v4990_v12, %v18021_v0  ;;  %vm5093_vm15 = vcmp.eq.s32.totalorder %v5088_v57, 2 }
 0x60c   : > { %v4458_v18 = vsel %vm15635_vm14, %v17966_v38, %v4455_v25  ;;  %v5092_v3 = vsel %vm5090_vm4, %v18024_v59, %v5091_v56  ;;  %v5095_v26 = vsel %vm5093_vm15, %v5094_v42, %v18023_v48  ;;  %v6973_v53 = vand.u32 2139095040, %v15731_v10  ;;  %v18027_v25 = vld [vmem:[#allocation55_spill] sm:$0xff]  ;;  %v18030_v42 = vld [vmem:[#allocation74_spill] sm:$0xff] }
 0x60d   : > { %8877 = vcosq.f32 %v4458_v18  ;;  %v6977_v27 = vand.u32 8388607, %v17320_v32  ;;  %v15765_v49 = vsel %vm4878_vm1, nan, %v4888_v46  ;;  %vm4985_vm11 = vcmp.lt.s32.totalorder %v4984_v4, 2 }
 0x60e   : > { %8879 = vsinq.f32 %v4458_v18  ;;  %vm18028_vm14 = vcmp.lt.s32.totalorder %v18027_v25, 0  ;;  %v4368_v0 = vsel %vm4361_vm10, %v4364_v1, %v4367_v40  ;;  %vm5089_vm4 = vcmp.lt.s32.totalorder %v5088_v57, 2  ;;  %v18031_v18 = vld [vmem:[#allocation6_spill] sm:$0xff] }
 0x60f   : > { %v5185_v29 = vsel %vm18028_vm14, %v5184_v5, %v18025_v41  ;;  %v6974_v7 = vshrl.u32 %v6973_v53, 23  ;;  %v4992_v56 = vsel %vm4985_vm11, %v4988_v63, %v4991_v28  ;;  %v5096_v47 = vsel %vm5089_vm4, %v5092_v3, %v5095_v26  ;;  %v18032_v41 = vld [vmem:[#allocation31_spill] sm:$0xff] }
 0x610   : > { %v5187_v48 = vsel %vm14525_vm8, 0, %v5185_v29  ;;  %v5288_v61 = vsub.s32 4, %v18030_v42  ;;  %vm4469_vm1 = vcmp.eq.s32.totalorder %v15693_v23, 2  ;;  %v6978_v46 = vor.u32 8388608, %v6977_v27  ;;  %v18034_v63 = vld [vmem:[#allocation71_spill] sm:$0xff] }
 0x611   : > { %v5191_v59 = vadd.s32 3, %v5187_v48  ;;  %v8182_v4 = vadd.s32 4294967169, %v6974_v7  ;;  %v5195_v32 = vxor.u32 2147483648, %v18031_v18  ;;  %v5198_v5 = vxor.u32 2147483648, %v18032_v41 }
 0x612   : > { %vm18033_vm10 = vweird.f32 %v17944_v6  ;;  %vm4466_vm8 = vcmp.eq.s32.totalorder %v15693_v23, 0  ;;  %vm18035_vm12 = vcmp.lt.s32.totalorder %v18034_v63, 0  ;;  %vm4465_vm2 = vcmp.lt.s32.totalorder %v15693_v23, 2 }
 0x613   : > { %v15782_v57 = vsel %vm18033_vm10, nan, %v4368_v0  ;;  %v5192_v40 = vand.u32 3, %v5191_v59  ;;  %v5289_v28 = vsel %vm18035_vm12, %v5288_v61, %v18030_v42  ;;  %v15793_v3 = vsel %vm4982_vm5, nan, %v4992_v56  ;;  %v18038_v42 = vld [vmem:[#allocation34_spill] sm:$0xff] }
 0x614   : > { %v6980_v26 = vadd.s32 1, %v8182_v4  ;;  %v5291_v53 = vsel %vm14749_vm6, 0, %v5289_v28  ;;  %v15799_v27 = vadd.f32 %v15727_v35, %v15472_v36  ;;  %vm4462_vm3 = vweird.f32 %v17966_v38  ;;  %v18037_v36 = vld [vmem:[#allocation39_spill] sm:$0xff]  ;;  %v18039_v28 = vld [vmem:[#allocation62_spill] sm:$0xff] }
 0x615   : > { %v15804_v29 = vsel %vm5086_vm9, nan, %v5096_v47  ;;  %vm5194_vm15 = vcmp.eq.s32.totalorder %v5192_v40, 0  ;;  %vm5197_vm11 = vcmp.eq.s32.totalorder %v5192_v40, 2  ;;  %v5295_v0 = vadd.s32 3, %v5291_v53 }
 0x616   : > { %vm6981_vm14 = vcmp.gt.s32.totalorder %v6980_v26, 0  ;;  %v15806_v60 = vshll.u32 %v6978_v46, 8  ;;  %v5196_v7 = vsel %vm5194_vm15, %v18032_v41, %v5195_v32  ;;  %v5199_v12 = vsel %vm5197_vm11, %v5198_v5, %v18031_v18 }
 0x617   : > { %v6982_v48 = vsel %vm6981_vm14, %v6980_v26, 0  ;;  %v15810_v56 = vand.u32 3, %v5295_v0  ;;  %v5299_v59 = vxor.u32 2147483648, %v18037_v36  ;;  %v5302_v61 = vxor.u32 2147483648, %v18038_v42  ;;  %v8878_v33 = vpop.eup %8877 }
 0x618   : > { %v6984_v47 = vand.u32 31, %v6982_v48  ;;  %vm5193_vm6 = vcmp.lt.s32.totalorder %v5192_v40, 2  ;;  %v8880_v46 = vpop.eup %8879  ;;  %v4470_v53 = vxor.u32 2147483648, %v8878_v33  ;;  %v6983_v1 = vshrl.u32 %v6982_v48, 5 }
 0x619   : > { %v5200_v32 = vsel %vm5193_vm6, %v5196_v7, %v5199_v12  ;;  %vm5298_vm5 = vcmp.eq.s32.totalorder %v15810_v56, 0  ;;  %v4467_v18 = vxor.u32 2147483648, %v8880_v46  ;;  %vm5301_vm9 = vcmp.eq.s32.totalorder %v15810_v56, 2 }
 0x61a   : > { %v6985_v41 = vsub.s32 32, %v6984_v47  ;;  %v6987_v5 = vshll.u32 %v17387_v19, %v6984_v47  ;;  %v6990_v26 = vshll.u32 %v17389_v43, %v6984_v47  ;;  %v4471_v40 = vsel %vm4469_vm1, %v4470_v53, %v8880_v46 }
 0x61b   : > { %v6993_v0 = vshll.u32 %v17390_v37, %v6984_v47  ;;  %v6996_v6 = vshll.u32 %v17395_v21, %v6984_v47  ;;  %v6999_v48 = vshll.u32 %v17769_v44, %v6984_v47  ;;  %v4468_v7 = vsel %vm4466_vm8, %v8878_v33, %v4467_v18 }
 0x61c   : > { %v6986_v12 = vshrl.u32 %v17387_v19, %v6985_v41  ;;  %v6988_v4 = vshrl.u32 %v17389_v43, %v6985_v41  ;;  %v6991_v8 = vshrl.u32 %v17390_v37, %v6985_v41  ;;  %v4472_v24 = vsel %vm4465_vm2, %v4468_v7, %v4471_v40 }
 0x61d   : > { %v6994_v46 = vshrl.u32 %v17395_v21, %v6985_v41  ;;  %v6997_v53 = vshrl.u32 %v17769_v44, %v6985_v41  ;;  %v7000_v62 = vshrl.u32 %v17770_v13, %v6985_v41  ;;  %vm5190_vm4 = vweird.f32 %v18027_v25 }
 0x61e   : > { %vm5294_vm1 = vweird.f32 %v18034_v63  ;;  %v4473_v33 = vsel %vm4462_vm3, nan, %v4472_v24  ;;  %v6989_v47 = vor.u32 %v6988_v4, %v6987_v5  ;;  %v6992_v18 = vor.u32 %v6991_v8, %v6990_v26 }
 0x61f   : > { %vm7002_vm10 = vcmp.lt.s32.totalorder %v6983_v1, 1  ;;  %v7594_v9 = vpack.c.bf16 %v4473_v33, %v15782_v57  ;;  %v6995_v23 = vor.u32 %v6994_v46, %v6993_v0  ;;  %v6998_v40 = vor.u32 %v6997_v53, %v6996_v6  ;;  %v18047_v33 = vld [vmem:[#allocation16_spill] sm:$0xff] }
 0x620   : > { %v7001_v7 = vor.u32 %v7000_v62, %v6999_v48  ;;  %vm7003_vm8 = vcmp.lt.s32.totalorder %v6983_v1, 2  ;;  %vm7004_vm12 = vcmp.lt.s32.totalorder %v6983_v1, 3  ;;  %vm7005_vm2 = vcmp.lt.s32.totalorder %v6983_v1, 4 }
 0x621   : > { %v7006_v16 = vsel %vm7002_vm10, %v6986_v12, %v6989_v47  ;;  %8329 = vmatprep.mubr.bf16.mxu1 %v7594_v9  ;;  %v7007_v41 = vsel %vm7005_vm2, %v6995_v23, 2102212464  ;;  %v7010_v45 = vsel %vm7002_vm10, %v6989_v47, %v6992_v18  ;;  %v7011_v14 = vsel %vm7005_vm2, %v6998_v40, 920167782 }
 0x622   : > { %v7014_v54 = vsel %vm7002_vm10, %v6992_v18, %v6995_v23  ;;  %vm17350_vm15 = vcmp.lt.s32.totalorder %v15153_v2, 0  ;;  %v18040_v8 = vpack.c.bf16 %v15695_v15, %v15688_v11  ;;  %v7008_v38 = vsel %vm7004_vm12, %v6992_v18, %v7007_v41 }
 0x623   : > { %v7012_v24 = vsel %vm7004_vm12, %v6995_v23, %v7011_v14  ;;  %v7015_v62 = vsel %vm7005_vm2, %v7001_v7, 1326507024  ;;  %v5300_v57 = vsel %vm5298_vm5, %v18038_v42, %v5299_v59  ;;  %v18041_v9 = vpack.c.bf16 %v15765_v49, %v15735_v17 }
 0x624   : > { %8330 = vmatmul.mubr.bf16.vlgmr.msra.gmra.mrb[0].mxu1 %v18040_v8  ;;  %v7013_v4 = vsel %vm7003_vm8, %v7010_v45, %v7012_v24  ;;  %v7016_v6 = vsel %vm7004_vm12, %v6998_v40, %v7015_v62  ;;  %vm5297_vm3 = vcmp.lt.s32.totalorder %v15810_v56, 2  ;;  %v5303_v11 = vsel %vm5301_vm9, %v5302_v61, %v18037_v36  ;;  %v18044_v61 = vld [vmem:[#allocation56_spill] sm:$0xff] }
 0x625   : > { %8333 = vmatprep.mubr.bf16.mxu1 %v18041_v9  ;;  %v7009_v14 = vsel %vm7003_vm8, %v7006_v16, %v7008_v38  ;;  %v7017_v15 = vsel %vm7003_vm8, %v7014_v54, %v7016_v6  ;;  %v15861_v59 = vmul.u32.u64.low %v15806_v60, %v7013_v4  ;;  %v15862_v42 = vmul.u32.u64.high %v15806_v60, %v7013_v4, %v15861_v59  ;;  %v18049_v40 = vld [vmem:[#allocation20_spill] sm:$0xff]  ;;  %v15896_v38 = vpop.f32.mrb[29].mxu0 }
 0x626   : > { %v15866_v17 = vmul.u32.u64.low %v15806_v60, %v7017_v15  ;;  %v15867_v45 = vmul.u32.u64.high %v15806_v60, %v7017_v15, %v15866_v17  ;;  %v5304_v49 = vsel %vm5297_vm3, %v5300_v57, %v5303_v11  ;;  %v6765_v5 = vand.u32 2139095040, %v15799_v27 }
 0x627   : > { %v5201_v56 = vsel %vm5190_vm4, nan, %v5200_v32  ;;  %v5305_v16 = vsel %vm5294_vm1, nan, %v5304_v49  ;;  %v18042_v54 = vand.u32 2147483647, %v15799_v27  ;;  %v18043_v36 = vsub.s32 4, %v18039_v28 }
 0x628   : > { %vm18045_vm11 = vcmp.lt.s32.totalorder %v18044_v61, 0  ;;  %v7597_v0 = vpack.c.bf16 %v15804_v29, %v15793_v3  ;;  %v7598_v48 = vpack.c.bf16 %v5305_v16, %v5201_v56  ;;  %v6766_v12 = vshrl.u32 %v6765_v5, 23 }
 0x629   : > { %v6769_v1 = vand.u32 8388607, %v18042_v54  ;;  %v5393_v26 = vsel %vm18045_vm11, %v18043_v36, %v18039_v28  ;;  %v7025_v63 = vmul.u32 %v15806_v60, %v7009_v14  ;;  %v7028_v32 = vadd.s32 1, %v15862_v42  ;;  %v18048_v28 = vld [vmem:[#allocation18_spill] sm:$0xff]  ;;  %v18050_v60 = vld [vmem:[#allocation64_spill] sm:$0xff] }
 0x62a   : > { %v5395_v25 = vsel %vm14330_vm0, 0, %v5393_v26  ;;  %v5496_v47 = vsub.s32 4, %v18047_v33  ;;  %vm7027_vm14 = vc.u32 %v15867_v45, %v15861_v59  ;;  %v8174_v18 = vadd.s32 4294967169, %v6766_v12 }
 0x62b   : > { %v5399_v53 = vadd.s32 3, %v5395_v25  ;;  %v5403_v23 = vxor.u32 2147483648, %v18048_v28  ;;  %v5406_v3 = vxor.u32 2147483648, %v18049_v40  ;;  %v7029_v29 = vsel %vm7027_vm14, %v7028_v32, %v15862_v42 }
 0x62c   : > { %8334 = vmatmul.mubr.bf16.gmra.mrb[4].mxu1 %v7597_v0  ;;  %v6770_v7 = vor.u32 8388608, %v6769_v1  ;;  %vm18051_vm0 = vcmp.lt.s32.totalorder %v18050_v60, 0  ;;  %v18052_v24 = vxor.u32 2147483648, %v15609_v20  ;;  %v7030_v57 = vadd.s32 %v7029_v29, %v7025_v63  ;;  %v18056_v1 = vld [vmem:[#allocation75_spill] sm:$0xff] }
 0x62d   : > { %v5400_v41 = vand.u32 3, %v5399_v53  ;;  %v5497_v8 = vsel %vm18051_vm0, %v5496_v47, %v18047_v33  ;;  %8337 = vmatprep.mubr.bf16.mxu1 %v7598_v48  ;;  %v6772_v9 = vadd.s32 1, %v8174_v18  ;;  %v6532_v11 = vcvt.s32.f32 %v15640_v58  ;;  %v18057_v48 = vld [vmem:[#allocation59_spill] sm:$0xff] }
 0x62e   : > { %v15903_v62 = vsel %vm17350_vm15, %v18052_v24, %v15609_v20  ;;  %v5499_v6 = vsel %vm14608_vm13, 0, %v5497_v8  ;;  %v7031_v15 = vadd.s32 536870912, %v7030_v57  ;;  %v18054_v20 = vand.u32 2147483647, %v15643_v52 }
 0x62f   : > { %vm5402_vm6 = vcmp.eq.s32.totalorder %v5400_v41, 0  ;;  %vm5405_vm5 = vcmp.eq.s32.totalorder %v5400_v41, 2  ;;  %v5503_v14 = vadd.s32 3, %v5499_v6  ;;  %vm6773_vm9 = vcmp.gt.s32.totalorder %v6772_v9, 0 }
 0x630   : > { %v5404_v42 = vsel %vm5402_vm6, %v18049_v40, %v5403_v23  ;;  %v5407_v17 = vsel %vm5405_vm5, %v5406_v3, %v18048_v28  ;;  %v15912_v49 = vmul.f32 %v6532_v11, %v18054_v20  ;;  %v6774_v5 = vsel %vm6773_vm9, %v6772_v9, 0 }
 0x631   : > { %v15914_v56 = vshll.u32 %v6770_v7, 8  ;;  %v5504_v16 = vand.u32 3, %v5503_v14  ;;  %v15916_v54 = vshrl.u32 %v7031_v15, 30  ;;  %v6776_v58 = vand.u32 31, %v6774_v5 }
 0x632   : > { %vm5401_vm13 = vcmp.lt.s32.totalorder %v5400_v41, 2  ;;  %v5507_v36 = vxor.u32 2147483648, %v18056_v1  ;;  %v15919_v26 = vshrl.u32 %v6774_v5, 5  ;;  %v5510_v12 = vxor.u32 2147483648, %v18057_v48 }
 0x633   : > { %18055 = vst [vmem:[#allocation27_spill] sm:$0xff] %v15916_v54  ;;  %v5408_v0 = vsel %vm5401_vm13, %v5404_v42, %v5407_v17  ;;  %vm5506_vm4 = vcmp.eq.s32.totalorder %v5504_v16, 0  ;;  %v7033_v52 = vshll.u32 %v15916_v54, 30  ;;  %v6777_v46 = vsub.s32 32, %v6776_v58 }
 0x634   : > { %vm5509_vm1 = vcmp.eq.s32.totalorder %v5504_v16, 2  ;;  %v15925_v25 = vadd.f32 %v15727_v35, %v15600_v31  ;;  %v6779_v63 = vshll.u32 %v17387_v19, %v6776_v58  ;;  %v6782_v32 = vshll.u32 %v17389_v43, %v6776_v58 }
 0x635   : > { %v6785_v53 = vshll.u32 %v17390_v37, %v6776_v58  ;;  %v6788_v33 = vshll.u32 %v17395_v21, %v6776_v58  ;;  %v15931_v47 = vsub.s32 %v7030_v57, %v7033_v52  ;;  %v6780_v18 = vshrl.u32 %v17389_v43, %v6777_v46 }
 0x636   : > { %18058 = vst [vmem:[#allocation57_spill] sm:$0xff] %v15925_v25  ;;  %v6783_v28 = vshrl.u32 %v17390_v37, %v6777_v46  ;;  %v6791_v23 = vshll.u32 %v17769_v44, %v6776_v58  ;;  %vm5505_vm10 = vcmp.lt.s32.totalorder %v5504_v16, 2  ;;  %v6786_v31 = vshrl.u32 %v17395_v21, %v6777_v46 }
 0x637   : > { %v6789_v40 = vshrl.u32 %v17769_v44, %v6777_v46  ;;  %v6792_v3 = vshrl.u32 %v17770_v13, %v6777_v46  ;;  %vm6794_vm8 = vcmp.lt.s32.totalorder %v15919_v26, 1  ;;  %vm5398_vm12 = vweird.f32 %v18044_v61 }
 0x638   : > { %vm5502_vm2 = vweird.f32 %v18050_v60  ;;  %v18059_v29 = vand.u32 2147483647, %v15153_v2  ;;  %v7036_v41 = vsub.s32 0, %v15931_v47  ;;  %v6778_v8 = vshrl.u32 %v17387_v19, %v6777_v46 }
 0x639   : > { %v6781_v24 = vor.u32 %v6780_v18, %v6779_v63  ;;  %v6784_v57 = vor.u32 %v6783_v28, %v6782_v32  ;;  %v6787_v9 = vor.u32 %v6786_v31, %v6785_v53  ;;  %v6790_v4 = vor.u32 %v6789_v40, %v6788_v33 }
 0x63a   : > { %vm15944_vm3 = vcmp.le.f32.partialorder %v18059_v29, 0.7853982  ;;  %v6793_v6 = vor.u32 %v6792_v3, %v6791_v23  ;;  %vm6795_vm11 = vcmp.lt.s32.totalorder %v15919_v26, 2  ;;  %v8183_v11 = vmin.u32 %v7036_v41, %v15931_v47 }
 0x63b   : > { %vm6796_vm14 = vcmp.lt.s32.totalorder %v15919_v26, 3  ;;  %vm6797_vm0 = vcmp.lt.s32.totalorder %v15919_v26, 4  ;;  %v6802_v14 = vsel %vm6794_vm8, %v6781_v24, %v6784_v57  ;;  %v6806_v17 = vsel %vm6794_vm8, %v6784_v57, %v6787_v9 }
 0x63c   : > { %v6799_v15 = vsel %vm6797_vm0, %v6787_v9, 2102212464  ;;  %v6803_v42 = vsel %vm6797_vm0, %v6790_v4, 920167782  ;;  %v6807_v20 = vsel %vm6797_vm0, %v6793_v6, 1326507024  ;;  %v7038_v5 = vclz %v8183_v11 }
 0x63d   : > { %v6804_v58 = vsel %vm6796_vm14, %v6787_v9, %v6803_v42  ;;  %v6808_v52 = vsel %vm6796_vm14, %v6790_v4, %v6807_v20  ;;  %v5508_v46 = vsel %vm5506_vm4, %v18057_v48, %v5507_v36  ;;  %v6798_v63 = vsel %vm6794_vm8, %v6778_v8, %v6781_v24 }
 0x63e   : > { %v6805_v32 = vsel %vm6795_vm11, %v6802_v14, %v6804_v58  ;;  %v6809_v53 = vsel %vm6795_vm11, %v6806_v17, %v6808_v52  ;;  %v5511_v33 = vsel %vm5509_vm1, %v5510_v12, %v18056_v1  ;;  %v8184_v18 = vadd.s32 4294967294, %v7038_v5 }
 0x63f   : > { %v6800_v28 = vsel %vm6796_vm14, %v6784_v57, %v6799_v15  ;;  %v15975_v23 = vmul.u32.u64.low %v15914_v56, %v6809_v53  ;;  %v15976_v31 = vmul.u32.u64.high %v15914_v56, %v6809_v53, %v15975_v23  ;;  %v5512_v40 = vsel %vm5505_vm10, %v5508_v46, %v5511_v33 }
 0x640   : > { %v15979_v36 = vmul.u32.u64.low %v15914_v56, %v6805_v32  ;;  %v15980_v48 = vmul.u32.u64.high %v15914_v56, %v6805_v32, %v15979_v36  ;;  %v17333_v3 = vand.u32 2147483647, %v15925_v25  ;;  %vm8185_vm6 = vcmp.lt.s32.totalorder %v8184_v18, 0 }
 0x641   : > { %v5409_v1 = vsel %vm5398_vm12, nan, %v5408_v0  ;;  %v5513_v12 = vsel %vm5502_vm2, nan, %v5512_v40  ;;  %v7077_v29 = vand.u32 2139095040, %v15925_v25  ;;  %v6746_v41 = vsel %vm15944_vm3, %v15153_v2, %v15903_v62 }
 0x642   : > { %v7041_v8 = vsel %vm8185_vm6, 0, %v8184_v18  ;;  %v6801_v16 = vsel %vm6795_vm11, %v6798_v63, %v6800_v28  ;;  %v7599_v24 = vpack.c.bf16 %v5513_v12, %v5409_v1  ;;  %v6534_v57 = vxor.u32 2147483648, %v15912_v49  ;;  %v18067_v12 = vld [vmem:[#allocation29_spill] sm:$0xff] }
 0x643   : > { %v7026_v61 = vadd.s32 %v15861_v59, %v15867_v45  ;;  %v7042_v0 = vsub.s32 32, %v7041_v8  ;;  %v7046_v60 = vsub.s32 4294967266, %v7041_v8  ;;  %vm6819_vm5 = vc.u32 %v15976_v31, %v15979_v36 }
 0x644   : > { %v6820_v9 = vadd.s32 1, %v15980_v48  ;;  %8338 = vmatmul.mubr.bf16.gmra.mrb[8].mxu1 %v7599_v24  ;;  %v7078_v4 = vshrl.u32 %v7077_v29, 23  ;;  %v7081_v62 = vand.u32 8388607, %v17333_v3  ;;  %v6817_v11 = vmul.u32 %v15914_v56, %v6801_v16 }
 0x645   : > { %v7044_v6 = vshrl.u32 %v7026_v61, %v7042_v0  ;;  %v7047_v26 = vadd.s32 127, %v7046_v60  ;;  %v16005_v14 = vadd.f32 %v15727_v35, %v15699_v34  ;;  %8881 = vsinq.f32 %v15605_v22 }
 0x646   : > { %v7043_v59 = vshll.u32 %v15931_v47, %v7041_v8  ;;  %v6821_v45 = vsel %vm6819_vm5, %v6820_v9, %v15980_v48  ;;  %v8186_v15 = vadd.s32 4294967169, %v7078_v4  ;;  %8883 = vcosq.f32 %v6746_v41 }
 0x647   : > { %18062 = vst [vmem:[#allocation68_spill] sm:$0xff] %v16005_v14  ;;  %vm17351_vm9 = vcmp.lt.s32.totalorder %v15219_v50, 0  ;;  %v7048_v42 = vshll.u32 %v7047_v26, 23  ;;  %v6822_v17 = vadd.s32 %v6821_v45, %v6817_v11  ;;  %v7082_v5 = vor.u32 8388608, %v7081_v62 }
 0x648   : > { %v6535_v56 = vsel %vm17351_vm9, %v6534_v57, %v15912_v49  ;;  %v7045_v20 = vor.u32 %v7044_v6, %v7043_v59  ;;  %v7084_v34 = vadd.s32 1, %v8186_v15  ;;  %v6869_v22 = vand.u32 2139095040, %v16005_v14  ;;  %v16045_v57 = vpop.f32.mrb[30].mxu0 }
 0x649   : > { %v7049_v58 = vor.u32 4788187, %v7048_v42  ;;  %v6823_v52 = vadd.s32 536870912, %v6822_v17  ;;  %v16017_v47 = vadd.f32 %v15727_v35, %v15778_v51  ;;  %8885 = vsinq.f32 %v6746_v41 }
 0x64a   : > { %v18064_v46 = vand.u32 2147483647, %v15219_v50  ;;  %vm7085_vm4 = vcmp.gt.s32.totalorder %v7084_v34, 0  ;;  %v17331_v49 = vand.u32 2147483647, %v16005_v14  ;;  %v7052_v51 = vcvt.s32.f32 %v7045_v20 }
 0x64b   : > { %18063 = vst [vmem:[#allocation49_spill] sm:$0xff] %v16017_v47  ;;  %v7050_v53 = vand.u32 2147483647, %v7049_v58  ;;  %v16031_v33 = vshrl.u32 %v6823_v52, 30  ;;  %v7086_v35 = vsel %vm7085_vm4, %v7084_v34, 0  ;;  %v16034_v18 = vadd.s32 %v15979_v36, %v15976_v31 }
 0x64c   : > { %vm16021_vm13 = vcmp.le.f32.partialorder %v18064_v46, 0.7853982  ;;  %v7088_v28 = vand.u32 31, %v7086_v35  ;;  %v16036_v23 = vshll.u32 %v7082_v5, 8  ;;  %v6870_v40 = vshrl.u32 %v6869_v22, 23 }
 0x64d   : > { %v16029_v32 = vsel %vm16021_vm13, %v15219_v50, %v6535_v56  ;;  %v6825_v48 = vshll.u32 %v16031_v33, 30  ;;  %v17332_v1 = vand.u32 2147483647, %v16017_v47  ;;  %v5600_v29 = vsub.s32 4, %v18067_v12 }
 0x64e   : > { %v7053_v41 = vmul.f32 %v7052_v51, %v7050_v53  ;;  %v7087_v8 = vshrl.u32 %v7086_v35, 5  ;;  %v7089_v16 = vsub.s32 32, %v7088_v28  ;;  %v16043_v24 = vand.u32 8388607, %v17331_v49 }
 0x64f   : > { %v16047_v31 = vsub.s32 %v6822_v17, %v6825_v48  ;;  %v7091_v36 = vshll.u32 %v17387_v19, %v7088_v28  ;;  %v7094_v61 = vshll.u32 %v17389_v43, %v7088_v28  ;;  %v7097_v0 = vshll.u32 %v17390_v37, %v7088_v28  ;;  %v16052_v60 = vpop.eup %8881 }
 0x650   : > { %vm17340_vm1 = vcmp.lt.s32.totalorder %v15731_v10, 0  ;;  %v7092_v9 = vshrl.u32 %v17389_v43, %v7089_v16  ;;  %v7095_v4 = vshrl.u32 %v17390_v37, %v7089_v16  ;;  %v7098_v62 = vshrl.u32 %v17395_v21, %v7089_v16  ;;  %v16059_v26 = vpop.eup %8883 }
 0x651   : > { %v7100_v6 = vshll.u32 %v17395_v21, %v7088_v28  ;;  %v6828_v11 = vsub.s32 0, %v16047_v31  ;;  %v7101_v59 = vshrl.u32 %v17769_v44, %v7089_v16  ;;  %v7103_v45 = vshll.u32 %v17769_v44, %v7088_v28 }
 0x652   : > { %v7104_v15 = vshrl.u32 %v17770_v13, %v7089_v16  ;;  %v7093_v42 = vor.u32 %v7092_v9, %v7091_v36  ;;  %v7096_v17 = vor.u32 %v7095_v4, %v7094_v61  ;;  %v7099_v56 = vor.u32 %v7098_v62, %v7097_v0 }
 0x653   : > { %v8178_v20 = vadd.s32 4294967169, %v6870_v40  ;;  %v18068_v5 = vand.u32 2147483647, %v15731_v10  ;;  %v18069_v34 = vmov 0  ;;  %v8175_v58 = vmin.u32 %v6828_v11, %v16047_v31  ;;  %v16073_v53 = vpop.eup %8885 }
 0x654   : > { %v7102_v52 = vor.u32 %v7101_v59, %v7100_v6  ;;  %v7105_v22 = vor.u32 %v7104_v15, %v7103_v45  ;;  %v6874_v46 = vor.u32 8388608, %v16043_v24  ;;  %v7054_v35 = vxor.u32 2147483648, %v7053_v41 }
 0x655   : > { %vm16067_vm10 = vcmp.le.f32.partialorder %v18068_v5, 0.7853982  ;;  %v7090_v51 = vshrl.u32 %v17387_v19, %v7089_v16  ;;  %vm7106_vm8 = vcmp.lt.s32.totalorder %v7087_v8, 1  ;;  %vm7107_vm12 = vcmp.lt.s32.totalorder %v7087_v8, 2 }
 0x656   : > { %v18070_v34 = vsel %vm16067_vm10, 4294967295, %v18069_v34  ;;  %v6830_v28 = vclz %v8175_v58  ;;  %vm7108_vm2 = vcmp.lt.s32.totalorder %v7087_v8, 3  ;;  %vm7109_vm11 = vcmp.lt.s32.totalorder %v7087_v8, 4 }
 0x657   : > { %18071 = vst [vmem:[#allocation67_spill] sm:$0xff] %v18070_v34  ;;  %v7114_v48 = vsel %vm7106_vm8, %v7093_v42, %v7096_v17  ;;  %v7111_v40 = vsel %vm7109_vm11, %v7099_v56, 2102212464  ;;  %v7115_v36 = vsel %vm7109_vm11, %v7102_v52, 920167782  ;;  %v7118_v61 = vsel %vm7106_vm8, %v7096_v17, %v7099_v56 }
 0x658   : > { %v7119_v0 = vsel %vm7109_vm11, %v7105_v22, 1326507024  ;;  %v8176_v9 = vadd.s32 4294967294, %v6830_v28  ;;  %v7110_v4 = vsel %vm7106_vm8, %v7090_v51, %v7093_v42  ;;  %v7116_v62 = vsel %vm7108_vm2, %v7099_v56, %v7115_v36 }
 0x659   : > { %v7120_v6 = vsel %vm7108_vm2, %v7102_v52, %v7119_v0  ;;  %v7112_v11 = vsel %vm7108_vm2, %v7096_v17, %v7111_v40  ;;  %v7117_v59 = vsel %vm7107_vm12, %v7114_v48, %v7116_v62  ;;  %v6876_v16 = vadd.s32 1, %v8178_v20 }
 0x65a   : > { %v7121_v45 = vsel %vm7107_vm12, %v7118_v61, %v7120_v6  ;;  %v7055_v15 = vsel %vm17340_vm1, %v7054_v35, %v7053_v41  ;;  %vm8177_vm14 = vcmp.lt.s32.totalorder %v8176_v9, 0  ;;  %v7113_v52 = vsel %vm7107_vm12, %v7110_v4, %v7112_v11 }
 0x65b   : > { %v16081_v5 = vmul.u32.u64.low %v16036_v23, %v7121_v45  ;;  %v16082_v58 = vmul.u32.u64.high %v16036_v23, %v7121_v45, %v16081_v5  ;;  %v6833_v49 = vsel %vm8177_vm14, 0, %v8176_v9  ;;  %vm6877_vm0 = vcmp.gt.s32.totalorder %v6876_v16, 0 }
 0x65c   : > { %v16085_v22 = vmul.u32.u64.low %v16036_v23, %v7117_v59  ;;  %v16086_v42 = vmul.u32.u64.high %v16036_v23, %v7117_v59, %v16085_v22  ;;  %v6834_v17 = vsub.s32 32, %v6833_v49  ;;  %v6838_v56 = vsub.s32 4294967266, %v6833_v49 }
 0x65d   : > { %v6878_v20 = vsel %vm6877_vm0, %v6876_v16, 0  ;;  %v16093_v41 = vsel %vm16067_vm10, %v15731_v10, %v7055_v15  ;;  %v7389_v51 = vand.u32 2139095040, %v16017_v47  ;;  %v16098_v28 = vand.u32 8388607, %v17332_v1 }
 0x65e   : > { %v6880_v35 = vand.u32 31, %v6878_v20  ;;  %v6835_v48 = vshll.u32 %v16047_v31, %v6833_v49  ;;  %v6836_v40 = vshrl.u32 %v16034_v18, %v6834_v17  ;;  %v6839_v36 = vadd.s32 127, %v6838_v56 }
 0x65f   : > { %vm7131_vm6 = vc.u32 %v16082_v58, %v16085_v22  ;;  %v7129_v8 = vmul.u32 %v16036_v23, %v7113_v52  ;;  %v7132_v61 = vadd.s32 1, %v16086_v42  ;;  %v6879_v0 = vshrl.u32 %v6878_v20, 5 }
 0x660   : > { %v6881_v9 = vsub.s32 32, %v6880_v35  ;;  %v6837_v4 = vor.u32 %v6836_v40, %v6835_v48  ;;  %v6840_v62 = vshll.u32 %v6839_v36, 23  ;;  %v6883_v6 = vshll.u32 %v17387_v19, %v6880_v35 }
 0x661   : > { %v6886_v11 = vshll.u32 %v17389_v43, %v6880_v35  ;;  %v7133_v49 = vsel %vm7131_vm6, %v7132_v61, %v16086_v42  ;;  %v6889_v59 = vshll.u32 %v17390_v37, %v6880_v35  ;;  %v6892_v15 = vshll.u32 %v17395_v21, %v6880_v35 }
 0x662   : > { %v6884_v18 = vshrl.u32 %v17389_v43, %v6881_v9  ;;  %v6887_v31 = vshrl.u32 %v17390_v37, %v6881_v9  ;;  %v6841_v45 = vor.u32 4788187, %v6840_v62  ;;  %v7134_v23 = vadd.s32 %v7133_v49, %v7129_v8 }
 0x663   : > { %v6890_v16 = vshrl.u32 %v17395_v21, %v6881_v9  ;;  %v6893_v56 = vshrl.u32 %v17769_v44, %v6881_v9  ;;  %v6895_v52 = vshll.u32 %v17769_v44, %v6880_v35  ;;  %v6896_v40 = vshrl.u32 %v17770_v13, %v6881_v9 }
 0x664   : > { %v6885_v5 = vor.u32 %v6884_v18, %v6883_v6  ;;  %v6888_v17 = vor.u32 %v6887_v31, %v6886_v11  ;;  %v6842_v20 = vand.u32 2147483647, %v6841_v45  ;;  %v7135_v42 = vadd.s32 536870912, %v7134_v23 }
 0x665   : > { %v6891_v48 = vor.u32 %v6890_v16, %v6889_v59  ;;  %v6844_v36 = vcvt.s32.f32 %v6837_v4  ;;  %v6894_v61 = vor.u32 %v6893_v56, %v6892_v15  ;;  %vm6898_vm5 = vcmp.lt.s32.totalorder %v6879_v0, 1  ;;  %v16127_v15 = vpop.f32.mrb[31].mxu0 }
 0x666   : > { %v6914_v8 = vshll.u32 %v6874_v46, 8  ;;  %v16119_v62 = vshrl.u32 %v7135_v42, 30  ;;  %v6897_v49 = vor.u32 %v6896_v40, %v6895_v52  ;;  %vm6900_vm4 = vcmp.lt.s32.totalorder %v6879_v0, 3 }
 0x667   : > { %vm6901_vm8 = vcmp.lt.s32.totalorder %v6879_v0, 4  ;;  %v6845_v6 = vmul.f32 %v6844_v36, %v6842_v20  ;;  %v6906_v35 = vsel %vm6898_vm5, %v6885_v5, %v6888_v17  ;;  %v6882_v59 = vshrl.u32 %v17387_v19, %v6881_v9 }
 0x668   : > { %18072 = vst [vmem:[#allocation45_spill] sm:$0xff] %v16119_v62  ;;  %v6903_v11 = vsel %vm6901_vm8, %v6891_v48, 2102212464  ;;  %v6907_v18 = vsel %vm6901_vm8, %v6894_v61, 920167782  ;;  %v7137_v31 = vshll.u32 %v16119_v62, 30  ;;  %v6910_v46 = vsel %vm6898_vm5, %v6888_v17, %v6891_v48 }
 0x669   : > { %vm6899_vm12 = vcmp.lt.s32.totalorder %v6879_v0, 2  ;;  %v6908_v4 = vsel %vm6900_vm4, %v6891_v48, %v6907_v18  ;;  %v6911_v45 = vsel %vm6901_vm8, %v6897_v49, 1326507024  ;;  %v7390_v16 = vshrl.u32 %v7389_v51, 23 }
 0x66a   : > { %v6909_v24 = vsel %vm6899_vm12, %v6906_v35, %v6908_v4  ;;  %v16129_v56 = vsub.s32 %v7134_v23, %v7137_v31  ;;  %v6902_v52 = vsel %vm6898_vm5, %v6882_v59, %v6885_v5  ;;  %v6904_v20 = vsel %vm6900_vm4, %v6888_v17, %v6903_v11 }
 0x66b   : > { %v6912_v42 = vsel %vm6900_vm4, %v6894_v61, %v6911_v45  ;;  %v6846_v9 = vxor.u32 2147483648, %v6845_v6  ;;  %v16135_v36 = vmul.u32.u64.low %v6914_v8, %v6909_v24  ;;  %v16136_v18 = vmul.u32.u64.high %v6914_v8, %v6909_v24, %v16135_v36 }
 0x66c   : > { %v6913_v40 = vsel %vm6899_vm12, %v6910_v46, %v6912_v42  ;;  %8887 = vcosq.f32 %v16029_v32  ;;  %v7140_v51 = vsub.s32 0, %v16129_v56  ;;  %v6905_v5 = vsel %vm6899_vm12, %v6902_v52, %v6904_v20  ;;  %v18078_v52 = vld [vmem:[#allocation79_spill] sm:$0xff] }
 0x66d   : > { %v16141_v48 = vmul.u32.u64.low %v6914_v8, %v6913_v40  ;;  %v16142_v23 = vmul.u32.u64.high %v6914_v8, %v6913_v40, %v16141_v48  ;;  %8889 = vsinq.f32 %v16029_v32  ;;  %v8198_v17 = vadd.s32 4294967169, %v7390_v16  ;;  %v18079_v40 = vld [vmem:[#allocation78_spill] sm:$0xff] }
 0x66e   : > { %vm18073_vm2 = vcmp.lt.s32.totalorder %v14277_v30, 0  ;;  %8891 = vcosq.f32 %v16093_v41  ;;  %vm17349_vm11 = vcmp.lt.s32.totalorder %v15799_v27, 0  ;;  %v8187_v49 = vmin.u32 %v7140_v51, %v16129_v56  ;;  %v18080_v48 = vld [vmem:[#allocation51_spill] sm:$0xff] }
 0x66f   : > { %v5601_v61 = vsel %vm18073_vm2, %v5600_v29, %v18067_v12  ;;  %vm18074_vm14 = vnez %v17899_v55  ;;  %v6847_v32 = vsel %vm17349_vm11, %v6846_v9, %v6845_v6  ;;  %v6924_v0 = vadd.s32 1, %v16136_v18 }
 0x670   : > { %v5603_v11 = vsel %vm18074_vm14, 0, %v5601_v61  ;;  %v7394_v35 = vor.u32 8388608, %v16098_v28  ;;  %v7396_v31 = vadd.s32 1, %v8198_v17  ;;  %v7142_v59 = vclz %v8187_v49 }
 0x671   : > { %v6921_v4 = vmul.u32 %v6914_v8, %v6905_v5  ;;  %vm6923_vm0 = vc.u32 %v16142_v23, %v16135_v36  ;;  %v5607_v12 = vadd.s32 3, %v5603_v11  ;;  %8893 = vsinq.f32 %v16093_v41 }
 0x672   : > { %v18075_v29 = vand.u32 2147483647, %v15799_v27  ;;  %v6925_v6 = vsel %vm6923_vm0, %v6924_v0, %v16136_v18  ;;  %vm7397_vm5 = vcmp.gt.s32.totalorder %v7396_v31, 0  ;;  %v7130_v28 = vadd.s32 %v16085_v22, %v16082_v58 }
 0x673   : > { %v8188_v24 = vadd.s32 4294967294, %v7142_v59  ;;  %v6926_v8 = vadd.s32 %v6925_v6, %v6921_v4  ;;  %v7398_v46 = vsel %vm7397_vm5, %v7396_v31, 0  ;;  %v16177_v16 = vshll.u32 %v7394_v35, 8 }
 0x674   : > { %vm16165_vm6 = vcmp.le.f32.partialorder %v18075_v29, 0.7853982  ;;  %v7400_v41 = vand.u32 31, %v7398_v46  ;;  %v16180_v9 = vand.u32 3, %v5607_v12  ;;  %v7399_v22 = vshrl.u32 %v7398_v46, 5 }
 0x675   : > { %v16175_v45 = vsel %vm16165_vm6, %v15799_v27, %v6847_v32  ;;  %vm8189_vm4 = vcmp.lt.s32.totalorder %v8188_v24, 0  ;;  %v6927_v42 = vadd.s32 536870912, %v6926_v8  ;;  %v6758_v7 = vxor.u32 2147483648, %v16059_v26 }
 0x676   : > { %v7145_v58 = vsel %vm8189_vm4, 0, %v8188_v24  ;;  %v7401_v51 = vsub.s32 32, %v7400_v41  ;;  %v16184_v17 = vpop.eup %8887  ;;  %v7403_v32 = vshll.u32 %v17387_v19, %v7400_v41  ;;  %v7406_v31 = vshll.u32 %v17389_v43, %v7400_v41 }
 0x677   : > { %v7146_v61 = vsub.s32 32, %v7145_v58  ;;  %v7150_v49 = vsub.s32 4294967266, %v7145_v58  ;;  %v16186_v11 = vshrl.u32 %v6927_v42, 30  ;;  %v16189_v0 = vpop.eup %8889  ;;  %v7409_v4 = vshll.u32 %v17390_v37, %v7400_v41 }
 0x678   : > { %v7404_v35 = vshrl.u32 %v17389_v43, %v7401_v51  ;;  %v7407_v59 = vshrl.u32 %v17390_v37, %v7401_v51  ;;  %v16195_v12 = vpop.eup %8891  ;;  %v7410_v46 = vshrl.u32 %v17395_v21, %v7401_v51  ;;  %v7147_v42 = vshll.u32 %v16129_v56, %v7145_v58 }
 0x679   : > { %18081 = vst [vmem:[#allocation72_spill] sm:$0xff] %v16195_v12  ;;  %v7148_v29 = vshrl.u32 %v7130_v28, %v7146_v61  ;;  %v7151_v6 = vadd.s32 127, %v7150_v49  ;;  %v6929_v24 = vshll.u32 %v16186_v11, 30  ;;  %v7412_v3 = vshll.u32 %v17395_v21, %v7400_v41 }
 0x67a   : > { %v7405_v1 = vor.u32 %v7404_v35, %v7403_v32  ;;  %v7413_v5 = vshrl.u32 %v17769_v44, %v7401_v51  ;;  %v7408_v62 = vor.u32 %v7407_v59, %v7406_v31  ;;  %v7411_v34 = vor.u32 %v7410_v46, %v7409_v4 }
 0x67b   : > { %v7152_v18 = vshll.u32 %v7151_v6, 23  ;;  %v16202_v20 = vsub.s32 %v6926_v8, %v6929_v24  ;;  %v16204_v10 = vpop.eup %8893  ;;  %v7402_v28 = vshrl.u32 %v17387_v19, %v7401_v51  ;;  %v7415_v49 = vshll.u32 %v17769_v44, %v7400_v41 }
 0x67c   : > { %18082 = vst [vmem:[#allocation15_spill] sm:$0xff] %v16204_v10  ;;  %v7414_v61 = vor.u32 %v7413_v5, %v7412_v3  ;;  %v7416_v12 = vshrl.u32 %v17770_v13, %v7401_v51  ;;  %v7149_v56 = vor.u32 %v7148_v29, %v7147_v42  ;;  %vm7418_vm8 = vcmp.lt.s32.totalorder %v7399_v22, 1 }
 0x67d   : > { %v7153_v58 = vor.u32 4788187, %v7152_v18  ;;  %v6932_v32 = vsub.s32 0, %v16202_v20  ;;  %vm7420_vm12 = vcmp.lt.s32.totalorder %v7399_v22, 3  ;;  %vm7421_vm2 = vcmp.lt.s32.totalorder %v7399_v22, 4 }
 0x67e   : > { %v7417_v35 = vor.u32 %v7416_v12, %v7415_v49  ;;  %v7422_v8 = vsel %vm7418_vm8, %v7402_v28, %v7405_v1  ;;  %v7423_v4 = vsel %vm7421_vm2, %v7411_v34, 2102212464  ;;  %v7426_v6 = vsel %vm7418_vm8, %v7405_v1, %v7408_v62 }
 0x67f   : > { %v7154_v31 = vand.u32 2147483647, %v7153_v58  ;;  %v8179_v59 = vmin.u32 %v6932_v32, %v16202_v20  ;;  %v7424_v3 = vsel %vm7420_vm12, %v7408_v62, %v7423_v4  ;;  %v7427_v5 = vsel %vm7421_vm2, %v7414_v61, 920167782 }
 0x680   : > { %v7430_v41 = vsel %vm7418_vm8, %v7408_v62, %v7411_v34  ;;  %v7431_v24 = vsel %vm7421_vm2, %v7417_v35, 1326507024  ;;  %v7156_v51 = vcvt.s32.f32 %v7149_v56  ;;  %vm7419_vm14 = vcmp.lt.s32.totalorder %v7399_v22, 2 }
 0x681   : > { %v6934_v29 = vclz %v8179_v59  ;;  %v7428_v18 = vsel %vm7420_vm12, %v7411_v34, %v7427_v5  ;;  %v7432_v12 = vsel %vm7420_vm12, %v7414_v61, %v7431_v24  ;;  %vm5610_vm0 = vcmp.eq.s32.totalorder %v16180_v9, 0 }
 0x682   : > { %v7429_v46 = vsel %vm7419_vm14, %v7426_v6, %v7428_v18  ;;  %vm5613_vm5 = vcmp.eq.s32.totalorder %v16180_v9, 2  ;;  %vm17346_vm4 = vcmp.lt.s32.totalorder %v15925_v25, 0  ;;  %v7157_v1 = vmul.f32 %v7156_v51, %v7154_v31  ;;  %v18086_v31 = vld [vmem:[#allocation4_spill] sm:$0xff] }
 0x683   : > { %v8180_v42 = vadd.s32 4294967294, %v6934_v29  ;;  %v7425_v28 = vsel %vm7419_vm14, %v7422_v8, %v7424_v3  ;;  %v7433_v49 = vsel %vm7419_vm14, %v7430_v41, %v7432_v12  ;;  %vm5606_vm8 = vweird.f32 %v14277_v30  ;;  %v18088_v3 = vld [vmem:[#allocation81_spill] sm:$0xff] }
 0x684   : > { %v16219_v62 = vmul.u32.u64.low %v16177_v16, %v7433_v49  ;;  %v16220_v56 = vmul.u32.u64.high %v16177_v16, %v7433_v49, %v16219_v62  ;;  %v16223_v34 = vmul.u32.u64.low %v16177_v16, %v7429_v46  ;;  %v16224_v22 = vmul.u32.u64.high %v16177_v16, %v7429_v46, %v16223_v34 }
 0x685   : > { %vm8181_vm12 = vcmp.lt.s32.totalorder %v8180_v42, 0  ;;  %v18083_v61 = vxor.u32 2147483648, %v18078_v52  ;;  %v18084_v32 = vxor.u32 2147483648, %v18079_v40  ;;  %v18085_v8 = vsub.s32 4, %v18080_v48  ;;  %v16261_v62 = vld [vmem:[%s16919_s2 + $0x1] ss:$0 sm:$0xff] }
 0x686   : > { %vm18087_vm2 = vcmp.lt.s32.totalorder %v18086_v31, 0  ;;  %v6922_v4 = vadd.s32 %v16135_v36, %v16142_v23  ;;  %v6937_v6 = vsel %vm8181_vm12, 0, %v8180_v42  ;;  %vm5609_vm14 = vcmp.lt.s32.totalorder %v16180_v9, 2  ;;  %v18094_v9 = vld [vmem:[#allocation90_spill] sm:$0xff] }
 0x687   : > { %v5612_v58 = vsel %vm5610_vm0, %v18079_v40, %v18083_v61  ;;  %v5615_v35 = vsel %vm5613_vm5, %v18084_v32, %v18078_v52  ;;  %v5705_v59 = vsel %vm18087_vm2, %v18085_v8, %v18080_v48  ;;  %vm18089_vm1 = vnez %v18088_v3 }
 0x688   : > { %v5707_v5 = vsel %vm18089_vm1, 0, %v5705_v59  ;;  %v7158_v41 = vxor.u32 2147483648, %v7157_v1  ;;  %v6938_v24 = vsub.s32 32, %v6937_v6  ;;  %v6942_v51 = vsub.s32 4294967266, %v6937_v6 }
 0x689   : > { %v7441_v52 = vmul.u32 %v16177_v16, %v7425_v28  ;;  %v18090_v40 = vand.u32 2147483647, %v15925_v25  ;;  %v18091_v29 = vmov 0  ;;  %vm7443_vm5 = vc.u32 %v16220_v56, %v16223_v34  ;;  %v18095_v28 = vld [vmem:[#allocation89_spill] sm:$0xff] }
 0x68a   : > { %v7444_v36 = vadd.s32 1, %v16224_v22  ;;  %v5616_v23 = vsel %vm5609_vm14, %v5612_v58, %v5615_v35  ;;  %vm5710_vm12 = vweird.f32 %v18086_v31  ;;  %v5715_v48 = vxor.u32 2147483648, %v18094_v9  ;;  %v18096_v58 = vld [vmem:[#allocation33_spill] sm:$0xff] }
 0x68b   : > { %vm16246_vm0 = vcmp.le.f32.partialorder %v18090_v40, 0.7853982  ;;  %v6939_v18 = vshll.u32 %v16202_v20, %v6937_v6  ;;  %v6940_v46 = vshrl.u32 %v6922_v4, %v6938_v24  ;;  %v6943_v16 = vadd.s32 127, %v6942_v51  ;;  %v18097_v51 = vld [vmem:[#allocation65_spill] sm:$0xff] }
 0x68c   : > { %v18092_v29 = vsel %vm16246_vm0, 4294967295, %v18091_v29  ;;  %v5711_v12 = vadd.s32 3, %v5707_v5  ;;  %v7445_v42 = vsel %vm7443_vm5, %v7444_v36, %v16224_v22  ;;  %v5718_v49 = vxor.u32 2147483648, %v18095_v28 }
 0x68d   : > { %18093 = vst [vmem:[#allocation58_spill] sm:$0xff] %v18092_v29  ;;  %v16265_v61 = vadd.f32 %v16261_v62, %v15896_v38  ;;  %v5808_v32 = vsub.s32 4, %v18096_v58  ;;  %v6941_v35 = vor.u32 %v6940_v46, %v6939_v18  ;;  %v6944_v20 = vshll.u32 %v6943_v16, 23  ;;  %v18100_v16 = vld [vmem:[#allocation37_spill] sm:$0xff] }
 0x68e   : > { %v7446_v8 = vadd.s32 %v7445_v42, %v7441_v52  ;;  %v5712_v59 = vand.u32 3, %v5711_v12  ;;  %v7159_v22 = vsel %vm17346_vm4, %v7158_v41, %v7157_v1  ;;  %v5617_v4 = vsel %vm5606_vm8, nan, %v5616_v23 }
 0x68f   : > { %v17341_v6 = vand.u32 2147483647, %v16265_v61  ;;  %v7181_v3 = vand.u32 2139095040, %v16265_v61  ;;  %v6945_v5 = vor.u32 4788187, %v6944_v20  ;;  %v6948_v24 = vcvt.s32.f32 %v6941_v35 }
 0x690   : > { %v7447_v38 = vadd.s32 536870912, %v7446_v8  ;;  %vm18098_vm1 = vcmp.lt.s32.totalorder %v18097_v51, 0  ;;  %vm5713_vm2 = vcmp.lt.s32.totalorder %v5712_v59, 2  ;;  %vm5714_vm14 = vcmp.eq.s32.totalorder %v5712_v59, 0 }
 0x691   : > { %v5809_v40 = vsel %vm18098_vm1, %v5808_v32, %v18096_v58  ;;  %vm5717_vm5 = vcmp.eq.s32.totalorder %v5712_v59, 2  ;;  %v7182_v52 = vshrl.u32 %v7181_v3, 23  ;;  %v6946_v36 = vand.u32 2147483647, %v6945_v5 }
 0x692   : > { %v16277_v1 = vshrl.u32 %v7447_v38, 30  ;;  %v5716_v30 = vsel %vm5714_vm14, %v18095_v28, %v5715_v48  ;;  %v5719_v41 = vsel %vm5717_vm5, %v5718_v49, %v18094_v9  ;;  %v7185_v46 = vand.u32 8388607, %v17341_v6 }
 0x693   : > { %v5720_v23 = vsel %vm5713_vm2, %v5716_v30, %v5719_v41  ;;  %v8190_v18 = vadd.s32 4294967169, %v7182_v52  ;;  %vm18101_vm8 = vnez %v18100_v16  ;;  %v7162_v42 = vsel %vm16246_vm0, %v15925_v25, %v7159_v22 }
 0x694   : > { %18099 = vst [vmem:[#allocation52_spill] sm:$0xff] %v16277_v1  ;;  %v5811_v12 = vsel %vm18101_vm8, 0, %v5809_v40  ;;  %v6949_v58 = vmul.f32 %v6948_v24, %v6946_v36  ;;  %v7449_v32 = vshll.u32 %v16277_v1, 30  ;;  %v5721_v48 = vsel %vm5710_vm12, nan, %v5720_v23  ;;  %v18103_v40 = vld [vmem:[#allocation38_spill] sm:$0xff] }
 0x695   : > { %8895 = vcosq.f32 %v16175_v45  ;;  %v7600_v9 = vpack.c.bf16 %v5721_v48, %v5617_v4  ;;  %v7188_v28 = vadd.s32 1, %v8190_v18  ;;  %v5815_v49 = vadd.s32 3, %v5811_v12  ;;  %v18104_v36 = vld [vmem:[#allocation46_spill] sm:$0xff] }
 0x696   : > { %8897 = vsinq.f32 %v16175_v45  ;;  %v16293_v35 = vsub.s32 %v7446_v8, %v7449_v32  ;;  %v7186_v20 = vor.u32 8388608, %v7185_v46  ;;  %v6950_v59 = vxor.u32 2147483648, %v6949_v58  ;;  %v18102_v45 = vld [vmem:[#allocation19_spill] sm:$0xff] }
 0x697   : > { %8899 = vcosq.f32 %v7162_v42  ;;  %8341 = vmatprep.mubr.bf16.mxu1 %v7600_v9  ;;  %vm7189_vm1 = vcmp.gt.s32.totalorder %v7188_v28, 0  ;;  %vm17348_vm2 = vcmp.lt.s32.totalorder %v16005_v14, 0  ;;  %v7442_v4 = vadd.s32 %v16223_v34, %v16220_v56 }
 0x698   : > { %8901 = vsinq.f32 %v7162_v42  ;;  %v7452_v31 = vsub.s32 0, %v16293_v35  ;;  %v7190_v22 = vsel %vm7189_vm1, %v7188_v28, 0  ;;  %v16299_v5 = vand.u32 3, %v5815_v49 }
 0x699   : > { %v7192_v3 = vand.u32 31, %v7190_v22  ;;  %v16303_v38 = vshll.u32 %v7186_v20, 8  ;;  %v5912_v30 = vsub.s32 4, %v18104_v36  ;;  %v16309_v41 = vsel %vm17348_vm2, %v6950_v59, %v6949_v58 }
 0x69a   : > { %v8199_v24 = vmin.u32 %v7452_v31, %v16293_v35  ;;  %v7191_v23 = vshrl.u32 %v7190_v22, 5  ;;  %vm5817_vm4 = vcmp.lt.s32.totalorder %v16299_v5, 2  ;;  %vm5814_vm2 = vweird.f32 %v18097_v51 }
 0x69b   : > { %v7193_v18 = vsub.s32 32, %v7192_v3  ;;  %v7195_v56 = vshll.u32 %v17387_v19, %v7192_v3  ;;  %v7198_v46 = vshll.u32 %v17389_v43, %v7192_v3  ;;  %v7201_v16 = vshll.u32 %v17390_v37, %v7192_v3 }
 0x69c   : > { %v7454_v34 = vclz %v8199_v24  ;;  %v7204_v12 = vshll.u32 %v17395_v21, %v7192_v3  ;;  %v7207_v58 = vshll.u32 %v17769_v44, %v7192_v3  ;;  %vm7210_vm12 = vcmp.lt.s32.totalorder %v7191_v23, 1 }
 0x69d   : > { %v7196_v42 = vshrl.u32 %v17389_v43, %v7193_v18  ;;  %v7199_v32 = vshrl.u32 %v17390_v37, %v7193_v18  ;;  %v7202_v48 = vshrl.u32 %v17395_v21, %v7193_v18  ;;  %v7194_v28 = vshrl.u32 %v17387_v19, %v7193_v18 }
 0x69e   : > { %v8200_v9 = vadd.s32 4294967294, %v7454_v34  ;;  %v7205_v49 = vshrl.u32 %v17769_v44, %v7193_v18  ;;  %v7208_v20 = vshrl.u32 %v17770_v13, %v7193_v18  ;;  %vm7211_vm5 = vcmp.lt.s32.totalorder %v7191_v23, 2 }
 0x69f   : > { %v16322_v59 = vpop.eup %8895  ;;  %v7197_v31 = vor.u32 %v7196_v42, %v7195_v56  ;;  %v7200_v22 = vor.u32 %v7199_v32, %v7198_v46  ;;  %v7203_v24 = vor.u32 %v7202_v48, %v7201_v16  ;;  %vm7212_vm8 = vcmp.lt.s32.totalorder %v7191_v23, 3 }
 0x6a0   : > { %v16324_v6 = vpop.eup %8897  ;;  %vm8201_vm14 = vcmp.lt.s32.totalorder %v8200_v9, 0  ;;  %v7206_v52 = vor.u32 %v7205_v49, %v7204_v12  ;;  %v7209_v8 = vor.u32 %v7208_v20, %v7207_v58  ;;  %vm7213_vm1 = vcmp.lt.s32.totalorder %v7191_v23, 4 }
 0x6a1   : > { %v16326_v3 = vpop.eup %8899  ;;  %v7457_v34 = vsel %vm8201_vm14, 0, %v8200_v9  ;;  %v7214_v1 = vsel %vm7210_vm12, %v7194_v28, %v7197_v31  ;;  %v7215_v46 = vsel %vm7213_vm1, %v7203_v24, 2102212464  ;;  %v7218_v16 = vsel %vm7210_vm12, %v7197_v31, %v7200_v22 }
 0x6a2   : > { %18105 = vst [vmem:[#allocation35_spill] sm:$0xff] %v16326_v3  ;;  %v16329_v18 = vpop.eup %8901  ;;  %v7458_v29 = vsub.s32 32, %v7457_v34  ;;  %v7462_v56 = vsub.s32 4294967266, %v7457_v34  ;;  %v7216_v42 = vsel %vm7212_vm8, %v7200_v22, %v7215_v46  ;;  %v7219_v32 = vsel %vm7213_vm1, %v7206_v52, 920167782 }
 0x6a3   : > { %18106 = vst [vmem:[#allocation73_spill] sm:$0xff] %v16329_v18  ;;  %v7222_v12 = vsel %vm7210_vm12, %v7200_v22, %v7203_v24  ;;  %v7223_v48 = vsel %vm7213_vm1, %v7209_v8, 1326507024  ;;  %v18107_v58 = vand.u32 2147483647, %v16005_v14  ;;  %v18108_v9 = vmov 0 }
 0x6a4   : > { %v7459_v28 = vshll.u32 %v16293_v35, %v7457_v34  ;;  %v7460_v49 = vshrl.u32 %v7442_v4, %v7458_v29  ;;  %v7463_v20 = vadd.s32 127, %v7462_v56  ;;  %v7220_v3 = vsel %vm7212_vm8, %v7203_v24, %v7219_v32 }
 0x6a5   : > { %vm16336_vm14 = vcmp.le.f32.partialorder %v18107_v58, 0.7853982  ;;  %v7221_v31 = vsel %vm7211_vm5, %v7218_v16, %v7220_v3  ;;  %v7224_v46 = vsel %vm7212_vm8, %v7206_v52, %v7223_v48  ;;  %vm5818_vm12 = vcmp.eq.s32.totalorder %v16299_v5, 0 }
 0x6a6   : > { %v18109_v9 = vsel %vm16336_vm14, 4294967295, %v18108_v9  ;;  %v7461_v8 = vor.u32 %v7460_v49, %v7459_v28  ;;  %v7464_v22 = vshll.u32 %v7463_v20, 23  ;;  %v7217_v58 = vsel %vm7211_vm5, %v7214_v1, %v7216_v42  ;;  %v18112_v1 = vld [vmem:[#allocation24_spill] sm:$0xff]  ;;  %v18115_v42 = vld [vmem:[#allocation2_spill] sm:$0xff] }
 0x6a7   : > { %18110 = vst [vmem:[#allocation11_spill] sm:$0xff] %v18109_v9  ;;  %v7225_v18 = vsel %vm7211_vm5, %v7222_v12, %v7224_v46  ;;  %v16353_v4 = vmul.u32.u64.low %v16303_v38, %v7221_v31  ;;  %v16354_v24 = vmul.u32.u64.high %v16303_v38, %v7221_v31, %v16353_v4  ;;  %vm17369_vm8 = vcmp.lt.s32.totalorder %v16017_v47, 0  ;;  %v18117_v20 = vld [vmem:[#allocation84_spill] sm:$0xff] }
 0x6a8   : > { %v16349_v35 = vmul.u32.u64.low %v16303_v38, %v7225_v18  ;;  %v16350_v29 = vmul.u32.u64.high %v16303_v38, %v7225_v18, %v16349_v35  ;;  %v7465_v52 = vor.u32 4788187, %v7464_v22  ;;  %v18111_v3 = vxor.u32 2147483648, %v18102_v45 }
 0x6a9   : > { %vm5821_vm1 = vcmp.eq.s32.totalorder %v16299_v5, 2  ;;  %vm18113_vm5 = vcmp.lt.s32.totalorder %v18112_v1, 0  ;;  %v7233_v18 = vmul.u32 %v16303_v38, %v7217_v58  ;;  %v18114_v56 = vxor.u32 2147483648, %v18103_v40 }
 0x6aa   : > { %v5820_v34 = vsel %vm5818_vm12, %v18103_v40, %v18111_v3  ;;  %v5913_v23 = vsel %vm18113_vm5, %v5912_v30, %v18104_v36  ;;  %vm18116_vm11 = vnez %v18115_v42  ;;  %v16373_v12 = vadd.f32 %v16261_v62, %v16045_v57  ;;  %v18122_v40 = vld [vmem:[#allocation82_spill] sm:$0xff] }
 0x6ab   : > { %v5823_v16 = vsel %vm5821_vm1, %v18114_v56, %v18102_v45  ;;  %v5915_v32 = vsel %vm18116_vm11, 0, %v5913_v23  ;;  %v7466_v48 = vand.u32 2147483647, %v7465_v52  ;;  %v7468_v28 = vcvt.s32.f32 %v7461_v8 }
 0x6ac   : > { %v5919_v49 = vadd.s32 3, %v5915_v32  ;;  %v5923_v36 = vxor.u32 2147483648, %v18117_v20  ;;  %v18118_v38 = vand.u32 2147483647, %v16017_v47  ;;  %v18119_v30 = vmov 0  ;;  %v18123_v32 = vld [vmem:[#allocation9_spill] sm:$0xff] }
 0x6ad   : > { %vm7235_vm1 = vc.u32 %v16350_v29, %v16353_v4  ;;  %v7236_v45 = vadd.s32 1, %v16354_v24  ;;  %v5926_v31 = vxor.u32 2147483648, %v18122_v40  ;;  %v17353_v57 = vand.u32 2147483647, %v16373_v12 }
 0x6ae   : > { %vm16378_vm12 = vcmp.le.f32.partialorder %v18118_v38, 0.7853982  ;;  %v7469_v46 = vmul.f32 %v7468_v28, %v7466_v48  ;;  %v5920_v22 = vand.u32 3, %v5919_v49  ;;  %v7493_v8 = vand.u32 2139095040, %v16373_v12 }
 0x6af   : > { %v18120_v30 = vsel %vm16378_vm12, 4294967295, %v18119_v30  ;;  %v16389_v58 = vadd.f32 %v16261_v62, %v16127_v15  ;;  %v6954_v35 = vsel %vm16336_vm14, %v16005_v14, %v16309_v41  ;;  %v7237_v52 = vsel %vm7235_vm1, %v7236_v45, %v16354_v24 }
 0x6b0   : > { %18121 = vst [vmem:[#allocation48_spill] sm:$0xff] %v18120_v30  ;;  %v5824_v3 = vsel %vm5817_vm4, %v5820_v34, %v5823_v16  ;;  %vm5918_vm11 = vweird.f32 %v18112_v1  ;;  %v7470_v23 = vxor.u32 2147483648, %v7469_v46  ;;  %v7238_v56 = vadd.s32 %v7237_v52, %v7233_v18  ;;  %v18125_v1 = vld [vmem:[#allocation13_spill] sm:$0xff]  ;;  %v18127_v52 = vld [vmem:[#allocation87_spill] sm:$0xff] }
 0x6b1   : > { %vm5922_vm5 = vcmp.eq.s32.totalorder %v5920_v22, 0  ;;  %v7497_v42 = vand.u32 8388607, %v17353_v57  ;;  %vm5925_vm15 = vcmp.eq.s32.totalorder %v5920_v22, 2  ;;  %v7494_v62 = vshrl.u32 %v7493_v8, 23 }
 0x6b2   : > { %v5924_v15 = vsel %vm5922_vm5, %v18122_v40, %v5923_v36  ;;  %v6016_v48 = vsub.s32 4, %v18123_v32  ;;  %v7239_v41 = vadd.s32 536870912, %v7238_v56  ;;  %vm5921_vm9 = vcmp.lt.s32.totalorder %v5920_v22, 2 }
 0x6b3   : > { %v5927_v24 = vsel %vm5925_vm15, %v5926_v31, %v18117_v20  ;;  %v17352_v5 = vand.u32 2147483647, %v16389_v58  ;;  %8903 = vcosq.f32 %v6954_v35  ;;  %v7471_v34 = vsel %vm17369_vm8, %v7470_v23, %v7469_v46 }
 0x6b4   : > { %v5928_v18 = vsel %vm5921_vm9, %v5924_v15, %v5927_v24  ;;  %v8202_v16 = vadd.s32 4294967169, %v7494_v62  ;;  %v16407_v28 = vshrl.u32 %v7239_v41, 30  ;;  %v5825_v49 = vsel %vm5814_vm2, nan, %v5824_v3 }
 0x6b5   : > { %v5929_v36 = vsel %vm5918_vm11, nan, %v5928_v18  ;;  %v7498_v38 = vor.u32 8388608, %v7497_v42  ;;  %8905 = vsinq.f32 %v6954_v35  ;;  %v7285_v40 = vand.u32 2139095040, %v16389_v58  ;;  %v18130_v18 = vld [vmem:[#allocation94_spill] sm:$0xff] }
 0x6b6   : > { %18124 = vst [vmem:[#allocation23_spill] sm:$0xff] %v16407_v28  ;;  %v7601_v45 = vpack.c.bf16 %v5929_v36, %v5825_v49  ;;  %v7500_v20 = vadd.s32 1, %v8202_v16  ;;  %v16417_v31 = vsel %vm16378_vm12, %v16017_v47, %v7471_v34  ;;  %v7241_v46 = vshll.u32 %v16407_v28, 30 }
 0x6b7   : > { %v16422_v51 = vand.u32 8388607, %v17352_v5  ;;  %vm18126_vm15 = vcmp.lt.s32.totalorder %v18125_v1, 0  ;;  %v16428_v8 = vadd.s32 %v16353_v4, %v16350_v29  ;;  %v7286_v35 = vshrl.u32 %v7285_v40, 23 }
 0x6b8   : > { %v6017_v22 = vsel %vm18126_vm15, %v6016_v48, %v18123_v32  ;;  %8342 = vmatmul.mubr.bf16.gmra.mrb[12].mxu1 %v7601_v45  ;;  %vm7501_vm9 = vcmp.gt.s32.totalorder %v7500_v20, 0  ;;  %vm18128_vm4 = vnez %v18127_v52  ;;  %v16432_v23 = vsub.s32 %v7238_v56, %v7241_v46  ;;  %v18129_v48 = vld [vmem:[#allocation95_spill] sm:$0xff] }
 0x6b9   : > { %v6019_v3 = vsel %vm18128_vm4, 0, %v6017_v22  ;;  %v7502_v42 = vsel %vm7501_vm9, %v7500_v20, 0  ;;  %v16434_v15 = vshll.u32 %v7498_v38, 8  ;;  %8907 = vcosq.f32 %v16417_v31  ;;  %v18131_v38 = vld [vmem:[#allocation83_spill] sm:$0xff] }
 0x6ba   : > { %v6023_v62 = vadd.s32 3, %v6019_v3  ;;  %v7504_v41 = vand.u32 31, %v7502_v42  ;;  %v7244_v4 = vsub.s32 0, %v16432_v23  ;;  %v7503_v24 = vshrl.u32 %v7502_v42, 5 }
 0x6bb   : > { %v8194_v34 = vadd.s32 4294967169, %v7286_v35  ;;  %v6030_v16 = vxor.u32 2147483648, %v18130_v18  ;;  %v6120_v45 = vsub.s32 4, %v18131_v38  ;;  %8909 = vsinq.f32 %v16417_v31 }
 0x6bc   : > { %v7505_v49 = vsub.s32 32, %v7504_v41  ;;  %v7507_v56 = vshll.u32 %v17387_v19, %v7504_v41  ;;  %v16442_v36 = vand.u32 3, %v6023_v62  ;;  %v8191_v20 = vmin.u32 %v7244_v4, %v16432_v23 }
 0x6bd   : > { %v7510_v40 = vshll.u32 %v17389_v43, %v7504_v41  ;;  %v7513_v46 = vshll.u32 %v17390_v37, %v7504_v41  ;;  %v7516_v22 = vshll.u32 %v17395_v21, %v7504_v41  ;;  %v16449_v52 = vpop.eup %8903  ;;  %v7519_v62 = vshll.u32 %v17769_v44, %v7504_v41 }
 0x6be   : > { %18132 = vst [vmem:[#allocation44_spill] sm:$0xff] %v16449_v52  ;;  %v7508_v35 = vshrl.u32 %v17389_v43, %v7505_v49  ;;  %v7511_v3 = vshrl.u32 %v17390_v37, %v7505_v49  ;;  %v7514_v42 = vshrl.u32 %v17395_v21, %v7505_v49  ;;  %v7246_v5 = vclz %v8191_v20 }
 0x6bf   : > { %v7517_v57 = vshrl.u32 %v17769_v44, %v7505_v49  ;;  %v7520_v4 = vshrl.u32 %v17770_v13, %v7505_v49  ;;  %vm7522_vm2 = vcmp.lt.s32.totalorder %v7503_v24, 1  ;;  %v16457_v32 = vpop.eup %8905  ;;  %v7506_v29 = vshrl.u32 %v17387_v19, %v7505_v49 }
 0x6c0   : > { %18133 = vst [vmem:[#allocation40_spill] sm:$0xff] %v16457_v32  ;;  %v7509_v30 = vor.u32 %v7508_v35, %v7507_v56  ;;  %v7512_v47 = vor.u32 %v7511_v3, %v7510_v40  ;;  %v7515_v28 = vor.u32 %v7514_v42, %v7513_v46  ;;  %v8192_v25 = vadd.s32 4294967294, %v7246_v5 }
 0x6c1   : > { %v7518_v10 = vor.u32 %v7517_v57, %v7516_v22  ;;  %v7521_v52 = vor.u32 %v7520_v4, %v7519_v62  ;;  %vm7525_vm1 = vcmp.lt.s32.totalorder %v7503_v24, 4  ;;  %vm7523_vm11 = vcmp.lt.s32.totalorder %v7503_v24, 2 }
 0x6c2   : > { %vm7524_vm5 = vcmp.lt.s32.totalorder %v7503_v24, 3  ;;  %v7527_v41 = vsel %vm7525_vm1, %v7515_v28, 2102212464  ;;  %v7530_v20 = vsel %vm7522_vm2, %v7509_v30, %v7512_v47  ;;  %vm8193_vm15 = vcmp.lt.s32.totalorder %v8192_v25, 0 }
 0x6c3   : > { %v7531_v54 = vsel %vm7525_vm1, %v7518_v10, 920167782  ;;  %v7534_v9 = vsel %vm7522_vm2, %v7512_v47, %v7515_v28  ;;  %v7535_v14 = vsel %vm7525_vm1, %v7521_v52, 1326507024  ;;  %v16462_v32 = vpop.eup %8907  ;;  %v7249_v49 = vsel %vm8193_vm15, 0, %v8192_v25 }
 0x6c4   : > { %v7526_v56 = vsel %vm7522_vm2, %v7506_v29, %v7509_v30  ;;  %v7532_v40 = vsel %vm7524_vm5, %v7515_v28, %v7531_v54  ;;  %v7536_v5 = vsel %vm7524_vm5, %v7518_v10, %v7535_v14  ;;  %v7250_v57 = vsub.s32 32, %v7249_v49 }
 0x6c5   : > { %v7254_v46 = vsub.s32 4294967266, %v7249_v49  ;;  %v7528_v22 = vsel %vm7524_vm5, %v7512_v47, %v7527_v41  ;;  %v7533_v35 = vsel %vm7523_vm11, %v7530_v20, %v7532_v40  ;;  %v7251_v3 = vshll.u32 %v16432_v23, %v7249_v49  ;;  %v18139_v40 = vld [vmem:[#allocation41_spill] sm:$0xff] }
 0x6c6   : > { %v7537_v42 = vsel %vm7523_vm11, %v7534_v9, %v7536_v5  ;;  %v16469_v62 = vmul.u32.u64.low %v16434_v15, %v7533_v35  ;;  %v16470_v4 = vmul.u32.u64.high %v16434_v15, %v7533_v35, %v16469_v62  ;;  %v7252_v52 = vshrl.u32 %v16428_v8, %v7250_v57 }
 0x6c7   : > { %v7255_v25 = vadd.s32 127, %v7254_v46  ;;  %v16474_v30 = vmul.u32.u64.low %v16434_v15, %v7537_v42  ;;  %v16475_v54 = vmul.u32.u64.high %v16434_v15, %v7537_v42, %v16474_v30  ;;  %v7529_v10 = vsel %vm7523_vm11, %v7526_v56, %v7528_v22 }
 0x6c8   : > { %v7292_v14 = vadd.s32 1, %v8194_v34  ;;  %vm6026_vm9 = vcmp.eq.s32.totalorder %v16442_v36, 0  ;;  %vm6029_vm4 = vcmp.eq.s32.totalorder %v16442_v36, 2  ;;  %v7253_v47 = vor.u32 %v7252_v52, %v7251_v3 }
 0x6c9   : > { %v7256_v9 = vshll.u32 %v7255_v25, 23  ;;  %v18134_v28 = vxor.u32 2147483648, %v18129_v48  ;;  %v6031_v8 = vsel %vm6029_vm4, %v6030_v16, %v18129_v48  ;;  %vm17370_vm2 = vcmp.lt.s32.totalorder %v16265_v61, 0 }
 0x6ca   : > { %v7548_v29 = vadd.s32 1, %v16470_v4  ;;  %vm7293_vm1 = vcmp.gt.s32.totalorder %v7292_v14, 0  ;;  %vm6025_vm11 = vcmp.lt.s32.totalorder %v16442_v36, 2  ;;  %vm18135_vm5 = vcmp.lt.s32.totalorder %v14905_v39, 0 }
 0x6cb   : > { %v6028_v23 = vsel %vm6026_vm9, %v18130_v18, %v18134_v28  ;;  %v6121_v24 = vsel %vm18135_vm5, %v6120_v45, %v18131_v38  ;;  %v7257_v34 = vor.u32 4788187, %v7256_v9  ;;  %v7545_v41 = vmul.u32 %v16434_v15, %v7529_v10 }
 0x6cc   : > { %vm7547_vm15 = vc.u32 %v16475_v54, %v16469_v62  ;;  %v6032_v20 = vsel %vm6025_vm11, %v6028_v23, %v6031_v8  ;;  %v7260_v18 = vcvt.s32.f32 %v7253_v47  ;;  %v7294_v16 = vsel %vm7293_vm1, %v7292_v14, 0 }
 0x6cd   : > { %v7549_v48 = vsel %vm7547_vm15, %v7548_v29, %v16470_v4  ;;  %vm6022_vm9 = vweird.f32 %v18125_v1  ;;  %v18136_v49 = vand.u32 2147483647, %v16265_v61  ;;  %v7258_v56 = vand.u32 2147483647, %v7257_v34 }
 0x6ce   : > { %v7550_v38 = vadd.s32 %v7549_v48, %v7545_v41  ;;  %v7296_v45 = vand.u32 31, %v7294_v16  ;;  %vm18140_vm5 = vnez %v18139_v40  ;;  %v16504_v5 = vadd.s32 %v16469_v62, %v16475_v54  ;;  %v18142_v41 = vld [vmem:[#allocation22_spill] sm:$0xff] }
 0x6cf   : > { %vm16496_vm4 = vcmp.le.f32.partialorder %v18136_v49, 0.7853982  ;;  %v6123_v15 = vsel %vm18140_vm5, 0, %v6121_v24  ;;  %v18141_v57 = vor.u32 8388608, %v16422_v51  ;;  %v16510_v46 = vsel %vm6022_vm9, nan, %v6032_v20 }
 0x6d0   : > { %v7261_v22 = vmul.f32 %v7260_v18, %v7258_v56  ;;  %v7551_v35 = vadd.s32 536870912, %v7550_v38  ;;  %v7295_v3 = vshrl.u32 %v7294_v16, 5  ;;  %v7297_v42 = vsub.s32 32, %v7296_v45  ;;  %v16537_v56 = vpop.eup %8909 }
 0x6d1   : > { %v16508_v1 = vshll.u32 %v18141_v57, 8  ;;  %v7299_v4 = vshll.u32 %v17387_v19, %v7296_v45  ;;  %v7302_v52 = vshll.u32 %v17389_v43, %v7296_v45  ;;  %v7305_v25 = vshll.u32 %v17390_v37, %v7296_v45 }
 0x6d2   : > { %v6127_v31 = vadd.s32 3, %v6123_v15  ;;  %v7262_v30 = vxor.u32 2147483648, %v7261_v22  ;;  %v16515_v62 = vshrl.u32 %v7551_v35, 30  ;;  %v7300_v51 = vshrl.u32 %v17389_v43, %v7297_v42 }
 0x6d3   : > { %v7308_v54 = vshll.u32 %v17395_v21, %v7296_v45  ;;  %v7303_v10 = vshrl.u32 %v17390_v37, %v7297_v42  ;;  %v7306_v14 = vshrl.u32 %v17395_v21, %v7297_v42  ;;  %v7309_v47 = vshrl.u32 %v17769_v44, %v7297_v42 }
 0x6d4   : > { %v7312_v9 = vshrl.u32 %v17770_v13, %v7297_v42  ;;  %v7263_v28 = vsel %vm17370_vm2, %v7262_v30, %v7261_v22  ;;  %v7553_v23 = vshll.u32 %v16515_v62, 30  ;;  %v7301_v8 = vor.u32 %v7300_v51, %v7299_v4 }
 0x6d5   : > { %v7311_v29 = vshll.u32 %v17769_v44, %v7296_v45  ;;  %v7304_v24 = vor.u32 %v7303_v10, %v7302_v52  ;;  %v7307_v43 = vor.u32 %v7306_v14, %v7305_v25  ;;  %v7310_v34 = vor.u32 %v7309_v47, %v7308_v54  ;;  %v18143_v25 = vld [vmem:[#allocation36_spill] sm:$0xff] }
 0x6d6   : > { %v6131_v20 = vxor.u32 2147483648, %v18142_v41  ;;  %v16528_v37 = vsub.s32 %v7550_v38, %v7553_v23  ;;  %v7298_v21 = vshrl.u32 %v17387_v19, %v7297_v42  ;;  %vm7314_vm1 = vcmp.lt.s32.totalorder %v7295_v3, 1 }
 0x6d7   : > { %v7313_v18 = vor.u32 %v7312_v9, %v7311_v29  ;;  %v16534_v13 = vsel %vm16496_vm4, %v16265_v61, %v7263_v28  ;;  %vm7315_vm11 = vcmp.lt.s32.totalorder %v7295_v3, 2  ;;  %vm7316_vm15 = vcmp.lt.s32.totalorder %v7295_v3, 3  ;;  %v18144_v9 = vld [vmem:[#allocation7_spill] sm:$0xff] }
 0x6d8   : > { %vm7317_vm9 = vcmp.lt.s32.totalorder %v7295_v3, 4  ;;  %v7556_v44 = vsub.s32 0, %v16528_v37  ;;  %v7322_v16 = vsel %vm7314_vm1, %v7301_v8, %v7304_v24  ;;  %v7318_v38 = vsel %vm7314_vm1, %v7298_v21, %v7301_v8 }
 0x6d9   : > { %v7319_v48 = vsel %vm7317_vm9, %v7307_v43, 2102212464  ;;  %v7323_v49 = vsel %vm7317_vm9, %v7310_v34, 920167782  ;;  %v7326_v19 = vsel %vm7314_vm1, %v7304_v24, %v7307_v43  ;;  %v7327_v40 = vsel %vm7317_vm9, %v7313_v18, 1326507024 }
 0x6da   : > { %v7324_v45 = vsel %vm7316_vm15, %v7307_v43, %v7323_v49  ;;  %v8203_v15 = vmin.u32 %v7556_v44, %v16528_v37  ;;  %v7320_v57 = vsel %vm7316_vm15, %v7304_v24, %v7319_v48  ;;  %v7328_v35 = vsel %vm7316_vm15, %v7310_v34, %v7327_v40  ;;  %v18150_v40 = vld [vmem:[#allocation91_spill] sm:$0xff] }
 0x6db   : > { %v7325_v22 = vsel %vm7315_vm11, %v7322_v16, %v7324_v45  ;;  %v7329_v42 = vsel %vm7315_vm11, %v7326_v19, %v7328_v35  ;;  %v6134_v30 = vxor.u32 2147483648, %v18143_v25  ;;  %v6128_v14 = vand.u32 3, %v6127_v31  ;;  %v18145_v31 = vld [vmem:[#allocation8_spill] sm:$0xff] }
 0x6dc   : > { %v16543_v4 = vmul.u32.u64.low %v16508_v1, %v7325_v22  ;;  %v16544_v52 = vmul.u32.u64.high %v16508_v1, %v7325_v22, %v16543_v4  ;;  %v7558_v51 = vclz %v8203_v15  ;;  %8911 = vcosq.f32 %v16534_v13 }
 0x6dd   : > { %v16549_v54 = vmul.u32.u64.low %v16508_v1, %v7329_v42  ;;  %v16550_v10 = vmul.u32.u64.high %v16508_v1, %v7329_v42, %v16549_v54  ;;  %v7321_v47 = vsel %vm7315_vm11, %v7318_v38, %v7320_v57  ;;  %vm6126_vm5 = vweird.f32 %v14905_v39  ;;  %v18149_v38 = vld [vmem:[#allocation69_spill] sm:$0xff] }
 0x6de   : > { %v6224_v28 = vsub.s32 4, %v18144_v9  ;;  %v8204_v23 = vadd.s32 4294967294, %v7558_v51  ;;  %vm6129_vm1 = vcmp.lt.s32.totalorder %v6128_v14, 2  ;;  %vm6130_vm15 = vcmp.eq.s32.totalorder %v6128_v14, 0  ;;  %v18151_v57 = vld [vmem:[#allocation77_spill] sm:$0xff] }
 0x6df   : > { %vm6133_vm9 = vcmp.eq.s32.totalorder %v6128_v14, 2  ;;  %v7340_v8 = vadd.s32 1, %v16544_v52  ;;  %v6132_v29 = vsel %vm6130_vm15, %v18143_v25, %v6131_v20  ;;  %vm18146_vm8 = vcmp.lt.s32.totalorder %v18145_v31, 0  ;;  %v18147_v20 = vld [vmem:[#allocation86_spill] sm:$0xff]  ;;  %v18155_v14 = vld [vmem:[#allocation88_spill] sm:$0xff] }
 0x6e0   : > { %v6135_v24 = vsel %vm6133_vm9, %v6134_v30, %v18142_v41  ;;  %v6225_v43 = vsel %vm18146_vm8, %v6224_v28, %v18144_v9  ;;  %vm8205_vm2 = vcmp.lt.s32.totalorder %v8204_v23, 0  ;;  %v7337_v3 = vmul.u32 %v16508_v1, %v7321_v47  ;;  %v18152_v30 = vld [vmem:[#allocation10_spill] sm:$0xff] }
 0x6e1   : > { %vm7339_vm11 = vc.u32 %v16550_v10, %v16543_v4  ;;  %v6136_v34 = vsel %vm6129_vm1, %v6132_v29, %v6135_v24  ;;  %v7561_v21 = vsel %vm8205_vm2, 0, %v8204_v23  ;;  %vm18148_vm15 = vnez %v18147_v20  ;;  %v18158_v24 = vld [vmem:[#allocation42_spill] sm:$0xff] }
 0x6e2   : > { %v7341_v18 = vsel %vm7339_vm11, %v7340_v8, %v16544_v52  ;;  %v6137_v44 = vsel %vm6126_vm5, nan, %v6136_v34  ;;  %v6227_v41 = vsel %vm18148_vm15, 0, %v6225_v43  ;;  %v7562_v48 = vsub.s32 32, %v7561_v21 }
 0x6e3   : > { %v7566_v16 = vsub.s32 4294967266, %v7561_v21  ;;  %v7342_v49 = vadd.s32 %v7341_v18, %v7337_v3  ;;  %vm6230_vm8 = vweird.f32 %v18145_v31  ;;  %v6235_v1 = vxor.u32 2147483648, %v18149_v38 }
 0x6e4   : > { %v7602_v45 = vpack.c.bf16 %v6137_v44, %v16510_v46  ;;  %v6231_v19 = vadd.s32 3, %v6227_v41  ;;  %v6238_v15 = vxor.u32 2147483648, %v18150_v40  ;;  %v6328_v22 = vsub.s32 4, %v18151_v57  ;;  %v18154_v46 = vld [vmem:[#allocation60_spill] sm:$0xff] }
 0x6e5   : > { %v7563_v39 = vshll.u32 %v16528_v37, %v7561_v21  ;;  %v7564_v35 = vshrl.u32 %v16504_v5, %v7562_v48  ;;  %v7567_v42 = vadd.s32 127, %v7566_v16  ;;  %v7343_v52 = vadd.s32 536870912, %v7342_v49  ;;  %v18156_v37 = vld [vmem:[#allocation92_spill] sm:$0xff] }
 0x6e6   : > { %8345 = vmatprep.mubr.bf16.mxu1 %v7602_v45  ;;  %v6232_v25 = vand.u32 3, %v6231_v19  ;;  %vm18153_vm2 = vcmp.lt.s32.totalorder %v18152_v30, 0  ;;  %v6339_v54 = vxor.u32 2147483648, %v18154_v46  ;;  %v6432_v47 = vsub.s32 4, %v18155_v14  ;;  %v16587_v8 = vpop.eup %8911  ;;  %v18159_v41 = vld [vmem:[#allocation80_spill] sm:$0xff] }
 0x6e7   : > { %v6329_v51 = vsel %vm18153_vm2, %v6328_v22, %v18151_v57  ;;  %v7565_v9 = vor.u32 %v7564_v35, %v7563_v39  ;;  %v7568_v28 = vshll.u32 %v7567_v42, 23  ;;  %v16583_v23 = vshrl.u32 %v7343_v52, 30  ;;  %v18162_v52 = vld [vmem:[#allocation53_spill] sm:$0xff] }
 0x6e8   : > { %vm18157_vm1 = vnez %v18156_v37  ;;  %vm6233_vm11 = vcmp.lt.s32.totalorder %v6232_v25, 2  ;;  %vm6234_vm15 = vcmp.eq.s32.totalorder %v6232_v25, 0  ;;  %v6342_v43 = vxor.u32 2147483648, %v18158_v24 }
 0x6e9   : > { %v6331_v5 = vsel %vm18157_vm1, 0, %v6329_v51  ;;  %v7569_v3 = vor.u32 4788187, %v7568_v28  ;;  %v7345_v34 = vshll.u32 %v16583_v23, 30  ;;  %v6236_v21 = vsel %vm6234_vm15, %v18150_v40, %v6235_v1 }
 0x6ea   : > { %v6335_v29 = vadd.s32 3, %v6331_v5  ;;  %vm6237_vm2 = vcmp.eq.s32.totalorder %v6232_v25, 2  ;;  %v7572_v18 = vcvt.s32.f32 %v7565_v9  ;;  %vm18160_vm1 = vcmp.lt.s32.totalorder %v18159_v41, 0 }
 0x6eb   : > { %v6239_v44 = vsel %vm6237_vm2, %v6238_v15, %v18149_v38  ;;  %v6433_v48 = vsel %vm18160_vm1, %v6432_v47, %v18155_v14  ;;  %v7570_v16 = vand.u32 2147483647, %v7569_v3  ;;  %v16597_v45 = vsub.s32 %v7342_v49, %v7345_v34  ;;  %v18164_v47 = vld [vmem:[#allocation30_spill] sm:$0xff] }
 0x6ec   : > { %v6336_v20 = vand.u32 3, %v6335_v29  ;;  %v6240_v19 = vsel %vm6233_vm11, %v6236_v21, %v6239_v44  ;;  %v6435_v22 = vsel %vm15552_vm7, 0, %v6433_v48  ;;  %v6443_v42 = vxor.u32 2147483648, %v16052_v60  ;;  %v18170_v21 = vld [vmem:[#allocation85_spill] sm:$0xff] }
 0x6ed   : > { %v6241_v39 = vsel %vm6230_vm8, nan, %v6240_v19  ;;  %v7573_v1 = vmul.f32 %v7572_v18, %v7570_v16  ;;  %v7348_v38 = vsub.s32 0, %v16597_v45  ;;  %v6439_v49 = vadd.s32 3, %v6435_v22 }
 0x6ee   : > { %vm6337_vm15 = vcmp.lt.s32.totalorder %v6336_v20, 2  ;;  %vm6338_vm9 = vcmp.eq.s32.totalorder %v6336_v20, 0  ;;  %vm6341_vm5 = vcmp.eq.s32.totalorder %v6336_v20, 2  ;;  %v6446_v25 = vxor.u32 2147483648, %v18162_v52 }
 0x6ef   : > { %v6340_v40 = vsel %vm6338_vm9, %v18158_v24, %v6339_v54  ;;  %v6343_v15 = vsel %vm6341_vm5, %v6342_v43, %v18154_v46  ;;  %v7574_v51 = vxor.u32 2147483648, %v7573_v1  ;;  %v8195_v31 = vmin.u32 %v7348_v38, %v16597_v45 }
 0x6f0   : > { %v6344_v35 = vsel %vm6337_vm15, %v6340_v40, %v6343_v15  ;;  %vm18163_vm7 = vweird.f32 %v18152_v30  ;;  %v6536_v9 = vsub.s32 4, %v18164_v47  ;;  %8913 = vsinq.f32 %v16534_v13  ;;  %v18174_v15 = vld [vmem:[#allocation50_spill] sm:$0xff] }
 0x6f1   : > { %v6345_v14 = vsel %vm18163_vm7, nan, %v6344_v35  ;;  %v18165_v54 = vand.u32 2147483647, %v16373_v12  ;;  %v6440_v37 = vand.u32 3, %v6439_v49  ;;  %vm18168_vm5 = vcmp.lt.s32.totalorder %v16373_v12, 0  ;;  %v18176_v49 = vld [vmem:[#allocation47_spill] sm:$0xff] }
 0x6f2   : > { %v7603_v28 = vpack.c.bf16 %v6345_v14, %v6241_v39  ;;  %v7575_v5 = vsel %vm18168_vm5, %v7574_v51, %v7573_v1  ;;  %v7338_v29 = vadd.s32 %v16543_v4, %v16550_v10  ;;  %v7350_v30 = vclz %v8195_v31  ;;  %v18173_v1 = vld [vmem:[#allocation28_spill] sm:$0xff] }
 0x6f3   : > { %vm16615_vm8 = vcmp.le.f32.partialorder %v18165_v54, 0.7853982  ;;  %vm18169_vm9 = vcmp.lt.s32.totalorder %v15219_v50, 0  ;;  %vm6438_vm11 = vweird.f32 %v18159_v41  ;;  %vm6442_vm2 = vcmp.eq.s32.totalorder %v6440_v37, 0 }
 0x6f4   : > { %v6537_v24 = vsel %vm18169_vm9, %v6536_v9, %v18164_v47  ;;  %v7578_v13 = vsel %vm16615_vm8, %v16373_v12, %v7575_v5  ;;  %8346 = vmatmul.mubr.bf16.gmra.mrb[16].mxu1 %v7603_v28  ;;  %vm6445_vm1 = vcmp.eq.s32.totalorder %v6440_v37, 2  ;;  %v8196_v43 = vadd.s32 4294967294, %v7350_v30 }
 0x6f5   : > { %vm6441_vm15 = vcmp.lt.s32.totalorder %v6440_v37, 2  ;;  %v6444_v3 = vsel %vm6442_vm2, %v18162_v52, %v6443_v42  ;;  %v6447_v4 = vsel %vm6445_vm1, %v6446_v25, %v16052_v60  ;;  %v6539_v34 = vsel %vm16021_vm13, 0, %v6537_v24  ;;  %v18171_v60 = vld [vmem:[#allocation76_spill] sm:$0xff]  ;;  %v18177_v52 = vld [vmem:[#allocation93_spill] sm:$0xff] }
 0x6f6   : > { %v6448_v10 = vsel %vm6441_vm15, %v6444_v3, %v6447_v4  ;;  %vm6542_vm7 = vweird.f32 %v15219_v50  ;;  %v6640_v18 = vsub.s32 4, %v18170_v21  ;;  %vm8197_vm5 = vcmp.lt.s32.totalorder %v8196_v43, 0 }
 0x6f7   : > { %v6543_v44 = vadd.s32 3, %v6539_v34  ;;  %v6547_v20 = vxor.u32 2147483648, %v16189_v0  ;;  %v6550_v48 = vxor.u32 2147483648, %v16184_v17  ;;  %8915 = vcosq.f32 %v7578_v13 }
 0x6f8   : > { %v7353_v16 = vsel %vm8197_vm5, 0, %v8196_v43  ;;  %v6449_v19 = vsel %vm6438_vm11, nan, %v6448_v10  ;;  %vm18172_vm9 = vcmp.lt.s32.totalorder %v18171_v60, 0  ;;  %v6651_v38 = vxor.u32 2147483648, %v18173_v1 }
 0x6f9   : > { %v6641_v63 = vsel %vm18172_vm9, %v6640_v18, %v18170_v21  ;;  %v7354_v57 = vsub.s32 32, %v7353_v16  ;;  %v7358_v22 = vsub.s32 4294967266, %v7353_v16  ;;  %v6544_v39 = vand.u32 3, %v6543_v44 }
 0x6fa   : > { %v7355_v40 = vshll.u32 %v16597_v45, %v7353_v16  ;;  %vm18175_vm13 = vnez %v18174_v15  ;;  %v6654_v42 = vxor.u32 2147483648, %v18176_v49  ;;  %v6744_v25 = vsub.s32 4, %v18177_v52  ;;  %v16649_v31 = vpop.eup %8913 }
 0x6fb   : > { %v6643_v35 = vsel %vm18175_vm13, 0, %v6641_v63  ;;  %v7356_v41 = vshrl.u32 %v7338_v29, %v7354_v57  ;;  %v7359_v51 = vadd.s32 127, %v7358_v22  ;;  %vm6545_vm11 = vcmp.lt.s32.totalorder %v6544_v39, 2 }
 0x6fc   : > { %vm6546_vm2 = vcmp.eq.s32.totalorder %v6544_v39, 0  ;;  %vm6549_vm1 = vcmp.eq.s32.totalorder %v6544_v39, 2  ;;  %v6647_v47 = vadd.s32 3, %v6643_v35  ;;  %vm18178_vm15 = vcmp.lt.s32.totalorder %v15153_v2, 0 }
 0x6fd   : > { %v6548_v14 = vsel %vm6546_vm2, %v16184_v17, %v6547_v20  ;;  %v6745_v45 = vsel %vm18178_vm15, %v6744_v25, %v18177_v52  ;;  %v7357_v9 = vor.u32 %v7356_v41, %v7355_v40  ;;  %v7360_v54 = vshll.u32 %v7359_v51, 23  ;;  %v18200_v51 = vld [vmem:[#allocation73_spill] sm:$0xff] }
 0x6fe   : > { %v6551_v28 = vsel %vm6549_vm1, %v6550_v48, %v16189_v0  ;;  %v6747_v37 = vsel %vm15944_vm3, 0, %v6745_v45  ;;  %v6648_v29 = vand.u32 3, %v6647_v47  ;;  %v6755_v17 = vxor.u32 2147483648, %v16073_v53  ;;  %v18187_v47 = vld [vmem:[#allocation27_spill] sm:$0xff] }
 0x6ff   : > { %v6552_v5 = vsel %vm6545_vm11, %v6548_v14, %v6551_v28  ;;  %v6751_v30 = vadd.s32 3, %v6747_v37  ;;  %v18179_v24 = vand.u32 2147483647, %v16389_v58  ;;  %v7361_v3 = vor.u32 4788187, %v7360_v54 }
 0x700   : > { %v6553_v0 = vsel %vm6542_vm7, nan, %v6552_v5  ;;  %v6848_v4 = vsub.s32 4, %v16031_v33  ;;  %v7364_v10 = vcvt.s32.f32 %v7357_v9  ;;  %vm6650_vm3 = vcmp.eq.s32.totalorder %v6648_v29, 0 }
 0x701   : > { %vm16662_vm9 = vcmp.le.f32.partialorder %v18179_v24, 0.7853982  ;;  %v7604_v34 = vpack.c.bf16 %v6553_v0, %v6449_v19  ;;  %vm6653_vm13 = vcmp.eq.s32.totalorder %v6648_v29, 2  ;;  %v7362_v21 = vand.u32 2147483647, %v7361_v3  ;;  %v16672_v48 = vpop.eup %8915 }
 0x702   : > { %v6652_v18 = vsel %vm6650_vm3, %v18176_v49, %v6651_v38  ;;  %v6655_v44 = vsel %vm6653_vm13, %v6654_v42, %v18173_v1  ;;  %v6752_v20 = vand.u32 3, %v6751_v30  ;;  %8917 = vsinq.f32 %v7578_v13  ;;  %v16685_v1 = vpop.f32.mrb[0].mxu1  ;;  %v18184_v42 = vld [vmem:[#allocation68_spill] sm:$0xff] }
 0x703   : > { %8349 = vmatprep.mubr.bf16.mxu1 %v7604_v34  ;;  %vm6646_vm7 = vweird.f32 %v18171_v60  ;;  %vm6649_vm11 = vcmp.lt.s32.totalorder %v6648_v29, 2  ;;  %vm18182_vm2 = vcmp.lt.s32.totalorder %v15799_v27, 0  ;;  %v7365_v16 = vmul.f32 %v7364_v10, %v7362_v21  ;;  %v16691_v55 = vpop.f32.mrb[1].mxu1  ;;  %v18189_v29 = vld [vmem:[#allocation44_spill] sm:$0xff]  ;;  %v18193_v10 = vld [vmem:[#allocation15_spill] sm:$0xff]  ;;  %v18194_v21 = vld [vmem:[#allocation45_spill] sm:$0xff] }
 0x704   : > { %v6849_v50 = vsel %vm18182_vm2, %v6848_v4, %v16031_v33  ;;  %v6656_v19 = vsel %vm6649_vm11, %v6652_v18, %v6655_v44  ;;  %vm6750_vm1 = vweird.f32 %v15153_v2  ;;  %vm6754_vm15 = vcmp.eq.s32.totalorder %v6752_v20, 0  ;;  %v16700_v60 = vpop.f32.mrb[2].mxu1  ;;  %v18188_v2 = vld [vmem:[#allocation40_spill] sm:$0xff] }
 0x705   : > { %vm6753_vm3 = vcmp.lt.s32.totalorder %v6752_v20, 2  ;;  %v6756_v63 = vsel %vm6754_vm15, %v16059_v26, %v6755_v17  ;;  %vm6757_vm13 = vcmp.eq.s32.totalorder %v6752_v20, 2  ;;  %v6851_v13 = vsel %vm16165_vm6, 0, %v6849_v50  ;;  %v16708_v9 = vpop.f32.mrb[3].mxu1  ;;  %v18190_v17 = vld [vmem:[#allocation66_spill] sm:$0xff]  ;;  %v18195_v20 = vld [vmem:[#allocation72_spill] sm:$0xff] }
 0x706   : > { %vm6854_vm5 = vweird.f32 %v15799_v27  ;;  %v7366_v57 = vxor.u32 2147483648, %v7365_v16  ;;  %v6759_v22 = vsel %vm6757_vm13, %v6758_v7, %v16073_v53  ;;  %v6855_v39 = vadd.s32 3, %v6851_v13  ;;  %v16727_v44 = vpop.f32.mrb[4].mxu1  ;;  %v18196_v13 = vld [vmem:[#allocation57_spill] sm:$0xff] }
 0x707   : > { %v6952_v33 = vsub.s32 4, %v16186_v11  ;;  %v6657_v38 = vsel %vm6646_vm7, nan, %v6656_v19  ;;  %v6760_v40 = vsel %vm6753_vm3, %v6756_v63, %v6759_v22  ;;  %v6859_v26 = vxor.u32 2147483648, %v16324_v6 }
 0x708   : > { %v6862_v15 = vxor.u32 2147483648, %v16322_v59  ;;  %vm18183_vm6 = vcmp.lt.s32.totalorder %v16389_v58, 0  ;;  %v6761_v53 = vsel %vm6750_vm1, nan, %v6760_v40  ;;  %v6856_v49 = vand.u32 3, %v6855_v39  ;;  %v18199_v40 = vld [vmem:[#allocation23_spill] sm:$0xff] }
 0x709   : > { %v7367_v35 = vsel %vm18183_vm6, %v7366_v57, %v7365_v16  ;;  %vm18185_vm11 = vcmp.lt.s32.totalorder %v18184_v42, 0  ;;  %v7605_v41 = vpack.c.bf16 %v6761_v53, %v6657_v38  ;;  %v7056_v45 = vsub.s32 4, %v18187_v47  ;;  %v16730_v16 = vpop.f32.mrb[5].mxu1 }
 0x70a   : > { %v6953_v52 = vsel %vm18185_vm11, %v6952_v33, %v16186_v11  ;;  %v7370_v25 = vsel %vm16662_vm9, %v16389_v58, %v7367_v35  ;;  %vm6857_vm7 = vcmp.lt.s32.totalorder %v6856_v49, 2  ;;  %vm6858_vm2 = vcmp.eq.s32.totalorder %v6856_v49, 0  ;;  %v16737_v22 = vpop.f32.mrb[6].mxu1 }
 0x70b   : > { %v6955_v14 = vsel %vm16336_vm14, 0, %v6953_v52  ;;  %vm6861_vm1 = vcmp.eq.s32.totalorder %v6856_v49, 2  ;;  %v6963_v54 = vxor.u32 2147483648, %v18188_v2  ;;  %8919 = vsinq.f32 %v7370_v25  ;;  %8350 = vmatmul.mubr.bf16.gmra.mrb[20].mxu1 %v7605_v41 }
 0x70c   : > { %v6860_v11 = vsel %vm6858_vm2, %v16322_v59, %v6859_v26  ;;  %v6863_v28 = vsel %vm6861_vm1, %v6862_v15, %v16324_v6  ;;  %v6959_v37 = vadd.s32 3, %v6955_v14  ;;  %8921 = vcosq.f32 %v7370_v25  ;;  %v16717_v3 = vpop.eup %8917  ;;  %v16743_v15 = vpop.f32.mrb[7].mxu1 }
 0x70d   : > { %v6864_v5 = vsel %vm6857_vm7, %v6860_v11, %v6863_v28  ;;  %v6966_v30 = vxor.u32 2147483648, %v18189_v29  ;;  %vm18191_vm14 = vcmp.lt.s32.totalorder %v18190_v17, 0  ;;  %vm6958_vm15 = vweird.f32 %v18184_v42 }
 0x70e   : > { %v7057_v24 = vsel %vm18191_vm14, %v7056_v45, %v18187_v47  ;;  %v6960_v0 = vand.u32 3, %v6959_v37  ;;  %vm7062_vm3 = vweird.f32 %v18190_v17  ;;  %v6865_v6 = vsel %vm6854_vm5, nan, %v6864_v5  ;;  %v18201_v47 = vld [vmem:[#allocation35_spill] sm:$0xff] }
 0x70f   : > { %v7059_v4 = vsel %vm16067_vm10, 0, %v7057_v24  ;;  %v7067_v34 = vxor.u32 2147483648, %v18193_v10  ;;  %v7160_v18 = vsub.s32 4, %v18194_v21  ;;  %v7070_v50 = vxor.u32 2147483648, %v18195_v20 }
 0x710   : > { %v7063_v59 = vadd.s32 3, %v7059_v4  ;;  %vm6961_vm13 = vcmp.lt.s32.totalorder %v6960_v0, 2  ;;  %vm6962_vm6 = vcmp.eq.s32.totalorder %v6960_v0, 0  ;;  %vm6965_vm11 = vcmp.eq.s32.totalorder %v6960_v0, 2 }
 0x711   : > { %v6964_v19 = vsel %vm6962_vm6, %v18189_v29, %v6963_v54  ;;  %v6967_v63 = vsel %vm6965_vm11, %v6966_v30, %v18188_v2  ;;  %vm18197_vm10 = vcmp.lt.s32.totalorder %v18196_v13, 0  ;;  %vm7166_vm5 = vweird.f32 %v18196_v13 }
 0x712   : > { %v7064_v27 = vand.u32 3, %v7063_v59  ;;  %v7161_v57 = vsel %vm18197_vm10, %v7160_v18, %v18194_v21  ;;  %v6968_v39 = vsel %vm6961_vm13, %v6964_v19, %v6967_v63  ;;  %v7264_v26 = vsub.s32 4, %v18199_v40  ;;  %v18204_v21 = vld [vmem:[#allocation52_spill] sm:$0xff] }
 0x713   : > { %v7163_v38 = vsel %vm16246_vm0, 0, %v7161_v57  ;;  %v6969_v35 = vsel %vm6958_vm15, nan, %v6968_v39  ;;  %v7171_v14 = vxor.u32 2147483648, %v18200_v51  ;;  %v7174_v45 = vxor.u32 2147483648, %v18201_v47 }
 0x714   : > { %vm7065_vm7 = vcmp.lt.s32.totalorder %v7064_v27, 2  ;;  %vm7066_vm2 = vcmp.eq.s32.totalorder %v7064_v27, 0  ;;  %vm7069_vm1 = vcmp.eq.s32.totalorder %v7064_v27, 2  ;;  %v7606_v53 = vpack.c.bf16 %v6969_v35, %v6865_v6  ;;  %v18205_v27 = vld [vmem:[#allocation49_spill] sm:$0xff] }
 0x715   : > { %v7068_v49 = vsel %vm7066_vm2, %v18195_v20, %v7067_v34  ;;  %v7071_v52 = vsel %vm7069_vm1, %v7070_v50, %v18193_v10  ;;  %v7167_v25 = vadd.s32 3, %v7163_v38  ;;  %vm18202_vm0 = vcmp.lt.s32.totalorder %v16265_v61, 0  ;;  %v8920_v42 = vpop.eup %8919 }
 0x716   : > { %v7072_v41 = vsel %vm7065_vm7, %v7068_v49, %v7071_v52  ;;  %v7265_v2 = vsel %vm18202_vm0, %v7264_v26, %v18199_v40  ;;  %8353 = vmatprep.mubr.bf16.mxu1 %v7606_v53  ;;  %v7275_v28 = vxor.u32 2147483648, %v16649_v31  ;;  %v7368_v37 = vsub.s32 4, %v16583_v23  ;;  %v8922_v5 = vpop.eup %8921 }
 0x717   : > { %v7168_v54 = vand.u32 3, %v7167_v25  ;;  %v7267_v11 = vsel %vm16496_vm4, 0, %v7265_v2  ;;  %v7073_v29 = vsel %vm7062_vm3, nan, %v7072_v41  ;;  %v7278_v24 = vxor.u32 2147483648, %v16587_v8 }
 0x718   : > { %v7271_v30 = vadd.s32 3, %v7267_v11  ;;  %v7379_v0 = vxor.u32 2147483648, %v8920_v42  ;;  %vm18203_vm6 = vcmp.lt.s32.totalorder %v16389_v58, 0  ;;  %v7382_v34 = vxor.u32 2147483648, %v8922_v5 }
 0x719   : > { %vm7169_vm14 = vcmp.lt.s32.totalorder %v7168_v54, 2  ;;  %vm7170_vm15 = vcmp.eq.s32.totalorder %v7168_v54, 0  ;;  %vm7173_vm13 = vcmp.eq.s32.totalorder %v7168_v54, 2  ;;  %v7369_v36 = vsel %vm18203_vm6, %v7368_v37, %v16583_v23 }
 0x71a   : > { %v7172_v7 = vsel %vm7170_vm15, %v18201_v47, %v7171_v14  ;;  %v7175_v4 = vsel %vm7173_vm13, %v7174_v45, %v18200_v51  ;;  %v7272_v6 = vand.u32 3, %v7271_v30  ;;  %v7371_v17 = vsel %vm16662_vm9, 0, %v7369_v36 }
 0x71b   : > { %v7176_v59 = vsel %vm7169_vm14, %v7172_v7, %v7175_v4  ;;  %v7375_v10 = vadd.s32 3, %v7371_v17  ;;  %v7472_v18 = vsub.s32 4, %v18204_v21  ;;  %vm7270_vm9 = vweird.f32 %v16265_v61 }
 0x71c   : > { %v7177_v20 = vsel %vm7166_vm5, nan, %v7176_v59  ;;  %vm7273_vm4 = vcmp.lt.s32.totalorder %v7272_v6, 2  ;;  %vm7274_vm3 = vcmp.eq.s32.totalorder %v7272_v6, 0  ;;  %vm7277_vm11 = vcmp.eq.s32.totalorder %v7272_v6, 2 }
 0x71d   : > { %v7607_v23 = vpack.c.bf16 %v7177_v20, %v7073_v29  ;;  %v7276_v50 = vsel %vm7274_vm3, %v16587_v8, %v7275_v28  ;;  %v7279_v19 = vsel %vm7277_vm11, %v7278_v24, %v16649_v31  ;;  %v7376_v63 = vand.u32 3, %v7375_v10  ;;  %v16782_v8 = vld [vmem:[%s16919_s2 + $0x2] ss:$0 sm:$0xff] }
 0x71e   : > { %v7280_v43 = vsel %vm7273_vm4, %v7276_v50, %v7279_v19  ;;  %vm7374_vm10 = vweird.f32 %v16389_v58  ;;  %vm18206_vm7 = vcmp.lt.s32.totalorder %v18205_v27, 0  ;;  %v7483_v57 = vxor.u32 2147483648, %v16537_v56 }
 0x71f   : > { %v7473_v13 = vsel %vm18206_vm7, %v7472_v18, %v18204_v21  ;;  %8354 = vmatmul.mubr.bf16.gmra.mrb[24].mxu1 %v7607_v23  ;;  %vm7377_vm5 = vcmp.lt.s32.totalorder %v7376_v63, 2  ;;  %vm7378_vm2 = vcmp.eq.s32.totalorder %v7376_v63, 0  ;;  %vm7381_vm1 = vcmp.eq.s32.totalorder %v7376_v63, 2 }
 0x720   : > { %v7380_v31 = vsel %vm7378_vm2, %v8922_v5, %v7379_v0  ;;  %v7383_v61 = vsel %vm7381_vm1, %v7382_v34, %v8920_v42  ;;  %v7475_v33 = vsel %vm16378_vm12, 0, %v7473_v13  ;;  %v7576_v38 = vsub.s32 4, %v16515_v62 }
 0x721   : > { %v7281_v40 = vsel %vm7270_vm9, nan, %v7280_v43  ;;  %v7384_v26 = vsel %vm7377_vm5, %v7380_v31, %v7383_v61  ;;  %v7479_v35 = vadd.s32 3, %v7475_v33  ;;  %v7486_v53 = vxor.u32 2147483648, %v16462_v32 }
 0x722   : > { %v7385_v49 = vsel %vm7374_vm10, nan, %v7384_v26  ;;  %vm18208_vm12 = vcmp.lt.s32.totalorder %v16373_v12, 0  ;;  %v7587_v25 = vxor.u32 2147483648, %v16717_v3  ;;  %v7722_v41 = vadd.f32 %v16685_v1, %v16782_v8 }
 0x723   : > { %v7577_v52 = vsel %vm18208_vm12, %v7576_v38, %v16515_v62  ;;  %v7608_v51 = vpack.c.bf16 %v7385_v49, %v7281_v40  ;;  %v7480_v14 = vand.u32 3, %v7479_v35  ;;  %vm7840_vm0 = vcmask 7168  }
 0x724   : > { %v7579_v47 = vsel %vm16615_vm8, 0, %v7577_v52  ;;  %7843 = vst.msk [vmem:[%s16792_s10 + $0x10] sm:$0xff] %vm7840_vm0, %v7722_v41  ;;  %v7714_v62 = vadd.f32 %v16782_v8, %v16691_v55  ;;  %v7725_v45 = vadd.f32 %v16700_v60, %v16782_v8  ;;  %v7717_v1 = vadd.f32 %v16782_v8, %v16708_v9  ;;  %v8339_v9 = vpop.f32.mrb[8].mxu1 }
 0x725   : > { %v7583_v58 = vadd.s32 3, %v7579_v47  ;;  %8357 = vmatprep.mubr.bf16.mxu1 %v7608_v51  ;;  %vm7482_vm14 = vcmp.eq.s32.totalorder %v7480_v14, 0  ;;  %vm7485_vm15 = vcmp.eq.s32.totalorder %v7480_v14, 2  ;;  %v7590_v46 = vxor.u32 2147483648, %v16672_v48  ;;  %v7745_v11 = vpop.f32.mrb[9].mxu1 }
 0x726   : > { %v7738_v2 = vadd.f32 %v16727_v44, %v16782_v8  ;;  %v7484_v42 = vsel %vm7482_vm14, %v16462_v32, %v7483_v57  ;;  %v7487_v54 = vsel %vm7485_vm15, %v7486_v53, %v16537_v56  ;;  %7841 = vst.msk [vmem:[%s16792_s10] sm:$0xff] %vm7840_vm0, %v7714_v62  ;;  %7844 = vst.msk [vmem:[%s16792_s10 + $0x18] sm:$0xff] %vm7840_vm0, %v7725_v45  ;;  %vm7481_vm8 = vcmp.lt.s32.totalorder %v7480_v14, 2 }
 0x727   : > { %v7584_v55 = vand.u32 3, %v7583_v58  ;;  %7842 = vst.msk [vmem:[%s16792_s10 + $0x8] sm:$0xff] %vm7840_vm0, %v7717_v1  ;;  %v7730_v60 = vadd.f32 %v16782_v8, %v16730_v16  ;;  %v7741_v32 = vadd.f32 %v16737_v22, %v16782_v8  ;;  %v7733_v56 = vadd.f32 %v16782_v8, %v16743_v15  ;;  %v8340_v16 = vpop.f32.mrb[10].mxu1 }
 0x728   : > { %7847 = vst.msk [vmem:[%s16792_s10 + $0x30] sm:$0xff] %vm7840_vm0, %v7738_v2  ;;  %v7754_v44 = vadd.f32 %v8339_v9, %v16782_v8  ;;  %v7488_v28 = vsel %vm7481_vm8, %v7484_v42, %v7487_v54  ;;  %v7746_v22 = vadd.f32 %v16782_v8, %v7745_v11  ;;  %v7757_v15 = vadd.f32 %v8340_v16, %v16782_v8  ;;  %v7748_v29 = vpop.f32.mrb[11].mxu1 }
 0x729   : > { %vm7585_vm13 = vcmp.lt.s32.totalorder %v7584_v55, 2  ;;  %vm7586_vm6 = vcmp.eq.s32.totalorder %v7584_v55, 0  ;;  %vm7589_vm4 = vcmp.eq.s32.totalorder %v7584_v55, 2  ;;  %7845 = vst.msk [vmem:[%s16792_s10 + $0x20] sm:$0xff] %vm7840_vm0, %v7730_v60  ;;  %7848 = vst.msk [vmem:[%s16792_s10 + $0x38] sm:$0xff] %vm7840_vm0, %v7741_v32  ;;  %vm7478_vm3 = vweird.f32 %v18205_v27 }
 0x72a   : > { %v7588_v37 = vsel %vm7586_vm6, %v16672_v48, %v7587_v25  ;;  %v7591_v5 = vsel %vm7589_vm4, %v7590_v46, %v16717_v3  ;;  %7846 = vst.msk [vmem:[%s16792_s10 + $0x28] sm:$0xff] %vm7840_vm0, %v7733_v56  ;;  %7851 = vst.msk [vmem:[%s16792_s10 + $0x50] sm:$0xff] %vm7840_vm0, %v7754_v44  ;;  %vm7582_vm11 = vweird.f32 %v16373_v12  ;;  %v7749_v3 = vadd.f32 %v16782_v8, %v7748_v29 }
 0x72b   : > { %v7592_v48 = vsel %vm7585_vm13, %v7588_v37, %v7591_v5  ;;  %v7489_v30 = vsel %vm7478_vm3, nan, %v7488_v28  ;;  %7849 = vst.msk [vmem:[%s16792_s10 + $0x40] sm:$0xff] %vm7840_vm0, %v7746_v22  ;;  %7852 = vst.msk [vmem:[%s16792_s10 + $0x58] sm:$0xff] %vm7840_vm0, %v7757_v15 }
 0x72c   : > { %v7593_v24 = vsel %vm7582_vm11, nan, %v7592_v48  ;;  %7850 = vst.msk [vmem:[%s16792_s10 + $0x48] sm:$0xff] %vm7840_vm0, %v7749_v3 }
 0x72d   : > { %v7609_v0 = vpack.c.bf16 %v7593_v24, %v7489_v30 }
 0x72f   : > { %8358 = vmatmul.mubr.bf16.gmra.mrb[28].mxu1 %v7609_v0 }
 0x78b   : > { %v8343_v36 = vpop.f32.mrb[12].mxu1 }
 0x78c   : > { %v7770_v7 = vadd.f32 %v8343_v36, %v16782_v8  ;;  %v7761_v12 = vpop.f32.mrb[13].mxu1 }
 0x78d   : > { %v7762_v4 = vadd.f32 %v16782_v8, %v7761_v12  ;;  %v8344_v6 = vpop.f32.mrb[14].mxu1 }
 0x78e   : > { %7855 = vst.msk [vmem:[%s16792_s10 + $0x70] sm:$0xff] %vm7840_vm0, %v7770_v7  ;;  %v7773_v17 = vadd.f32 %v8344_v6, %v16782_v8  ;;  %v7764_v59 = vpop.f32.mrb[15].mxu1 }
 0x78f   : > { %7853 = vst.msk [vmem:[%s16792_s10 + $0x60] sm:$0xff] %vm7840_vm0, %v7762_v4  ;;  %v7765_v10 = vadd.f32 %v16782_v8, %v7764_v59 }
 0x790   : > { %7856 = vst.msk [vmem:[%s16792_s10 + $0x78] sm:$0xff] %vm7840_vm0, %v7773_v17 }
 0x791   : > { %7854 = vst.msk [vmem:[%s16792_s10 + $0x68] sm:$0xff] %vm7840_vm0, %v7765_v10 }
 0x7c7   : > { %v8347_v34 = vpop.f32.mrb[16].mxu1 }
 0x7c8   : > { %v7786_v21 = vadd.f32 %v8347_v34, %v16782_v8  ;;  %v7777_v18 = vpop.f32.mrb[17].mxu1 }
 0x7c9   : > { %v7778_v20 = vadd.f32 %v16782_v8, %v7777_v18  ;;  %v8348_v23 = vpop.f32.mrb[18].mxu1 }
 0x7ca   : > { %7859 = vst.msk [vmem:[%s16792_s10 + $0x90] sm:$0xff] %vm7840_vm0, %v7786_v21  ;;  %v7789_v50 = vadd.f32 %v8348_v23, %v16782_v8  ;;  %v7780_v19 = vpop.f32.mrb[19].mxu1 }
 0x7cb   : > { %7857 = vst.msk [vmem:[%s16792_s10 + $0x80] sm:$0xff] %vm7840_vm0, %v7778_v20  ;;  %v7781_v63 = vadd.f32 %v16782_v8, %v7780_v19 }
 0x7cc   : > { %7860 = vst.msk [vmem:[%s16792_s10 + $0x98] sm:$0xff] %vm7840_vm0, %v7789_v50 }
 0x7cd   : > { %7858 = vst.msk [vmem:[%s16792_s10 + $0x88] sm:$0xff] %vm7840_vm0, %v7781_v63 }
 0x7de   : > { %v8351_v43 = vpop.f32.mrb[20].mxu1 }
 0x7df   : > { %v7802_v27 = vadd.f32 %v8351_v43, %v16782_v8  ;;  %v7793_v13 = vpop.f32.mrb[21].mxu1 }
 0x7e0   : > { %v7794_v57 = vadd.f32 %v16782_v8, %v7793_v13  ;;  %v8352_v31 = vpop.f32.mrb[22].mxu1 }
 0x7e1   : > { %7863 = vst.msk [vmem:[%s16792_s10 + $0xb0] sm:$0xff] %vm7840_vm0, %v7802_v27  ;;  %v7805_v61 = vadd.f32 %v8352_v31, %v16782_v8  ;;  %v7796_v39 = vpop.f32.mrb[23].mxu1 }
 0x7e2   : > { %7861 = vst.msk [vmem:[%s16792_s10 + $0xa0] sm:$0xff] %vm7840_vm0, %v7794_v57  ;;  %v7797_v33 = vadd.f32 %v16782_v8, %v7796_v39 }
 0x7e3   : > { %7864 = vst.msk [vmem:[%s16792_s10 + $0xb8] sm:$0xff] %vm7840_vm0, %v7805_v61 }
 0x7e4   : > { %7862 = vst.msk [vmem:[%s16792_s10 + $0xa8] sm:$0xff] %vm7840_vm0, %v7797_v33 }
 0x7f2   : > { %v8355_v38 = vpop.f32.mrb[24].mxu1 }
 0x7f3   : > { %v7818_v40 = vadd.f32 %v8355_v38, %v16782_v8  ;;  %v7809_v26 = vpop.f32.mrb[25].mxu1 }
 0x7f4   : > { %v7810_v35 = vadd.f32 %v16782_v8, %v7809_v26  ;;  %v8356_v53 = vpop.f32.mrb[26].mxu1 }
 0x7f5   : > { %7867 = vst.msk [vmem:[%s16792_s10 + $0xd0] sm:$0xff] %vm7840_vm0, %v7818_v40  ;;  %v7821_v49 = vadd.f32 %v8356_v53, %v16782_v8  ;;  %v7812_v52 = vpop.f32.mrb[27].mxu1 }
 0x7f6   : > { %7865 = vst.msk [vmem:[%s16792_s10 + $0xc0] sm:$0xff] %vm7840_vm0, %v7810_v35  ;;  %v7813_v25 = vadd.f32 %v16782_v8, %v7812_v52 }
 0x7f7   : > { %7868 = vst.msk [vmem:[%s16792_s10 + $0xd8] sm:$0xff] %vm7840_vm0, %v7821_v49 }
 0x7f8   : > { %7866 = vst.msk [vmem:[%s16792_s10 + $0xc8] sm:$0xff] %vm7840_vm0, %v7813_v25 }
 0x802   : > { %v8359_v41 = vpop.f32.mrb[28].mxu1 }
 0x803   : > { %v7834_v51 = vadd.f32 %v8359_v41, %v16782_v8  ;;  %v7825_v14 = vpop.f32.mrb[29].mxu1 }
 0x804   : > { %v7826_v47 = vadd.f32 %v16782_v8, %v7825_v14  ;;  %v8360_v58 = vpop.f32.mrb[30].mxu1 }
 0x805   : > { %7871 = vst.msk [vmem:[%s16792_s10 + $0xf0] sm:$0xff] %vm7840_vm0, %v7834_v51  ;;  %v7837_v62 = vadd.f32 %v8360_v58, %v16782_v8  ;;  %v7828_v45 = vpop.f32.mrb[31].mxu1 }
 0x806   : > { %7869 = vst.msk [vmem:[%s16792_s10 + $0xe0] sm:$0xff] %vm7840_vm0, %v7826_v47  ;;  %v7829_v1 = vadd.f32 %v16782_v8, %v7828_v45 }
 0x807   : > { %7872 = vst.msk [vmem:[%s16792_s10 + $0xf8] sm:$0xff] %vm7840_vm0, %v7837_v62 }
 0x808   : > { %7870 = vst.msk [vmem:[%s16792_s10 + $0xe8] sm:$0xff] %vm7840_vm0, %v7829_v1 }
 0x809 PF: > { %s15_s18 = sadd.s32 1, %s8945_s18  }
 0x80a   : > { %p12_p4 = scmp.ge.s32.totalorder %s15_s18, 4  }
 0x80c   :  { %14 = sbr.rel (!%p12_p4) target bundleno = 1 (0x1), region = 70 }

</bundles_post_ra>
